<compile_context>
chip_gen: v7x
topology: tpu7x:2x2x1
jax: 0.10.0
libtpu: 0.0.40
codegen_flags: <defaults>
</compile_context>

<pallas_src>
import jax
import jax.numpy as jnp
from jax.experimental import pallas as pl
from jax.experimental.pallas import tpu as pltpu

F32 = jnp.float32
BF16 = jnp.bfloat16


def _round_up(x, m):
    return ((x + m - 1) // m) * m


def _full_spec(arr):
    nd = arr.ndim
    return pl.BlockSpec(arr.shape, lambda *_: (0,) * nd)


def _smem_spec():
    return pl.BlockSpec(memory_space=pltpu.MemorySpace.SMEM)


def _batched_spec(C, T):
    return pl.BlockSpec((1, C, T), lambda b: (b, 0, 0))


def _cparams(semantics, vmem_est=None):
    kw = dict(dimension_semantics=semantics)
    if vmem_est is not None:
        # Floor at 32 MiB (cheap headroom everywhere), cap below v7x physical (64 MiB).
        kw["vmem_limit_bytes"] = int(min(max(vmem_est + (8 << 20), 32 << 20), 56 << 20))
    return pltpu.CompilerParams(**kw)


def _branch_select(idx, fns, operand):
    """Value-returning P-way select built as a binary tree of lax.cond.

    Only one leaf executes per call; avoids any VMEM scratch round-trip."""
    if len(fns) == 1:
        return fns[0](operand)
    mid = len(fns) // 2
    return jax.lax.cond(
        idx < mid,
        lambda op: _branch_select(idx, fns[:mid], op),
        lambda op: _branch_select(idx - mid, fns[mid:], op),
        operand)


# ----------------------------------------------------------------------------
# Tiled matmul (encoder / projection): (M, K) @ (K, N) -> (M, N), f32 accumulate
# ----------------------------------------------------------------------------

def _mm_kernel(a_ref, b_ref, o_ref):
    @pl.when(pl.program_id(1) == 0)
    def _():
        o_ref[...] = jnp.zeros_like(o_ref)

    o_ref[...] += jnp.dot(a_ref[...], b_ref[...], preferred_element_type=F32)


def _pick_tile(n, cap):
    if n <= cap:
        return n
    for t in (cap, 512, 256, 128):
        if n % t == 0:
            return t
    return n


def pallas_matmul(a, b):
    M, K = a.shape
    K2, N = b.shape
    assert K == K2
    tn = _pick_tile(N, 1024)
    tk = _pick_tile(K, 1024)
    return pl.pallas_call(
        _mm_kernel,
        grid=(N // tn, K // tk),
        in_specs=[pl.BlockSpec((M, tk), lambda j, k: (0, k)),
                  pl.BlockSpec((tk, tn), lambda j, k: (k, j))],
        out_specs=pl.BlockSpec((M, tn), lambda j, k: (0, j)),
        out_shape=jax.ShapeDtypeStruct((M, N), F32),
        compiler_params=pltpu.CompilerParams(
            dimension_semantics=("parallel", "arbitrary")),
    )(a, b)


# ----------------------------------------------------------------------------
# Fused DepthConv1d stack (Conv-TasNet style), all layers in one pallas_call
# ----------------------------------------------------------------------------

def depth_conv_stack(x, p, dilations, *, t_true, use_skip):
    """x: (B, C, Tp).  p: per-layer params stacked on a leading layer axis.
    Returns updated activation (and accumulated skip if use_skip)."""
    B, C, Tp = x.shape
    L, H, _ = p["w1"].shape
    P = len(dilations)

    if use_skip:
        vmem_names = ["w1", "b1", "g1", "be1", "dw", "db", "g2", "be2", "wrs", "brs"]
    else:
        vmem_names = ["w1", "b1", "g1", "be1", "dw", "db", "g2", "be2", "wr", "br"]
    nw = len(vmem_names)

    def kernel(*refs):
        x_ref, a1_ref, a2_ref = refs[0], refs[1], refs[2]
        (w1r, b1r, g1r, be1r, dwr, dbr, g2r, be2r, wor, bor) = refs[3:3 + nw]
        if use_skip:
            out_ref, skip_ref = refs[3 + nw], refs[4 + nw]
        else:
            out_ref = refs[3 + nw]
            skip_ref = None

        l = pl.program_id(1)
        lidx = l % P

        @pl.when(l == 0)
        def _init():
            out_ref[0] = x_ref[0]
            if use_skip:
                skip_ref[0] = jnp.zeros((C, Tp), F32)

        lane1 = jax.lax.broadcasted_iota(jnp.int32, (1, Tp), 1)   # (1, Tp) lane index
        valid = (lane1 < t_true).astype(F32)                      # (1, Tp) frame validity
        cnt = float(H * t_true)

        xx = out_ref[0]                                           # (C, Tp) running activation

        # 1x1 conv -> PReLU -> GroupNorm(1, H), one-pass masked statistics
        h = jnp.dot(w1r[l], xx.astype(BF16), preferred_element_type=F32) + b1r[l]
        h = jnp.where(h >= 0, h, a1_ref[l] * h)
        hv = h * valid
        m = jnp.sum(hv) / cnt
        v = jnp.maximum(jnp.sum(hv * h) / cnt - m * m, 0.0)
        h = (hv - m * valid) * (jax.lax.rsqrt(v + 1e-8) * g1r[l]) + be1r[l] * valid
        # h is exactly zero beyond t_true (padding invariant relied on below).

        # depthwise dilated conv (kernel=3, padding=d) via masked lane rolls; the per-layer
        # dilation branch is a value-returning cond tree (no scratch round-trip).
        dw3 = dwr[l]                                              # (H, 3)

        def make_branch(d):
            def branch(hh):
                sl = d % Tp
                h_l = hh if sl == 0 else pltpu.roll(hh, shift=sl, axis=1)      # h[t-d]
                h_l = jnp.where(lane1 >= d, h_l, 0.0)
                sr = (Tp - sl) % Tp
                h_r = hh if sr == 0 else pltpu.roll(hh, shift=sr, axis=1)      # h[t+d]
                h_r = jnp.where(lane1 < (t_true - d), h_r, 0.0)
                return dw3[:, 0:1] * h_l + dw3[:, 1:2] * hh + dw3[:, 2:3] * h_r
            return branch

        h2 = _branch_select(lidx, [make_branch(d) for d in dilations], h)
        h2 = h2 + dbr[l]

        # PReLU -> GroupNorm(1, H), one-pass masked statistics
        h2 = jnp.where(h2 >= 0, h2, a2_ref[l] * h2)
        hv2 = h2 * valid
        m2 = jnp.sum(hv2) / cnt
        v2 = jnp.maximum(jnp.sum(hv2 * h2) / cnt - m2 * m2, 0.0)
        h2 = (hv2 - m2 * valid) * (jax.lax.rsqrt(v2 + 1e-8) * g2r[l]) + be2r[l] * valid
        h2b = h2.astype(BF16)

        # merged residual(+skip) 1x1 conv: one (2C,H)@(H,Tp) matmul, static split
        rs = jnp.dot(wor[l], h2b, preferred_element_type=F32) + bor[l]
        if use_skip:
            out_ref[0] = xx + rs[:C] * valid
            skip_ref[0] = skip_ref[0] + rs[C:] * valid
        else:
            out_ref[0] = xx + rs * valid

    in_specs = [pl.BlockSpec((1, C, Tp), lambda b, l: (b, 0, 0)),
                _smem_spec(), _smem_spec()]
    for name in vmem_names:
        in_specs.append(_full_spec(p[name]))                      # fully VMEM-resident

    act_spec = pl.BlockSpec((1, C, Tp), lambda b, l: (b, 0, 0))
    if use_skip:
        out_specs = (act_spec, pl.BlockSpec((1, C, Tp), lambda b, l: (b, 0, 0)))
        out_shape = (jax.ShapeDtypeStruct((B, C, Tp), F32),
                     jax.ShapeDtypeStruct((B, C, Tp), F32))
    else:
        out_specs = act_spec
        out_shape = jax.ShapeDtypeStruct((B, C, Tp), F32)

    act_bytes = C * Tp * 4
    w_bytes = sum(int(p[n].size) * p[n].dtype.itemsize for n in vmem_names)
    n_out = 2 if use_skip else 1
    vmem_est = 2 * act_bytes + 2 * n_out * act_bytes + 2 * w_bytes + 8 * H * Tp * 4

    return pl.pallas_call(
        kernel,
        grid=(B, L),
        in_specs=in_specs,
        out_specs=out_specs,
        out_shape=out_shape,
        compiler_params=_cparams(("parallel", "arbitrary"), vmem_est),
    )(x, p["a1"], p["a2"], *[p[n] for n in vmem_names])


# ----------------------------------------------------------------------------
# Fused front: GroupNorm(1, enc) + folded bottleneck/fusion 1x1 convs
#   (wa@w and wa@b+bc are folded on the host: two matmuls instead of three)
# ----------------------------------------------------------------------------

def tcn_front_cmca(enc, eeg, p, *, t_true):
    B, Ce, Tp = enc.shape
    Cf = p["wf"].shape[0]

    def kernel(enc_ref, eeg_ref, g, be, wf, we, bf, o_ref):
        xx = enc_ref[0]                                           # (Ce, Tp)
        lane1 = jax.lax.broadcasted_iota(jnp.int32, (1, Tp), 1)
        valid = (lane1 < t_true).astype(F32)
        cnt = float(Ce * t_true)
        xv = xx * valid
        m = jnp.sum(xv) / cnt
        v = jnp.maximum(jnp.sum(xv * xx) / cnt - m * m, 0.0)
        xn = (xv - m * valid) * (jax.lax.rsqrt(v + 1e-8) * g[...]) + be[...] * valid
        o = (jnp.dot(wf[...], xn.astype(BF16), preferred_element_type=F32)
             + jnp.dot(we[...], eeg_ref[0].astype(BF16), preferred_element_type=F32)
             + bf[...])
        o_ref[0] = o * valid

    vmem_est = 2 * (Ce + 2 * Cf) * Tp * 4 + 4 * Ce * Tp * 4
    return pl.pallas_call(
        kernel,
        grid=(B,),
        in_specs=[_batched_spec(Ce, Tp), _batched_spec(Cf, Tp)]
                 + [_full_spec(p[k]) for k in ("g", "be", "wf", "we", "bf")],
        out_specs=_batched_spec(Cf, Tp),
        out_shape=jax.ShapeDtypeStruct((B, Cf, Tp), F32),
        compiler_params=_cparams(("parallel",), vmem_est),
    )(enc, eeg, p["g"], p["be"], p["wf"], p["we"], p["bf"])


# ----------------------------------------------------------------------------
# Fused mask head (PReLU + 1x1 conv + sigmoid + masking) + decoder frame matmul
# ----------------------------------------------------------------------------

def mask_and_decode_frames(skip_sum, enc, p, dec_w_t):
    B, Cf, Tp = skip_sum.shape
    Ce = enc.shape[1]
    k = dec_w_t.shape[0]

    def kernel(s_ref, enc_ref, a_ref, w, b, dw, o_ref):
        s = s_ref[0]
        s = jnp.where(s >= 0, s, a_ref[0] * s)
        logits = jnp.dot(w[...], s.astype(BF16), preferred_element_type=F32) + b[...]
        mask = jax.nn.sigmoid(logits)                             # (Ce, Tp)
        masked = enc_ref[0] * mask
        o_ref[0] = jnp.dot(dw[...], masked.astype(BF16), preferred_element_type=F32)

    vmem_est = 2 * (Cf + Ce + k) * Tp * 4 + 4 * Ce * Tp * 4
    return pl.pallas_call(
        kernel,
        grid=(B,),
        in_specs=[_batched_spec(Cf, Tp), _batched_spec(Ce, Tp), _smem_spec(),
                  _full_spec(p["w"]), _full_spec(p["b"]), _full_spec(dec_w_t)],
        out_specs=_batched_spec(k, Tp),
        out_shape=jax.ShapeDtypeStruct((B, k, Tp), F32),
        compiler_params=_cparams(("parallel",), vmem_est),
    )(skip_sum, enc, p["a"], p["w"], p["b"], dec_w_t)


# ----------------------------------------------------------------------------
# Glue: padding, framing, overlap-add
# ----------------------------------------------------------------------------

def pad_signal(x, win=32, stride=8):
    B, L = x.shape
    rest = win - (stride + L % win) % win
    if rest > 0:
        x = jnp.concatenate([x, jnp.zeros((B, rest), x.dtype)], axis=1)
    aux = jnp.zeros((B, stride), x.dtype)
    x = jnp.concatenate([aux, x, aux], axis=1)
    return x[:, None, :], rest


def audio_encode(padded, W, stride, Tp):
    # padded: (B, 1, Lp), W: (enc, 1, k)   -> (B, enc, Tp), lane-dense (B*Tp on lanes)
    B, _, Lp = padded.shape
    enc_ch, _, k = W.shape
    T = (Lp - k) // stride + 1
    idx = jnp.arange(T)[:, None] * stride + jnp.arange(k)[None, :]
    frames = padded[:, 0, :][:, idx]                              # (B, T, k)
    F = frames.transpose(2, 0, 1)                                 # (k, B, T)
    F = jnp.pad(F, ((0, 0), (0, 0), (0, Tp - T))).reshape(k, B * Tp)
    out = pallas_matmul(W[:, 0, :].astype(BF16), F.astype(BF16))  # (enc, B*Tp)
    return out.reshape(enc_ch, B, Tp).transpose(1, 0, 2)


def eeg_project(spike, W, stride, Tp):
    # spike: (B, 128, Ts), W: (feat, 128, k) -> (B, feat, Tp), lane-dense
    B, Ci, Ts = spike.shape
    feat, _, k = W.shape
    T = (Ts - k) // stride + 1
    idx = jnp.arange(T)[:, None] * stride + jnp.arange(k)[None, :]
    fr = spike[:, :, idx]                                         # (B, Ci, T, k)
    F = fr.transpose(1, 3, 0, 2).reshape(Ci * k, B, T)            # (Ci*k, B, T)
    F = jnp.pad(F, ((0, 0), (0, 0), (0, Tp - T))).reshape(Ci * k, B * Tp)
    Wm = W.reshape(feat, Ci * k)
    out = pallas_matmul(Wm.astype(BF16), F.astype(BF16))          # (feat, B*Tp)
    return out.reshape(feat, B, Tp).transpose(1, 0, 2)


def overlap_add(frames, Lpad, stride):
    # frames: (B, k, T) -> ConvTranspose1d-style overlap-add, output (B, Lpad)
    B, k, T = frames.shape
    assert k % stride == 0
    n = k // stride
    y = frames.reshape(B, n, stride, T).transpose(0, 1, 3, 2).reshape(B, n, T * stride)
    out = jnp.zeros((B, Lpad), F32)
    for c in range(n):
        out = out.at[:, c * stride: c * stride + T * stride].add(y[:, c])
    return out


# ----------------------------------------------------------------------------
# Parameters (deterministic synthetic init) and full forward
# ----------------------------------------------------------------------------

def init_params(key, enc_ch=64, feat_ch=32, kernel_size=32,
                eeg_layers=8, layer_per_stack=4, stack=2):
    ks = iter(jax.random.split(key, 64))

    def nrm(shape, scale=0.1):
        return (scale * jax.random.normal(next(ks), shape)).astype(F32)

    def stacked_depth(L, c_in, hidden, use_skip):
        d = dict(
            w1=nrm((L, hidden, c_in)).astype(BF16), b1=nrm((L, hidden, 1), 0.01),
            a1=jnp.full((L,), 0.25, F32),
            g1=jnp.ones((L, hidden, 1), F32), be1=jnp.zeros((L, hidden, 1), F32),
            dw=nrm((L, hidden, 3)), db=nrm((L, hidden, 1), 0.01),
            a2=jnp.full((L,), 0.25, F32),
            g2=jnp.ones((L, hidden, 1), F32), be2=jnp.zeros((L, hidden, 1), F32),
        )
        wr = nrm((L, c_in, hidden)); br = nrm((L, c_in, 1), 0.01)
        if use_skip:
            ws = nrm((L, c_in, hidden)); bs = nrm((L, c_in, 1), 0.01)
            d["wrs"] = jnp.concatenate([wr, ws], axis=1).astype(BF16)   # (L, 2C, H)
            d["brs"] = jnp.concatenate([br, bs], axis=1)                # (L, 2C, 1)
        else:
            d["wr"] = wr.astype(BF16)
            d["br"] = br
        return d

    # front: fold bottleneck + fusion (wa@w, wa@b + bc) on the host
    w = nrm((feat_ch, enc_ch)); b = nrm((feat_ch, 1), 0.01)
    wa = nrm((feat_ch, feat_ch)); we = nrm((feat_ch, feat_ch)); bc = nrm((feat_ch, 1), 0.01)
    front = dict(g=jnp.ones((enc_ch, 1), F32), be=jnp.zeros((enc_ch, 1), F32),
                 wf=(wa @ w).astype(BF16), we=we.astype(BF16), bf=(wa @ b + bc))

    return dict(
        audio_enc_w=nrm((enc_ch, 1, kernel_size)),
        eeg_proj_w=nrm((feat_ch, 128, kernel_size), 0.02),
        eeg_blocks=stacked_depth(eeg_layers, feat_ch, feat_ch * 2, use_skip=False),
        front=front,
        tcn_blocks=stacked_depth(stack * layer_per_stack, feat_ch, feat_ch * 4,
                                 use_skip=True),
        tcn_out=dict(a=jnp.full((1,), 0.25, F32),
                     w=nrm((enc_ch, feat_ch)).astype(BF16), b=nrm((enc_ch, 1), 0.01)),
        dec_w=nrm((enc_ch, 1, kernel_size)),
        layer_per_stack=layer_per_stack,
    )


def basen_forward(params, audio, spike, win=32, stride=8):
    padded, rest = pad_signal(audio, win, stride)
    B, _, Lpad = padded.shape
    T = (Lpad - win) // stride + 1
    Tp = _round_up(T, 128)
    assert (spike.shape[-1] - win) // stride + 1 == T, "audio/EEG frame counts must match"

    # audio encoder
    enc = audio_encode(padded, params["audio_enc_w"], stride, Tp)     # (B, enc_ch, Tp)

    # EEG encoder: projection + dilated DepthConv1d blocks (skip path unused by reference)
    eeg = eeg_project(spike, params["eeg_proj_w"], stride, Tp)        # (B, feat_ch, Tp)
    n_eeg = params["eeg_blocks"]["w1"].shape[0]
    eeg = depth_conv_stack(eeg, params["eeg_blocks"],
                           dilations=[2 ** i for i in range(n_eeg)],
                           t_true=T, use_skip=False)

    # TCN separation network front + cross-modal fusion (folded)
    a = tcn_front_cmca(enc, eeg, params["front"], t_true=T)           # (B, feat_ch, Tp)

    # TCN DepthConv1d stacks (residual + skip accumulated in-kernel)
    P = params["layer_per_stack"]
    a, skip_sum = depth_conv_stack(a, params["tcn_blocks"],
                                   dilations=[2 ** i for i in range(P)],
                                   t_true=T, use_skip=True)

    # mask head (sigmoid mask, num_spk == 1) + masking + decoder per-frame matmul
    dec_w_t = params["dec_w"][:, 0, :].T.astype(BF16)                 # (k, enc_ch)
    frames = mask_and_decode_frames(skip_sum, enc, params["tcn_out"], dec_w_t)  # (B, k, Tp)

    # ConvTranspose1d overlap-add + unpad
    dec = overlap_add(frames[:, :, :T], Lpad, stride)                 # (B, Lpad)
    out = dec[:, stride: Lpad - (rest + stride)]
    return out.reshape(B, 1, -1)


if __name__ == "__main__":
    key = jax.random.PRNGKey(0)
    k_audio, k_spike, k_param = jax.random.split(key, 3)

    B, nsample = 2, 256          # audio: (B, nsample); B>=2 so v7x's 2nd core is used
    T_spike = 296                # EEG:   (B, 128, T_spike) -> same frame count as audio
    audio = jax.random.normal(k_audio, (B, nsample), dtype=F32)
    spike = jax.random.normal(k_spike, (B, 128, T_spike), dtype=F32)

    params = init_params(k_param)
    fwd = jax.jit(lambda a, s: basen_forward(params, a, s))
    out = jax.block_until_ready(fwd(audio, spike))
    assert out.shape == (B, 1, nsample), out.shape
    assert bool(jnp.all(jnp.isfinite(out)))
    print("KERNEL_OK")
</pallas_src>

<mosaic_0001>
module attributes {stable_mosaic.version = 11 : i64} {
  func.func @_mm_kernel(%arg0: i32, %arg1: i32, %arg2: memref<32x1024xbf16, #tpu.memory_space<vmem>>, %arg3: memref<1024x256xbf16, #tpu.memory_space<vmem>>, %arg4: memref<32x256xf32, #tpu.memory_space<vmem>>) attributes {dimension_semantics = [#tpu.dimension_semantics<parallel>, #tpu.dimension_semantics<arbitrary>], iteration_bounds = array<i64: 1, 4>, scalar_prefetch = 0 : i64, scratch_operands = 0 : i64, tpu.core_type = #tpu.core_type<tc>, window_params = [{transform_indices = @transform_0, window_bounds = array<i64: 32, 1024>}, {transform_indices = @transform_1, window_bounds = array<i64: 1024, 256>}, {transform_indices = @transform_2, window_bounds = array<i64: 32, 256>}]} {
    %c0_i32 = arith.constant 0 : i32
    %0 = arith.cmpi eq, %arg1, %c0_i32 : i32
    %1 = arith.extui %0 : i1 to i32
    %c0_i32_0 = arith.constant 0 : i32
    %2 = arith.cmpi ne, %1, %c0_i32_0 : i32
    scf.if %2 {
      %cst_8 = arith.constant 0.000000e+00 : f32
      %9 = vector.broadcast %cst_8 : f32 to vector<32x256xf32>
      %c0_9 = arith.constant 0 : index
      %c0_10 = arith.constant 0 : index
      %10 = vector.load %arg4[%c0_9, %c0_10] : memref<32x256xf32, #tpu.memory_space<vmem>>, vector<32x256xf32>
      tpu.vector_store %arg4[%c0_9, %c0_10], %9 {strides = array<i32>} : memref<32x256xf32, #tpu.memory_space<vmem>>, vector<32x256xf32>,
    } else {
    }
    %c0 = arith.constant 0 : index
    %c0_1 = arith.constant 0 : index
    %3 = vector.load %arg4[%c0, %c0_1] : memref<32x256xf32, #tpu.memory_space<vmem>>, vector<32x256xf32>
    %c0_2 = arith.constant 0 : index
    %c0_3 = arith.constant 0 : index
    %4 = vector.load %arg2[%c0_2, %c0_3] : memref<32x1024xbf16, #tpu.memory_space<vmem>>, vector<32x1024xbf16>
    %c0_4 = arith.constant 0 : index
    %c0_5 = arith.constant 0 : index
    %5 = vector.load %arg3[%c0_4, %c0_5] : memref<1024x256xbf16, #tpu.memory_space<vmem>>, vector<1024x256xbf16>
    %cst = arith.constant dense<0.000000e+00> : vector<32x256xf32>
    %6 = tpu.matmul %4, %5, %cst {dimension_numbers = #tpu.dot_dimension_numbers<[1], [0], [0], [1], [0, 0, 1, 1], [], []>} : vector<32x1024xbf16>, vector<1024x256xbf16>, vector<32x256xf32> -> vector<32x256xf32>
    %7 = arith.addf %3, %6 : vector<32x256xf32>
    %c0_6 = arith.constant 0 : index
    %c0_7 = arith.constant 0 : index
    %8 = vector.load %arg4[%c0_6, %c0_7] : memref<32x256xf32, #tpu.memory_space<vmem>>, vector<32x256xf32>
    tpu.vector_store %arg4[%c0_6, %c0_7], %7 {strides = array<i32>} : memref<32x256xf32, #tpu.memory_space<vmem>>, vector<32x256xf32>,
    return
  }
  func.func @transform_0(%arg0: i32, %arg1: i32) -> (i32, i32) {
    %c0_i32 = arith.constant 0 : i32
    %c0_i32_0 = arith.constant 0 : i32
    return %c0_i32, %arg1 : i32, i32
  }
  func.func @transform_1(%arg0: i32, %arg1: i32) -> (i32, i32) {
    %c0_i32 = arith.constant 0 : i32
    return %arg1, %arg0 : i32, i32
  }
  func.func @transform_2(%arg0: i32, %arg1: i32) -> (i32, i32) {
    %c0_i32 = arith.constant 0 : i32
    %c0_i32_0 = arith.constant 0 : i32
    return %c0_i32, %arg0 : i32, i32
  }
}

module attributes {stable_mosaic.version = 11 : i64} {
  func.func @kernel(%arg0: i32, %arg1: i32, %arg2: memref<1x32x128xf32, #tpu.memory_space<vmem>>, %arg3: memref<8xf32, #tpu.memory_space<smem>>, %arg4: memref<8xf32, #tpu.memory_space<smem>>, %arg5: memref<8x64x32xbf16, #tpu.memory_space<vmem>>, %arg6: memref<8x64x1xf32, #tpu.memory_space<vmem>>, %arg7: memref<8x64x1xf32, #tpu.memory_space<vmem>>, %arg8: memref<8x64x1xf32, #tpu.memory_space<vmem>>, %arg9: memref<8x64x3xf32, #tpu.memory_space<vmem>>, %arg10: memref<8x64x1xf32, #tpu.memory_space<vmem>>, %arg11: memref<8x64x1xf32, #tpu.memory_space<vmem>>, %arg12: memref<8x64x1xf32, #tpu.memory_space<vmem>>, %arg13: memref<8x32x64xbf16, #tpu.memory_space<vmem>>, %arg14: memref<8x32x1xf32, #tpu.memory_space<vmem>>, %arg15: memref<1x32x128xf32, #tpu.memory_space<vmem>>) attributes {dimension_semantics = [#tpu.dimension_semantics<parallel>, #tpu.dimension_semantics<arbitrary>], iteration_bounds = array<i64: 2, 8>, scalar_prefetch = 0 : i64, scratch_operands = 0 : i64, tpu.core_type = #tpu.core_type<tc>, window_params = [{transform_indices = @transform_0, window_bounds = array<i64: 1, 32, 128>}, {transform_indices = @transform_1, window_bounds = array<i64: 8>}, {transform_indices = @transform_2, window_bounds = array<i64: 8>}, {pipeline_mode = #tpu.pipeline_mode<synchronous>, transform_indices = @transform_3, window_bounds = array<i64: 8, 64, 32>}, {pipeline_mode = #tpu.pipeline_mode<synchronous>, transform_indices = @transform_4, window_bounds = array<i64: 8, 64, 1>}, {pipeline_mode = #tpu.pipeline_mode<synchronous>, transform_indices = @transform_5, window_bounds = array<i64: 8, 64, 1>}, {pipeline_mode = #tpu.pipeline_mode<synchronous>, transform_indices = @transform_6, window_bounds = array<i64: 8, 64, 1>}, {pipeline_mode = #tpu.pipeline_mode<synchronous>, transform_indices = @transform_7, window_bounds = array<i64: 8, 64, 3>}, {pipeline_mode = #tpu.pipeline_mode<synchronous>, transform_indices = @transform_8, window_bounds = array<i64: 8, 64, 1>}, {pipeline_mode = #tpu.pipeline_mode<synchronous>, transform_indices = @transform_9, window_bounds = array<i64: 8, 64, 1>}, {pipeline_mode = #tpu.pipeline_mode<synchronous>, transform_indices = @transform_10, window_bounds = array<i64: 8, 64, 1>}, {pipeline_mode = #tpu.pipeline_mode<synchronous>, transform_indices = @transform_11, window_bounds = array<i64: 8, 32, 64>}, {pipeline_mode = #tpu.pipeline_mode<synchronous>, transform_indices = @transform_12, window_bounds = array<i64: 8, 32, 1>}, {transform_indices = @transform_13, window_bounds = array<i64: 1, 32, 128>}]} {
    %c8_i32 = arith.constant 8 : i32
    %c0_i32 = arith.constant 0 : i32
    %0 = arith.cmpi eq, %c8_i32, %c0_i32 : i32
    %c1_i32 = arith.constant 1 : i32
    %1 = arith.select %0, %c1_i32, %c8_i32 : i32
    %2 = arith.remsi %arg1, %1 : i32
    %c0_i32_0 = arith.constant 0 : i32
    %3 = arith.cmpi ne, %2, %c0_i32_0 : i32
    %c0_i32_1 = arith.constant 0 : i32
    %4 = arith.cmpi slt, %2, %c0_i32_1 : i32
    %c0_i32_2 = arith.constant 0 : i32
    %5 = arith.cmpi slt, %1, %c0_i32_2 : i32
    %6 = arith.xori %4, %5 : i1
    %7 = arith.andi %6, %3 : i1
    %8 = arith.addi %2, %1 : i32
    %9 = arith.select %7, %8, %2 : i32
    %c0_i32_3 = arith.constant 0 : i32
    %10 = arith.cmpi eq, %arg1, %c0_i32_3 : i32
    %11 = arith.extui %10 : i1 to i32
    %c0_i32_4 = arith.constant 0 : i32
    %12 = arith.cmpi ne, %11, %c0_i32_4 : i32
    scf.if %12 {
      %c0_46 = arith.constant 0 : index
      %c0_47 = arith.constant 0 : index
      %c0_48 = arith.constant 0 : index
      %144 = vector.load %arg2[%c0_46, %c0_47, %c0_48] : memref<1x32x128xf32, #tpu.memory_space<vmem>>, vector<1x32x128xf32>
      %145 = vector.shape_cast %144 : vector<1x32x128xf32> to vector<32x128xf32>
      %c0_49 = arith.constant 0 : index
      %c0_50 = arith.constant 0 : index
      %c0_51 = arith.constant 0 : index
      %146 = vector.load %arg15[%c0_49, %c0_50, %c0_51] : memref<1x32x128xf32, #tpu.memory_space<vmem>>, vector<1x32x128xf32>
      %147 = vector.shape_cast %146 : vector<1x32x128xf32> to vector<32x128xf32>
      %148 = vector.shape_cast %145 : vector<32x128xf32> to vector<1x32x128xf32>
      tpu.vector_store %arg15[%c0_49, %c0_50, %c0_51], %148 {strides = array<i32>} : memref<1x32x128xf32, #tpu.memory_space<vmem>>, vector<1x32x128xf32>,
    } else {
    }
    %13 = tpu.iota {dimensions = array<i32: 1>} : vector<1x128xi32>
    %c34_i32 = arith.constant 34 : i32
    %14 = vector.broadcast %c34_i32 : i32 to vector<1x128xi32>
    %15 = arith.cmpi slt, %13, %14 : vector<1x128xi32>
    %16 = arith.extui %15 : vector<1x128xi1> to vector<1x128xi32>
    %17 = arith.sitofp %16 : vector<1x128xi32> to vector<1x128xf32>
    %c0 = arith.constant 0 : index
    %c0_5 = arith.constant 0 : index
    %c0_6 = arith.constant 0 : index
    %18 = vector.load %arg15[%c0, %c0_5, %c0_6] : memref<1x32x128xf32, #tpu.memory_space<vmem>>, vector<1x32x128xf32>
    %19 = vector.shape_cast %18 : vector<1x32x128xf32> to vector<32x128xf32>
    %20 = arith.index_cast %arg1 : i32 to index
    %c0_7 = arith.constant 0 : index
    %c0_8 = arith.constant 0 : index
    %21 = vector.load %arg5[%20, %c0_7, %c0_8] : memref<8x64x32xbf16, #tpu.memory_space<vmem>>, vector<1x64x32xbf16>
    %22 = vector.shape_cast %21 : vector<1x64x32xbf16> to vector<64x32xbf16>
    %23 = arith.truncf %19 : vector<32x128xf32> to vector<32x128xbf16>
    %cst = arith.constant dense<0.000000e+00> : vector<64x128xf32>
    %24 = tpu.matmul %22, %23, %cst {dimension_numbers = #tpu.dot_dimension_numbers<[1], [0], [0], [1], [0, 0, 1, 1], [], []>} : vector<64x32xbf16>, vector<32x128xbf16>, vector<64x128xf32> -> vector<64x128xf32>
    %25 = arith.index_cast %arg1 : i32 to index
    %c0_9 = arith.constant 0 : index
    %c0_10 = arith.constant 0 : index
    %26 = vector.load %arg6[%25, %c0_9, %c0_10] : memref<8x64x1xf32, #tpu.memory_space<vmem>>, vector<1x64x1xf32>
    %27 = vector.shape_cast %26 : vector<1x64x1xf32> to vector<64x1xf32>
    %28 = vector.broadcast %27 : vector<64x1xf32> to vector<64x128xf32>
    %29 = arith.addf %24, %28 : vector<64x128xf32>
    %cst_11 = arith.constant 0.000000e+00 : f32
    %30 = vector.broadcast %cst_11 : f32 to vector<64x128xf32>
    %31 = arith.cmpf oge, %29, %30 : vector<64x128xf32>
    %32 = arith.index_cast %arg1 : i32 to index
    %33 = memref.load %arg3[%32] : memref<8xf32, #tpu.memory_space<smem>>
    %34 = vector.broadcast %33 : f32 to vector<64x128xf32>
    %35 = arith.mulf %34, %29 : vector<64x128xf32>
    %36 = arith.select %31, %29, %35 : vector<64x128xi1>, vector<64x128xf32>
    %37 = vector.broadcast %17 : vector<1x128xf32> to vector<64x128xf32>
    %38 = arith.mulf %36, %37 : vector<64x128xf32>
    %39 = vector.shape_cast %38 : vector<64x128xf32> to vector<1x64x128xf32>
    %cst_12 = arith.constant dense<0.000000e+00> : vector<1xf32>
    %40 = vector.multi_reduction <add>, %39, %cst_12 [1, 2] : vector<1x64x128xf32> to vector<1xf32>
    %41 = vector.shape_cast %40 : vector<1xf32> to vector<1x1x1xf32>
    %42 = vector.extract %41[0, 0, 0] : f32 from vector<1x1x1xf32>
    %cst_13 = arith.constant 2.176000e+03 : f32
    %43 = arith.divf %42, %cst_13 : f32
    %44 = arith.mulf %38, %36 : vector<64x128xf32>
    %45 = vector.shape_cast %44 : vector<64x128xf32> to vector<1x64x128xf32>
    %cst_14 = arith.constant dense<0.000000e+00> : vector<1xf32>
    %46 = vector.multi_reduction <add>, %45, %cst_14 [1, 2] : vector<1x64x128xf32> to vector<1xf32>
    %47 = vector.shape_cast %46 : vector<1xf32> to vector<1x1x1xf32>
    %48 = vector.extract %47[0, 0, 0] : f32 from vector<1x1x1xf32>
    %cst_15 = arith.constant 2.176000e+03 : f32
    %49 = arith.divf %48, %cst_15 : f32
    %50 = arith.mulf %43, %43 : f32
    %51 = arith.subf %49, %50 : f32
    %cst_16 = arith.constant 0.000000e+00 : f32
    %52 = arith.maximumf %51, %cst_16 : f32
    %53 = vector.broadcast %43 : f32 to vector<1x128xf32>
    %54 = arith.mulf %53, %17 : vector<1x128xf32>
    %55 = vector.broadcast %54 : vector<1x128xf32> to vector<64x128xf32>
    %56 = arith.subf %38, %55 : vector<64x128xf32>
    %cst_17 = arith.constant 9.99999993E-9 : f32
    %57 = arith.addf %52, %cst_17 : f32
    %58 = math.rsqrt %57 : f32
    %59 = arith.index_cast %arg1 : i32 to index
    %c0_18 = arith.constant 0 : index
    %c0_19 = arith.constant 0 : index
    %60 = vector.load %arg7[%59, %c0_18, %c0_19] : memref<8x64x1xf32, #tpu.memory_space<vmem>>, vector<1x64x1xf32>
    %61 = vector.shape_cast %60 : vector<1x64x1xf32> to vector<64x1xf32>
    %62 = vector.broadcast %58 : f32 to vector<64x1xf32>
    %63 = arith.mulf %62, %61 : vector<64x1xf32>
    %64 = vector.broadcast %63 : vector<64x1xf32> to vector<64x128xf32>
    %65 = arith.mulf %56, %64 : vector<64x128xf32>
    %66 = arith.index_cast %arg1 : i32 to index
    %c0_20 = arith.constant 0 : index
    %c0_21 = arith.constant 0 : index
    %67 = vector.load %arg8[%66, %c0_20, %c0_21] : memref<8x64x1xf32, #tpu.memory_space<vmem>>, vector<1x64x1xf32>
    %68 = vector.shape_cast %67 : vector<1x64x1xf32> to vector<64x1xf32>
    %69 = vector.broadcast %68 : vector<64x1xf32> to vector<64x128xf32>
    %70 = vector.broadcast %17 : vector<1x128xf32> to vector<64x128xf32>
    %71 = arith.mulf %69, %70 : vector<64x128xf32>
    %72 = arith.addf %65, %71 : vector<64x128xf32>
    %73 = arith.index_cast %arg1 : i32 to index
    %c0_22 = arith.constant 0 : index
    %c0_23 = arith.constant 0 : index
    %74 = vector.load %arg9[%73, %c0_22, %c0_23] : memref<8x64x3xf32, #tpu.memory_space<vmem>>, vector<1x64x3xf32>
    %75 = vector.shape_cast %74 : vector<1x64x3xf32> to vector<64x3xf32>
    %c4_i32 = arith.constant 4 : i32
    %76 = arith.cmpi slt, %9, %c4_i32 : i32
    %77 = arith.extui %76 : i1 to i32
    %c0_i32_24 = arith.constant 0 : i32
    %78 = arith.cmpi ne, %77, %c0_i32_24 : i32
    %79 = scf.if %78 -> (vector<64x128xf32>) {
      %c2_i32 = arith.constant 2 : i32
      %144 = arith.cmpi slt, %9, %c2_i32 : i32
      %145 = arith.extui %144 : i1 to i32
      %c0_i32_46 = arith.constant 0 : i32
      %146 = arith.cmpi ne, %145, %c0_i32_46 : i32
      %147 = scf.if %146 -> (vector<64x128xf32>) {
        %c1_i32_47 = arith.constant 1 : i32
        %148 = arith.cmpi slt, %9, %c1_i32_47 : i32
        %149 = arith.extui %148 : i1 to i32
        %c0_i32_48 = arith.constant 0 : i32
        %150 = arith.cmpi ne, %149, %c0_i32_48 : i32
        %151 = scf.if %150 -> (vector<64x128xf32>) {
          %c1_i32_49 = arith.constant 1 : i32
          %152 = tpu.dynamic_rotate %72 by %c1_i32_49 dim 1 : vector<64x128xf32>, i32 -> vector<64x128xf32>
          %c1_i32_50 = arith.constant 1 : i32
          %153 = vector.broadcast %c1_i32_50 : i32 to vector<1x128xi32>
          %154 = arith.cmpi sge, %13, %153 : vector<1x128xi32>
          %cst_51 = arith.constant 0.000000e+00 : f32
          %155 = vector.shape_cast %154 : vector<1x128xi1> to vector<1x128xi1>
          %156 = vector.broadcast %155 : vector<1x128xi1> to vector<64x128xi1>
          %157 = vector.broadcast %cst_51 : f32 to vector<64x128xf32>
          %158 = arith.select %156, %152, %157 : vector<64x128xi1>, vector<64x128xf32>
          %c127_i32 = arith.constant 127 : i32
          %159 = tpu.dynamic_rotate %72 by %c127_i32 dim 1 : vector<64x128xf32>, i32 -> vector<64x128xf32>
          %c33_i32 = arith.constant 33 : i32
          %160 = vector.broadcast %c33_i32 : i32 to vector<1x128xi32>
          %161 = arith.cmpi slt, %13, %160 : vector<1x128xi32>
          %cst_52 = arith.constant 0.000000e+00 : f32
          %162 = vector.shape_cast %161 : vector<1x128xi1> to vector<1x128xi1>
          %163 = vector.broadcast %162 : vector<1x128xi1> to vector<64x128xi1>
          %164 = vector.broadcast %cst_52 : f32 to vector<64x128xf32>
          %165 = arith.select %163, %159, %164 : vector<64x128xi1>, vector<64x128xf32>
          %166 = vector.extract_strided_slice %75 {offsets = [0, 0], sizes = [64, 1], strides = [1, 1]} : vector<64x3xf32> to vector<64x1xf32>
          %167 = vector.broadcast %166 : vector<64x1xf32> to vector<64x128xf32>
          %168 = arith.mulf %167, %158 : vector<64x128xf32>
          %169 = vector.extract_strided_slice %75 {offsets = [0, 1], sizes = [64, 1], strides = [1, 1]} : vector<64x3xf32> to vector<64x1xf32>
          %170 = vector.broadcast %169 : vector<64x1xf32> to vector<64x128xf32>
          %171 = arith.mulf %170, %72 : vector<64x128xf32>
          %172 = arith.addf %168, %171 : vector<64x128xf32>
          %173 = vector.extract_strided_slice %75 {offsets = [0, 2], sizes = [64, 1], strides = [1, 1]} : vector<64x3xf32> to vector<64x1xf32>
          %174 = vector.broadcast %173 : vector<64x1xf32> to vector<64x128xf32>
          %175 = arith.mulf %174, %165 : vector<64x128xf32>
          %176 = arith.addf %172, %175 : vector<64x128xf32>
          scf.yield %176 : vector<64x128xf32>
        } else {
          %c2_i32_49 = arith.constant 2 : i32
          %152 = tpu.dynamic_rotate %72 by %c2_i32_49 dim 1 : vector<64x128xf32>, i32 -> vector<64x128xf32>
          %c2_i32_50 = arith.constant 2 : i32
          %153 = vector.broadcast %c2_i32_50 : i32 to vector<1x128xi32>
          %154 = arith.cmpi sge, %13, %153 : vector<1x128xi32>
          %cst_51 = arith.constant 0.000000e+00 : f32
          %155 = vector.shape_cast %154 : vector<1x128xi1> to vector<1x128xi1>
          %156 = vector.broadcast %155 : vector<1x128xi1> to vector<64x128xi1>
          %157 = vector.broadcast %cst_51 : f32 to vector<64x128xf32>
          %158 = arith.select %156, %152, %157 : vector<64x128xi1>, vector<64x128xf32>
          %c126_i32 = arith.constant 126 : i32
          %159 = tpu.dynamic_rotate %72 by %c126_i32 dim 1 : vector<64x128xf32>, i32 -> vector<64x128xf32>
          %c32_i32 = arith.constant 32 : i32
          %160 = vector.broadcast %c32_i32 : i32 to vector<1x128xi32>
          %161 = arith.cmpi slt, %13, %160 : vector<1x128xi32>
          %cst_52 = arith.constant 0.000000e+00 : f32
          %162 = vector.shape_cast %161 : vector<1x128xi1> to vector<1x128xi1>
          %163 = vector.broadcast %162 : vector<1x128xi1> to vector<64x128xi1>
          %164 = vector.broadcast %cst_52 : f32 to vector<64x128xf32>
          %165 = arith.select %163, %159, %164 : vector<64x128xi1>, vector<64x128xf32>
          %166 = vector.extract_strided_slice %75 {offsets = [0, 0], sizes = [64, 1], strides = [1, 1]} : vector<64x3xf32> to vector<64x1xf32>
          %167 = vector.broadcast %166 : vector<64x1xf32> to vector<64x128xf32>
          %168 = arith.mulf %167, %158 : vector<64x128xf32>
          %169 = vector.extract_strided_slice %75 {offsets = [0, 1], sizes = [64, 1], strides = [1, 1]} : vector<64x3xf32> to vector<64x1xf32>
          %170 = vector.broadcast %169 : vector<64x1xf32> to vector<64x128xf32>
          %171 = arith.mulf %170, %72 : vector<64x128xf32>
          %172 = arith.addf %168, %171 : vector<64x128xf32>
          %173 = vector.extract_strided_slice %75 {offsets = [0, 2], sizes = [64, 1], strides = [1, 1]} : vector<64x3xf32> to vector<64x1xf32>
          %174 = vector.broadcast %173 : vector<64x1xf32> to vector<64x128xf32>
          %175 = arith.mulf %174, %165 : vector<64x128xf32>
          %176 = arith.addf %172, %175 : vector<64x128xf32>
          scf.yield %176 : vector<64x128xf32>
        }
        scf.yield %151 : vector<64x128xf32>
      } else {
        %c2_i32_47 = arith.constant 2 : i32
        %148 = arith.subi %9, %c2_i32_47 : i32
        %c1_i32_48 = arith.constant 1 : i32
        %149 = arith.cmpi slt, %148, %c1_i32_48 : i32
        %150 = arith.extui %149 : i1 to i32
        %c0_i32_49 = arith.constant 0 : i32
        %151 = arith.cmpi ne, %150, %c0_i32_49 : i32
        %152 = scf.if %151 -> (vector<64x128xf32>) {
          %c4_i32_50 = arith.constant 4 : i32
          %153 = tpu.dynamic_rotate %72 by %c4_i32_50 dim 1 : vector<64x128xf32>, i32 -> vector<64x128xf32>
          %c4_i32_51 = arith.constant 4 : i32
          %154 = vector.broadcast %c4_i32_51 : i32 to vector<1x128xi32>
          %155 = arith.cmpi sge, %13, %154 : vector<1x128xi32>
          %cst_52 = arith.constant 0.000000e+00 : f32
          %156 = vector.shape_cast %155 : vector<1x128xi1> to vector<1x128xi1>
          %157 = vector.broadcast %156 : vector<1x128xi1> to vector<64x128xi1>
          %158 = vector.broadcast %cst_52 : f32 to vector<64x128xf32>
          %159 = arith.select %157, %153, %158 : vector<64x128xi1>, vector<64x128xf32>
          %c124_i32 = arith.constant 124 : i32
          %160 = tpu.dynamic_rotate %72 by %c124_i32 dim 1 : vector<64x128xf32>, i32 -> vector<64x128xf32>
          %c30_i32 = arith.constant 30 : i32
          %161 = vector.broadcast %c30_i32 : i32 to vector<1x128xi32>
          %162 = arith.cmpi slt, %13, %161 : vector<1x128xi32>
          %cst_53 = arith.constant 0.000000e+00 : f32
          %163 = vector.shape_cast %162 : vector<1x128xi1> to vector<1x128xi1>
          %164 = vector.broadcast %163 : vector<1x128xi1> to vector<64x128xi1>
          %165 = vector.broadcast %cst_53 : f32 to vector<64x128xf32>
          %166 = arith.select %164, %160, %165 : vector<64x128xi1>, vector<64x128xf32>
          %167 = vector.extract_strided_slice %75 {offsets = [0, 0], sizes = [64, 1], strides = [1, 1]} : vector<64x3xf32> to vector<64x1xf32>
          %168 = vector.broadcast %167 : vector<64x1xf32> to vector<64x128xf32>
          %169 = arith.mulf %168, %159 : vector<64x128xf32>
          %170 = vector.extract_strided_slice %75 {offsets = [0, 1], sizes = [64, 1], strides = [1, 1]} : vector<64x3xf32> to vector<64x1xf32>
          %171 = vector.broadcast %170 : vector<64x1xf32> to vector<64x128xf32>
          %172 = arith.mulf %171, %72 : vector<64x128xf32>
          %173 = arith.addf %169, %172 : vector<64x128xf32>
          %174 = vector.extract_strided_slice %75 {offsets = [0, 2], sizes = [64, 1], strides = [1, 1]} : vector<64x3xf32> to vector<64x1xf32>
          %175 = vector.broadcast %174 : vector<64x1xf32> to vector<64x128xf32>
          %176 = arith.mulf %175, %166 : vector<64x128xf32>
          %177 = arith.addf %173, %176 : vector<64x128xf32>
          scf.yield %177 : vector<64x128xf32>
        } else {
          %c8_i32_50 = arith.constant 8 : i32
          %153 = tpu.dynamic_rotate %72 by %c8_i32_50 dim 1 : vector<64x128xf32>, i32 -> vector<64x128xf32>
          %c8_i32_51 = arith.constant 8 : i32
          %154 = vector.broadcast %c8_i32_51 : i32 to vector<1x128xi32>
          %155 = arith.cmpi sge, %13, %154 : vector<1x128xi32>
          %cst_52 = arith.constant 0.000000e+00 : f32
          %156 = vector.shape_cast %155 : vector<1x128xi1> to vector<1x128xi1>
          %157 = vector.broadcast %156 : vector<1x128xi1> to vector<64x128xi1>
          %158 = vector.broadcast %cst_52 : f32 to vector<64x128xf32>
          %159 = arith.select %157, %153, %158 : vector<64x128xi1>, vector<64x128xf32>
          %c120_i32 = arith.constant 120 : i32
          %160 = tpu.dynamic_rotate %72 by %c120_i32 dim 1 : vector<64x128xf32>, i32 -> vector<64x128xf32>
          %c26_i32 = arith.constant 26 : i32
          %161 = vector.broadcast %c26_i32 : i32 to vector<1x128xi32>
          %162 = arith.cmpi slt, %13, %161 : vector<1x128xi32>
          %cst_53 = arith.constant 0.000000e+00 : f32
          %163 = vector.shape_cast %162 : vector<1x128xi1> to vector<1x128xi1>
          %164 = vector.broadcast %163 : vector<1x128xi1> to vector<64x128xi1>
          %165 = vector.broadcast %cst_53 : f32 to vector<64x128xf32>
          %166 = arith.select %164, %160, %165 : vector<64x128xi1>, vector<64x128xf32>
          %167 = vector.extract_strided_slice %75 {offsets = [0, 0], sizes = [64, 1], strides = [1, 1]} : vector<64x3xf32> to vector<64x1xf32>
          %168 = vector.broadcast %167 : vector<64x1xf32> to vector<64x128xf32>
          %169 = arith.mulf %168, %159 : vector<64x128xf32>
          %170 = vector.extract_strided_slice %75 {offsets = [0, 1], sizes = [64, 1], strides = [1, 1]} : vector<64x3xf32> to vector<64x1xf32>
          %171 = vector.broadcast %170 : vector<64x1xf32> to vector<64x128xf32>
          %172 = arith.mulf %171, %72 : vector<64x128xf32>
          %173 = arith.addf %169, %172 : vector<64x128xf32>
          %174 = vector.extract_strided_slice %75 {offsets = [0, 2], sizes = [64, 1], strides = [1, 1]} : vector<64x3xf32> to vector<64x1xf32>
          %175 = vector.broadcast %174 : vector<64x1xf32> to vector<64x128xf32>
          %176 = arith.mulf %175, %166 : vector<64x128xf32>
          %177 = arith.addf %173, %176 : vector<64x128xf32>
          scf.yield %177 : vector<64x128xf32>
        }
        scf.yield %152 : vector<64x128xf32>
      }
      scf.yield %147 : vector<64x128xf32>
    } else {
      %c4_i32_46 = arith.constant 4 : i32
      %144 = arith.subi %9, %c4_i32_46 : i32
      %c2_i32 = arith.constant 2 : i32
      %145 = arith.cmpi slt, %144, %c2_i32 : i32
      %146 = arith.extui %145 : i1 to i32
      %c0_i32_47 = arith.constant 0 : i32
      %147 = arith.cmpi ne, %146, %c0_i32_47 : i32
      %148 = scf.if %147 -> (vector<64x128xf32>) {
        %c1_i32_48 = arith.constant 1 : i32
        %149 = arith.cmpi slt, %144, %c1_i32_48 : i32
        %150 = arith.extui %149 : i1 to i32
        %c0_i32_49 = arith.constant 0 : i32
        %151 = arith.cmpi ne, %150, %c0_i32_49 : i32
        %152 = scf.if %151 -> (vector<64x128xf32>) {
          %c16_i32 = arith.constant 16 : i32
          %153 = tpu.dynamic_rotate %72 by %c16_i32 dim 1 : vector<64x128xf32>, i32 -> vector<64x128xf32>
          %c16_i32_50 = arith.constant 16 : i32
          %154 = vector.broadcast %c16_i32_50 : i32 to vector<1x128xi32>
          %155 = arith.cmpi sge, %13, %154 : vector<1x128xi32>
          %cst_51 = arith.constant 0.000000e+00 : f32
          %156 = vector.shape_cast %155 : vector<1x128xi1> to vector<1x128xi1>
          %157 = vector.broadcast %156 : vector<1x128xi1> to vector<64x128xi1>
          %158 = vector.broadcast %cst_51 : f32 to vector<64x128xf32>
          %159 = arith.select %157, %153, %158 : vector<64x128xi1>, vector<64x128xf32>
          %c112_i32 = arith.constant 112 : i32
          %160 = tpu.dynamic_rotate %72 by %c112_i32 dim 1 : vector<64x128xf32>, i32 -> vector<64x128xf32>
          %c18_i32 = arith.constant 18 : i32
          %161 = vector.broadcast %c18_i32 : i32 to vector<1x128xi32>
          %162 = arith.cmpi slt, %13, %161 : vector<1x128xi32>
          %cst_52 = arith.constant 0.000000e+00 : f32
          %163 = vector.shape_cast %162 : vector<1x128xi1> to vector<1x128xi1>
          %164 = vector.broadcast %163 : vector<1x128xi1> to vector<64x128xi1>
          %165 = vector.broadcast %cst_52 : f32 to vector<64x128xf32>
          %166 = arith.select %164, %160, %165 : vector<64x128xi1>, vector<64x128xf32>
          %167 = vector.extract_strided_slice %75 {offsets = [0, 0], sizes = [64, 1], strides = [1, 1]} : vector<64x3xf32> to vector<64x1xf32>
          %168 = vector.broadcast %167 : vector<64x1xf32> to vector<64x128xf32>
          %169 = arith.mulf %168, %159 : vector<64x128xf32>
          %170 = vector.extract_strided_slice %75 {offsets = [0, 1], sizes = [64, 1], strides = [1, 1]} : vector<64x3xf32> to vector<64x1xf32>
          %171 = vector.broadcast %170 : vector<64x1xf32> to vector<64x128xf32>
          %172 = arith.mulf %171, %72 : vector<64x128xf32>
          %173 = arith.addf %169, %172 : vector<64x128xf32>
          %174 = vector.extract_strided_slice %75 {offsets = [0, 2], sizes = [64, 1], strides = [1, 1]} : vector<64x3xf32> to vector<64x1xf32>
          %175 = vector.broadcast %174 : vector<64x1xf32> to vector<64x128xf32>
          %176 = arith.mulf %175, %166 : vector<64x128xf32>
          %177 = arith.addf %173, %176 : vector<64x128xf32>
          scf.yield %177 : vector<64x128xf32>
        } else {
          %c32_i32 = arith.constant 32 : i32
          %153 = tpu.dynamic_rotate %72 by %c32_i32 dim 1 : vector<64x128xf32>, i32 -> vector<64x128xf32>
          %c32_i32_50 = arith.constant 32 : i32
          %154 = vector.broadcast %c32_i32_50 : i32 to vector<1x128xi32>
          %155 = arith.cmpi sge, %13, %154 : vector<1x128xi32>
          %cst_51 = arith.constant 0.000000e+00 : f32
          %156 = vector.shape_cast %155 : vector<1x128xi1> to vector<1x128xi1>
          %157 = vector.broadcast %156 : vector<1x128xi1> to vector<64x128xi1>
          %158 = vector.broadcast %cst_51 : f32 to vector<64x128xf32>
          %159 = arith.select %157, %153, %158 : vector<64x128xi1>, vector<64x128xf32>
          %c96_i32 = arith.constant 96 : i32
          %160 = tpu.dynamic_rotate %72 by %c96_i32 dim 1 : vector<64x128xf32>, i32 -> vector<64x128xf32>
          %c2_i32_52 = arith.constant 2 : i32
          %161 = vector.broadcast %c2_i32_52 : i32 to vector<1x128xi32>
          %162 = arith.cmpi slt, %13, %161 : vector<1x128xi32>
          %cst_53 = arith.constant 0.000000e+00 : f32
          %163 = vector.shape_cast %162 : vector<1x128xi1> to vector<1x128xi1>
          %164 = vector.broadcast %163 : vector<1x128xi1> to vector<64x128xi1>
          %165 = vector.broadcast %cst_53 : f32 to vector<64x128xf32>
          %166 = arith.select %164, %160, %165 : vector<64x128xi1>, vector<64x128xf32>
          %167 = vector.extract_strided_slice %75 {offsets = [0, 0], sizes = [64, 1], strides = [1, 1]} : vector<64x3xf32> to vector<64x1xf32>
          %168 = vector.broadcast %167 : vector<64x1xf32> to vector<64x128xf32>
          %169 = arith.mulf %168, %159 : vector<64x128xf32>
          %170 = vector.extract_strided_slice %75 {offsets = [0, 1], sizes = [64, 1], strides = [1, 1]} : vector<64x3xf32> to vector<64x1xf32>
          %171 = vector.broadcast %170 : vector<64x1xf32> to vector<64x128xf32>
          %172 = arith.mulf %171, %72 : vector<64x128xf32>
          %173 = arith.addf %169, %172 : vector<64x128xf32>
          %174 = vector.extract_strided_slice %75 {offsets = [0, 2], sizes = [64, 1], strides = [1, 1]} : vector<64x3xf32> to vector<64x1xf32>
          %175 = vector.broadcast %174 : vector<64x1xf32> to vector<64x128xf32>
          %176 = arith.mulf %175, %166 : vector<64x128xf32>
          %177 = arith.addf %173, %176 : vector<64x128xf32>
          scf.yield %177 : vector<64x128xf32>
        }
        scf.yield %152 : vector<64x128xf32>
      } else {
        %c2_i32_48 = arith.constant 2 : i32
        %149 = arith.subi %144, %c2_i32_48 : i32
        %c1_i32_49 = arith.constant 1 : i32
        %150 = arith.cmpi slt, %149, %c1_i32_49 : i32
        %151 = arith.extui %150 : i1 to i32
        %c0_i32_50 = arith.constant 0 : i32
        %152 = arith.cmpi ne, %151, %c0_i32_50 : i32
        %153 = scf.if %152 -> (vector<64x128xf32>) {
          %c64_i32 = arith.constant 64 : i32
          %154 = tpu.dynamic_rotate %72 by %c64_i32 dim 1 : vector<64x128xf32>, i32 -> vector<64x128xf32>
          %c64_i32_51 = arith.constant 64 : i32
          %155 = vector.broadcast %c64_i32_51 : i32 to vector<1x128xi32>
          %156 = arith.cmpi sge, %13, %155 : vector<1x128xi32>
          %cst_52 = arith.constant 0.000000e+00 : f32
          %157 = vector.shape_cast %156 : vector<1x128xi1> to vector<1x128xi1>
          %158 = vector.broadcast %157 : vector<1x128xi1> to vector<64x128xi1>
          %159 = vector.broadcast %cst_52 : f32 to vector<64x128xf32>
          %160 = arith.select %158, %154, %159 : vector<64x128xi1>, vector<64x128xf32>
          %c64_i32_53 = arith.constant 64 : i32
          %161 = tpu.dynamic_rotate %72 by %c64_i32_53 dim 1 : vector<64x128xf32>, i32 -> vector<64x128xf32>
          %c-30_i32 = arith.constant -30 : i32
          %162 = vector.broadcast %c-30_i32 : i32 to vector<1x128xi32>
          %163 = arith.cmpi slt, %13, %162 : vector<1x128xi32>
          %cst_54 = arith.constant 0.000000e+00 : f32
          %164 = vector.shape_cast %163 : vector<1x128xi1> to vector<1x128xi1>
          %165 = vector.broadcast %164 : vector<1x128xi1> to vector<64x128xi1>
          %166 = vector.broadcast %cst_54 : f32 to vector<64x128xf32>
          %167 = arith.select %165, %161, %166 : vector<64x128xi1>, vector<64x128xf32>
          %168 = vector.extract_strided_slice %75 {offsets = [0, 0], sizes = [64, 1], strides = [1, 1]} : vector<64x3xf32> to vector<64x1xf32>
          %169 = vector.broadcast %168 : vector<64x1xf32> to vector<64x128xf32>
          %170 = arith.mulf %169, %160 : vector<64x128xf32>
          %171 = vector.extract_strided_slice %75 {offsets = [0, 1], sizes = [64, 1], strides = [1, 1]} : vector<64x3xf32> to vector<64x1xf32>
          %172 = vector.broadcast %171 : vector<64x1xf32> to vector<64x128xf32>
          %173 = arith.mulf %172, %72 : vector<64x128xf32>
          %174 = arith.addf %170, %173 : vector<64x128xf32>
          %175 = vector.extract_strided_slice %75 {offsets = [0, 2], sizes = [64, 1], strides = [1, 1]} : vector<64x3xf32> to vector<64x1xf32>
          %176 = vector.broadcast %175 : vector<64x1xf32> to vector<64x128xf32>
          %177 = arith.mulf %176, %167 : vector<64x128xf32>
          %178 = arith.addf %174, %177 : vector<64x128xf32>
          scf.yield %178 : vector<64x128xf32>
        } else {
          %c128_i32 = arith.constant 128 : i32
          %154 = vector.broadcast %c128_i32 : i32 to vector<1x128xi32>
          %155 = arith.cmpi sge, %13, %154 : vector<1x128xi32>
          %cst_51 = arith.constant 0.000000e+00 : f32
          %156 = vector.shape_cast %155 : vector<1x128xi1> to vector<1x128xi1>
          %157 = vector.broadcast %156 : vector<1x128xi1> to vector<64x128xi1>
          %158 = vector.broadcast %cst_51 : f32 to vector<64x128xf32>
          %159 = arith.select %157, %72, %158 : vector<64x128xi1>, vector<64x128xf32>
          %c-94_i32 = arith.constant -94 : i32
          %160 = vector.broadcast %c-94_i32 : i32 to vector<1x128xi32>
          %161 = arith.cmpi slt, %13, %160 : vector<1x128xi32>
          %cst_52 = arith.constant 0.000000e+00 : f32
          %162 = vector.shape_cast %161 : vector<1x128xi1> to vector<1x128xi1>
          %163 = vector.broadcast %162 : vector<1x128xi1> to vector<64x128xi1>
          %164 = vector.broadcast %cst_52 : f32 to vector<64x128xf32>
          %165 = arith.select %163, %72, %164 : vector<64x128xi1>, vector<64x128xf32>
          %166 = vector.extract_strided_slice %75 {offsets = [0, 0], sizes = [64, 1], strides = [1, 1]} : vector<64x3xf32> to vector<64x1xf32>
          %167 = vector.broadcast %166 : vector<64x1xf32> to vector<64x128xf32>
          %168 = arith.mulf %167, %159 : vector<64x128xf32>
          %169 = vector.extract_strided_slice %75 {offsets = [0, 1], sizes = [64, 1], strides = [1, 1]} : vector<64x3xf32> to vector<64x1xf32>
          %170 = vector.broadcast %169 : vector<64x1xf32> to vector<64x128xf32>
          %171 = arith.mulf %170, %72 : vector<64x128xf32>
          %172 = arith.addf %168, %171 : vector<64x128xf32>
          %173 = vector.extract_strided_slice %75 {offsets = [0, 2], sizes = [64, 1], strides = [1, 1]} : vector<64x3xf32> to vector<64x1xf32>
          %174 = vector.broadcast %173 : vector<64x1xf32> to vector<64x128xf32>
          %175 = arith.mulf %174, %165 : vector<64x128xf32>
          %176 = arith.addf %172, %175 : vector<64x128xf32>
          scf.yield %176 : vector<64x128xf32>
        }
        scf.yield %153 : vector<64x128xf32>
      }
      scf.yield %148 : vector<64x128xf32>
    }
    %80 = arith.index_cast %arg1 : i32 to index
    %c0_25 = arith.constant 0 : index
    %c0_26 = arith.constant 0 : index
    %81 = vector.load %arg10[%80, %c0_25, %c0_26] : memref<8x64x1xf32, #tpu.memory_space<vmem>>, vector<1x64x1xf32>
    %82 = vector.shape_cast %81 : vector<1x64x1xf32> to vector<64x1xf32>
    %83 = vector.broadcast %82 : vector<64x1xf32> to vector<64x128xf32>
    %84 = arith.addf %79, %83 : vector<64x128xf32>
    %cst_27 = arith.constant 0.000000e+00 : f32
    %85 = vector.broadcast %cst_27 : f32 to vector<64x128xf32>
    %86 = arith.cmpf oge, %84, %85 : vector<64x128xf32>
    %87 = arith.index_cast %arg1 : i32 to index
    %88 = memref.load %arg4[%87] : memref<8xf32, #tpu.memory_space<smem>>
    %89 = vector.broadcast %88 : f32 to vector<64x128xf32>
    %90 = arith.mulf %89, %84 : vector<64x128xf32>
    %91 = arith.select %86, %84, %90 : vector<64x128xi1>, vector<64x128xf32>
    %92 = vector.broadcast %17 : vector<1x128xf32> to vector<64x128xf32>
    %93 = arith.mulf %91, %92 : vector<64x128xf32>
    %94 = vector.shape_cast %93 : vector<64x128xf32> to vector<1x64x128xf32>
    %cst_28 = arith.constant dense<0.000000e+00> : vector<1xf32>
    %95 = vector.multi_reduction <add>, %94, %cst_28 [1, 2] : vector<1x64x128xf32> to vector<1xf32>
    %96 = vector.shape_cast %95 : vector<1xf32> to vector<1x1x1xf32>
    %97 = vector.extract %96[0, 0, 0] : f32 from vector<1x1x1xf32>
    %cst_29 = arith.constant 2.176000e+03 : f32
    %98 = arith.divf %97, %cst_29 : f32
    %99 = arith.mulf %93, %91 : vector<64x128xf32>
    %100 = vector.shape_cast %99 : vector<64x128xf32> to vector<1x64x128xf32>
    %cst_30 = arith.constant dense<0.000000e+00> : vector<1xf32>
    %101 = vector.multi_reduction <add>, %100, %cst_30 [1, 2] : vector<1x64x128xf32> to vector<1xf32>
    %102 = vector.shape_cast %101 : vector<1xf32> to vector<1x1x1xf32>
    %103 = vector.extract %102[0, 0, 0] : f32 from vector<1x1x1xf32>
    %cst_31 = arith.constant 2.176000e+03 : f32
    %104 = arith.divf %103, %cst_31 : f32
    %105 = arith.mulf %98, %98 : f32
    %106 = arith.subf %104, %105 : f32
    %cst_32 = arith.constant 0.000000e+00 : f32
    %107 = arith.maximumf %106, %cst_32 : f32
    %108 = vector.broadcast %98 : f32 to vector<1x128xf32>
    %109 = arith.mulf %108, %17 : vector<1x128xf32>
    %110 = vector.broadcast %109 : vector<1x128xf32> to vector<64x128xf32>
    %111 = arith.subf %93, %110 : vector<64x128xf32>
    %cst_33 = arith.constant 9.99999993E-9 : f32
    %112 = arith.addf %107, %cst_33 : f32
    %113 = math.rsqrt %112 : f32
    %114 = arith.index_cast %arg1 : i32 to index
    %c0_34 = arith.constant 0 : index
    %c0_35 = arith.constant 0 : index
    %115 = vector.load %arg11[%114, %c0_34, %c0_35] : memref<8x64x1xf32, #tpu.memory_space<vmem>>, vector<1x64x1xf32>
    %116 = vector.shape_cast %115 : vector<1x64x1xf32> to vector<64x1xf32>
    %117 = vector.broadcast %113 : f32 to vector<64x1xf32>
    %118 = arith.mulf %117, %116 : vector<64x1xf32>
    %119 = vector.broadcast %118 : vector<64x1xf32> to vector<64x128xf32>
    %120 = arith.mulf %111, %119 : vector<64x128xf32>
    %121 = arith.index_cast %arg1 : i32 to index
    %c0_36 = arith.constant 0 : index
    %c0_37 = arith.constant 0 : index
    %122 = vector.load %arg12[%121, %c0_36, %c0_37] : memref<8x64x1xf32, #tpu.memory_space<vmem>>, vector<1x64x1xf32>
    %123 = vector.shape_cast %122 : vector<1x64x1xf32> to vector<64x1xf32>
    %124 = vector.broadcast %123 : vector<64x1xf32> to vector<64x128xf32>
    %125 = vector.broadcast %17 : vector<1x128xf32> to vector<64x128xf32>
    %126 = arith.mulf %124, %125 : vector<64x128xf32>
    %127 = arith.addf %120, %126 : vector<64x128xf32>
    %128 = arith.truncf %127 : vector<64x128xf32> to vector<64x128xbf16>
    %129 = arith.index_cast %arg1 : i32 to index
    %c0_38 = arith.constant 0 : index
    %c0_39 = arith.constant 0 : index
    %130 = vector.load %arg13[%129, %c0_38, %c0_39] : memref<8x32x64xbf16, #tpu.memory_space<vmem>>, vector<1x32x64xbf16>
    %131 = vector.shape_cast %130 : vector<1x32x64xbf16> to vector<32x64xbf16>
    %cst_40 = arith.constant dense<0.000000e+00> : vector<32x128xf32>
    %132 = tpu.matmul %131, %128, %cst_40 {dimension_numbers = #tpu.dot_dimension_numbers<[1], [0], [0], [1], [0, 0, 1, 1], [], []>} : vector<32x64xbf16>, vector<64x128xbf16>, vector<32x128xf32> -> vector<32x128xf32>
    %133 = arith.index_cast %arg1 : i32 to index
    %c0_41 = arith.constant 0 : index
    %c0_42 = arith.constant 0 : index
    %134 = vector.load %arg14[%133, %c0_41, %c0_42] : memref<8x32x1xf32, #tpu.memory_space<vmem>>, vector<1x32x1xf32>
    %135 = vector.shape_cast %134 : vector<1x32x1xf32> to vector<32x1xf32>
    %136 = vector.broadcast %135 : vector<32x1xf32> to vector<32x128xf32>
    %137 = arith.addf %132, %136 : vector<32x128xf32>
    %138 = vector.broadcast %17 : vector<1x128xf32> to vector<32x128xf32>
    %139 = arith.mulf %137, %138 : vector<32x128xf32>
    %140 = arith.addf %19, %139 : vector<32x128xf32>
    %c0_43 = arith.constant 0 : index
    %c0_44 = arith.constant 0 : index
    %c0_45 = arith.constant 0 : index
    %141 = vector.load %arg15[%c0_43, %c0_44, %c0_45] : memref<1x32x128xf32, #tpu.memory_space<vmem>>, vector<1x32x128xf32>
    %142 = vector.shape_cast %141 : vector<1x32x128xf32> to vector<32x128xf32>
    %143 = vector.shape_cast %140 : vector<32x128xf32> to vector<1x32x128xf32>
    tpu.vector_store %arg15[%c0_43, %c0_44, %c0_45], %143 {strides = array<i32>} : memref<1x32x128xf32, #tpu.memory_space<vmem>>, vector<1x32x128xf32>,
    return
  }
  func.func @transform_0(%arg0: i32, %arg1: i32) -> (i32, i32, i32) {
    %c0_i32 = arith.constant 0 : i32
    %c0_i32_0 = arith.constant 0 : i32
    %c0_i32_1 = arith.constant 0 : i32
    return %arg0, %c0_i32, %c0_i32_0 : i32, i32, i32
  }
  func.func @transform_1(%arg0: i32, %arg1: i32) -> i32 {
    %c0_i32 = arith.constant 0 : i32
    %c0_i32_0 = arith.constant 0 : i32
    return %c0_i32 : i32
  }
  func.func @transform_2(%arg0: i32, %arg1: i32) -> i32 {
    %c0_i32 = arith.constant 0 : i32
    %c0_i32_0 = arith.constant 0 : i32
    return %c0_i32 : i32
  }
  func.func @transform_3(%arg0: i32, %arg1: i32) -> (i32, i32, i32) {
    %c0_i32 = arith.constant 0 : i32
    %c0_i32_0 = arith.constant 0 : i32
    %c0_i32_1 = arith.constant 0 : i32
    %c0_i32_2 = arith.constant 0 : i32
    return %c0_i32, %c0_i32_0, %c0_i32_1 : i32, i32, i32
  }
  func.func @transform_4(%arg0: i32, %arg1: i32) -> (i32, i32, i32) {
    %c0_i32 = arith.constant 0 : i32
    %c0_i32_0 = arith.constant 0 : i32
    %c0_i32_1 = arith.constant 0 : i32
    %c0_i32_2 = arith.constant 0 : i32
    return %c0_i32, %c0_i32_0, %c0_i32_1 : i32, i32, i32
  }
  func.func @transform_5(%arg0: i32, %arg1: i32) -> (i32, i32, i32) {
    %c0_i32 = arith.constant 0 : i32
    %c0_i32_0 = arith.constant 0 : i32
    %c0_i32_1 = arith.constant 0 : i32
    %c0_i32_2 = arith.constant 0 : i32
    return %c0_i32, %c0_i32_0, %c0_i32_1 : i32, i32, i32
  }
  func.func @transform_6(%arg0: i32, %arg1: i32) -> (i32, i32, i32) {
    %c0_i32 = arith.constant 0 : i32
    %c0_i32_0 = arith.constant 0 : i32
    %c0_i32_1 = arith.constant 0 : i32
    %c0_i32_2 = arith.constant 0 : i32
    return %c0_i32, %c0_i32_0, %c0_i32_1 : i32, i32, i32
  }
  func.func @transform_7(%arg0: i32, %arg1: i32) -> (i32, i32, i32) {
    %c0_i32 = arith.constant 0 : i32
    %c0_i32_0 = arith.constant 0 : i32
    %c0_i32_1 = arith.constant 0 : i32
    %c0_i32_2 = arith.constant 0 : i32
    return %c0_i32, %c0_i32_0, %c0_i32_1 : i32, i32, i32
  }
  func.func @transform_8(%arg0: i32, %arg1: i32) -> (i32, i32, i32) {
    %c0_i32 = arith.constant 0 : i32
    %c0_i32_0 = arith.constant 0 : i32
    %c0_i32_1 = arith.constant 0 : i32
    %c0_i32_2 = arith.constant 0 : i32
    return %c0_i32, %c0_i32_0, %c0_i32_1 : i32, i32, i32
  }
  func.func @transform_9(%arg0: i32, %arg1: i32) -> (i32, i32, i32) {
    %c0_i32 = arith.constant 0 : i32
    %c0_i32_0 = arith.constant 0 : i32
    %c0_i32_1 = arith.constant 0 : i32
    %c0_i32_2 = arith.constant 0 : i32
    return %c0_i32, %c0_i32_0, %c0_i32_1 : i32, i32, i32
  }
  func.func @transform_10(%arg0: i32, %arg1: i32) -> (i32, i32, i32) {
    %c0_i32 = arith.constant 0 : i32
    %c0_i32_0 = arith.constant 0 : i32
    %c0_i32_1 = arith.constant 0 : i32
    %c0_i32_2 = arith.constant 0 : i32
    return %c0_i32, %c0_i32_0, %c0_i32_1 : i32, i32, i32
  }
  func.func @transform_11(%arg0: i32, %arg1: i32) -> (i32, i32, i32) {
    %c0_i32 = arith.constant 0 : i32
    %c0_i32_0 = arith.constant 0 : i32
    %c0_i32_1 = arith.constant 0 : i32
    %c0_i32_2 = arith.constant 0 : i32
    return %c0_i32, %c0_i32_0, %c0_i32_1 : i32, i32, i32
  }
  func.func @transform_12(%arg0: i32, %arg1: i32) -> (i32, i32, i32) {
    %c0_i32 = arith.constant 0 : i32
    %c0_i32_0 = arith.constant 0 : i32
    %c0_i32_1 = arith.constant 0 : i32
    %c0_i32_2 = arith.constant 0 : i32
    return %c0_i32, %c0_i32_0, %c0_i32_1 : i32, i32, i32
  }
  func.func @transform_13(%arg0: i32, %arg1: i32) -> (i32, i32, i32) {
    %c0_i32 = arith.constant 0 : i32
    %c0_i32_0 = arith.constant 0 : i32
    %c0_i32_1 = arith.constant 0 : i32
    return %arg0, %c0_i32, %c0_i32_0 : i32, i32, i32
  }
}

module attributes {stable_mosaic.version = 11 : i64} {
  func.func @_mm_kernel(%arg0: i32, %arg1: i32, %arg2: memref<64x32xbf16, #tpu.memory_space<vmem>>, %arg3: memref<32x256xbf16, #tpu.memory_space<vmem>>, %arg4: memref<64x256xf32, #tpu.memory_space<vmem>>) attributes {dimension_semantics = [#tpu.dimension_semantics<parallel>, #tpu.dimension_semantics<arbitrary>], iteration_bounds = array<i64: 1, 1>, scalar_prefetch = 0 : i64, scratch_operands = 0 : i64, tpu.core_type = #tpu.core_type<tc>, window_params = [{transform_indices = @transform_0, window_bounds = array<i64: 64, 32>}, {transform_indices = @transform_1, window_bounds = array<i64: 32, 256>}, {transform_indices = @transform_2, window_bounds = array<i64: 64, 256>}]} {
    %c0_i32 = arith.constant 0 : i32
    %0 = arith.cmpi eq, %arg1, %c0_i32 : i32
    %1 = arith.extui %0 : i1 to i32
    %c0_i32_0 = arith.constant 0 : i32
    %2 = arith.cmpi ne, %1, %c0_i32_0 : i32
    scf.if %2 {
      %cst_8 = arith.constant 0.000000e+00 : f32
      %9 = vector.broadcast %cst_8 : f32 to vector<64x256xf32>
      %c0_9 = arith.constant 0 : index
      %c0_10 = arith.constant 0 : index
      %10 = vector.load %arg4[%c0_9, %c0_10] : memref<64x256xf32, #tpu.memory_space<vmem>>, vector<64x256xf32>
      tpu.vector_store %arg4[%c0_9, %c0_10], %9 {strides = array<i32>} : memref<64x256xf32, #tpu.memory_space<vmem>>, vector<64x256xf32>,
    } else {
    }
    %c0 = arith.constant 0 : index
    %c0_1 = arith.constant 0 : index
    %3 = vector.load %arg4[%c0, %c0_1] : memref<64x256xf32, #tpu.memory_space<vmem>>, vector<64x256xf32>
    %c0_2 = arith.constant 0 : index
    %c0_3 = arith.constant 0 : index
    %4 = vector.load %arg2[%c0_2, %c0_3] : memref<64x32xbf16, #tpu.memory_space<vmem>>, vector<64x32xbf16>
    %c0_4 = arith.constant 0 : index
    %c0_5 = arith.constant 0 : index
    %5 = vector.load %arg3[%c0_4, %c0_5] : memref<32x256xbf16, #tpu.memory_space<vmem>>, vector<32x256xbf16>
    %cst = arith.constant dense<0.000000e+00> : vector<64x256xf32>
    %6 = tpu.matmul %4, %5, %cst {dimension_numbers = #tpu.dot_dimension_numbers<[1], [0], [0], [1], [0, 0, 1, 1], [], []>} : vector<64x32xbf16>, vector<32x256xbf16>, vector<64x256xf32> -> vector<64x256xf32>
    %7 = arith.addf %3, %6 : vector<64x256xf32>
    %c0_6 = arith.constant 0 : index
    %c0_7 = arith.constant 0 : index
    %8 = vector.load %arg4[%c0_6, %c0_7] : memref<64x256xf32, #tpu.memory_space<vmem>>, vector<64x256xf32>
    tpu.vector_store %arg4[%c0_6, %c0_7], %7 {strides = array<i32>} : memref<64x256xf32, #tpu.memory_space<vmem>>, vector<64x256xf32>,
    return
  }
  func.func @transform_0(%arg0: i32, %arg1: i32) -> (i32, i32) {
    %c0_i32 = arith.constant 0 : i32
    %c0_i32_0 = arith.constant 0 : i32
    return %c0_i32, %arg1 : i32, i32
  }
  func.func @transform_1(%arg0: i32, %arg1: i32) -> (i32, i32) {
    %c0_i32 = arith.constant 0 : i32
    return %arg1, %arg0 : i32, i32
  }
  func.func @transform_2(%arg0: i32, %arg1: i32) -> (i32, i32) {
    %c0_i32 = arith.constant 0 : i32
    %c0_i32_0 = arith.constant 0 : i32
    return %c0_i32, %arg0 : i32, i32
  }
}

module attributes {stable_mosaic.version = 11 : i64} {
  func.func @kernel(%arg0: i32, %arg1: memref<1x64x128xf32, #tpu.memory_space<vmem>>, %arg2: memref<1x32x128xf32, #tpu.memory_space<vmem>>, %arg3: memref<64x1xf32, #tpu.memory_space<vmem>>, %arg4: memref<64x1xf32, #tpu.memory_space<vmem>>, %arg5: memref<32x64xbf16, #tpu.memory_space<vmem>>, %arg6: memref<32x32xbf16, #tpu.memory_space<vmem>>, %arg7: memref<32x1xf32, #tpu.memory_space<vmem>>, %arg8: memref<1x32x128xf32, #tpu.memory_space<vmem>>) attributes {dimension_semantics = [#tpu.dimension_semantics<parallel>], iteration_bounds = array<i64: 2>, scalar_prefetch = 0 : i64, scratch_operands = 0 : i64, tpu.core_type = #tpu.core_type<tc>, window_params = [{transform_indices = @transform_0, window_bounds = array<i64: 1, 64, 128>}, {transform_indices = @transform_1, window_bounds = array<i64: 1, 32, 128>}, {pipeline_mode = #tpu.pipeline_mode<synchronous>, transform_indices = @transform_2, window_bounds = array<i64: 64, 1>}, {pipeline_mode = #tpu.pipeline_mode<synchronous>, transform_indices = @transform_3, window_bounds = array<i64: 64, 1>}, {pipeline_mode = #tpu.pipeline_mode<synchronous>, transform_indices = @transform_4, window_bounds = array<i64: 32, 64>}, {pipeline_mode = #tpu.pipeline_mode<synchronous>, transform_indices = @transform_5, window_bounds = array<i64: 32, 32>}, {pipeline_mode = #tpu.pipeline_mode<synchronous>, transform_indices = @transform_6, window_bounds = array<i64: 32, 1>}, {transform_indices = @transform_7, window_bounds = array<i64: 1, 32, 128>}]} {
    %c0 = arith.constant 0 : index
    %c0_0 = arith.constant 0 : index
    %c0_1 = arith.constant 0 : index
    %0 = vector.load %arg1[%c0, %c0_0, %c0_1] : memref<1x64x128xf32, #tpu.memory_space<vmem>>, vector<1x64x128xf32>
    %1 = vector.shape_cast %0 : vector<1x64x128xf32> to vector<64x128xf32>
    %2 = tpu.iota {dimensions = array<i32: 1>} : vector<1x128xi32>
    %c34_i32 = arith.constant 34 : i32
    %3 = vector.broadcast %c34_i32 : i32 to vector<1x128xi32>
    %4 = arith.cmpi slt, %2, %3 : vector<1x128xi32>
    %5 = arith.extui %4 : vector<1x128xi1> to vector<1x128xi32>
    %6 = arith.sitofp %5 : vector<1x128xi32> to vector<1x128xf32>
    %7 = vector.broadcast %6 : vector<1x128xf32> to vector<64x128xf32>
    %8 = arith.mulf %1, %7 : vector<64x128xf32>
    %9 = vector.shape_cast %8 : vector<64x128xf32> to vector<1x64x128xf32>
    %cst = arith.constant dense<0.000000e+00> : vector<1xf32>
    %10 = vector.multi_reduction <add>, %9, %cst [1, 2] : vector<1x64x128xf32> to vector<1xf32>
    %11 = vector.shape_cast %10 : vector<1xf32> to vector<1x1x1xf32>
    %12 = vector.extract %11[0, 0, 0] : f32 from vector<1x1x1xf32>
    %cst_2 = arith.constant 2.176000e+03 : f32
    %13 = arith.divf %12, %cst_2 : f32
    %14 = arith.mulf %8, %1 : vector<64x128xf32>
    %15 = vector.shape_cast %14 : vector<64x128xf32> to vector<1x64x128xf32>
    %cst_3 = arith.constant dense<0.000000e+00> : vector<1xf32>
    %16 = vector.multi_reduction <add>, %15, %cst_3 [1, 2] : vector<1x64x128xf32> to vector<1xf32>
    %17 = vector.shape_cast %16 : vector<1xf32> to vector<1x1x1xf32>
    %18 = vector.extract %17[0, 0, 0] : f32 from vector<1x1x1xf32>
    %cst_4 = arith.constant 2.176000e+03 : f32
    %19 = arith.divf %18, %cst_4 : f32
    %20 = arith.mulf %13, %13 : f32
    %21 = arith.subf %19, %20 : f32
    %cst_5 = arith.constant 0.000000e+00 : f32
    %22 = arith.maximumf %21, %cst_5 : f32
    %23 = vector.broadcast %13 : f32 to vector<1x128xf32>
    %24 = arith.mulf %23, %6 : vector<1x128xf32>
    %25 = vector.broadcast %24 : vector<1x128xf32> to vector<64x128xf32>
    %26 = arith.subf %8, %25 : vector<64x128xf32>
    %cst_6 = arith.constant 9.99999993E-9 : f32
    %27 = arith.addf %22, %cst_6 : f32
    %28 = math.rsqrt %27 : f32
    %c0_7 = arith.constant 0 : index
    %c0_8 = arith.constant 0 : index
    %29 = vector.load %arg3[%c0_7, %c0_8] : memref<64x1xf32, #tpu.memory_space<vmem>>, vector<64x1xf32>
    %30 = vector.broadcast %28 : f32 to vector<64x1xf32>
    %31 = arith.mulf %30, %29 : vector<64x1xf32>
    %32 = vector.broadcast %31 : vector<64x1xf32> to vector<64x128xf32>
    %33 = arith.mulf %26, %32 : vector<64x128xf32>
    %c0_9 = arith.constant 0 : index
    %c0_10 = arith.constant 0 : index
    %34 = vector.load %arg4[%c0_9, %c0_10] : memref<64x1xf32, #tpu.memory_space<vmem>>, vector<64x1xf32>
    %35 = vector.broadcast %34 : vector<64x1xf32> to vector<64x128xf32>
    %36 = vector.broadcast %6 : vector<1x128xf32> to vector<64x128xf32>
    %37 = arith.mulf %35, %36 : vector<64x128xf32>
    %38 = arith.addf %33, %37 : vector<64x128xf32>
    %c0_11 = arith.constant 0 : index
    %c0_12 = arith.constant 0 : index
    %39 = vector.load %arg5[%c0_11, %c0_12] : memref<32x64xbf16, #tpu.memory_space<vmem>>, vector<32x64xbf16>
    %40 = arith.truncf %38 : vector<64x128xf32> to vector<64x128xbf16>
    %cst_13 = arith.constant dense<0.000000e+00> : vector<32x128xf32>
    %41 = tpu.matmul %39, %40, %cst_13 {dimension_numbers = #tpu.dot_dimension_numbers<[1], [0], [0], [1], [0, 0, 1, 1], [], []>} : vector<32x64xbf16>, vector<64x128xbf16>, vector<32x128xf32> -> vector<32x128xf32>
    %c0_14 = arith.constant 0 : index
    %c0_15 = arith.constant 0 : index
    %42 = vector.load %arg6[%c0_14, %c0_15] : memref<32x32xbf16, #tpu.memory_space<vmem>>, vector<32x32xbf16>
    %c0_16 = arith.constant 0 : index
    %c0_17 = arith.constant 0 : index
    %c0_18 = arith.constant 0 : index
    %43 = vector.load %arg2[%c0_16, %c0_17, %c0_18] : memref<1x32x128xf32, #tpu.memory_space<vmem>>, vector<1x32x128xf32>
    %44 = vector.shape_cast %43 : vector<1x32x128xf32> to vector<32x128xf32>
    %45 = arith.truncf %44 : vector<32x128xf32> to vector<32x128xbf16>
    %cst_19 = arith.constant dense<0.000000e+00> : vector<32x128xf32>
    %46 = tpu.matmul %42, %45, %cst_19 {dimension_numbers = #tpu.dot_dimension_numbers<[1], [0], [0], [1], [0, 0, 1, 1], [], []>} : vector<32x32xbf16>, vector<32x128xbf16>, vector<32x128xf32> -> vector<32x128xf32>
    %47 = arith.addf %41, %46 : vector<32x128xf32>
    %c0_20 = arith.constant 0 : index
    %c0_21 = arith.constant 0 : index
    %48 = vector.load %arg7[%c0_20, %c0_21] : memref<32x1xf32, #tpu.memory_space<vmem>>, vector<32x1xf32>
    %49 = vector.broadcast %48 : vector<32x1xf32> to vector<32x128xf32>
    %50 = arith.addf %47, %49 : vector<32x128xf32>
    %51 = vector.broadcast %6 : vector<1x128xf32> to vector<32x128xf32>
    %52 = arith.mulf %50, %51 : vector<32x128xf32>
    %c0_22 = arith.constant 0 : index
    %c0_23 = arith.constant 0 : index
    %c0_24 = arith.constant 0 : index
    %53 = vector.load %arg8[%c0_22, %c0_23, %c0_24] : memref<1x32x128xf32, #tpu.memory_space<vmem>>, vector<1x32x128xf32>
    %54 = vector.shape_cast %53 : vector<1x32x128xf32> to vector<32x128xf32>
    %55 = vector.shape_cast %52 : vector<32x128xf32> to vector<1x32x128xf32>
    tpu.vector_store %arg8[%c0_22, %c0_23, %c0_24], %55 {strides = array<i32>} : memref<1x32x128xf32, #tpu.memory_space<vmem>>, vector<1x32x128xf32>,
    return
  }
  func.func @transform_0(%arg0: i32) -> (i32, i32, i32) {
    %c0_i32 = arith.constant 0 : i32
    %c0_i32_0 = arith.constant 0 : i32
    %c0_i32_1 = arith.constant 0 : i32
    return %arg0, %c0_i32, %c0_i32_0 : i32, i32, i32
  }
  func.func @transform_1(%arg0: i32) -> (i32, i32, i32) {
    %c0_i32 = arith.constant 0 : i32
    %c0_i32_0 = arith.constant 0 : i32
    %c0_i32_1 = arith.constant 0 : i32
    return %arg0, %c0_i32, %c0_i32_0 : i32, i32, i32
  }
  func.func @transform_2(%arg0: i32) -> (i32, i32) {
    %c0_i32 = arith.constant 0 : i32
    %c0_i32_0 = arith.constant 0 : i32
    %c0_i32_1 = arith.constant 0 : i32
    return %c0_i32, %c0_i32_0 : i32, i32
  }
  func.func @transform_3(%arg0: i32) -> (i32, i32) {
    %c0_i32 = arith.constant 0 : i32
    %c0_i32_0 = arith.constant 0 : i32
    %c0_i32_1 = arith.constant 0 : i32
    return %c0_i32, %c0_i32_0 : i32, i32
  }
  func.func @transform_4(%arg0: i32) -> (i32, i32) {
    %c0_i32 = arith.constant 0 : i32
    %c0_i32_0 = arith.constant 0 : i32
    %c0_i32_1 = arith.constant 0 : i32
    return %c0_i32, %c0_i32_0 : i32, i32
  }
  func.func @transform_5(%arg0: i32) -> (i32, i32) {
    %c0_i32 = arith.constant 0 : i32
    %c0_i32_0 = arith.constant 0 : i32
    %c0_i32_1 = arith.constant 0 : i32
    return %c0_i32, %c0_i32_0 : i32, i32
  }
  func.func @transform_6(%arg0: i32) -> (i32, i32) {
    %c0_i32 = arith.constant 0 : i32
    %c0_i32_0 = arith.constant 0 : i32
    %c0_i32_1 = arith.constant 0 : i32
    return %c0_i32, %c0_i32_0 : i32, i32
  }
  func.func @transform_7(%arg0: i32) -> (i32, i32, i32) {
    %c0_i32 = arith.constant 0 : i32
    %c0_i32_0 = arith.constant 0 : i32
    %c0_i32_1 = arith.constant 0 : i32
    return %arg0, %c0_i32, %c0_i32_0 : i32, i32, i32
  }
}

module attributes {stable_mosaic.version = 11 : i64} {
  func.func @kernel(%arg0: i32, %arg1: i32, %arg2: memref<1x32x128xf32, #tpu.memory_space<vmem>>, %arg3: memref<8xf32, #tpu.memory_space<smem>>, %arg4: memref<8xf32, #tpu.memory_space<smem>>, %arg5: memref<8x128x32xbf16, #tpu.memory_space<vmem>>, %arg6: memref<8x128x1xf32, #tpu.memory_space<vmem>>, %arg7: memref<8x128x1xf32, #tpu.memory_space<vmem>>, %arg8: memref<8x128x1xf32, #tpu.memory_space<vmem>>, %arg9: memref<8x128x3xf32, #tpu.memory_space<vmem>>, %arg10: memref<8x128x1xf32, #tpu.memory_space<vmem>>, %arg11: memref<8x128x1xf32, #tpu.memory_space<vmem>>, %arg12: memref<8x128x1xf32, #tpu.memory_space<vmem>>, %arg13: memref<8x64x128xbf16, #tpu.memory_space<vmem>>, %arg14: memref<8x64x1xf32, #tpu.memory_space<vmem>>, %arg15: memref<1x32x128xf32, #tpu.memory_space<vmem>>, %arg16: memref<1x32x128xf32, #tpu.memory_space<vmem>>) attributes {dimension_semantics = [#tpu.dimension_semantics<parallel>, #tpu.dimension_semantics<arbitrary>], iteration_bounds = array<i64: 2, 8>, scalar_prefetch = 0 : i64, scratch_operands = 0 : i64, tpu.core_type = #tpu.core_type<tc>, window_params = [{transform_indices = @transform_0, window_bounds = array<i64: 1, 32, 128>}, {transform_indices = @transform_1, window_bounds = array<i64: 8>}, {transform_indices = @transform_2, window_bounds = array<i64: 8>}, {pipeline_mode = #tpu.pipeline_mode<synchronous>, transform_indices = @transform_3, window_bounds = array<i64: 8, 128, 32>}, {pipeline_mode = #tpu.pipeline_mode<synchronous>, transform_indices = @transform_4, window_bounds = array<i64: 8, 128, 1>}, {pipeline_mode = #tpu.pipeline_mode<synchronous>, transform_indices = @transform_5, window_bounds = array<i64: 8, 128, 1>}, {pipeline_mode = #tpu.pipeline_mode<synchronous>, transform_indices = @transform_6, window_bounds = array<i64: 8, 128, 1>}, {pipeline_mode = #tpu.pipeline_mode<synchronous>, transform_indices = @transform_7, window_bounds = array<i64: 8, 128, 3>}, {pipeline_mode = #tpu.pipeline_mode<synchronous>, transform_indices = @transform_8, window_bounds = array<i64: 8, 128, 1>}, {pipeline_mode = #tpu.pipeline_mode<synchronous>, transform_indices = @transform_9, window_bounds = array<i64: 8, 128, 1>}, {pipeline_mode = #tpu.pipeline_mode<synchronous>, transform_indices = @transform_10, window_bounds = array<i64: 8, 128, 1>}, {pipeline_mode = #tpu.pipeline_mode<synchronous>, transform_indices = @transform_11, window_bounds = array<i64: 8, 64, 128>}, {pipeline_mode = #tpu.pipeline_mode<synchronous>, transform_indices = @transform_12, window_bounds = array<i64: 8, 64, 1>}, {transform_indices = @transform_13, window_bounds = array<i64: 1, 32, 128>}, {transform_indices = @transform_14, window_bounds = array<i64: 1, 32, 128>}]} {
    %c4_i32 = arith.constant 4 : i32
    %c0_i32 = arith.constant 0 : i32
    %0 = arith.cmpi eq, %c4_i32, %c0_i32 : i32
    %c1_i32 = arith.constant 1 : i32
    %1 = arith.select %0, %c1_i32, %c4_i32 : i32
    %2 = arith.remsi %arg1, %1 : i32
    %c0_i32_0 = arith.constant 0 : i32
    %3 = arith.cmpi ne, %2, %c0_i32_0 : i32
    %c0_i32_1 = arith.constant 0 : i32
    %4 = arith.cmpi slt, %2, %c0_i32_1 : i32
    %c0_i32_2 = arith.constant 0 : i32
    %5 = arith.cmpi slt, %1, %c0_i32_2 : i32
    %6 = arith.xori %4, %5 : i1
    %7 = arith.andi %6, %3 : i1
    %8 = arith.addi %2, %1 : i32
    %9 = arith.select %7, %8, %2 : i32
    %c0_i32_3 = arith.constant 0 : i32
    %10 = arith.cmpi eq, %arg1, %c0_i32_3 : i32
    %11 = arith.extui %10 : i1 to i32
    %c0_i32_4 = arith.constant 0 : i32
    %12 = arith.cmpi ne, %11, %c0_i32_4 : i32
    scf.if %12 {
      %c0_52 = arith.constant 0 : index
      %c0_53 = arith.constant 0 : index
      %c0_54 = arith.constant 0 : index
      %154 = vector.load %arg2[%c0_52, %c0_53, %c0_54] : memref<1x32x128xf32, #tpu.memory_space<vmem>>, vector<1x32x128xf32>
      %155 = vector.shape_cast %154 : vector<1x32x128xf32> to vector<32x128xf32>
      %c0_55 = arith.constant 0 : index
      %c0_56 = arith.constant 0 : index
      %c0_57 = arith.constant 0 : index
      %156 = vector.load %arg15[%c0_55, %c0_56, %c0_57] : memref<1x32x128xf32, #tpu.memory_space<vmem>>, vector<1x32x128xf32>
      %157 = vector.shape_cast %156 : vector<1x32x128xf32> to vector<32x128xf32>
      %158 = vector.shape_cast %155 : vector<32x128xf32> to vector<1x32x128xf32>
      tpu.vector_store %arg15[%c0_55, %c0_56, %c0_57], %158 {strides = array<i32>} : memref<1x32x128xf32, #tpu.memory_space<vmem>>, vector<1x32x128xf32>,
      %cst_58 = arith.constant 0.000000e+00 : f32
      %159 = vector.broadcast %cst_58 : f32 to vector<32x128xf32>
      %c0_59 = arith.constant 0 : index
      %c0_60 = arith.constant 0 : index
      %c0_61 = arith.constant 0 : index
      %160 = vector.load %arg16[%c0_59, %c0_60, %c0_61] : memref<1x32x128xf32, #tpu.memory_space<vmem>>, vector<1x32x128xf32>
      %161 = vector.shape_cast %160 : vector<1x32x128xf32> to vector<32x128xf32>
      %162 = vector.shape_cast %159 : vector<32x128xf32> to vector<1x32x128xf32>
      tpu.vector_store %arg16[%c0_59, %c0_60, %c0_61], %162 {strides = array<i32>} : memref<1x32x128xf32, #tpu.memory_space<vmem>>, vector<1x32x128xf32>,
    } else {
    }
    %13 = tpu.iota {dimensions = array<i32: 1>} : vector<1x128xi32>
    %c34_i32 = arith.constant 34 : i32
    %14 = vector.broadcast %c34_i32 : i32 to vector<1x128xi32>
    %15 = arith.cmpi slt, %13, %14 : vector<1x128xi32>
    %16 = arith.extui %15 : vector<1x128xi1> to vector<1x128xi32>
    %17 = arith.sitofp %16 : vector<1x128xi32> to vector<1x128xf32>
    %c0 = arith.constant 0 : index
    %c0_5 = arith.constant 0 : index
    %c0_6 = arith.constant 0 : index
    %18 = vector.load %arg15[%c0, %c0_5, %c0_6] : memref<1x32x128xf32, #tpu.memory_space<vmem>>, vector<1x32x128xf32>
    %19 = vector.shape_cast %18 : vector<1x32x128xf32> to vector<32x128xf32>
    %20 = arith.index_cast %arg1 : i32 to index
    %c0_7 = arith.constant 0 : index
    %c0_8 = arith.constant 0 : index
    %21 = vector.load %arg5[%20, %c0_7, %c0_8] : memref<8x128x32xbf16, #tpu.memory_space<vmem>>, vector<1x128x32xbf16>
    %22 = vector.shape_cast %21 : vector<1x128x32xbf16> to vector<128x32xbf16>
    %23 = arith.truncf %19 : vector<32x128xf32> to vector<32x128xbf16>
    %cst = arith.constant dense<0.000000e+00> : vector<128x128xf32>
    %24 = tpu.matmul %22, %23, %cst {dimension_numbers = #tpu.dot_dimension_numbers<[1], [0], [0], [1], [0, 0, 1, 1], [], []>} : vector<128x32xbf16>, vector<32x128xbf16>, vector<128x128xf32> -> vector<128x128xf32>
    %25 = arith.index_cast %arg1 : i32 to index
    %c0_9 = arith.constant 0 : index
    %c0_10 = arith.constant 0 : index
    %26 = vector.load %arg6[%25, %c0_9, %c0_10] : memref<8x128x1xf32, #tpu.memory_space<vmem>>, vector<1x128x1xf32>
    %27 = vector.shape_cast %26 : vector<1x128x1xf32> to vector<128x1xf32>
    %28 = vector.broadcast %27 : vector<128x1xf32> to vector<128x128xf32>
    %29 = arith.addf %24, %28 : vector<128x128xf32>
    %cst_11 = arith.constant 0.000000e+00 : f32
    %30 = vector.broadcast %cst_11 : f32 to vector<128x128xf32>
    %31 = arith.cmpf oge, %29, %30 : vector<128x128xf32>
    %32 = arith.index_cast %arg1 : i32 to index
    %33 = memref.load %arg3[%32] : memref<8xf32, #tpu.memory_space<smem>>
    %34 = vector.broadcast %33 : f32 to vector<128x128xf32>
    %35 = arith.mulf %34, %29 : vector<128x128xf32>
    %36 = arith.select %31, %29, %35 : vector<128x128xi1>, vector<128x128xf32>
    %37 = vector.broadcast %17 : vector<1x128xf32> to vector<128x128xf32>
    %38 = arith.mulf %36, %37 : vector<128x128xf32>
    %39 = vector.shape_cast %38 : vector<128x128xf32> to vector<1x128x128xf32>
    %cst_12 = arith.constant dense<0.000000e+00> : vector<1xf32>
    %40 = vector.multi_reduction <add>, %39, %cst_12 [1, 2] : vector<1x128x128xf32> to vector<1xf32>
    %41 = vector.shape_cast %40 : vector<1xf32> to vector<1x1x1xf32>
    %42 = vector.extract %41[0, 0, 0] : f32 from vector<1x1x1xf32>
    %cst_13 = arith.constant 4.352000e+03 : f32
    %43 = arith.divf %42, %cst_13 : f32
    %44 = arith.mulf %38, %36 : vector<128x128xf32>
    %45 = vector.shape_cast %44 : vector<128x128xf32> to vector<1x128x128xf32>
    %cst_14 = arith.constant dense<0.000000e+00> : vector<1xf32>
    %46 = vector.multi_reduction <add>, %45, %cst_14 [1, 2] : vector<1x128x128xf32> to vector<1xf32>
    %47 = vector.shape_cast %46 : vector<1xf32> to vector<1x1x1xf32>
    %48 = vector.extract %47[0, 0, 0] : f32 from vector<1x1x1xf32>
    %cst_15 = arith.constant 4.352000e+03 : f32
    %49 = arith.divf %48, %cst_15 : f32
    %50 = arith.mulf %43, %43 : f32
    %51 = arith.subf %49, %50 : f32
    %cst_16 = arith.constant 0.000000e+00 : f32
    %52 = arith.maximumf %51, %cst_16 : f32
    %53 = vector.broadcast %43 : f32 to vector<1x128xf32>
    %54 = arith.mulf %53, %17 : vector<1x128xf32>
    %55 = vector.broadcast %54 : vector<1x128xf32> to vector<128x128xf32>
    %56 = arith.subf %38, %55 : vector<128x128xf32>
    %cst_17 = arith.constant 9.99999993E-9 : f32
    %57 = arith.addf %52, %cst_17 : f32
    %58 = math.rsqrt %57 : f32
    %59 = arith.index_cast %arg1 : i32 to index
    %c0_18 = arith.constant 0 : index
    %c0_19 = arith.constant 0 : index
    %60 = vector.load %arg7[%59, %c0_18, %c0_19] : memref<8x128x1xf32, #tpu.memory_space<vmem>>, vector<1x128x1xf32>
    %61 = vector.shape_cast %60 : vector<1x128x1xf32> to vector<128x1xf32>
    %62 = vector.broadcast %58 : f32 to vector<128x1xf32>
    %63 = arith.mulf %62, %61 : vector<128x1xf32>
    %64 = vector.broadcast %63 : vector<128x1xf32> to vector<128x128xf32>
    %65 = arith.mulf %56, %64 : vector<128x128xf32>
    %66 = arith.index_cast %arg1 : i32 to index
    %c0_20 = arith.constant 0 : index
    %c0_21 = arith.constant 0 : index
    %67 = vector.load %arg8[%66, %c0_20, %c0_21] : memref<8x128x1xf32, #tpu.memory_space<vmem>>, vector<1x128x1xf32>
    %68 = vector.shape_cast %67 : vector<1x128x1xf32> to vector<128x1xf32>
    %69 = vector.broadcast %68 : vector<128x1xf32> to vector<128x128xf32>
    %70 = vector.broadcast %17 : vector<1x128xf32> to vector<128x128xf32>
    %71 = arith.mulf %69, %70 : vector<128x128xf32>
    %72 = arith.addf %65, %71 : vector<128x128xf32>
    %73 = arith.index_cast %arg1 : i32 to index
    %c0_22 = arith.constant 0 : index
    %c0_23 = arith.constant 0 : index
    %74 = vector.load %arg9[%73, %c0_22, %c0_23] : memref<8x128x3xf32, #tpu.memory_space<vmem>>, vector<1x128x3xf32>
    %75 = vector.shape_cast %74 : vector<1x128x3xf32> to vector<128x3xf32>
    %c2_i32 = arith.constant 2 : i32
    %76 = arith.cmpi slt, %9, %c2_i32 : i32
    %77 = arith.extui %76 : i1 to i32
    %c0_i32_24 = arith.constant 0 : i32
    %78 = arith.cmpi ne, %77, %c0_i32_24 : i32
    %79 = scf.if %78 -> (vector<128x128xf32>) {
      %c1_i32_52 = arith.constant 1 : i32
      %154 = arith.cmpi slt, %9, %c1_i32_52 : i32
      %155 = arith.extui %154 : i1 to i32
      %c0_i32_53 = arith.constant 0 : i32
      %156 = arith.cmpi ne, %155, %c0_i32_53 : i32
      %157 = scf.if %156 -> (vector<128x128xf32>) {
        %c1_i32_54 = arith.constant 1 : i32
        %158 = tpu.dynamic_rotate %72 by %c1_i32_54 dim 1 : vector<128x128xf32>, i32 -> vector<128x128xf32>
        %c1_i32_55 = arith.constant 1 : i32
        %159 = vector.broadcast %c1_i32_55 : i32 to vector<1x128xi32>
        %160 = arith.cmpi sge, %13, %159 : vector<1x128xi32>
        %cst_56 = arith.constant 0.000000e+00 : f32
        %161 = vector.shape_cast %160 : vector<1x128xi1> to vector<1x128xi1>
        %162 = vector.broadcast %161 : vector<1x128xi1> to vector<128x128xi1>
        %163 = vector.broadcast %cst_56 : f32 to vector<128x128xf32>
        %164 = arith.select %162, %158, %163 : vector<128x128xi1>, vector<128x128xf32>
        %c127_i32 = arith.constant 127 : i32
        %165 = tpu.dynamic_rotate %72 by %c127_i32 dim 1 : vector<128x128xf32>, i32 -> vector<128x128xf32>
        %c33_i32 = arith.constant 33 : i32
        %166 = vector.broadcast %c33_i32 : i32 to vector<1x128xi32>
        %167 = arith.cmpi slt, %13, %166 : vector<1x128xi32>
        %cst_57 = arith.constant 0.000000e+00 : f32
        %168 = vector.shape_cast %167 : vector<1x128xi1> to vector<1x128xi1>
        %169 = vector.broadcast %168 : vector<1x128xi1> to vector<128x128xi1>
        %170 = vector.broadcast %cst_57 : f32 to vector<128x128xf32>
        %171 = arith.select %169, %165, %170 : vector<128x128xi1>, vector<128x128xf32>
        %172 = vector.extract_strided_slice %75 {offsets = [0, 0], sizes = [128, 1], strides = [1, 1]} : vector<128x3xf32> to vector<128x1xf32>
        %173 = vector.broadcast %172 : vector<128x1xf32> to vector<128x128xf32>
        %174 = arith.mulf %173, %164 : vector<128x128xf32>
        %175 = vector.extract_strided_slice %75 {offsets = [0, 1], sizes = [128, 1], strides = [1, 1]} : vector<128x3xf32> to vector<128x1xf32>
        %176 = vector.broadcast %175 : vector<128x1xf32> to vector<128x128xf32>
        %177 = arith.mulf %176, %72 : vector<128x128xf32>
        %178 = arith.addf %174, %177 : vector<128x128xf32>
        %179 = vector.extract_strided_slice %75 {offsets = [0, 2], sizes = [128, 1], strides = [1, 1]} : vector<128x3xf32> to vector<128x1xf32>
        %180 = vector.broadcast %179 : vector<128x1xf32> to vector<128x128xf32>
        %181 = arith.mulf %180, %171 : vector<128x128xf32>
        %182 = arith.addf %178, %181 : vector<128x128xf32>
        scf.yield %182 : vector<128x128xf32>
      } else {
        %c2_i32_54 = arith.constant 2 : i32
        %158 = tpu.dynamic_rotate %72 by %c2_i32_54 dim 1 : vector<128x128xf32>, i32 -> vector<128x128xf32>
        %c2_i32_55 = arith.constant 2 : i32
        %159 = vector.broadcast %c2_i32_55 : i32 to vector<1x128xi32>
        %160 = arith.cmpi sge, %13, %159 : vector<1x128xi32>
        %cst_56 = arith.constant 0.000000e+00 : f32
        %161 = vector.shape_cast %160 : vector<1x128xi1> to vector<1x128xi1>
        %162 = vector.broadcast %161 : vector<1x128xi1> to vector<128x128xi1>
        %163 = vector.broadcast %cst_56 : f32 to vector<128x128xf32>
        %164 = arith.select %162, %158, %163 : vector<128x128xi1>, vector<128x128xf32>
        %c126_i32 = arith.constant 126 : i32
        %165 = tpu.dynamic_rotate %72 by %c126_i32 dim 1 : vector<128x128xf32>, i32 -> vector<128x128xf32>
        %c32_i32 = arith.constant 32 : i32
        %166 = vector.broadcast %c32_i32 : i32 to vector<1x128xi32>
        %167 = arith.cmpi slt, %13, %166 : vector<1x128xi32>
        %cst_57 = arith.constant 0.000000e+00 : f32
        %168 = vector.shape_cast %167 : vector<1x128xi1> to vector<1x128xi1>
        %169 = vector.broadcast %168 : vector<1x128xi1> to vector<128x128xi1>
        %170 = vector.broadcast %cst_57 : f32 to vector<128x128xf32>
        %171 = arith.select %169, %165, %170 : vector<128x128xi1>, vector<128x128xf32>
        %172 = vector.extract_strided_slice %75 {offsets = [0, 0], sizes = [128, 1], strides = [1, 1]} : vector<128x3xf32> to vector<128x1xf32>
        %173 = vector.broadcast %172 : vector<128x1xf32> to vector<128x128xf32>
        %174 = arith.mulf %173, %164 : vector<128x128xf32>
        %175 = vector.extract_strided_slice %75 {offsets = [0, 1], sizes = [128, 1], strides = [1, 1]} : vector<128x3xf32> to vector<128x1xf32>
        %176 = vector.broadcast %175 : vector<128x1xf32> to vector<128x128xf32>
        %177 = arith.mulf %176, %72 : vector<128x128xf32>
        %178 = arith.addf %174, %177 : vector<128x128xf32>
        %179 = vector.extract_strided_slice %75 {offsets = [0, 2], sizes = [128, 1], strides = [1, 1]} : vector<128x3xf32> to vector<128x1xf32>
        %180 = vector.broadcast %179 : vector<128x1xf32> to vector<128x128xf32>
        %181 = arith.mulf %180, %171 : vector<128x128xf32>
        %182 = arith.addf %178, %181 : vector<128x128xf32>
        scf.yield %182 : vector<128x128xf32>
      }
      scf.yield %157 : vector<128x128xf32>
    } else {
      %c2_i32_52 = arith.constant 2 : i32
      %154 = arith.subi %9, %c2_i32_52 : i32
      %c1_i32_53 = arith.constant 1 : i32
      %155 = arith.cmpi slt, %154, %c1_i32_53 : i32
      %156 = arith.extui %155 : i1 to i32
      %c0_i32_54 = arith.constant 0 : i32
      %157 = arith.cmpi ne, %156, %c0_i32_54 : i32
      %158 = scf.if %157 -> (vector<128x128xf32>) {
        %c4_i32_55 = arith.constant 4 : i32
        %159 = tpu.dynamic_rotate %72 by %c4_i32_55 dim 1 : vector<128x128xf32>, i32 -> vector<128x128xf32>
        %c4_i32_56 = arith.constant 4 : i32
        %160 = vector.broadcast %c4_i32_56 : i32 to vector<1x128xi32>
        %161 = arith.cmpi sge, %13, %160 : vector<1x128xi32>
        %cst_57 = arith.constant 0.000000e+00 : f32
        %162 = vector.shape_cast %161 : vector<1x128xi1> to vector<1x128xi1>
        %163 = vector.broadcast %162 : vector<1x128xi1> to vector<128x128xi1>
        %164 = vector.broadcast %cst_57 : f32 to vector<128x128xf32>
        %165 = arith.select %163, %159, %164 : vector<128x128xi1>, vector<128x128xf32>
        %c124_i32 = arith.constant 124 : i32
        %166 = tpu.dynamic_rotate %72 by %c124_i32 dim 1 : vector<128x128xf32>, i32 -> vector<128x128xf32>
        %c30_i32 = arith.constant 30 : i32
        %167 = vector.broadcast %c30_i32 : i32 to vector<1x128xi32>
        %168 = arith.cmpi slt, %13, %167 : vector<1x128xi32>
        %cst_58 = arith.constant 0.000000e+00 : f32
        %169 = vector.shape_cast %168 : vector<1x128xi1> to vector<1x128xi1>
        %170 = vector.broadcast %169 : vector<1x128xi1> to vector<128x128xi1>
        %171 = vector.broadcast %cst_58 : f32 to vector<128x128xf32>
        %172 = arith.select %170, %166, %171 : vector<128x128xi1>, vector<128x128xf32>
        %173 = vector.extract_strided_slice %75 {offsets = [0, 0], sizes = [128, 1], strides = [1, 1]} : vector<128x3xf32> to vector<128x1xf32>
        %174 = vector.broadcast %173 : vector<128x1xf32> to vector<128x128xf32>
        %175 = arith.mulf %174, %165 : vector<128x128xf32>
        %176 = vector.extract_strided_slice %75 {offsets = [0, 1], sizes = [128, 1], strides = [1, 1]} : vector<128x3xf32> to vector<128x1xf32>
        %177 = vector.broadcast %176 : vector<128x1xf32> to vector<128x128xf32>
        %178 = arith.mulf %177, %72 : vector<128x128xf32>
        %179 = arith.addf %175, %178 : vector<128x128xf32>
        %180 = vector.extract_strided_slice %75 {offsets = [0, 2], sizes = [128, 1], strides = [1, 1]} : vector<128x3xf32> to vector<128x1xf32>
        %181 = vector.broadcast %180 : vector<128x1xf32> to vector<128x128xf32>
        %182 = arith.mulf %181, %172 : vector<128x128xf32>
        %183 = arith.addf %179, %182 : vector<128x128xf32>
        scf.yield %183 : vector<128x128xf32>
      } else {
        %c8_i32 = arith.constant 8 : i32
        %159 = tpu.dynamic_rotate %72 by %c8_i32 dim 1 : vector<128x128xf32>, i32 -> vector<128x128xf32>
        %c8_i32_55 = arith.constant 8 : i32
        %160 = vector.broadcast %c8_i32_55 : i32 to vector<1x128xi32>
        %161 = arith.cmpi sge, %13, %160 : vector<1x128xi32>
        %cst_56 = arith.constant 0.000000e+00 : f32
        %162 = vector.shape_cast %161 : vector<1x128xi1> to vector<1x128xi1>
        %163 = vector.broadcast %162 : vector<1x128xi1> to vector<128x128xi1>
        %164 = vector.broadcast %cst_56 : f32 to vector<128x128xf32>
        %165 = arith.select %163, %159, %164 : vector<128x128xi1>, vector<128x128xf32>
        %c120_i32 = arith.constant 120 : i32
        %166 = tpu.dynamic_rotate %72 by %c120_i32 dim 1 : vector<128x128xf32>, i32 -> vector<128x128xf32>
        %c26_i32 = arith.constant 26 : i32
        %167 = vector.broadcast %c26_i32 : i32 to vector<1x128xi32>
        %168 = arith.cmpi slt, %13, %167 : vector<1x128xi32>
        %cst_57 = arith.constant 0.000000e+00 : f32
        %169 = vector.shape_cast %168 : vector<1x128xi1> to vector<1x128xi1>
        %170 = vector.broadcast %169 : vector<1x128xi1> to vector<128x128xi1>
        %171 = vector.broadcast %cst_57 : f32 to vector<128x128xf32>
        %172 = arith.select %170, %166, %171 : vector<128x128xi1>, vector<128x128xf32>
        %173 = vector.extract_strided_slice %75 {offsets = [0, 0], sizes = [128, 1], strides = [1, 1]} : vector<128x3xf32> to vector<128x1xf32>
        %174 = vector.broadcast %173 : vector<128x1xf32> to vector<128x128xf32>
        %175 = arith.mulf %174, %165 : vector<128x128xf32>
        %176 = vector.extract_strided_slice %75 {offsets = [0, 1], sizes = [128, 1], strides = [1, 1]} : vector<128x3xf32> to vector<128x1xf32>
        %177 = vector.broadcast %176 : vector<128x1xf32> to vector<128x128xf32>
        %178 = arith.mulf %177, %72 : vector<128x128xf32>
        %179 = arith.addf %175, %178 : vector<128x128xf32>
        %180 = vector.extract_strided_slice %75 {offsets = [0, 2], sizes = [128, 1], strides = [1, 1]} : vector<128x3xf32> to vector<128x1xf32>
        %181 = vector.broadcast %180 : vector<128x1xf32> to vector<128x128xf32>
        %182 = arith.mulf %181, %172 : vector<128x128xf32>
        %183 = arith.addf %179, %182 : vector<128x128xf32>
        scf.yield %183 : vector<128x128xf32>
      }
      scf.yield %158 : vector<128x128xf32>
    }
    %80 = arith.index_cast %arg1 : i32 to index
    %c0_25 = arith.constant 0 : index
    %c0_26 = arith.constant 0 : index
    %81 = vector.load %arg10[%80, %c0_25, %c0_26] : memref<8x128x1xf32, #tpu.memory_space<vmem>>, vector<1x128x1xf32>
    %82 = vector.shape_cast %81 : vector<1x128x1xf32> to vector<128x1xf32>
    %83 = vector.broadcast %82 : vector<128x1xf32> to vector<128x128xf32>
    %84 = arith.addf %79, %83 : vector<128x128xf32>
    %cst_27 = arith.constant 0.000000e+00 : f32
    %85 = vector.broadcast %cst_27 : f32 to vector<128x128xf32>
    %86 = arith.cmpf oge, %84, %85 : vector<128x128xf32>
    %87 = arith.index_cast %arg1 : i32 to index
    %88 = memref.load %arg4[%87] : memref<8xf32, #tpu.memory_space<smem>>
    %89 = vector.broadcast %88 : f32 to vector<128x128xf32>
    %90 = arith.mulf %89, %84 : vector<128x128xf32>
    %91 = arith.select %86, %84, %90 : vector<128x128xi1>, vector<128x128xf32>
    %92 = vector.broadcast %17 : vector<1x128xf32> to vector<128x128xf32>
    %93 = arith.mulf %91, %92 : vector<128x128xf32>
    %94 = vector.shape_cast %93 : vector<128x128xf32> to vector<1x128x128xf32>
    %cst_28 = arith.constant dense<0.000000e+00> : vector<1xf32>
    %95 = vector.multi_reduction <add>, %94, %cst_28 [1, 2] : vector<1x128x128xf32> to vector<1xf32>
    %96 = vector.shape_cast %95 : vector<1xf32> to vector<1x1x1xf32>
    %97 = vector.extract %96[0, 0, 0] : f32 from vector<1x1x1xf32>
    %cst_29 = arith.constant 4.352000e+03 : f32
    %98 = arith.divf %97, %cst_29 : f32
    %99 = arith.mulf %93, %91 : vector<128x128xf32>
    %100 = vector.shape_cast %99 : vector<128x128xf32> to vector<1x128x128xf32>
    %cst_30 = arith.constant dense<0.000000e+00> : vector<1xf32>
    %101 = vector.multi_reduction <add>, %100, %cst_30 [1, 2] : vector<1x128x128xf32> to vector<1xf32>
    %102 = vector.shape_cast %101 : vector<1xf32> to vector<1x1x1xf32>
    %103 = vector.extract %102[0, 0, 0] : f32 from vector<1x1x1xf32>
    %cst_31 = arith.constant 4.352000e+03 : f32
    %104 = arith.divf %103, %cst_31 : f32
    %105 = arith.mulf %98, %98 : f32
    %106 = arith.subf %104, %105 : f32
    %cst_32 = arith.constant 0.000000e+00 : f32
    %107 = arith.maximumf %106, %cst_32 : f32
    %108 = vector.broadcast %98 : f32 to vector<1x128xf32>
    %109 = arith.mulf %108, %17 : vector<1x128xf32>
    %110 = vector.broadcast %109 : vector<1x128xf32> to vector<128x128xf32>
    %111 = arith.subf %93, %110 : vector<128x128xf32>
    %cst_33 = arith.constant 9.99999993E-9 : f32
    %112 = arith.addf %107, %cst_33 : f32
    %113 = math.rsqrt %112 : f32
    %114 = arith.index_cast %arg1 : i32 to index
    %c0_34 = arith.constant 0 : index
    %c0_35 = arith.constant 0 : index
    %115 = vector.load %arg11[%114, %c0_34, %c0_35] : memref<8x128x1xf32, #tpu.memory_space<vmem>>, vector<1x128x1xf32>
    %116 = vector.shape_cast %115 : vector<1x128x1xf32> to vector<128x1xf32>
    %117 = vector.broadcast %113 : f32 to vector<128x1xf32>
    %118 = arith.mulf %117, %116 : vector<128x1xf32>
    %119 = vector.broadcast %118 : vector<128x1xf32> to vector<128x128xf32>
    %120 = arith.mulf %111, %119 : vector<128x128xf32>
    %121 = arith.index_cast %arg1 : i32 to index
    %c0_36 = arith.constant 0 : index
    %c0_37 = arith.constant 0 : index
    %122 = vector.load %arg12[%121, %c0_36, %c0_37] : memref<8x128x1xf32, #tpu.memory_space<vmem>>, vector<1x128x1xf32>
    %123 = vector.shape_cast %122 : vector<1x128x1xf32> to vector<128x1xf32>
    %124 = vector.broadcast %123 : vector<128x1xf32> to vector<128x128xf32>
    %125 = vector.broadcast %17 : vector<1x128xf32> to vector<128x128xf32>
    %126 = arith.mulf %124, %125 : vector<128x128xf32>
    %127 = arith.addf %120, %126 : vector<128x128xf32>
    %128 = arith.truncf %127 : vector<128x128xf32> to vector<128x128xbf16>
    %129 = arith.index_cast %arg1 : i32 to index
    %c0_38 = arith.constant 0 : index
    %c0_39 = arith.constant 0 : index
    %130 = vector.load %arg13[%129, %c0_38, %c0_39] : memref<8x64x128xbf16, #tpu.memory_space<vmem>>, vector<1x64x128xbf16>
    %131 = vector.shape_cast %130 : vector<1x64x128xbf16> to vector<64x128xbf16>
    %cst_40 = arith.constant dense<0.000000e+00> : vector<64x128xf32>
    %132 = tpu.matmul %131, %128, %cst_40 {dimension_numbers = #tpu.dot_dimension_numbers<[1], [0], [0], [1], [0, 0, 1, 1], [], []>} : vector<64x128xbf16>, vector<128x128xbf16>, vector<64x128xf32> -> vector<64x128xf32>
    %133 = arith.index_cast %arg1 : i32 to index
    %c0_41 = arith.constant 0 : index
    %c0_42 = arith.constant 0 : index
    %134 = vector.load %arg14[%133, %c0_41, %c0_42] : memref<8x64x1xf32, #tpu.memory_space<vmem>>, vector<1x64x1xf32>
    %135 = vector.shape_cast %134 : vector<1x64x1xf32> to vector<64x1xf32>
    %136 = vector.broadcast %135 : vector<64x1xf32> to vector<64x128xf32>
    %137 = arith.addf %132, %136 : vector<64x128xf32>
    %138 = vector.extract_strided_slice %137 {offsets = [0, 0], sizes = [32, 128], strides = [1, 1]} : vector<64x128xf32> to vector<32x128xf32>
    %139 = vector.broadcast %17 : vector<1x128xf32> to vector<32x128xf32>
    %140 = arith.mulf %138, %139 : vector<32x128xf32>
    %141 = arith.addf %19, %140 : vector<32x128xf32>
    %c0_43 = arith.constant 0 : index
    %c0_44 = arith.constant 0 : index
    %c0_45 = arith.constant 0 : index
    %142 = vector.load %arg15[%c0_43, %c0_44, %c0_45] : memref<1x32x128xf32, #tpu.memory_space<vmem>>, vector<1x32x128xf32>
    %143 = vector.shape_cast %142 : vector<1x32x128xf32> to vector<32x128xf32>
    %144 = vector.shape_cast %141 : vector<32x128xf32> to vector<1x32x128xf32>
    tpu.vector_store %arg15[%c0_43, %c0_44, %c0_45], %144 {strides = array<i32>} : memref<1x32x128xf32, #tpu.memory_space<vmem>>, vector<1x32x128xf32>,
    %c0_46 = arith.constant 0 : index
    %c0_47 = arith.constant 0 : index
    %c0_48 = arith.constant 0 : index
    %145 = vector.load %arg16[%c0_46, %c0_47, %c0_48] : memref<1x32x128xf32, #tpu.memory_space<vmem>>, vector<1x32x128xf32>
    %146 = vector.shape_cast %145 : vector<1x32x128xf32> to vector<32x128xf32>
    %147 = vector.extract_strided_slice %137 {offsets = [32, 0], sizes = [32, 128], strides = [1, 1]} : vector<64x128xf32> to vector<32x128xf32>
    %148 = vector.broadcast %17 : vector<1x128xf32> to vector<32x128xf32>
    %149 = arith.mulf %147, %148 : vector<32x128xf32>
    %150 = arith.addf %146, %149 : vector<32x128xf32>
    %c0_49 = arith.constant 0 : index
    %c0_50 = arith.constant 0 : index
    %c0_51 = arith.constant 0 : index
    %151 = vector.load %arg16[%c0_49, %c0_50, %c0_51] : memref<1x32x128xf32, #tpu.memory_space<vmem>>, vector<1x32x128xf32>
    %152 = vector.shape_cast %151 : vector<1x32x128xf32> to vector<32x128xf32>
    %153 = vector.shape_cast %150 : vector<32x128xf32> to vector<1x32x128xf32>
    tpu.vector_store %arg16[%c0_49, %c0_50, %c0_51], %153 {strides = array<i32>} : memref<1x32x128xf32, #tpu.memory_space<vmem>>, vector<1x32x128xf32>,
    return
  }
  func.func @transform_0(%arg0: i32, %arg1: i32) -> (i32, i32, i32) {
    %c0_i32 = arith.constant 0 : i32
    %c0_i32_0 = arith.constant 0 : i32
    %c0_i32_1 = arith.constant 0 : i32
    return %arg0, %c0_i32, %c0_i32_0 : i32, i32, i32
  }
  func.func @transform_1(%arg0: i32, %arg1: i32) -> i32 {
    %c0_i32 = arith.constant 0 : i32
    %c0_i32_0 = arith.constant 0 : i32
    return %c0_i32 : i32
  }
  func.func @transform_2(%arg0: i32, %arg1: i32) -> i32 {
    %c0_i32 = arith.constant 0 : i32
    %c0_i32_0 = arith.constant 0 : i32
    return %c0_i32 : i32
  }
  func.func @transform_3(%arg0: i32, %arg1: i32) -> (i32, i32, i32) {
    %c0_i32 = arith.constant 0 : i32
    %c0_i32_0 = arith.constant 0 : i32
    %c0_i32_1 = arith.constant 0 : i32
    %c0_i32_2 = arith.constant 0 : i32
    return %c0_i32, %c0_i32_0, %c0_i32_1 : i32, i32, i32
  }
  func.func @transform_4(%arg0: i32, %arg1: i32) -> (i32, i32, i32) {
    %c0_i32 = arith.constant 0 : i32
    %c0_i32_0 = arith.constant 0 : i32
    %c0_i32_1 = arith.constant 0 : i32
    %c0_i32_2 = arith.constant 0 : i32
    return %c0_i32, %c0_i32_0, %c0_i32_1 : i32, i32, i32
  }
  func.func @transform_5(%arg0: i32, %arg1: i32) -> (i32, i32, i32) {
    %c0_i32 = arith.constant 0 : i32
    %c0_i32_0 = arith.constant 0 : i32
    %c0_i32_1 = arith.constant 0 : i32
    %c0_i32_2 = arith.constant 0 : i32
    return %c0_i32, %c0_i32_0, %c0_i32_1 : i32, i32, i32
  }
  func.func @transform_6(%arg0: i32, %arg1: i32) -> (i32, i32, i32) {
    %c0_i32 = arith.constant 0 : i32
    %c0_i32_0 = arith.constant 0 : i32
    %c0_i32_1 = arith.constant 0 : i32
    %c0_i32_2 = arith.constant 0 : i32
    return %c0_i32, %c0_i32_0, %c0_i32_1 : i32, i32, i32
  }
  func.func @transform_7(%arg0: i32, %arg1: i32) -> (i32, i32, i32) {
    %c0_i32 = arith.constant 0 : i32
    %c0_i32_0 = arith.constant 0 : i32
    %c0_i32_1 = arith.constant 0 : i32
    %c0_i32_2 = arith.constant 0 : i32
    return %c0_i32, %c0_i32_0, %c0_i32_1 : i32, i32, i32
  }
  func.func @transform_8(%arg0: i32, %arg1: i32) -> (i32, i32, i32) {
    %c0_i32 = arith.constant 0 : i32
    %c0_i32_0 = arith.constant 0 : i32
    %c0_i32_1 = arith.constant 0 : i32
    %c0_i32_2 = arith.constant 0 : i32
    return %c0_i32, %c0_i32_0, %c0_i32_1 : i32, i32, i32
  }
  func.func @transform_9(%arg0: i32, %arg1: i32) -> (i32, i32, i32) {
    %c0_i32 = arith.constant 0 : i32
    %c0_i32_0 = arith.constant 0 : i32
    %c0_i32_1 = arith.constant 0 : i32
    %c0_i32_2 = arith.constant 0 : i32
    return %c0_i32, %c0_i32_0, %c0_i32_1 : i32, i32, i32
  }
  func.func @transform_10(%arg0: i32, %arg1: i32) -> (i32, i32, i32) {
    %c0_i32 = arith.constant 0 : i32
    %c0_i32_0 = arith.constant 0 : i32
    %c0_i32_1 = arith.constant 0 : i32
    %c0_i32_2 = arith.constant 0 : i32
    return %c0_i32, %c0_i32_0, %c0_i32_1 : i32, i32, i32
  }
  func.func @transform_11(%arg0: i32, %arg1: i32) -> (i32, i32, i32) {
    %c0_i32 = arith.constant 0 : i32
    %c0_i32_0 = arith.constant 0 : i32
    %c0_i32_1 = arith.constant 0 : i32
    %c0_i32_2 = arith.constant 0 : i32
    return %c0_i32, %c0_i32_0, %c0_i32_1 : i32, i32, i32
  }
  func.func @transform_12(%arg0: i32, %arg1: i32) -> (i32, i32, i32) {
    %c0_i32 = arith.constant 0 : i32
    %c0_i32_0 = arith.constant 0 : i32
    %c0_i32_1 = arith.constant 0 : i32
    %c0_i32_2 = arith.constant 0 : i32
    return %c0_i32, %c0_i32_0, %c0_i32_1 : i32, i32, i32
  }
  func.func @transform_13(%arg0: i32, %arg1: i32) -> (i32, i32, i32) {
    %c0_i32 = arith.constant 0 : i32
    %c0_i32_0 = arith.constant 0 : i32
    %c0_i32_1 = arith.constant 0 : i32
    return %arg0, %c0_i32, %c0_i32_0 : i32, i32, i32
  }
  func.func @transform_14(%arg0: i32, %arg1: i32) -> (i32, i32, i32) {
    %c0_i32 = arith.constant 0 : i32
    %c0_i32_0 = arith.constant 0 : i32
    %c0_i32_1 = arith.constant 0 : i32
    return %arg0, %c0_i32, %c0_i32_0 : i32, i32, i32
  }
}

module attributes {stable_mosaic.version = 11 : i64} {
  func.func @kernel(%arg0: i32, %arg1: memref<1x32x128xf32, #tpu.memory_space<vmem>>, %arg2: memref<1x64x128xf32, #tpu.memory_space<vmem>>, %arg3: memref<1xf32, #tpu.memory_space<smem>>, %arg4: memref<64x32xbf16, #tpu.memory_space<vmem>>, %arg5: memref<64x1xf32, #tpu.memory_space<vmem>>, %arg6: memref<32x64xbf16, #tpu.memory_space<vmem>>, %arg7: memref<1x32x128xf32, #tpu.memory_space<vmem>>) attributes {dimension_semantics = [#tpu.dimension_semantics<parallel>], iteration_bounds = array<i64: 2>, scalar_prefetch = 0 : i64, scratch_operands = 0 : i64, tpu.core_type = #tpu.core_type<tc>, window_params = [{transform_indices = @transform_0, window_bounds = array<i64: 1, 32, 128>}, {transform_indices = @transform_1, window_bounds = array<i64: 1, 64, 128>}, {transform_indices = @transform_2, window_bounds = array<i64: 1>}, {pipeline_mode = #tpu.pipeline_mode<synchronous>, transform_indices = @transform_3, window_bounds = array<i64: 64, 32>}, {pipeline_mode = #tpu.pipeline_mode<synchronous>, transform_indices = @transform_4, window_bounds = array<i64: 64, 1>}, {pipeline_mode = #tpu.pipeline_mode<synchronous>, transform_indices = @transform_5, window_bounds = array<i64: 32, 64>}, {transform_indices = @transform_6, window_bounds = array<i64: 1, 32, 128>}]} {
    %c0 = arith.constant 0 : index
    %c0_0 = arith.constant 0 : index
    %c0_1 = arith.constant 0 : index
    %0 = vector.load %arg1[%c0, %c0_0, %c0_1] : memref<1x32x128xf32, #tpu.memory_space<vmem>>, vector<1x32x128xf32>
    %1 = vector.shape_cast %0 : vector<1x32x128xf32> to vector<32x128xf32>
    %cst = arith.constant 0.000000e+00 : f32
    %2 = vector.broadcast %cst : f32 to vector<32x128xf32>
    %3 = arith.cmpf oge, %1, %2 : vector<32x128xf32>
    %c0_2 = arith.constant 0 : index
    %4 = memref.load %arg3[%c0_2] : memref<1xf32, #tpu.memory_space<smem>>
    %5 = vector.broadcast %4 : f32 to vector<32x128xf32>
    %6 = arith.mulf %5, %1 : vector<32x128xf32>
    %7 = arith.select %3, %1, %6 : vector<32x128xi1>, vector<32x128xf32>
    %c0_3 = arith.constant 0 : index
    %c0_4 = arith.constant 0 : index
    %8 = vector.load %arg4[%c0_3, %c0_4] : memref<64x32xbf16, #tpu.memory_space<vmem>>, vector<64x32xbf16>
    %9 = arith.truncf %7 : vector<32x128xf32> to vector<32x128xbf16>
    %cst_5 = arith.constant dense<0.000000e+00> : vector<64x128xf32>
    %10 = tpu.matmul %8, %9, %cst_5 {dimension_numbers = #tpu.dot_dimension_numbers<[1], [0], [0], [1], [0, 0, 1, 1], [], []>} : vector<64x32xbf16>, vector<32x128xbf16>, vector<64x128xf32> -> vector<64x128xf32>
    %c0_6 = arith.constant 0 : index
    %c0_7 = arith.constant 0 : index
    %11 = vector.load %arg5[%c0_6, %c0_7] : memref<64x1xf32, #tpu.memory_space<vmem>>, vector<64x1xf32>
    %12 = vector.broadcast %11 : vector<64x1xf32> to vector<64x128xf32>
    %13 = arith.addf %10, %12 : vector<64x128xf32>
    %14 = arith.negf %13 : vector<64x128xf32>
    %15 = math.exp %14 : vector<64x128xf32>
    %cst_8 = arith.constant 1.000000e+00 : f32
    %16 = vector.broadcast %cst_8 : f32 to vector<64x128xf32>
    %17 = arith.addf %16, %15 : vector<64x128xf32>
    %18 = arith.divf %16, %17 : vector<64x128xf32>
    %c0_9 = arith.constant 0 : index
    %c0_10 = arith.constant 0 : index
    %c0_11 = arith.constant 0 : index
    %19 = vector.load %arg2[%c0_9, %c0_10, %c0_11] : memref<1x64x128xf32, #tpu.memory_space<vmem>>, vector<1x64x128xf32>
    %20 = vector.shape_cast %19 : vector<1x64x128xf32> to vector<64x128xf32>
    %21 = arith.mulf %20, %18 : vector<64x128xf32>
    %c0_12 = arith.constant 0 : index
    %c0_13 = arith.constant 0 : index
    %22 = vector.load %arg6[%c0_12, %c0_13] : memref<32x64xbf16, #tpu.memory_space<vmem>>, vector<32x64xbf16>
    %23 = arith.truncf %21 : vector<64x128xf32> to vector<64x128xbf16>
    %cst_14 = arith.constant dense<0.000000e+00> : vector<32x128xf32>
    %24 = tpu.matmul %22, %23, %cst_14 {dimension_numbers = #tpu.dot_dimension_numbers<[1], [0], [0], [1], [0, 0, 1, 1], [], []>} : vector<32x64xbf16>, vector<64x128xbf16>, vector<32x128xf32> -> vector<32x128xf32>
    %c0_15 = arith.constant 0 : index
    %c0_16 = arith.constant 0 : index
    %c0_17 = arith.constant 0 : index
    %25 = vector.load %arg7[%c0_15, %c0_16, %c0_17] : memref<1x32x128xf32, #tpu.memory_space<vmem>>, vector<1x32x128xf32>
    %26 = vector.shape_cast %25 : vector<1x32x128xf32> to vector<32x128xf32>
    %27 = vector.shape_cast %24 : vector<32x128xf32> to vector<1x32x128xf32>
    tpu.vector_store %arg7[%c0_15, %c0_16, %c0_17], %27 {strides = array<i32>} : memref<1x32x128xf32, #tpu.memory_space<vmem>>, vector<1x32x128xf32>,
    return
  }
  func.func @transform_0(%arg0: i32) -> (i32, i32, i32) {
    %c0_i32 = arith.constant 0 : i32
    %c0_i32_0 = arith.constant 0 : i32
    %c0_i32_1 = arith.constant 0 : i32
    return %arg0, %c0_i32, %c0_i32_0 : i32, i32, i32
  }
  func.func @transform_1(%arg0: i32) -> (i32, i32, i32) {
    %c0_i32 = arith.constant 0 : i32
    %c0_i32_0 = arith.constant 0 : i32
    %c0_i32_1 = arith.constant 0 : i32
    return %arg0, %c0_i32, %c0_i32_0 : i32, i32, i32
  }
  func.func @transform_2(%arg0: i32) -> i32 {
    %c0_i32 = arith.constant 0 : i32
    %c0_i32_0 = arith.constant 0 : i32
    return %c0_i32 : i32
  }
  func.func @transform_3(%arg0: i32) -> (i32, i32) {
    %c0_i32 = arith.constant 0 : i32
    %c0_i32_0 = arith.constant 0 : i32
    %c0_i32_1 = arith.constant 0 : i32
    return %c0_i32, %c0_i32_0 : i32, i32
  }
  func.func @transform_4(%arg0: i32) -> (i32, i32) {
    %c0_i32 = arith.constant 0 : i32
    %c0_i32_0 = arith.constant 0 : i32
    %c0_i32_1 = arith.constant 0 : i32
    return %c0_i32, %c0_i32_0 : i32, i32
  }
  func.func @transform_5(%arg0: i32) -> (i32, i32) {
    %c0_i32 = arith.constant 0 : i32
    %c0_i32_0 = arith.constant 0 : i32
    %c0_i32_1 = arith.constant 0 : i32
    return %c0_i32, %c0_i32_0 : i32, i32
  }
  func.func @transform_6(%arg0: i32) -> (i32, i32, i32) {
    %c0_i32 = arith.constant 0 : i32
    %c0_i32_0 = arith.constant 0 : i32
    %c0_i32_1 = arith.constant 0 : i32
    return %arg0, %c0_i32, %c0_i32_0 : i32, i32, i32
  }
}

</mosaic_0001>

<bundles_post_ra>
// kernel: _lambda_.7
= control target key start
LH: loop header
LB: loop body
LE: loop exit
PB: predicated region body
PF: predicated region fallthrough
CT: control target
= control target key end

     0   :  { %s1922_s9 = smov 0   ;;  %s1924_s10 = smov 0   ;;  %s2242_s0 = inlined_call_operand.vmem [shape: bf16[32,4096], index: 0, kind: input, shape index: {}]   ;;  %s2243_s1 = inlined_call_operand.vmem [shape: bf16[4096,256], index: 1, kind: input, shape index: {}]   ;;  %s2244_s2 = inlined_call_operand.vmem [shape: f32[32,256], index: 2, kind: output, shape index: {}]  }
   0x1   :  { %s1926_s11 = smov 0   ;;  %s1928_s12 = smov 0  }
   0x2   :  { %s1930_s13 = smov 0  }
   0x3 LB: > { %s21_s14 = sadd.s32 1, %s1900_s12  ;;  %p38_p1 = scmp.ne.s32.totalorder %s1892_s10, %s1888_s9  ;;  %s1904_s13 = sphi %s1930_s13, %s12_s13   ;;  %s1900_s12 = sphi %s1928_s12, %s2248_s12   ;;  %s1896_s11 = sphi %s1926_s11, %s2247_s11   ;;  %s1892_s10 = sphi %s1924_s10, %s2246_s10   ;;  %s1888_s9 = sphi %s1922_s9, %s2245_s9  }
   0x4   : > { %p22_p0 = scmp.ge.s32.totalorder %s21_s14, 4  ;;  %p39_p2 = scmp.eq.s32.totalorder %s1904_s13, 0 }
   0x5   : > { %s31_s16 = sadd.s32 1, %s1892_s10  ;;  %p1449_p5 = scmp.ge.s32.totalorder %s1904_s13, 4 }
   0x6   : > { %s2250_s14 = smov (%p22_p0, %s21_s14), 0  ;;  %p40_p3 = por %p39_p2, %p38_p1 }
   0x7   : > { %s28_s15 = ssub.s32 %s1900_s12, %s2250_s14  ;;  %118 = sbr.rel (%p1449_p5) target bundleno = 26 (0x1a), region = 16 }
   0x8   : > { %p29_p4 = scmp.eq.s32.totalorder %s28_s15, 0 }
   0xa   : > { %s1957_s17 = scalar_select %p29_p4, %s1892_s10, %s31_s16  }
   0xe   : > { %121 = sbr.rel (!%p40_p3) target bundleno = 26 (0x1a), region = 20  ;;  %s123_s18 = sand.u32 (%p40_p3), 1, %s1892_s10  }
   0xf   : > { %s1607_s19 = sshll.u32 (%p40_p3), %s1900_s12, 5  ;;  %s1450_s20 = sshll.u32 (%p40_p3), %s123_s18, 7 }
  0x10   : > { %s1965_s23 = scalar_lea.vmem (%p40_p3), %s2242_s0, %s1607_s19  ;;  %s125_s24 = scalar_lea.vmem (%p40_p3), [#allocation2], %s1450_s20 }
  0x11   : > { %v141_v0 = vld [vmem:[%s1965_s23] sm:$0xff] (%p40_p3)  ;;  %v143_v1 = vld [vmem:[%s1965_s23 + $0x8] sm:$0xff] (%p40_p3)  ;;  %v145_v2 = vld [vmem:[%s1965_s23 + $0x10] sm:$0xff] (%p40_p3) }
  0x12   : > { %142 = vst [vmem:[%s125_s24] sm:$0xff] (%p40_p3), %v141_v0  ;;  %144 = vst [vmem:[%s125_s24 + $0x8] sm:$0xff] (%p40_p3), %v143_v1  ;;  %v147_v3 = vld [vmem:[%s1965_s23 + $0x18] sm:$0xff] (%p40_p3)  ;;  %v149_v4 = vld [vmem:[%s1965_s23 + $0x80] sm:$0xff] (%p40_p3) }
  0x13   : > { %146 = vst [vmem:[%s125_s24 + $0x10] sm:$0xff] (%p40_p3), %v145_v2  ;;  %v151_v5 = vld [vmem:[%s1965_s23 + $0x88] sm:$0xff] (%p40_p3)  ;;  %148 = vst [vmem:[%s125_s24 + $0x18] sm:$0xff] (%p40_p3), %v147_v3  ;;  %v153_v6 = vld [vmem:[%s1965_s23 + $0x90] sm:$0xff] (%p40_p3) }
  0x14   : > { %150 = vst [vmem:[%s125_s24 + $0x20] sm:$0xff] (%p40_p3), %v149_v4  ;;  %152 = vst [vmem:[%s125_s24 + $0x28] sm:$0xff] (%p40_p3), %v151_v5  ;;  %v155_v7 = vld [vmem:[%s1965_s23 + $0x98] sm:$0xff] (%p40_p3)  ;;  %v157_v8 = vld [vmem:[%s1965_s23 + $0x100] sm:$0xff] (%p40_p3) }
  0x15   : > { %154 = vst [vmem:[%s125_s24 + $0x30] sm:$0xff] %v153_v6  ;;  %156 = vst [vmem:[%s125_s24 + $0x38] sm:$0xff] %v155_v7  ;;  %v159_v9 = vld [vmem:[%s1965_s23 + $0x108] sm:$0xff]  ;;  %v161_v10 = vld [vmem:[%s1965_s23 + $0x110] sm:$0xff] }
  0x16   : > { %158 = vst [vmem:[%s125_s24 + $0x40] sm:$0xff] %v157_v8  ;;  %v163_v11 = vld [vmem:[%s1965_s23 + $0x118] sm:$0xff]  ;;  %160 = vst [vmem:[%s125_s24 + $0x48] sm:$0xff] %v159_v9  ;;  %v165_v12 = vld [vmem:[%s1965_s23 + $0x180] sm:$0xff] }
  0x17   : > { %162 = vst [vmem:[%s125_s24 + $0x50] sm:$0xff] %v161_v10  ;;  %164 = vst [vmem:[%s125_s24 + $0x58] sm:$0xff] %v163_v11  ;;  %v167_v13 = vld [vmem:[%s1965_s23 + $0x188] sm:$0xff]  ;;  %v169_v14 = vld [vmem:[%s1965_s23 + $0x190] sm:$0xff] }
  0x18   : > { %166 = vst [vmem:[%s125_s24 + $0x60] sm:$0xff] %v165_v12  ;;  %168 = vst [vmem:[%s125_s24 + $0x68] sm:$0xff] %v167_v13  ;;  %v171_v15 = vld [vmem:[%s1965_s23 + $0x198] sm:$0xff] }
  0x19   : > { %170 = vst [vmem:[%s125_s24 + $0x70] sm:$0xff] %v169_v14  ;;  %172 = vst [vmem:[%s125_s24 + $0x78] sm:$0xff] %v171_v15 }
  0x1a PF: > { %p1453_p6 = scmp.ge.s32.totalorder %s1904_s13, 1  ;;  %p192_p7 = scmp.lt.s32.totalorder %s1904_s13, 5 }
  0x1c   : > { %p193_p8 = pnand %p1453_p6, %p192_p7 }
  0x1d   : > { %s199_s25 = sand.u32 (!%p193_p8), 1, %s1888_s9   ;;  %s1455_s26 = sshll.u32 (!%p193_p8), %s1896_s11, 7 }
  0x1e   : > { %196 = sbr.rel (%p193_p8) target bundleno = 402 (0x192), region = 47  ;;  %s1454_s27 = sshll.u32 (!%p193_p8), %s199_s25, 7 }
  0x1f   : > { %p233_p9 = scmp.lt.s32.totalorder (!%p193_p8), %s1455_s26, 511  ;;  %s1992_s4 = scalar_lea.vmem (!%p193_p8), [#allocation2], %s1454_s27 }
  0x20   : > { %p1458_p10 = scmp.ne.s32.totalorder (!%p193_p8), %s1896_s11, 0 }
  0x25   : > { %s2252_s26 = smov (!%p233_p9, %s1455_s26), 511  ;;  %252 = sbr.rel (%p1458_p10) target bundleno = 44 (0x2c), region = 55 }
  0x26   : > { %s1608_s28 = sshll.u32 %s2252_s26, 3  ;;  %v1906_v16 = vmov (!%p1458_p10), 0.0  }
  0x27   : > { %s1990_s3 = scalar_lea.vmem %s2243_s1, %s1608_s28  ;;  %253 = vst [vmem:[%s2244_s2] sm:$0xff] (!%p1458_p10), %v1906_v16  ;;  %254 = vst [vmem:[%s2244_s2 + $0x8] sm:$0xff] (!%p1458_p10), %v1906_v16 }
  0x28   : > { %255 = vst [vmem:[%s2244_s2 + $0x10] sm:$0xff] (!%p1458_p10), %v1906_v16  ;;  %256 = vst [vmem:[%s2244_s2 + $0x18] sm:$0xff] (!%p1458_p10), %v1906_v16 }
  0x29   : > { %257 = vst [vmem:[%s2244_s2 + $0x20] sm:$0xff] (!%p1458_p10), %v1906_v16  ;;  %258 = vst [vmem:[%s2244_s2 + $0x28] sm:$0xff] (!%p1458_p10), %v1906_v16 }
  0x2a   : > { %259 = vst [vmem:[%s2244_s2 + $0x30] sm:$0xff] (!%p1458_p10), %v1906_v16  ;;  %260 = vst [vmem:[%s2244_s2 + $0x38] sm:$0xff] (!%p1458_p10), %v1906_v16 }
  0x2c PF: > { %v1674_v17 = vld [vmem:[%s1990_s3 + $0x4] ss:$8 sps:$4 sm:$0xff]   ;;  %v1678_v19 = vld [vmem:[%s1990_s3] ss:$8 sps:$4 sm:$0xff]   ;;  %v1680_v21 = vld [vmem:[%s1990_s3 + $0x14] ss:$8 sps:$4 sm:$0xff]  }
  0x2d   : > { %v1676_v18 = vld [vmem:[%s1990_s3 + $0x204] ss:$8 sps:$4 sm:$0xff]   ;;  %1133 = vmatprep.subr.bf16.mxu1 %v1674_v17  ;;  %v1679_v20 = vld [vmem:[%s1990_s3 + $0x200] ss:$8 sps:$4 sm:$0xff]   ;;  %v1682_v22 = vld [vmem:[%s1990_s3 + $0x214] ss:$8 sps:$4 sm:$0xff]  }
  0x2e   : > { %1239 = vmatprep.subr.bf16.mxu0 %v1676_v18  ;;  %1134 = vmatpush1.bf16.msra.mxu1 %v1678_v19  ;;  %v1684_v23 = vld [vmem:[%s1990_s3 + $0x10] ss:$8 sps:$4 sm:$0xff]   ;;  %v1686_v25 = vld [vmem:[%s1990_s3 + $0x24] ss:$8 sps:$4 sm:$0xff]   ;;  %v1690_v27 = vld [vmem:[%s1990_s3 + $0x20] ss:$8 sps:$4 sm:$0xff]  }
  0x2f   : > { %1240 = vmatpush1.bf16.msra.mxu0 %v1679_v20  ;;  %1135 = vmatprep.subr.bf16.mxu1 %v1680_v21  ;;  %v1685_v24 = vld [vmem:[%s1990_s3 + $0x210] ss:$8 sps:$4 sm:$0xff]   ;;  %v1688_v26 = vld [vmem:[%s1990_s3 + $0x224] ss:$8 sps:$4 sm:$0xff]   ;;  %v1691_v28 = vld [vmem:[%s1990_s3 + $0x220] ss:$8 sps:$4 sm:$0xff]  }
  0x30   : > { %1241 = vmatprep.subr.bf16.mxu0 %v1682_v22  ;;  %v1692_v29 = vld [vmem:[%s1990_s3 + $0x34] ss:$8 sps:$4 sm:$0xff]   ;;  %v1696_v31 = vld [vmem:[%s1990_s3 + $0x30] ss:$8 sps:$4 sm:$0xff]   ;;  %v1698_v33 = vld [vmem:[%s1990_s3 + $0x44] ss:$8 sps:$4 sm:$0xff]  }
  0x31   : > { %v1694_v30 = vld [vmem:[%s1990_s3 + $0x234] ss:$8 sps:$4 sm:$0xff]   ;;  %v1697_v32 = vld [vmem:[%s1990_s3 + $0x230] ss:$8 sps:$4 sm:$0xff]   ;;  %v1700_v34 = vld [vmem:[%s1990_s3 + $0x244] ss:$8 sps:$4 sm:$0xff]  }
  0x32   : > { %1136 = vmatpush1.bf16.msra.mxu1 %v1684_v23  ;;  %v1702_v35 = vld [vmem:[%s1990_s3 + $0x40] ss:$8 sps:$4 sm:$0xff]   ;;  %v1704_v37 = vld [vmem:[%s1990_s3 + $0x54] ss:$8 sps:$4 sm:$0xff]   ;;  %v1708_v39 = vld [vmem:[%s1990_s3 + $0x50] ss:$8 sps:$4 sm:$0xff]  }
  0x33   : > { %1242 = vmatpush1.bf16.msra.mxu0 %v1685_v24  ;;  %1137 = vmatprep.subr.bf16.mxu1 %v1686_v25  ;;  %v1703_v36 = vld [vmem:[%s1990_s3 + $0x240] ss:$8 sps:$4 sm:$0xff]   ;;  %v1706_v38 = vld [vmem:[%s1990_s3 + $0x254] ss:$8 sps:$4 sm:$0xff]   ;;  %v1709_v40 = vld [vmem:[%s1990_s3 + $0x250] ss:$8 sps:$4 sm:$0xff]  }
  0x34   : > { %1243 = vmatprep.subr.bf16.mxu0 %v1688_v26  ;;  %v1710_v41 = vld [vmem:[%s1990_s3 + $0x64] ss:$8 sps:$4 sm:$0xff]   ;;  %v1714_v43 = vld [vmem:[%s1990_s3 + $0x60] ss:$8 sps:$4 sm:$0xff]   ;;  %v1716_v45 = vld [vmem:[%s1990_s3 + $0x74] ss:$8 sps:$4 sm:$0xff]  }
  0x35   : > { %v1712_v42 = vld [vmem:[%s1990_s3 + $0x264] ss:$8 sps:$4 sm:$0xff]   ;;  %v1715_v44 = vld [vmem:[%s1990_s3 + $0x260] ss:$8 sps:$4 sm:$0xff]   ;;  %v1718_v46 = vld [vmem:[%s1990_s3 + $0x274] ss:$8 sps:$4 sm:$0xff]  }
  0x36   : > { %1138 = vmatpush1.bf16.msra.mxu1 %v1690_v27  ;;  %v1720_v47 = vld [vmem:[%s1990_s3 + $0x70] ss:$8 sps:$4 sm:$0xff]   ;;  %v1722_v49 = vld [vmem:[%s1990_s3 + $0x84] ss:$8 sps:$4 sm:$0xff]   ;;  %v1726_v51 = vld [vmem:[%s1990_s3 + $0x80] ss:$8 sps:$4 sm:$0xff]  }
  0x37   : > { %1244 = vmatpush1.bf16.msra.mxu0 %v1691_v28  ;;  %1139 = vmatprep.subr.bf16.mxu1 %v1692_v29  ;;  %v1721_v48 = vld [vmem:[%s1990_s3 + $0x270] ss:$8 sps:$4 sm:$0xff]   ;;  %v1724_v50 = vld [vmem:[%s1990_s3 + $0x284] ss:$8 sps:$4 sm:$0xff]   ;;  %v1727_v52 = vld [vmem:[%s1990_s3 + $0x280] ss:$8 sps:$4 sm:$0xff]  }
  0x38   : > { %1245 = vmatprep.subr.bf16.mxu0 %v1694_v30  ;;  %v1728_v53 = vld [vmem:[%s1990_s3 + $0x94] ss:$8 sps:$4 sm:$0xff]   ;;  %v1732_v55 = vld [vmem:[%s1990_s3 + $0x90] ss:$8 sps:$4 sm:$0xff]   ;;  %v1734_v57 = vld [vmem:[%s1990_s3 + $0xa4] ss:$8 sps:$4 sm:$0xff]  }
  0x39   : > { %v1730_v54 = vld [vmem:[%s1990_s3 + $0x294] ss:$8 sps:$4 sm:$0xff]   ;;  %v1733_v56 = vld [vmem:[%s1990_s3 + $0x290] ss:$8 sps:$4 sm:$0xff]   ;;  %v1736_v58 = vld [vmem:[%s1990_s3 + $0x2a4] ss:$8 sps:$4 sm:$0xff]  }
  0x3a   : > { %1140 = vmatpush1.bf16.msra.mxu1 %v1696_v31  ;;  %v1738_v59 = vld [vmem:[%s1990_s3 + $0xa0] ss:$8 sps:$4 sm:$0xff]   ;;  %v1740_v61 = vld [vmem:[%s1990_s3 + $0xb4] ss:$8 sps:$4 sm:$0xff]   ;;  %v1744_v63 = vld [vmem:[%s1990_s3 + $0xb0] ss:$8 sps:$4 sm:$0xff]  }
  0x3b   : > { %1246 = vmatpush1.bf16.msra.mxu0 %v1697_v32  ;;  %1141 = vmatprep.subr.bf16.mxu1 %v1698_v33  ;;  %v1739_v60 = vld [vmem:[%s1990_s3 + $0x2a0] ss:$8 sps:$4 sm:$0xff]   ;;  %v1742_v62 = vld [vmem:[%s1990_s3 + $0x2b4] ss:$8 sps:$4 sm:$0xff]   ;;  %v1745_v0 = vld [vmem:[%s1990_s3 + $0x2b0] ss:$8 sps:$4 sm:$0xff]  }
  0x3c   : > { %1247 = vmatprep.subr.bf16.mxu0 %v1700_v34  ;;  %v269_v1 = vld [vmem:[%s1992_s4] sm:$0xff]  ;;  %v271_v6 = vld [vmem:[%s1992_s4 + $0x10] sm:$0xff] }
  0x3d   : > { %v273_v2 = vld [vmem:[%s1992_s4 + $0x20] sm:$0xff]  ;;  %v275_v7 = vld [vmem:[%s1992_s4 + $0x30] sm:$0xff] }
  0x3e   : > { %1142 = vmatpush1.bf16.msra.mxu1 %v1702_v35  ;;  %v1746_v3 = vld [vmem:[%s1990_s3 + $0xc4] ss:$8 sps:$4 sm:$0xff]   ;;  %v1460_v5 = vcombine.high %v269_v1, %v273_v2  ;;  %v1464_v8 = vcombine.high %v271_v6, %v275_v7  ;;  %v1750_v9 = vld [vmem:[%s1990_s3 + $0xc0] ss:$8 sps:$4 sm:$0xff]   ;;  %v1752_v11 = vld [vmem:[%s1990_s3 + $0xd4] ss:$8 sps:$4 sm:$0xff]   ;;  %v1459_v25 = vcombine.low %v269_v1, %v273_v2  ;;  %v1463_v27 = vcombine.low %v271_v6, %v275_v7 }
  0x3f   : > { %1248 = vmatpush1.bf16.msra.mxu0 %v1703_v36  ;;  %1143 = vmatprep.subr.bf16.mxu1 %v1704_v37  ;;  %v1748_v4 = vld [vmem:[%s1990_s3 + $0x2c4] ss:$8 sps:$4 sm:$0xff]   ;;  %v1751_v10 = vld [vmem:[%s1990_s3 + $0x2c0] ss:$8 sps:$4 sm:$0xff]   ;;  %v1754_v12 = vld [vmem:[%s1990_s3 + $0x2d4] ss:$8 sps:$4 sm:$0xff]  }
  0x40   : > { %1249 = vmatprep.subr.bf16.mxu0 %v1706_v38  ;;  %1165 = vmatprep.mubr.bf16.mxu1 %v1460_v5  ;;  %v1756_v13 = vld [vmem:[%s1990_s3 + $0xd0] ss:$8 sps:$4 sm:$0xff]   ;;  %v1758_v15 = vld [vmem:[%s1990_s3 + $0xe4] ss:$8 sps:$4 sm:$0xff]   ;;  %v1762_v17 = vld [vmem:[%s1990_s3 + $0xe0] ss:$8 sps:$4 sm:$0xff]  }
  0x41   : > { %1271 = vmatprep.mubr.bf16.mxu0 %v1464_v8  ;;  %v1757_v14 = vld [vmem:[%s1990_s3 + $0x2d0] ss:$8 sps:$4 sm:$0xff]   ;;  %v1760_v16 = vld [vmem:[%s1990_s3 + $0x2e4] ss:$8 sps:$4 sm:$0xff]   ;;  %v1763_v18 = vld [vmem:[%s1990_s3 + $0x2e0] ss:$8 sps:$4 sm:$0xff]  }
  0x42   : > { %1144 = vmatpush1.bf16.msra.mxu1 %v1708_v39  ;;  %v1764_v19 = vld [vmem:[%s1990_s3 + $0xf4] ss:$8 sps:$4 sm:$0xff]   ;;  %v1768_v21 = vld [vmem:[%s1990_s3 + $0xf0] ss:$8 sps:$4 sm:$0xff]   ;;  %v1772_v23 = vld [vmem:[%s1990_s3 + $0x104] ss:$8 sps:$4 sm:$0xff]  }
  0x43   : > { %1250 = vmatpush1.bf16.msra.mxu0 %v1709_v40  ;;  %1145 = vmatprep.subr.bf16.mxu1 %v1710_v41  ;;  %v1766_v20 = vld [vmem:[%s1990_s3 + $0x2f4] ss:$8 sps:$4 sm:$0xff]   ;;  %v1769_v22 = vld [vmem:[%s1990_s3 + $0x2f0] ss:$8 sps:$4 sm:$0xff]   ;;  %v1775_v24 = vld [vmem:[%s1990_s3 + $0x304] ss:$8 sps:$4 sm:$0xff]  }
  0x44   : > { %1251 = vmatprep.subr.bf16.mxu0 %v1712_v42  ;;  %v1770_v26 = vld [vmem:[%s1990_s3 + $0x100] ss:$8 sps:$4 sm:$0xff]   ;;  %v1778_v29 = vld [vmem:[%s1990_s3 + $0x114] ss:$8 sps:$4 sm:$0xff]   ;;  %v1776_v31 = vld [vmem:[%s1990_s3 + $0x110] ss:$8 sps:$4 sm:$0xff]  }
  0x45   : > { %v1773_v28 = vld [vmem:[%s1990_s3 + $0x300] ss:$8 sps:$4 sm:$0xff]   ;;  %v1781_v30 = vld [vmem:[%s1990_s3 + $0x314] ss:$8 sps:$4 sm:$0xff]   ;;  %v1779_v32 = vld [vmem:[%s1990_s3 + $0x310] ss:$8 sps:$4 sm:$0xff]  }
  0x46   : > { %1146 = vmatpush1.bf16.msra.mxu1 %v1714_v43  ;;  %v1784_v33 = vld [vmem:[%s1990_s3 + $0x124] ss:$8 sps:$4 sm:$0xff]   ;;  %v1782_v35 = vld [vmem:[%s1990_s3 + $0x120] ss:$8 sps:$4 sm:$0xff]   ;;  %v1790_v37 = vld [vmem:[%s1990_s3 + $0x134] ss:$8 sps:$4 sm:$0xff]  }
  0x47   : > { %1252 = vmatpush1.bf16.msra.mxu0 %v1715_v44  ;;  %1147 = vmatprep.subr.bf16.mxu1 %v1716_v45  ;;  %v1787_v34 = vld [vmem:[%s1990_s3 + $0x324] ss:$8 sps:$4 sm:$0xff]   ;;  %v1785_v36 = vld [vmem:[%s1990_s3 + $0x320] ss:$8 sps:$4 sm:$0xff]   ;;  %v1793_v38 = vld [vmem:[%s1990_s3 + $0x334] ss:$8 sps:$4 sm:$0xff]  }
  0x48   : > { %1253 = vmatprep.subr.bf16.mxu0 %v1718_v46  ;;  %v1788_v39 = vld [vmem:[%s1990_s3 + $0x130] ss:$8 sps:$4 sm:$0xff]   ;;  %v1796_v41 = vld [vmem:[%s1990_s3 + $0x144] ss:$8 sps:$4 sm:$0xff]   ;;  %v1794_v43 = vld [vmem:[%s1990_s3 + $0x140] ss:$8 sps:$4 sm:$0xff]  }
  0x49   : > { %v1791_v40 = vld [vmem:[%s1990_s3 + $0x330] ss:$8 sps:$4 sm:$0xff]   ;;  %v1799_v42 = vld [vmem:[%s1990_s3 + $0x344] ss:$8 sps:$4 sm:$0xff]   ;;  %v1797_v44 = vld [vmem:[%s1990_s3 + $0x340] ss:$8 sps:$4 sm:$0xff]  }
  0x4a   : > { %1148 = vmatpush1.bf16.msra.mxu1 %v1720_v47  ;;  %v1802_v45 = vld [vmem:[%s1990_s3 + $0x154] ss:$8 sps:$4 sm:$0xff]   ;;  %v277_v47 = vld [vmem:[%s1992_s4 + $0x40] sm:$0xff]  ;;  %v1812_v5 = vld [vmem:[%s1990_s3 + $0x170] ss:$8 sps:$4 sm:$0xff]  }
  0x4b   : > { %1254 = vmatpush1.bf16.msra.mxu0 %v1721_v48  ;;  %1149 = vmatprep.subr.bf16.mxu1 %v1722_v49  ;;  %v1805_v46 = vld [vmem:[%s1990_s3 + $0x354] ss:$8 sps:$4 sm:$0xff]   ;;  %v281_v48 = vld [vmem:[%s1992_s4 + $0x60] sm:$0xff]  ;;  %v1815_v6 = vld [vmem:[%s1990_s3 + $0x370] ss:$8 sps:$4 sm:$0xff]  }
  0x4c   : > { %1255 = vmatprep.subr.bf16.mxu0 %v1724_v50  ;;  %v1468_v49 = vcombine.high %v277_v47, %v281_v48  ;;  %v279_v50 = vld [vmem:[%s1992_s4 + $0x50] sm:$0xff]  ;;  %v1820_v7 = vld [vmem:[%s1990_s3 + $0x184] ss:$8 sps:$4 sm:$0xff]  }
  0x4d   : > { %v1817_v1 = vld [vmem:[%s1990_s3 + $0x374] ss:$8 sps:$4 sm:$0xff]   ;;  %v1823_v8 = vld [vmem:[%s1990_s3 + $0x384] ss:$8 sps:$4 sm:$0xff]  }
  0x4e   : > { %1150 = vmatpush1.bf16.msra.mxu1 %v1726_v51  ;;  %v283_v51 = vld [vmem:[%s1992_s4 + $0x70] sm:$0xff] }
  0x4f   : > { %1256 = vmatpush1.bf16.msra.mxu0 %v1727_v52  ;;  %1151 = vmatprep.subr.bf16.mxu1 %v1728_v53  ;;  %v1800_v52 = vld [vmem:[%s1990_s3 + $0x150] ss:$8 sps:$4 sm:$0xff]  }
  0x50   : > { %1257 = vmatprep.subr.bf16.mxu0 %v1730_v54  ;;  %v1803_v53 = vld [vmem:[%s1990_s3 + $0x350] ss:$8 sps:$4 sm:$0xff]   ;;  %v1472_v54 = vcombine.high %v279_v50, %v283_v51 }
  0x52   : > { %1152 = vmatpush1.bf16.msra.mxu1 %v1732_v55  ;;  %v1467_v55 = vcombine.low %v277_v47, %v281_v48 }
  0x53   : > { %1258 = vmatpush1.bf16.msra.mxu0 %v1733_v56  ;;  %1153 = vmatprep.subr.bf16.mxu1 %v1734_v57  ;;  %v1471_v56 = vcombine.low %v279_v50, %v283_v51  ;;  %v1808_v57 = vld [vmem:[%s1990_s3 + $0x164] ss:$8 sps:$4 sm:$0xff]  }
  0x54   : > { %1259 = vmatprep.subr.bf16.mxu0 %v1736_v58  ;;  %v1811_v58 = vld [vmem:[%s1990_s3 + $0x364] ss:$8 sps:$4 sm:$0xff]  }
  0x55   : > { %v261_v50 = vld [vmem:[%s2244_s2] sm:$0xff] }
  0x56   : > { %1154 = vmatpush1.bf16.msra.mxu1 %v1738_v59  ;;  %v1806_v59 = vld [vmem:[%s1990_s3 + $0x160] ss:$8 sps:$4 sm:$0xff]  }
  0x57   : > { %1260 = vmatpush1.bf16.msra.mxu0 %v1739_v60  ;;  %1155 = vmatprep.subr.bf16.mxu1 %v1740_v61  ;;  %v1809_v60 = vld [vmem:[%s1990_s3 + $0x360] ss:$8 sps:$4 sm:$0xff]  }
  0x58   : > { %1261 = vmatprep.subr.bf16.mxu0 %v1742_v62  ;;  %v2120_v61 = vld [vmem:[%s1992_s4 + $0x8] sm:$0xff] }
  0x59   : > { %v2123_v62 = vld [vmem:[%s1992_s4 + $0x28] sm:$0xff] }
  0x5a   : > { %1156 = vmatpush1.bf16.msra.mxu1 %v1744_v63  ;;  %v2126_v63 = vld [vmem:[%s1992_s4 + $0x18] sm:$0xff]  ;;  %v1462_v2 = vcombine.high %v2120_v61, %v2123_v62 }
  0x5b   : > { %1262 = vmatpush1.bf16.msra.mxu0 %v1745_v0  ;;  %1157 = vmatprep.subr.bf16.mxu1 %v1746_v3  ;;  %v1814_v0 = vld [vmem:[%s1990_s3 + $0x174] ss:$8 sps:$4 sm:$0xff]  }
  0x5c   : > { %1263 = vmatprep.subr.bf16.mxu0 %v1748_v4  ;;  %v2133_v3 = vld [vmem:[%s1992_s4 + $0x38] sm:$0xff] }
  0x5d   : > { %v1466_v4 = vcombine.high %v2126_v63, %v2133_v3 }
  0x5e   : > { %1158 = vmatpush1.bf16.msra.mxu1 %v1750_v9  ;;  %v1818_v9 = vld [vmem:[%s1990_s3 + $0x180] ss:$8 sps:$4 sm:$0xff]  }
  0x5f   : > { %1264 = vmatpush1.bf16.msra.mxu0 %v1751_v10  ;;  %1159 = vmatprep.subr.bf16.mxu1 %v1752_v11  ;;  %v1821_v10 = vld [vmem:[%s1990_s3 + $0x380] ss:$8 sps:$4 sm:$0xff]   ;;  %v1826_v11 = vld [vmem:[%s1990_s3 + $0x194] ss:$8 sps:$4 sm:$0xff]  }
  0x60   : > { %1265 = vmatprep.subr.bf16.mxu0 %v1754_v12  ;;  %v1829_v12 = vld [vmem:[%s1990_s3 + $0x394] ss:$8 sps:$4 sm:$0xff]  }
  0x62   : > { %1160 = vmatpush1.bf16.msra.mxu1 %v1756_v13  ;;  %v1824_v13 = vld [vmem:[%s1990_s3 + $0x190] ss:$8 sps:$4 sm:$0xff]  }
  0x63   : > { %1266 = vmatpush1.bf16.msra.mxu0 %v1757_v14  ;;  %1161 = vmatprep.subr.bf16.mxu1 %v1758_v15  ;;  %v1827_v14 = vld [vmem:[%s1990_s3 + $0x390] ss:$8 sps:$4 sm:$0xff]   ;;  %v1832_v15 = vld [vmem:[%s1990_s3 + $0x1a4] ss:$8 sps:$4 sm:$0xff]  }
  0x64   : > { %1267 = vmatprep.subr.bf16.mxu0 %v1760_v16  ;;  %v1835_v16 = vld [vmem:[%s1990_s3 + $0x3a4] ss:$8 sps:$4 sm:$0xff]  }
  0x66   : > { %1162 = vmatpush1.bf16.msra.mxu1 %v1762_v17  ;;  %v1830_v17 = vld [vmem:[%s1990_s3 + $0x1a0] ss:$8 sps:$4 sm:$0xff]  }
  0x67   : > { %1268 = vmatpush1.bf16.msra.mxu0 %v1763_v18  ;;  %1163 = vmatprep.subr.bf16.mxu1 %v1764_v19  ;;  %v1833_v18 = vld [vmem:[%s1990_s3 + $0x3a0] ss:$8 sps:$4 sm:$0xff]   ;;  %v1838_v19 = vld [vmem:[%s1990_s3 + $0x1b4] ss:$8 sps:$4 sm:$0xff]  }
  0x68   : > { %1269 = vmatprep.subr.bf16.mxu0 %v1766_v20  ;;  %v1841_v20 = vld [vmem:[%s1990_s3 + $0x3b4] ss:$8 sps:$4 sm:$0xff]  }
  0x6a   : > { %1164 = vmatpush1.bf16.msra.mxu1 %v1768_v21  ;;  %v1836_v21 = vld [vmem:[%s1990_s3 + $0x1b0] ss:$8 sps:$4 sm:$0xff]  }
  0x6b   : > { %1270 = vmatpush1.bf16.msra.mxu0 %v1769_v22  ;;  %1186 = vmatprep.subr.bf16.mxu1 %v1772_v23  ;;  %v1839_v22 = vld [vmem:[%s1990_s3 + $0x3b0] ss:$8 sps:$4 sm:$0xff]   ;;  %v1844_v23 = vld [vmem:[%s1990_s3 + $0x1c4] ss:$8 sps:$4 sm:$0xff]  }
  0x6c   : > { %1292 = vmatprep.subr.bf16.mxu0 %v1775_v24  ;;  %v1847_v24 = vld [vmem:[%s1990_s3 + $0x3c4] ss:$8 sps:$4 sm:$0xff]  }
  0x6d   : > { %1166 = vmatmul.mubr.bf16.vlgmr.msra.gmra.mrb[0].mxu1 %v1459_v25  ;;  %v1842_v25 = vld [vmem:[%s1990_s3 + $0x1c0] ss:$8 sps:$4 sm:$0xff]  }
  0x6e   : > { %1272 = vmatmul.mubr.bf16.vlgmr.msra.gmra.mrb[0].mxu0 %v1463_v27  ;;  %1187 = vmatpush1.bf16.msra.mxu1 %v1770_v26  ;;  %v1845_v26 = vld [vmem:[%s1990_s3 + $0x3c0] ss:$8 sps:$4 sm:$0xff]   ;;  %v1850_v27 = vld [vmem:[%s1990_s3 + $0x1d4] ss:$8 sps:$4 sm:$0xff]  }
  0x6f   : > { %1293 = vmatpush1.bf16.msra.mxu0 %v1773_v28  ;;  %1188 = vmatprep.subr.bf16.mxu1 %v1778_v29  ;;  %v1853_v28 = vld [vmem:[%s1990_s3 + $0x3d4] ss:$8 sps:$4 sm:$0xff]   ;;  %v1848_v29 = vld [vmem:[%s1990_s3 + $0x1d0] ss:$8 sps:$4 sm:$0xff]  }
  0x70   : > { %1294 = vmatprep.subr.bf16.mxu0 %v1781_v30  ;;  %1175 = vmatprep.mubr.bf16.mxu1 %v1468_v49  ;;  %v1851_v30 = vld [vmem:[%s1990_s3 + $0x3d0] ss:$8 sps:$4 sm:$0xff]  }
  0x71   : > { %1281 = vmatprep.mubr.bf16.mxu0 %v1472_v54  ;;  %v262_v54 = vld [vmem:[%s2244_s2 + $0x8] sm:$0xff] }
  0x72   : > { %1189 = vmatpush1.bf16.msra.mxu1 %v1776_v31  ;;  %v1856_v31 = vld [vmem:[%s1990_s3 + $0x1e4] ss:$8 sps:$4 sm:$0xff]  }
  0x73   : > { %1295 = vmatpush1.bf16.msra.mxu0 %v1779_v32  ;;  %1190 = vmatprep.subr.bf16.mxu1 %v1784_v33  ;;  %v1859_v32 = vld [vmem:[%s1990_s3 + $0x3e4] ss:$8 sps:$4 sm:$0xff]   ;;  %v1854_v33 = vld [vmem:[%s1990_s3 + $0x1e0] ss:$8 sps:$4 sm:$0xff]  }
  0x74   : > { %1296 = vmatprep.subr.bf16.mxu0 %v1787_v34  ;;  %v1857_v34 = vld [vmem:[%s1990_s3 + $0x3e0] ss:$8 sps:$4 sm:$0xff]  }
  0x75   : > { %1176 = vmatmul.mubr.bf16.gmra.mrb[4].mxu1 %v1467_v55 }
  0x76   : > { %1191 = vmatpush1.bf16.msra.mxu1 %v1782_v35  ;;  %1282 = vmatmul.mubr.bf16.gmra.mrb[4].mxu0 %v1471_v56  ;;  %v1862_v35 = vld [vmem:[%s1990_s3 + $0x1f4] ss:$8 sps:$4 sm:$0xff]  }
  0x77   : > { %1297 = vmatpush1.bf16.msra.mxu0 %v1785_v36  ;;  %1192 = vmatprep.subr.bf16.mxu1 %v1790_v37  ;;  %v1865_v36 = vld [vmem:[%s1990_s3 + $0x3f4] ss:$8 sps:$4 sm:$0xff]   ;;  %v1860_v37 = vld [vmem:[%s1990_s3 + $0x1f0] ss:$8 sps:$4 sm:$0xff]  }
  0x78   : > { %1298 = vmatprep.subr.bf16.mxu0 %v1793_v38  ;;  %1218 = vmatprep.mubr.bf16.mxu1 %v1462_v2  ;;  %v1863_v38 = vld [vmem:[%s1990_s3 + $0x3f0] ss:$8 sps:$4 sm:$0xff]  }
  0x79   : > { %1324 = vmatprep.mubr.bf16.mxu0 %v1466_v4 }
  0x7a   : > { %1193 = vmatpush1.bf16.msra.mxu1 %v1788_v39  ;;  %v278_v39 = vld [vmem:[%s1992_s4 + $0x48] sm:$0xff] }
  0x7b   : > { %1299 = vmatpush1.bf16.msra.mxu0 %v1791_v40  ;;  %1194 = vmatprep.subr.bf16.mxu1 %v1796_v41  ;;  %v282_v40 = vld [vmem:[%s1992_s4 + $0x68] sm:$0xff]  ;;  %v280_v41 = vld [vmem:[%s1992_s4 + $0x58] sm:$0xff] }
  0x7c   : > { %1300 = vmatprep.subr.bf16.mxu0 %v1799_v42  ;;  %v284_v42 = vld [vmem:[%s1992_s4 + $0x78] sm:$0xff]  ;;  %v1469_v47 = vcombine.low %v278_v39, %v282_v40 }
  0x7d   : > { %v1473_v48 = vcombine.low %v280_v41, %v284_v42 }
  0x7e   : > { %1195 = vmatpush1.bf16.msra.mxu1 %v1794_v43  ;;  %v1461_v43 = vcombine.low %v2120_v61, %v2123_v62 }
  0x7f   : > { %1301 = vmatpush1.bf16.msra.mxu0 %v1797_v44  ;;  %1196 = vmatprep.subr.bf16.mxu1 %v1802_v45  ;;  %v1465_v44 = vcombine.low %v2126_v63, %v2133_v3  ;;  %v1470_v45 = vcombine.high %v278_v39, %v282_v40  ;;  %v264_v63 = vld [vmem:[%s2244_s2 + $0x18] sm:$0xff] }
  0x80   : > { %1302 = vmatprep.subr.bf16.mxu0 %v1805_v46  ;;  %v1474_v46 = vcombine.high %v280_v41, %v284_v42 }
  0x82   : > { %1197 = vmatpush1.bf16.msra.mxu1 %v1800_v52 }
  0x83   : > { %1303 = vmatpush1.bf16.msra.mxu0 %v1803_v53  ;;  %1198 = vmatprep.subr.bf16.mxu1 %v1808_v57 }
  0x84   : > { %1304 = vmatprep.subr.bf16.mxu0 %v1811_v58  ;;  %v263_v58 = vld [vmem:[%s2244_s2 + $0x10] sm:$0xff] }
  0x86   : > { %1199 = vmatpush1.bf16.msra.mxu1 %v1806_v59 }
  0x87   : > { %1305 = vmatpush1.bf16.msra.mxu0 %v1809_v60  ;;  %1200 = vmatprep.subr.bf16.mxu1 %v1814_v0 }
  0x88   : > { %1306 = vmatprep.subr.bf16.mxu0 %v1817_v1 }
  0x8a   : > { %1201 = vmatpush1.bf16.msra.mxu1 %v1812_v5 }
  0x8b   : > { %1307 = vmatpush1.bf16.msra.mxu0 %v1815_v6  ;;  %1202 = vmatprep.subr.bf16.mxu1 %v1820_v7  ;;  %v265_v6 = vld [vmem:[%s2244_s2 + $0x20] sm:$0xff] }
  0x8c   : > { %1308 = vmatprep.subr.bf16.mxu0 %v1823_v8 }
  0x8e   : > { %1203 = vmatpush1.bf16.msra.mxu1 %v1818_v9 }
  0x8f   : > { %1309 = vmatpush1.bf16.msra.mxu0 %v1821_v10  ;;  %1204 = vmatprep.subr.bf16.mxu1 %v1826_v11  ;;  %v266_v10 = vld [vmem:[%s2244_s2 + $0x28] sm:$0xff] }
  0x90   : > { %1310 = vmatprep.subr.bf16.mxu0 %v1829_v12 }
  0x92   : > { %1205 = vmatpush1.bf16.msra.mxu1 %v1824_v13 }
  0x93   : > { %1311 = vmatpush1.bf16.msra.mxu0 %v1827_v14  ;;  %1206 = vmatprep.subr.bf16.mxu1 %v1832_v15  ;;  %v267_v14 = vld [vmem:[%s2244_s2 + $0x30] sm:$0xff] }
  0x94   : > { %1312 = vmatprep.subr.bf16.mxu0 %v1835_v16 }
  0x96   : > { %1207 = vmatpush1.bf16.msra.mxu1 %v1830_v17 }
  0x97   : > { %1313 = vmatpush1.bf16.msra.mxu0 %v1833_v18  ;;  %1208 = vmatprep.subr.bf16.mxu1 %v1838_v19  ;;  %v268_v19 = vld [vmem:[%s2244_s2 + $0x38] sm:$0xff] }
  0x98   : > { %1314 = vmatprep.subr.bf16.mxu0 %v1841_v20 }
  0x9a   : > { %1209 = vmatpush1.bf16.msra.mxu1 %v1836_v21 }
  0x9b   : > { %1315 = vmatpush1.bf16.msra.mxu0 %v1839_v22  ;;  %1210 = vmatprep.subr.bf16.mxu1 %v1844_v23 }
  0x9c   : > { %1316 = vmatprep.subr.bf16.mxu0 %v1847_v24 }
  0x9e   : > { %1211 = vmatpush1.bf16.msra.mxu1 %v1842_v25 }
  0x9f   : > { %1317 = vmatpush1.bf16.msra.mxu0 %v1845_v26  ;;  %1212 = vmatprep.subr.bf16.mxu1 %v1850_v27 }
  0xa0   : > { %1318 = vmatprep.subr.bf16.mxu0 %v1853_v28 }
  0xa2   : > { %1213 = vmatpush1.bf16.msra.mxu1 %v1848_v29 }
  0xa3   : > { %1319 = vmatpush1.bf16.msra.mxu0 %v1851_v30  ;;  %1214 = vmatprep.subr.bf16.mxu1 %v1856_v31 }
  0xa4   : > { %1320 = vmatprep.subr.bf16.mxu0 %v1859_v32 }
  0xa6   : > { %1215 = vmatpush1.bf16.msra.mxu1 %v1854_v33 }
  0xa7   : > { %1321 = vmatpush1.bf16.msra.mxu0 %v1857_v34  ;;  %1216 = vmatprep.subr.bf16.mxu1 %v1862_v35 }
  0xa8   : > { %1322 = vmatprep.subr.bf16.mxu0 %v1865_v36 }
  0xaa   : > { %1217 = vmatpush1.bf16.msra.mxu1 %v1860_v37 }
  0xab   : > { %1323 = vmatpush1.bf16.msra.mxu0 %v1863_v38 }
  0xad   : > { %1219 = vmatmul.mubr.bf16.vlgmr.msra.gmra.mrb[0].mxu1 %v1461_v43 }
  0xae   : > { %1325 = vmatmul.mubr.bf16.vlgmr.msra.gmra.mrb[0].mxu0 %v1465_v44  ;;  %1228 = vmatprep.mubr.bf16.mxu1 %v1470_v45 }
  0xaf   : > { %1334 = vmatprep.mubr.bf16.mxu0 %v1474_v46 }
  0xb5   : > { %1229 = vmatmul.mubr.bf16.gmra.mrb[4].mxu1 %v1469_v47 }
  0xb6   : > { %1335 = vmatmul.mubr.bf16.gmra.mrb[4].mxu0 %v1473_v48 }
 0x180   : > { %v1220_v49 = vpop.f32.mrb[0].mxu1 }
 0x181   : > { %v1326_v51 = vpop.f32.mrb[0].mxu0  ;;  %v1222_v53 = vpop.f32.mrb[1].mxu1 }
 0x182   : > { %v1609_v52 = vadd.f32 %v1326_v51, %v1220_v49  ;;  %v1328_v55 = vpop.f32.mrb[1].mxu0  ;;  %v1224_v57 = vpop.f32.mrb[2].mxu1 }
 0x183   : > { %v1610_v56 = vadd.f32 %v1328_v55, %v1222_v53  ;;  %v1330_v59 = vpop.f32.mrb[2].mxu0  ;;  %v1226_v62 = vpop.f32.mrb[3].mxu1 }
 0x184   : > { %v1345_v60 = vadd.f32 %v1609_v52, %v261_v50  ;;  %v1611_v61 = vadd.f32 %v1330_v59, %v1224_v57  ;;  %v1332_v0 = vpop.f32.mrb[3].mxu0 }
 0x185   : > { %v1346_v1 = vadd.f32 %v1610_v56, %v262_v54  ;;  %v1612_v2 = vadd.f32 %v1332_v0, %v1226_v62 }
 0x186   : > { %1353 = vst [vmem:[%s2244_s2] sm:$0xff] %v1345_v60  ;;  %v1347_v3 = vadd.f32 %v1611_v61, %v263_v58 }
 0x187   : > { %1354 = vst [vmem:[%s2244_s2 + $0x8] sm:$0xff] %v1346_v1  ;;  %v1348_v4 = vadd.f32 %v1612_v2, %v264_v63 }
 0x188   : > { %1355 = vst [vmem:[%s2244_s2 + $0x10] sm:$0xff] %v1347_v3  ;;  %v1230_v5 = vpop.f32.mrb[4].mxu1 }
 0x189   : > { %1356 = vst [vmem:[%s2244_s2 + $0x18] sm:$0xff] %v1348_v4  ;;  %v1336_v7 = vpop.f32.mrb[4].mxu0  ;;  %v1232_v9 = vpop.f32.mrb[5].mxu1 }
 0x18a   : > { %v1613_v8 = vadd.f32 %v1336_v7, %v1230_v5  ;;  %v1338_v11 = vpop.f32.mrb[5].mxu0  ;;  %v1234_v13 = vpop.f32.mrb[6].mxu1 }
 0x18b   : > { %v1614_v12 = vadd.f32 %v1338_v11, %v1232_v9  ;;  %v1340_v15 = vpop.f32.mrb[6].mxu0  ;;  %v1236_v18 = vpop.f32.mrb[7].mxu1 }
 0x18c   : > { %v1349_v16 = vadd.f32 %v1613_v8, %v265_v6  ;;  %v1615_v17 = vadd.f32 %v1340_v15, %v1234_v13  ;;  %v1342_v20 = vpop.f32.mrb[7].mxu0 }
 0x18d   : > { %v1350_v21 = vadd.f32 %v1614_v12, %v266_v10  ;;  %v1616_v22 = vadd.f32 %v1342_v20, %v1236_v18 }
 0x18e   : > { %1357 = vst [vmem:[%s2244_s2 + $0x20] sm:$0xff] %v1349_v16  ;;  %v1351_v23 = vadd.f32 %v1615_v17, %v267_v14 }
 0x18f   : > { %1358 = vst [vmem:[%s2244_s2 + $0x28] sm:$0xff] %v1350_v21  ;;  %v1352_v24 = vadd.f32 %v1616_v22, %v268_v19 }
 0x190   : > { %1359 = vst [vmem:[%s2244_s2 + $0x30] sm:$0xff] %v1351_v23 }
 0x191   : > { %1360 = vst [vmem:[%s2244_s2 + $0x38] sm:$0xff] %v1352_v24 }
 0x192 PF: > { %s12_s13 = sadd.s32 1, %s1904_s13   ;;  %s2245_s9 = smov %s1892_s10 }
 0x193   : > { %p9_p11 = scmp.ge.s32.totalorder %s12_s13, 6   ;;  %s2246_s10 = smov %s1957_s17 }
 0x194   : > { %s2247_s11 = smov %s1900_s12  ;;  %s2248_s12 = smov %s2250_s14 }
 0x195   :  { %11 = sbr.rel (!%p9_p11) target bundleno = 3 (0x3), region = 93 }

// kernel: _lambda_.8
= control target key start
LH: loop header
LB: loop body
LE: loop exit
PB: predicated region body
PF: predicated region fallthrough
CT: control target
= control target key end

     0   :  { %s7040_s0 = inlined_call_operand.vmem [shape: f32[2,32,128], index: 0, kind: input, shape index: {}]   ;;  %s7041_s1 = inlined_call_operand.vmem [shape: f32[8], index: 1, kind: input, shape index: {}, may-alias: {1,2}]   ;;  %s7042_s2 = inlined_call_operand.vmem [shape: f32[8], index: 2, kind: input, shape index: {}, may-alias: {1,2}]   ;;  %s7043_s3 = inlined_call_operand.vmem [shape: bf16[8,64,32], index: 3, kind: input, shape index: {}]   ;;  %s7044_s4 = inlined_call_operand.vmem [shape: f32[8,64,1], index: 4, kind: input, shape index: {}]   ;;  %s7045_s5 = inlined_call_operand.vmem [shape: f32[8,64,1], index: 5, kind: input, shape index: {}, may-alias: {5,9}]   ;;  %s7046_s6 = inlined_call_operand.vmem [shape: f32[8,64,1], index: 6, kind: input, shape index: {}, may-alias: {6,10}]   ;;  %s7047_s7 = inlined_call_operand.vmem [shape: f32[8,64,3], index: 7, kind: input, shape index: {}]   ;;  %s7048_s8 = inlined_call_operand.vmem [shape: f32[8,64,1], index: 8, kind: input, shape index: {}]   ;;  %s7049_s9 = inlined_call_operand.vmem [shape: f32[8,64,1], index: 9, kind: input, shape index: {}, may-alias: {5,9}]   ;;  %s7050_s10 = inlined_call_operand.vmem [shape: f32[8,64,1], index: 10, kind: input, shape index: {}, may-alias: {6,10}]   ;;  %s7051_s11 = inlined_call_operand.vmem [shape: bf16[8,32,64], index: 11, kind: input, shape index: {}]   ;;  %s7052_s12 = inlined_call_operand.vmem [shape: f32[8,32,1], index: 12, kind: input, shape index: {}]   ;;  %s7053_s13 = inlined_call_operand.vmem [shape: f32[2,32,128], index: 13, kind: output, shape index: {}]  }
   0x1   :  { %7061 = sst [smem:[#allocation9_spill]] %s7040_s0 }
   0x2   :  { %7062 = sst [smem:[#allocation10_spill]] %s7041_s1 }
   0x3   :  { %7063 = sst [smem:[#allocation11_spill]] %s7042_s2 }
   0x4   :  { %7064 = sst [smem:[#allocation12_spill]] %s7043_s3 }
   0x5   :  { %7065 = sst [smem:[#allocation13_spill]] %s7044_s4 }
   0x6   :  { %18 = vsyncpa [#allocation3], 0 }
   0x7   :  { %19 = vsyncpa [#allocation5], 0  ;;  %s5366_s25 = smov 0   ;;  %s5368_s26 = smov 0  }
   0x8   :  { %s5370_s27 = smov 0   ;;  %s5372_s28 = smov 0  }
   0x9   :  { %s5374_s29 = smov 0  }
   0xa LB: > { %s3121_s30 = sadd.s32 4294967295, %s4804_s29   ;;  %s34_s14 = sadd.s32 1, %s4796_s27  ;;  %s4804_s29 = sphi %s5374_s29, %s25_s29   ;;  %s4800_s28 = sphi %s5372_s28, %s7149_s28   ;;  %s4796_s27 = sphi %s5370_s27, %s7148_s27   ;;  %s4792_s26 = sphi %s5368_s26, %s7147_s26   ;;  %s4788_s25 = sphi %s5366_s25, %s7146_s25  }
   0xb   : > { %p35_p0 = scmp.ge.s32.totalorder %s34_s14, 8  ;;  %s37_s15 = sadd.s32 1, %s4800_s28 }
   0xc   : > { %p3123_p1 = scmp.ge.s32.totalorder %s4804_s29, 1  ;;  %p346_p2 = scmp.lt.s32.totalorder %s4804_s29, 17 }
   0xd   : > { %s7151_s14 = smov (%p35_p0, %s34_s14), 0  ;;  %s7153_s15 = smov (!%p35_p0, %s37_s15), %s4800_s28 }
   0xe   : > { %p5399_p3 = pnand %p3123_p1, %p346_p2  ;;  %p39_p4 = scmp.ge.s32.totalorder %s7153_s15, 2 }
   0xf   : > { %p5403_p5 = scmp.eq.s32.totalorder %s3121_s30, 0  ;;  %s7068_s1 = sld [smem:[#allocation10_spill]] }
  0x10   : > { %s7066_s16 = scalar_select %p5399_p3, 1, 0 }
  0x11   : > { %s7067_s17 = scalar_select %p5403_p5, 1, 0 }
  0x12   : > { %p3229_p6 = pneg %p5399_p3  ;;  %s7155_s15 = smov (%p39_p4, %s7153_s15), 0 }
  0x13   : > { %s7070_s2 = sld [smem:[#allocation11_spill]] }
  0x14   : > { %p5416_p7 = pnand %p5403_p5, %p3229_p6 }
  0x15   : > { %s359_s20 = sshll.u32 %s7068_s1, 4  ;;  %s360_s20 = int_to_ptr.vmem [resolvable:$true] %s359_s20 }
  0x16   : > { %s4280_s30 = scalar_lea.vmem %s360_s20, 16  ;;  %p4282_p9 = pneg %p5416_p7 }
  0x17   : > { %p4281_p8 = scmp.ne.s32.totalorder %s360_s20, %s4280_s30  ;;  %p4288_p12 = scmp.lt.s32.totalorder %s360_s20, %s360_s20 }
  0x18   : > { %p4289_p13 = scmp.lt.s32.totalorder %s4280_s30, %s4280_s30 }
  0x19   : > { %s370_s24 = sshll.u32 %s7070_s2, 4  ;;  %p4283_p10 = pnand %p4282_p9, %p4281_p8  ;;  %s371_s24 = int_to_ptr.vmem [resolvable:$true] %s370_s24 }
  0x1a   : > { %p4290_p0 = por %p4289_p13, %p4288_p12 }
  0x1b   : > { %p4284_p11 = pneg %p4283_p10 }
  0x1d   : > { %p4291_p1 = pnand %p4290_p0, %p4284_p11 }
  0x1f   : > { %4294 = shalt.err (!%p4291_p1)
}
  0x20   : > { %s5254_s18 = smov [#allocation2]   ;;  %s4295_s19 = scalar_lea.vmem %s371_s24, 16 }
  0x21   : > { %3232 = dma.vmem_to_smem (!%p5416_p7), %s360_s20, 16, %s5254_s18, [#allocation3]  }
  0x22   : > { %p4296_p2 = scmp.ne.s32.totalorder %s371_s24, %s4295_s19  ;;  %p4303_p5 = scmp.lt.s32.totalorder %s371_s24, %s371_s24 }
  0x23   : > { %p4304_p3 = scmp.lt.s32.totalorder %s4295_s19, %s4295_s19 }
  0x24   : > { %p4298_p4 = pnand %p4296_p2, %p4282_p9 }
  0x25   : > { %p4305_p8 = por %p4304_p3, %p4303_p5 }
  0x26   : > { %p4299_p6 = pneg %p4298_p4 }
  0x28   : > { %p4306_p10 = pnand %p4305_p8, %p4299_p6 }
  0x2a   : > { %4309 = shalt.err (!%p4306_p10)
}
  0x2b   : > { %s5255_s22 = smov [#allocation4]   ;;  %p7071_p11 = scmp.ne.s32.totalorder %s7066_s16, 0 }
  0x2c   : > { %3235 = dma.vmem_to_smem (!%p5416_p7), %s371_s24, 16, %s5255_s22, [#allocation5]  }
  0x2d   : > { %421 = sbr.rel (%p7071_p11) target bundleno = 3275 (0xccb), region = 72 }
  0x34   : > { %p7072_p12 = scmp.ne.s32.totalorder %s7067_s17, 0 }
  0x36   : > { %4779 = dma.done.wait (%p7072_p12), [#allocation3], 16  }
  0x37   : > { %4781 = vsyncadd (%p7072_p12), [#allocation3], 4294967280 }
  0x38   : > { %4783 = dma.done.wait (%p7072_p12), [#allocation5], 16  }
  0x39   : > { %4785 = vsyncadd (%p7072_p12), [#allocation5], 4294967280 }
  0x3a   : > { %431 = sfence }
  0x3b   : > { %p470_p3 = scmp.lt.s32.totalorder %s4792_s26, 1  ;;  %s482_s16 = ssub.s32 0, %s4788_s25 }
  0x3c   : > { %p481_p5 = scmp.lt.s32.totalorder %s4788_s25, 0  ;;  %s3134_s20 = smin.u32 %s4788_s25, %s482_s16 }
  0x3d   : > { %s7157_s26 = smov (!%p470_p3, %s4792_s26), 1  ;;  %s484_s23 = sand.u32 7, %s3134_s20  }
  0x3e   : > { %s3169_s21 = sshll.u32 %s7157_s26, 5  ;;  %s7073_s0 = sld [smem:[#allocation9_spill]] }
  0x3f   : > { %s5450_s22 = scalar_lea.vmem %s7053_s13, %s3169_s21  ;;  %s485_s1 = ssub.s32 0, %s484_s23 }
  0x40   : > { %s7159_s1 = smov (!%p481_p5, %s485_s1), %s484_s23  ;;  %p3137_p9 = scmp.ne.s32.totalorder %s4788_s25, 0 }
  0x41   : > { %p3136_p7 = scmp.lt.s32.totalorder %s7159_s1, 0  ;;  %s491_s2 = sadd.s32 8, %s7159_s1 }
  0x42   : > { %496 = sbr.rel (%p3137_p9) target bundleno = 73 (0x49), region = 84 }
  0x43   : > { %s7161_s2 = smov (!%p3136_p7, %s491_s2), %s7159_s1 }
  0x44   : > { %s474_s18 = scalar_lea.vmem %s7073_s0, %s3169_s21 }
  0x45   : > { %v497_v0 = vld [vmem:[%s474_s18] sm:$0xff] (!%p3137_p9)  ;;  %v498_v1 = vld [vmem:[%s474_s18 + $0x8] sm:$0xff] (!%p3137_p9)  ;;  %v499_v2 = vld [vmem:[%s474_s18 + $0x10] sm:$0xff] (!%p3137_p9) }
  0x46   : > { %501 = vst [vmem:[%s5450_s22] sm:$0xff] (!%p3137_p9), %v497_v0  ;;  %502 = vst [vmem:[%s5450_s22 + $0x8] sm:$0xff] (!%p3137_p9), %v498_v1  ;;  %v500_v3 = vld [vmem:[%s474_s18 + $0x18] sm:$0xff] (!%p3137_p9) }
  0x47   : > { %503 = vst [vmem:[%s5450_s22 + $0x10] sm:$0xff] (!%p3137_p9), %v499_v2  ;;  %504 = vst [vmem:[%s5450_s22 + $0x18] sm:$0xff] (!%p3137_p9), %v500_v3 }
  0x49 PF: > { %s7057_s1 = sshll.u32 %s4788_s25, 5  ;;  %s7075_s3 = sld [smem:[#allocation12_spill]]  ;;  %vm597_vm0 = vcmask 261120   ;;  %v7058_v9 = vmov 0   ;;  %v505_v33 = vlaneseq  ;;  %v5257_v47 = vmov 0.0  }
  0x4a   : > { %4218 = vset.pattern.permute.xlu0 %v7058_v9  ;;  %s5483_s21 = sshll.u32 %s4788_s25, 6  ;;  %4219 = vset.pattern.permute.xlu1 %v7058_v9  ;;  %s7076_s4 = sld [smem:[#allocation13_spill]] }
  0x4b   : > { %s903_s17 = scalar_lea.vmem %s7047_s7, %s5483_s21  ;;  %s683_s26 = sld [smem:[#allocation2 + %s4788_s25]]  ;;  %v5531_v35 = vand.u32 127, %v505_v33 }
  0x4c   : > { %v5503_v15 = vld [vmem:[%s903_s17] sm:$0xff]  ;;  %v5505_v16 = vld [vmem:[%s903_s17 + $0x8] sm:$0xff]  ;;  %v5507_v17 = vld [vmem:[%s903_s17 + $0x10] sm:$0xff]  ;;  %s5580_s23 = scalar_lea.vmem %s7046_s6, %s5483_s21  ;;  %s5258_s16 = smov 0.0  }
  0x4d   : > { %v5460_v4 = vld [vmem:[%s5450_s22] sm:$0xff]  ;;  %v5463_v5 = vld [vmem:[%s5450_s22 + $0x8] sm:$0xff]  ;;  %v5509_v18 = vld [vmem:[%s903_s17 + $0x18] sm:$0xff]  ;;  %vm507_vm1 = vcmp.lt.s32.totalorder %v5531_v35, 34  ;;  %p912_p13 = scmp.lt.s32.totalorder %s7161_s2, 4  ;;  %p3150_p0 = scmp.ge.s32.totalorder %s7161_s2, 4 }
  0x4e   : > { %7074 = vst [vmem:[#allocation8_spill] sm:$0xff] %v5463_v5  ;;  %v5466_v6 = vld [vmem:[%s5450_s22 + $0x10] sm:$0xff]  ;;  %v525_v7 = vpack.c.bf16 %v5463_v5, %v5460_v4  ;;  %v5472_v8 = vld [vmem:[%s5450_s22 + $0x18] sm:$0xff]  ;;  %v5511_v19 = vld [vmem:[%s903_s17 + $0x20] sm:$0xff]  ;;  %v5534_v48 = vsel %vm507_vm1, 1.0, %v5257_v47  ;;  %p916_p1 = scmp.lt.s32.totalorder (!%p3150_p0), %s7161_s2, 2 }
  0x4f   : > { %s5479_s20 = scalar_lea.vmem %s7075_s3, %s7057_s1  ;;  %v526_v10 = vpack.c.bf16 %v5472_v8, %v5466_v6  ;;  %v5513_v20 = vld [vmem:[%s903_s17 + $0x28] sm:$0xff]  ;;  %v5515_v21 = vld [vmem:[%s903_s17 + $0x30] sm:$0xff]  ;;  %v5517_v22 = vld [vmem:[%s903_s17 + $0x38] sm:$0xff]  ;;  %p3151_p2 = scmp.ge.s32.totalorder (!%p3150_p0), %s7161_s2, 2 }
  0x50   : > { %v4220_v11 = vld [vmem:[%s5479_s20] sm:$0xff]   ;;  %3185 = vmatprep.subr.bf16.mxu0 %v525_v7  ;;  %s5493_s30 = scalar_lea.vmem %s7076_s4, %s5483_s21  ;;  %v4221_v12 = vld [vmem:[%s5479_s20 + $0x8] sm:$0xff]   ;;  %v4222_v13 = vld [vmem:[%s5479_s20 + $0x10] sm:$0xff]   ;;  %s772_s4 = scalar_lea.vmem %s7045_s5, %s5483_s21 }
  0x51   : > { %3186 = vmatpush3.bf16.msra.mxu0 %v525_v7  ;;  %3189 = vmatprep.mubr.msk.bf16.mxu0 %vm597_vm0, %v4220_v11  ;;  %v529_v14 = vld [vmem:[%s5493_s30] sm:$0xff]  ;;  %v531_v23 = vld [vmem:[%s5493_s30 + $0x10] sm:$0xff]  ;;  %v530_v24 = vld [vmem:[%s5493_s30 + $0x8] sm:$0xff]  ;;  %v684_v38 = vstv %s683_s26 }
  0x52   : > { %3187 = vmatprep.subr.bf16.mxu0 %v526_v10  ;;  %539 = vperm.xlu0 %4218, %v529_v14   ;;  %v532_v25 = vld [vmem:[%s5493_s30 + $0x18] sm:$0xff]  ;;  %v533_v26 = vld [vmem:[%s5493_s30 + $0x20] sm:$0xff]  ;;  %v534_v28 = vld [vmem:[%s5493_s30 + $0x28] sm:$0xff] }
  0x53   : > { %549 = vperm.xlu1 %4219, %v531_v23   ;;  %v4223_v27 = vld [vmem:[%s5479_s20 + $0x18] sm:$0xff]   ;;  %v535_v29 = vld [vmem:[%s5493_s30 + $0x30] sm:$0xff] }
  0x54   : > { %v536_v30 = vld [vmem:[%s5493_s30 + $0x38] sm:$0xff] }
  0x55   : > { %3188 = vmatpush3.bf16.msra.mxu0 %v526_v10 }
  0x56   : > { %544 = vperm.xlu0 %4218, %v530_v24  }
  0x57   : > { %554 = vperm.xlu1 %4219, %v532_v25  }
  0x58   : > { %3190 = vmatmul.mubr.msk.bf16.vlgmr.msra.gmra.mrb[0].mxu0 %vm597_vm0, %v4221_v12 }
  0x59   : > { %3193 = vmatprep.mubr.msk.bf16.mxu0 %vm597_vm0, %v4222_v13 }
  0x5a   : > { %559 = vperm.xlu0 %4218, %v533_v26  }
  0x5b   : > { %564 = vperm.xlu1 %4219, %v534_v28  }
  0x5e   : > { %569 = vperm.xlu0 %4218, %v535_v29  }
  0x5f   : > { %574 = vperm.xlu1 %4219, %v536_v30  }
  0x60   : > { %3194 = vmatmul.mubr.msk.bf16.gmra.mrb[4].mxu0 %vm597_vm0, %v4223_v27 }
  0xd1   : > { %v540_v31 = vpop.permute.xlu0 %539 }
  0xd2   : > { %v550_v32 = vpop.permute.xlu1 %549 }
  0xd5   : > { %v545_v34 = vpop.permute.xlu0 %544 }
  0xd6   : > { %v555_v36 = vpop.permute.xlu1 %554 }
  0xd9   : > { %v560_v41 = vpop.permute.xlu0 %559 }
  0xda   : > { %v565_v51 = vpop.permute.xlu1 %564 }
  0xdd   : > { %v570_v58 = vpop.permute.xlu0 %569 }
  0xde   : > { %v575_v10 = vpop.permute.xlu1 %574 }
 0x12b   : > { %v3191_v37 = vpop.f32.mrb[0].mxu0 }
 0x12c   : > { %v653_v39 = vadd.f32 %v3191_v37, %v550_v32  ;;  %v644_v40 = vpop.f32.mrb[1].mxu0 }
 0x12d   : > { %v645_v42 = vadd.f32 %v644_v40, %v540_v31  ;;  %v3192_v43 = vpop.f32.mrb[2].mxu0 }
 0x12e   : > { %vm677_vm2 = vcmp.ge.f32.partialorder %v653_v39, 0.0  ;;  %v687_v44 = vmul.f32 %v684_v38, %v653_v39  ;;  %v656_v45 = vadd.f32 %v3192_v43, %v555_v36  ;;  %v647_v46 = vpop.f32.mrb[3].mxu0 }
 0x12f   : > { %vm675_vm3 = vcmp.ge.f32.partialorder %v645_v42, 0.0  ;;  %v685_v49 = vmul.f32 %v684_v38, %v645_v42  ;;  %v648_v50 = vadd.f32 %v647_v46, %v545_v34 }
 0x130   : > { %vm678_vm4 = vcmp.ge.f32.partialorder %v656_v45, 0.0  ;;  %v688_v52 = vmul.f32 %v684_v38, %v656_v45  ;;  %v695_v53 = vsel %vm677_vm2, %v653_v39, %v687_v44 }
 0x131   : > { %v693_v54 = vsel %vm675_vm3, %v645_v42, %v685_v49  ;;  %vm676_vm5 = vcmp.ge.f32.partialorder %v648_v50, 0.0  ;;  %v686_v55 = vmul.f32 %v684_v38, %v648_v50  ;;  %v5540_v61 = vmul.f32 %v5534_v48, %v695_v53 }
 0x132   : > { %v5537_v56 = vmul.f32 %v5534_v48, %v693_v54  ;;  %v696_v57 = vsel %vm678_vm4, %v656_v45, %v688_v52 }
 0x133   : > { %v694_v59 = vsel %vm676_vm5, %v648_v50, %v686_v55  ;;  %v3195_v60 = vpop.f32.mrb[4].mxu0  ;;  %v5543_v62 = vmul.f32 %v5534_v48, %v696_v57  ;;  %v730_v26 = vmul.f32 %v5540_v61, %v695_v53 }
 0x134   : > { %v5546_v63 = vmul.f32 %v5534_v48, %v694_v59  ;;  %v669_v0 = vadd.f32 %v3195_v60, %v570_v58  ;;  %v660_v1 = vpop.f32.mrb[5].mxu0  ;;  %v728_v2 = vmul.f32 %v5537_v56, %v693_v54  ;;  %v840_v58 = vld [vmem:[%s5580_s23 + $0x8] sm:$0xff]  ;;  %v842_v60 = vld [vmem:[%s5580_s23 + $0x18] sm:$0xff] }
 0x135   : > { %v661_v3 = vadd.f32 %v660_v1, %v560_v41  ;;  %v3196_v7 = vpop.f32.mrb[6].mxu0  ;;  %v731_v27 = vmul.f32 %v5543_v62, %v696_v57  ;;  %v844_v1 = vld [vmem:[%s5580_s23 + $0x28] sm:$0xff] }
 0x136   : > { %v709_v11 = vadd.f32 %v5546_v63, %v5537_v56  ;;  %v729_v12 = vmul.f32 %v5546_v63, %v694_v59  ;;  %vm681_vm6 = vcmp.ge.f32.partialorder %v669_v0, 0.0  ;;  %v691_v13 = vmul.f32 %v684_v38, %v669_v0  ;;  %v663_v14 = vpop.f32.mrb[7].mxu0  ;;  %v839_v59 = vld [vmem:[%s5580_s23] sm:$0xff] }
 0x137   : > { %vm679_vm7 = vcmp.ge.f32.partialorder %v661_v3, 0.0  ;;  %v689_v23 = vmul.f32 %v684_v38, %v661_v3  ;;  %v672_v24 = vadd.f32 %v3196_v7, %v575_v10  ;;  %v664_v25 = vadd.f32 %v663_v14, %v565_v51 }
 0x138   : > { %v736_v28 = vadd.f32 %v729_v12, %v728_v2  ;;  %v710_v29 = vadd.f32 %v709_v11, %v5540_v61  ;;  %v699_v30 = vsel %vm681_vm6, %v669_v0, %v691_v13  ;;  %v841_v0 = vld [vmem:[%s5580_s23 + $0x10] sm:$0xff]  ;;  %v843_v2 = vld [vmem:[%s5580_s23 + $0x20] sm:$0xff] }
 0x139   : > { %v697_v31 = vsel %vm679_vm7, %v661_v3, %v689_v23  ;;  %vm682_vm8 = vcmp.ge.f32.partialorder %v672_v24, 0.0  ;;  %v692_v32 = vmul.f32 %v684_v38, %v672_v24  ;;  %vm680_vm9 = vcmp.ge.f32.partialorder %v664_v25, 0.0 }
 0x13a   : > { %v737_v33 = vadd.f32 %v736_v28, %v730_v26  ;;  %v5556_v34 = vmul.f32 %v5534_v48, %v697_v31  ;;  %v690_v36 = vmul.f32 %v684_v38, %v664_v25  ;;  %v711_v37 = vadd.f32 %v710_v29, %v5543_v62 }
 0x13b   : > { %v700_v40 = vsel %vm682_vm8, %v672_v24, %v692_v32  ;;  %v5561_v43 = vmul.f32 %v5534_v48, %v699_v30  ;;  %v774_v32 = vld [vmem:[%s772_s4 + $0x8] sm:$0xff] }
 0x13c   : > { %v732_v39 = vmul.f32 %v5556_v34, %v697_v31  ;;  %v698_v41 = vsel %vm680_vm9, %v664_v25, %v690_v36  ;;  %v738_v42 = vadd.f32 %v737_v33, %v731_v27  ;;  %v712_v45 = vadd.f32 %v711_v37, %v5556_v34  ;;  %v773_v33 = vld [vmem:[%s772_s4] sm:$0xff] }
 0x13d   : > { %v5564_v44 = vmul.f32 %v5534_v48, %v698_v41  ;;  %v5569_v38 = vmul.f32 %v5534_v48, %v700_v40  ;;  %v734_v51 = vmul.f32 %v5561_v43, %v699_v30 }
 0x13e   : > { %v739_v46 = vadd.f32 %v738_v42, %v732_v39 }
 0x13f   : > { %v733_v47 = vmul.f32 %v5564_v44, %v698_v41  ;;  %v713_v49 = vadd.f32 %v712_v45, %v5564_v44  ;;  %v735_v54 = vmul.f32 %v5569_v38, %v700_v40  ;;  %v776_v40 = vld [vmem:[%s772_s4 + $0x18] sm:$0xff]  ;;  %v775_v41 = vld [vmem:[%s772_s4 + $0x10] sm:$0xff] }
 0x141   : > { %v714_v50 = vadd.f32 %v713_v49, %v5561_v43  ;;  %v740_v52 = vadd.f32 %v739_v46, %v733_v47  ;;  %v778_v46 = vld [vmem:[%s772_s4 + $0x28] sm:$0xff]  ;;  %v777_v47 = vld [vmem:[%s772_s4 + $0x20] sm:$0xff] }
 0x143   : > { %v715_v53 = vadd.f32 %v714_v50, %v5569_v38  ;;  %v741_v55 = vadd.f32 %v740_v52, %v734_v51  ;;  %v780_v51 = vld [vmem:[%s772_s4 + $0x38] sm:$0xff]  ;;  %v779_v52 = vld [vmem:[%s772_s4 + $0x30] sm:$0xff] }
 0x145   : > { %716 = vadd.xlane.f32.xlu0 %v715_v53  ;;  %v742_v57 = vadd.f32 %v741_v55, %v735_v54  ;;  %v846_v55 = vld [vmem:[%s5580_s23 + $0x38] sm:$0xff] }
 0x147   : > { %743 = vadd.xlane.f32.xlu1 %v742_v57  ;;  %v845_v57 = vld [vmem:[%s5580_s23 + $0x30] sm:$0xff] }
 0x158   : > { %854 = vperm.xlu1 %4219, %v840_v58  }
 0x15b   : > { %849 = vperm.xlu0 %4218, %v839_v59  }
 0x15c   : > { %864 = vperm.xlu1 %4219, %v842_v60  }
 0x15f   : > { %859 = vperm.xlu0 %4218, %v841_v0  }
 0x160   : > { %874 = vperm.xlu1 %4219, %v844_v1  }
 0x163   : > { %869 = vperm.xlu0 %4218, %v843_v2  }
 0x1d2   : > { %v717_v3 = vpop.xlane.xlu0 %716 }
 0x1d3   : > { %v718_v7 = vrot.slane %v717_v3, 4 }
 0x1d4   : > { %v744_v10 = vpop.xlane.xlu1 %743 }
 0x1d5   : > { %v719_v11 = vadd.f32 %v718_v7, %v717_v3  ;;  %v745_v12 = vrot.slane %v744_v10, 4 }
 0x1d7   : > { %v720_v13 = vrot.slane %v719_v11, 2  ;;  %v746_v14 = vadd.f32 %v745_v12, %v744_v10 }
 0x1d8   : > { %v855_v58 = vpop.permute.xlu1 %854 }
 0x1d9   : > { %v747_v23 = vrot.slane %v746_v14, 2  ;;  %v721_v24 = vadd.f32 %v720_v13, %v719_v11 }
 0x1da   : > { %v850_v59 = vpop.permute.xlu0 %849 }
 0x1db   : > { %v722_v25 = vrot.slane %v721_v24, 1  ;;  %v748_v26 = vadd.f32 %v747_v23, %v746_v14  ;;  %v888_v14 = vmul.f32 %v5534_v48, %v855_v58  ;;  %v887_v23 = vmul.f32 %v5534_v48, %v850_v59 }
 0x1dc   : > { %v865_v60 = vpop.permute.xlu1 %864 }
 0x1dd   : > { %v723_v27 = vadd.f32 %v722_v25, %v721_v24  ;;  %v749_v28 = vrot.slane %v748_v26, 1 }
 0x1de   : > { %v860_v0 = vpop.permute.xlu0 %859 }
 0x1df   : > { %3209 = vpush %v723_v27  ;;  %v750_v29 = vadd.f32 %v749_v28, %v748_v26 }
 0x1e0   : > { %v875_v3 = vpop.permute.xlu1 %874 }
 0x1e1   : > { %3211 = vpush %v750_v29 }
 0x1e2   : > { %v870_v7 = vpop.permute.xlu0 %869 }
 0x210   : > { %s3210_s24 = spop %3209 }
 0x211   : > { %s5588_s30 = smul.f32 0.00045955883, %s3210_s24 }
 0x212   : > { %s3212_s18 = spop %3211 }
 0x213   : > { %s755_s19 = smul.f32 %s5588_s30, %s5588_s30  ;;  %v758_v1 = vstv %s5588_s30 }
 0x214   : > { %s754_s17 = smul.f32 0.00045955883, %s3212_s18  ;;  %v759_v2 = vmul.f32 %v5534_v48, %v758_v1  ;;  %v5637_v1 = vmov 0  }
 0x216   : > { %s756_s26 = ssub.f32 %s754_s17, %s755_s19  ;;  %v761_v10 = vsub.f32 %v5546_v63, %v759_v2  ;;  %v760_v11 = vsub.f32 %v5537_v56, %v759_v2  ;;  %v763_v28 = vsub.f32 %v5543_v62, %v759_v2  ;;  %v762_v29 = vsub.f32 %v5540_v61, %v759_v2 }
 0x217   : > { %v890_v56 = vmul.f32 %v5534_v48, %v865_v60  ;;  %v892_v61 = vmul.f32 %v5534_v48, %v875_v3  ;;  %v5645_v3 = vmov 0  }
 0x218   : > { %s757_s20 = smax.f32 %s5258_s16, %s756_s26 }
 0x219   : > { %s768_s1 = sadd.f32 1e-08, %s757_s20 }
 0x21b   : > { %v769_v30 = vstv %s768_s1 }
 0x21c   : > { %4224 = vrsqrt.f32 %v769_v30 }
 0x226   : > { %v4225_v31 = vpop.eup %4224 }
 0x227   : > { %3213 = vpush %v4225_v31  ;;  %v889_v31 = vmul.f32 %v5534_v48, %v860_v0  ;;  %v5635_v0 = vmov 0  }
 0x258   : > { %s3214_s24 = spop %3213 }
 0x259   : > { %v781_v36 = vstv %s3214_s24 }
 0x25a   : > { %v783_v37 = vmul.f32 %v781_v36, %v774_v32  ;;  %v782_v39 = vmul.f32 %v781_v36, %v773_v33  ;;  %v785_v42 = vmul.f32 %v781_v36, %v776_v40  ;;  %v784_v45 = vmul.f32 %v781_v36, %v775_v41 }
 0x25b   : > { %v787_v49 = vmul.f32 %v781_v36, %v778_v46  ;;  %v786_v50 = vmul.f32 %v781_v36, %v777_v47  ;;  %v789_v53 = vmul.f32 %v781_v36, %v780_v51  ;;  %v788_v54 = vmul.f32 %v781_v36, %v779_v52 }
 0x25c   : > { %797 = vperm.xlu1 %4219, %v783_v37   ;;  %792 = vperm.xlu0 %4218, %v782_v39   ;;  %v765_v39 = vsub.f32 %v5564_v44, %v759_v2  ;;  %v764_v40 = vsub.f32 %v5556_v34, %v759_v2  ;;  %v767_v52 = vsub.f32 %v5569_v38, %v759_v2  ;;  %v5639_v38 = vmov 0  }
 0x25d   : > { %v766_v44 = vsub.f32 %v5561_v43, %v759_v2  ;;  %v5641_v43 = vmov 0   ;;  %v5643_v2 = vmov 0  }
 0x260   : > { %807 = vperm.xlu1 %4219, %v785_v42   ;;  %802 = vperm.xlu0 %4218, %v784_v45   ;;  %v891_v42 = vmul.f32 %v5534_v48, %v870_v7  ;;  %v5647_v7 = vmov 0  }
 0x264   : > { %817 = vperm.xlu1 %4219, %v787_v49   ;;  %812 = vperm.xlu0 %4218, %v786_v50  }
 0x268   : > { %827 = vperm.xlu1 %4219, %v789_v53   ;;  %822 = vperm.xlu0 %4218, %v788_v54  }
 0x26c   : > { %884 = vperm.xlu1 %4219, %v846_v55   ;;  %879 = vperm.xlu0 %4218, %v845_v57  }
 0x2db   : > { %v798_v12 = vpop.permute.xlu1 %797  ;;  %v793_v13 = vpop.permute.xlu0 %792 }
 0x2dc   : > { %v831_v24 = vmul.f32 %v798_v12, %v761_v10  ;;  %v830_v25 = vmul.f32 %v793_v13, %v760_v11  ;;  %v5649_v10 = vmov 0   ;;  %v5653_v11 = vmov (!%p3150_p0), 0  }
 0x2dd   : > { %v5655_v12 = vmov (!%p3150_p0), 0   ;;  %v5657_v13 = vmov (!%p3150_p0), 0  }
 0x2de   : > { %v5606_v26 = vadd.f32 %v888_v14, %v831_v24  ;;  %v5608_v27 = vadd.f32 %v887_v23, %v830_v25  ;;  %v5659_v14 = vmov (!%p3150_p0), 0   ;;  %v5661_v23 = vmov (!%p3150_p0), 0  }
 0x2df   : > { %v808_v30 = vpop.permute.xlu1 %807  ;;  %v803_v63 = vpop.permute.xlu0 %802  ;;  %v5663_v24 = vmov (!%p3150_p0), 0   ;;  %v5665_v25 = vmov (!%p3150_p0), 0  }
 0x2e0   : > { %v833_v32 = vmul.f32 %v808_v30, %v763_v28  ;;  %v832_v33 = vmul.f32 %v803_v63, %v762_v29  ;;  %v5667_v28 = vmov (!%p3150_p0), 0  }
 0x2e2   : > { %v5614_v36 = vadd.f32 %v890_v56, %v833_v32  ;;  %v5616_v37 = vadd.f32 %v889_v31, %v832_v33 }
 0x2e3   : > { %v818_v41 = vpop.permute.xlu1 %817  ;;  %v813_v62 = vpop.permute.xlu0 %812 }
 0x2e4   : > { %v835_v45 = vmul.f32 %v818_v41, %v765_v39  ;;  %v834_v46 = vmul.f32 %v813_v62, %v764_v40 }
 0x2e6   : > { %v5622_v47 = vadd.f32 %v892_v61, %v835_v45  ;;  %v5624_v49 = vadd.f32 %v891_v42, %v834_v46 }
 0x2e7   : > { %v828_v50 = vpop.permute.xlu1 %827  ;;  %v823_v51 = vpop.permute.xlu0 %822 }
 0x2e8   : > { %v837_v54 = vmul.f32 %v828_v50, %v767_v52  ;;  %v836_v55 = vmul.f32 %v823_v51, %v766_v44  ;;  %915 = sbr.rel (%p3150_p0) target bundleno = 1628 (0x65c), region = 88 }
 0x2eb   : > { %v885_v53 = vpop.permute.xlu1 %884  ;;  %v880_v34 = vpop.permute.xlu0 %879 }
 0x2ec   : > { %v894_v57 = vmul.f32 %v5534_v48, %v885_v53  ;;  %v893_v58 = vmul.f32 %v5534_v48, %v880_v34 }
 0x2ee   : > { %v5630_v59 = vadd.f32 %v894_v57, %v837_v54  ;;  %v5632_v60 = vadd.f32 %v893_v58, %v836_v55 }
 0x2ef   : > { %919 = sbr.rel (%p3151_p2) target bundleno = 1188 (0x4a4), region = 92  ;;  %p920_p4 = scmp.lt.s32.totalorder (!%p3151_p2), %s7161_s2, 1  ;;  %v5671_v29 = vmov (!%p3151_p2), 0   ;;  %v5673_v30 = vmov (!%p3151_p2), 0   ;;  %v5675_v63 = vmov (!%p3151_p2), 0   ;;  %v5677_v56 = vmov (!%p3151_p2), 0  }
 0x2f0   : > { %p3152_p6 = scmp.ge.s32.totalorder (!%p3151_p2), %s7161_s2, 1  ;;  %v5679_v31 = vmov (!%p3151_p2), 0   ;;  %v5681_v32 = vmov (!%p3151_p2), 0   ;;  %v5683_v33 = vmov (!%p3151_p2), 0   ;;  %v5685_v39 = vmov (!%p3151_p2), 0  }
 0x2f6   : > { %923 = sbr.rel (%p3152_p6) target bundleno = 972 (0x3cc), region = 96  ;;  %s5259_s0 = smov (!%p3152_p6), 1   ;;  %v5260_v40 = vmov (!%p3152_p6), 0   ;;  %v5262_v41 = vmov (!%p3152_p6), 1   ;;  %v5263_v62 = vmov (!%p3152_p6), 2   ;;  %vm940_vm10 = vcmp.ge.s32.totalorder (!%p3152_p6), %v5531_v35, 1 }
 0x2f7   : > { %928 = vrot.lane.b32.xlu1 (!%p3152_p6), %v5616_v37, %s5259_s0  ;;  %924 = vrot.lane.b32.xlu0 (!%p3152_p6), %v5608_v27, %s5259_s0  ;;  %s5261_s3 = smov (!%p3152_p6), 127   ;;  %vm967_vm11 = vcmp.lt.s32.totalorder (!%p3152_p6), %v5531_v35, 33 }
 0x2f8   : > { %4227 = vset.pattern.permute.xlu1 (!%p3152_p6), %v5260_v40  ;;  %4226 = vset.pattern.permute.xlu0 (!%p3152_p6), %v5260_v40 }
 0x2fb   : > { %930 = vrot.lane.b32.xlu1 (!%p3152_p6), %v5614_v36, %s5259_s0  ;;  %926 = vrot.lane.b32.xlu0 (!%p3152_p6), %v5606_v26, %s5259_s0 }
 0x2ff   : > { %934 = vrot.lane.b32.xlu1 %v5622_v47, %s5259_s0  ;;  %932 = vrot.lane.b32.xlu0 %v5624_v49, %s5259_s0 }
 0x303   : > { %938 = vrot.lane.b32.xlu1 %v5630_v59, %s5259_s0  ;;  %936 = vrot.lane.b32.xlu0 %v5632_v60, %s5259_s0 }
 0x307   : > { %953 = vrot.lane.b32.xlu1 %v5606_v26, %s5261_s3  ;;  %951 = vrot.lane.b32.xlu0 %v5608_v27, %s5261_s3 }
 0x30b   : > { %957 = vrot.lane.b32.xlu1 %v5614_v36, %s5261_s3  ;;  %955 = vrot.lane.b32.xlu0 %v5616_v37, %s5261_s3 }
 0x30f   : > { %961 = vrot.lane.b32.xlu1 %v5622_v47, %s5261_s3  ;;  %959 = vrot.lane.b32.xlu0 %v5624_v49, %s5261_s3 }
 0x313   : > { %965 = vrot.lane.b32.xlu1 %v5630_v59, %s5261_s3  ;;  %963 = vrot.lane.b32.xlu0 %v5632_v60, %s5261_s3 }
 0x317   : > { %985 = vperm.xlu1 %4227, %v5505_v16   ;;  %980 = vperm.xlu0 %4226, %v5503_v15  }
 0x31b   : > { %990 = vperm.xlu1 %4227, %v5507_v17   ;;  %995 = vperm.xlu0 %4226, %v5509_v18  }
 0x31f   : > { %1000 = vperm.xlu1 %4227, %v5511_v19   ;;  %1005 = vperm.xlu0 %4226, %v5513_v20  }
 0x323   : > { %1010 = vperm.xlu1 %4227, %v5515_v21   ;;  %1015 = vperm.xlu0 %4226, %v5517_v22  }
 0x327   : > { %4228 = vset.pattern.permute.xlu1 %v5262_v41  ;;  %4229 = vset.pattern.permute.xlu0 %v5262_v41 }
 0x328   : > { %1027 = vperm.xlu1 %4228, %v5503_v15   ;;  %1031 = vperm.xlu0 %4229, %v5505_v16  }
 0x32c   : > { %1035 = vperm.xlu1 %4228, %v5507_v17   ;;  %1043 = vperm.xlu0 %4229, %v5511_v19  }
 0x330   : > { %1039 = vperm.xlu1 %4228, %v5509_v18   ;;  %1051 = vperm.xlu0 %4229, %v5515_v21  }
 0x334   : > { %1047 = vperm.xlu1 %4228, %v5513_v20   ;;  %4230 = vset.pattern.permute.xlu0 %v5263_v62 }
 0x335   : > { %1075 = vperm.xlu0 %4230, %v5503_v15  }
 0x338   : > { %1055 = vperm.xlu1 %4228, %v5517_v22  }
 0x339   : > { %1087 = vperm.xlu0 %4230, %v5509_v18  }
 0x33c   : > { %4231 = vset.pattern.permute.xlu1 %v5263_v62 }
 0x33d   : > { %1079 = vperm.xlu1 %4231, %v5505_v16   ;;  %1095 = vperm.xlu0 %4230, %v5513_v20  }
 0x341   : > { %1083 = vperm.xlu1 %4231, %v5507_v17   ;;  %1103 = vperm.xlu0 %4230, %v5517_v22  }
 0x345   : > { %1091 = vperm.xlu1 %4231, %v5511_v19  }
 0x349   : > { %1099 = vperm.xlu1 %4231, %v5515_v21  }
 0x369   : > { %v929_v61 = vpop.permute.xlu1 %928  ;;  %v925_v42 = vpop.permute.xlu0 %924 }
 0x36a   : > { %v943_v30 = vsel %vm940_vm10, %v925_v42, 0.0 }
 0x36d   : > { %v931_v45 = vpop.permute.xlu1 %930  ;;  %v927_v46 = vpop.permute.xlu0 %926 }
 0x36e   : > { %v946_v41 = vsel %vm940_vm10, %v931_v45, 0.0  ;;  %v944_v42 = vsel %vm940_vm10, %v927_v46, 0.0 }
 0x371   : > { %v935_v50 = vpop.permute.xlu1 %934  ;;  %v5727_v51 = vpop.permute.xlu0 %932 }
 0x372   : > { %v948_v45 = vsel %vm940_vm10, %v935_v50, 0.0 }
 0x375   : > { %v939_v52 = vpop.permute.xlu1 %938  ;;  %v5729_v44 = vpop.permute.xlu0 %936 }
 0x376   : > { %v950_v46 = vsel %vm940_vm10, %v939_v52, 0.0 }
 0x379   : > { %v954_v53 = vpop.permute.xlu1 %953  ;;  %v952_v34 = vpop.permute.xlu0 %951 }
 0x37a   : > { %v970_v31 = vsel %vm967_vm11, %v952_v34, 0.0 }
 0x37d   : > { %v958_v54 = vpop.permute.xlu1 %957  ;;  %v956_v55 = vpop.permute.xlu0 %955 }
 0x381   : > { %v962_v57 = vpop.permute.xlu1 %961  ;;  %v5731_v58 = vpop.permute.xlu0 %959 }
 0x385   : > { %v966_v0 = vpop.permute.xlu1 %965  ;;  %v5733_v1 = vpop.permute.xlu0 %963 }
 0x396   : > { %v986_v38 = vpop.permute.xlu1 %985  ;;  %v981_v43 = vpop.permute.xlu0 %980 }
 0x397   : > { %v1018_v63 = vmul.f32 %v981_v43, %v943_v30  ;;  %v973_v43 = vsel %vm967_vm11, %v958_v54, 0.0  ;;  %v971_v54 = vsel %vm967_vm11, %v954_v53, 0.0  ;;  %v947_v53 = vsel %vm940_vm10, %v5727_v51, 0.0 }
 0x398   : > { %v974_v51 = vsel %vm967_vm11, %v5731_v58, 0.0 }
 0x39a   : > { %v991_v2 = vpop.permute.xlu1 %990  ;;  %v996_v3 = vpop.permute.xlu0 %995 }
 0x39b   : > { %v1021_v62 = vmul.f32 %v996_v3, %v946_v41  ;;  %v1019_v3 = vmul.f32 %v986_v38, %v944_v42 }
 0x39e   : > { %v1001_v7 = vpop.permute.xlu1 %1000  ;;  %v1006_v10 = vpop.permute.xlu0 %1005 }
 0x3a2   : > { %v5735_v11 = vpop.permute.xlu1 %1010  ;;  %v1016_v12 = vpop.permute.xlu0 %1015 }
 0x3a3   : > { %v1025_v52 = vmul.f32 %v1016_v12, %v950_v46 }
 0x3a7   : > { %v1028_v13 = vpop.permute.xlu1 %1027  ;;  %v1032_v14 = vpop.permute.xlu0 %1031 }
 0x3a8   : > { %v1058_v29 = vmul.f32 %v1028_v13, %v5608_v27  ;;  %v1059_v30 = vmul.f32 %v1032_v14, %v5606_v26 }
 0x3aa   : > { %v1066_v33 = vadd.f32 %v1058_v29, %v1018_v63  ;;  %v945_v63 = vsel %vm940_vm10, %v929_v61, 0.0 }
 0x3ab   : > { %v1036_v23 = vpop.permute.xlu1 %1035  ;;  %v1044_v24 = vpop.permute.xlu0 %1043 }
 0x3af   : > { %v1040_v25 = vpop.permute.xlu1 %1039  ;;  %v1052_v28 = vpop.permute.xlu0 %1051 }
 0x3b0   : > { %v1061_v39 = vmul.f32 %v1040_v25, %v5614_v36 }
 0x3b2   : > { %v1069_v5 = vadd.f32 %v1061_v39, %v1021_v62  ;;  %v1020_v62 = vmul.f32 %v991_v2, %v945_v63 }
 0x3b3   : > { %v1048_v56 = vpop.permute.xlu1 %1047 }
 0x3b4   : > { %v1076_v32 = vpop.permute.xlu0 %1075  ;;  %v1063_v29 = vmul.f32 %v1048_v56, %v5622_v47  ;;  %v1067_v56 = vadd.f32 %v1059_v30, %v1019_v3 }
 0x3b5   : > { %v1106_v40 = vmul.f32 %v1076_v32, %v970_v31  ;;  %v1023_v31 = vmul.f32 %v1006_v10, %v948_v45  ;;  %v975_v32 = vsel %vm967_vm11, %v962_v57, 0.0  ;;  %v977_v10 = vsel %vm967_vm11, %v966_v0, 0.0 }
 0x3b6   : > { %v1064_v45 = vmul.f32 %v1052_v28, %v5632_v60 }
 0x3b7   : > { %v1114_v13 = vadd.f32 %v1106_v40, %v1066_v33   ;;  %v1056_v9 = vpop.permute.xlu1 %1055  ;;  %v1060_v33 = vmul.f32 %v1036_v23, %v5616_v37  ;;  %v1071_v50 = vadd.f32 %v1063_v29, %v1023_v31  ;;  %v1062_v23 = vmul.f32 %v1044_v24, %v5624_v49 }
 0x3b8   : > { %v1088_v34 = vpop.permute.xlu0 %1087  ;;  %v1065_v61 = vmul.f32 %v1056_v9, %v5630_v59  ;;  %v949_v24 = vsel %vm940_vm10, %v5729_v44, 0.0 }
 0x3b9   : > { %v1109_v25 = vmul.f32 %v1088_v34, %v973_v43  ;;  %v1068_v9 = vadd.f32 %v1060_v33, %v1020_v62  ;;  %v1022_v34 = vmul.f32 %v1001_v7, %v947_v53  ;;  %v1024_v3 = vmul.f32 %v5735_v11, %v949_v24 }
 0x3ba   : > { %v1073_v42 = vadd.f32 %v1065_v61, %v1025_v52  ;;  %v976_v7 = vsel %vm967_vm11, %v5733_v1, 0.0 }
 0x3bb   : > { %v1117_v14 = vadd.f32 %v1109_v25, %v1069_v5   ;;  %v972_v5 = vsel %vm967_vm11, %v956_v55, 0.0  ;;  %v1070_v55 = vadd.f32 %v1062_v23, %v1022_v34 }
 0x3bc   : > { %v1080_v39 = vpop.permute.xlu1 %1079  ;;  %v1096_v40 = vpop.permute.xlu0 %1095 }
 0x3bd   : > { %v1107_v38 = vmul.f32 %v1080_v39, %v971_v54  ;;  %v1111_v41 = vmul.f32 %v1096_v40, %v975_v32  ;;  %v1072_v54 = vadd.f32 %v1064_v45, %v1024_v3  ;;  %v7079_v39 = vmov %v1114_v13 }
 0x3bf   : > { %v1115_v57 = vadd.f32 %v1107_v38, %v1067_v56   ;;  %v1119_v63 = vadd.f32 %v1111_v41, %v1071_v50  }
 0x3c0   : > { %v1084_v43 = vpop.permute.xlu1 %1083  ;;  %v1104_v30 = vpop.permute.xlu0 %1103 }
 0x3c1   : > { %v1108_v2 = vmul.f32 %v1084_v43, %v972_v5  ;;  %v1113_v12 = vmul.f32 %v1104_v30, %v977_v10  ;;  %v7078_v33 = vmov %v1115_v57 }
 0x3c3   : > { %v1116_v32 = vadd.f32 %v1108_v2, %v1068_v9   ;;  %v1121_v29 = vadd.f32 %v1113_v12, %v1073_v42  }
 0x3c4   : > { %v1092_v25 = vpop.permute.xlu1 %1091 }
 0x3c5   : > { %v1110_v0 = vmul.f32 %v1092_v25, %v974_v51 }
 0x3c7   : > { %v1118_v56 = vadd.f32 %v1110_v0, %v1070_v55  }
 0x3c8   : > { %v1100_v46 = vpop.permute.xlu1 %1099 }
 0x3c9   : > { %v1112_v31 = vmul.f32 %v1100_v46, %v976_v7 }
 0x3cb   : > { %v1120_v30 = vadd.f32 %v1112_v31, %v1072_v54   ;;  %v7077_v31 = vmov %v1117_v14 }
 0x3cc PF: > { %1132 = sbr.rel (%p920_p4) target bundleno = 1186 (0x4a2), region = 100  ;;  %s5264_s4 = smov (!%p920_p4), 2   ;;  %v5265_v44 = vmov (!%p920_p4), 0   ;;  %v5267_v58 = vmov (!%p920_p4), 1   ;;  %v5268_v1 = vmov (!%p920_p4), 2   ;;  %vm1149_vm12 = vcmp.ge.s32.totalorder (!%p920_p4), %v5531_v35, 2  ;;  %v4836_v39 = vphi %v5685_v39, %v7079_v39   ;;  %v4832_v33 = vphi %v5683_v33, %v7078_v33   ;;  %v4828_v32 = vphi %v5681_v32, %v1116_v32   ;;  %v4824_v31 = vphi %v5679_v31, %v7077_v31   ;;  %v4820_v56 = vphi %v5677_v56, %v1118_v56   ;;  %v4816_v63 = vphi %v5675_v63, %v1119_v63   ;;  %v4812_v30 = vphi %v5673_v30, %v1120_v30   ;;  %v4808_v29 = vphi %v5671_v29, %v1121_v29  }
 0x3cd   : > { %1137 = vrot.lane.b32.xlu1 (!%p920_p4), %v5616_v37, %s5264_s4  ;;  %1133 = vrot.lane.b32.xlu0 (!%p920_p4), %v5608_v27, %s5264_s4  ;;  %s5266_s1 = smov (!%p920_p4), 126   ;;  %vm1176_vm13 = vcmp.lt.s32.totalorder (!%p920_p4), %v5531_v35, 32 }
 0x3ce   : > { %4233 = vset.pattern.permute.xlu1 (!%p920_p4), %v5265_v44  ;;  %4232 = vset.pattern.permute.xlu0 (!%p920_p4), %v5265_v44 }
 0x3d1   : > { %1139 = vrot.lane.b32.xlu1 (!%p920_p4), %v5614_v36, %s5264_s4  ;;  %1135 = vrot.lane.b32.xlu0 (!%p920_p4), %v5606_v26, %s5264_s4 }
 0x3d5   : > { %1143 = vrot.lane.b32.xlu1 %v5622_v47, %s5264_s4  ;;  %1141 = vrot.lane.b32.xlu0 %v5624_v49, %s5264_s4 }
 0x3d9   : > { %1147 = vrot.lane.b32.xlu1 %v5630_v59, %s5264_s4  ;;  %1145 = vrot.lane.b32.xlu0 %v5632_v60, %s5264_s4 }
 0x3dd   : > { %1162 = vrot.lane.b32.xlu1 %v5606_v26, %s5266_s1  ;;  %1160 = vrot.lane.b32.xlu0 %v5608_v27, %s5266_s1 }
 0x3e1   : > { %1166 = vrot.lane.b32.xlu1 %v5614_v36, %s5266_s1  ;;  %1164 = vrot.lane.b32.xlu0 %v5616_v37, %s5266_s1 }
 0x3e5   : > { %1170 = vrot.lane.b32.xlu1 %v5622_v47, %s5266_s1  ;;  %1168 = vrot.lane.b32.xlu0 %v5624_v49, %s5266_s1 }
 0x3e9   : > { %1174 = vrot.lane.b32.xlu1 %v5630_v59, %s5266_s1  ;;  %1172 = vrot.lane.b32.xlu0 %v5632_v60, %s5266_s1 }
 0x3ed   : > { %1194 = vperm.xlu1 %4233, %v5505_v16   ;;  %1189 = vperm.xlu0 %4232, %v5503_v15  }
 0x3f1   : > { %1199 = vperm.xlu1 %4233, %v5507_v17   ;;  %1204 = vperm.xlu0 %4232, %v5509_v18  }
 0x3f5   : > { %1209 = vperm.xlu1 %4233, %v5511_v19   ;;  %1214 = vperm.xlu0 %4232, %v5513_v20  }
 0x3f9   : > { %1219 = vperm.xlu1 %4233, %v5515_v21   ;;  %1224 = vperm.xlu0 %4232, %v5517_v22  }
 0x3fd   : > { %4234 = vset.pattern.permute.xlu1 %v5267_v58  ;;  %4235 = vset.pattern.permute.xlu0 %v5267_v58 }
 0x3fe   : > { %1236 = vperm.xlu1 %4234, %v5503_v15   ;;  %1240 = vperm.xlu0 %4235, %v5505_v16  }
 0x402   : > { %1244 = vperm.xlu1 %4234, %v5507_v17   ;;  %1252 = vperm.xlu0 %4235, %v5511_v19  }
 0x406   : > { %1248 = vperm.xlu1 %4234, %v5509_v18   ;;  %1260 = vperm.xlu0 %4235, %v5515_v21  }
 0x40a   : > { %1256 = vperm.xlu1 %4234, %v5513_v20   ;;  %4236 = vset.pattern.permute.xlu0 %v5268_v1 }
 0x40b   : > { %1284 = vperm.xlu0 %4236, %v5503_v15  }
 0x40e   : > { %1264 = vperm.xlu1 %4234, %v5517_v22  }
 0x40f   : > { %1296 = vperm.xlu0 %4236, %v5509_v18  }
 0x412   : > { %4237 = vset.pattern.permute.xlu1 %v5268_v1 }
 0x413   : > { %1288 = vperm.xlu1 %4237, %v5505_v16   ;;  %1304 = vperm.xlu0 %4236, %v5513_v20  }
 0x417   : > { %1292 = vperm.xlu1 %4237, %v5507_v17   ;;  %1312 = vperm.xlu0 %4236, %v5517_v22  }
 0x41b   : > { %1300 = vperm.xlu1 %4237, %v5511_v19  }
 0x41f   : > { %1308 = vperm.xlu1 %4237, %v5515_v21  }
 0x43f   : > { %v1138_v11 = vpop.permute.xlu1 %1137  ;;  %v1134_v28 = vpop.permute.xlu0 %1133 }
 0x440   : > { %v1152_v25 = vsel %vm1149_vm12, %v1134_v28, 0.0 }
 0x443   : > { %v1140_v13 = vpop.permute.xlu1 %1139  ;;  %v1136_v29 = vpop.permute.xlu0 %1135 }
 0x444   : > { %v1155_v31 = vsel %vm1149_vm12, %v1140_v13, 0.0  ;;  %v1153_v28 = vsel %vm1149_vm12, %v1136_v29, 0.0 }
 0x447   : > { %v1144_v63 = vpop.permute.xlu1 %1143  ;;  %v5866_v14 = vpop.permute.xlu0 %1141 }
 0x448   : > { %v1157_v13 = vsel %vm1149_vm12, %v1144_v63, 0.0 }
 0x44b   : > { %v1148_v32 = vpop.permute.xlu1 %1147  ;;  %v5868_v56 = vpop.permute.xlu0 %1145 }
 0x44c   : > { %v1159_v29 = vsel %vm1149_vm12, %v1148_v32, 0.0 }
 0x44f   : > { %v1163_v33 = vpop.permute.xlu1 %1162  ;;  %v1161_v61 = vpop.permute.xlu0 %1160 }
 0x450   : > { %v1179_v24 = vsel %vm1176_vm13, %v1161_v61, 0.0 }
 0x453   : > { %v1167_v39 = vpop.permute.xlu1 %1166  ;;  %v1165_v40 = vpop.permute.xlu0 %1164 }
 0x457   : > { %v1171_v50 = vpop.permute.xlu1 %1170  ;;  %v5870_v38 = vpop.permute.xlu0 %1168 }
 0x45b   : > { %v1175_v41 = vpop.permute.xlu1 %1174  ;;  %v5872_v62 = vpop.permute.xlu0 %1172 }
 0x46c   : > { %v1195_v52 = vpop.permute.xlu1 %1194  ;;  %v1190_v53 = vpop.permute.xlu0 %1189 }
 0x46d   : > { %v1227_v45 = vmul.f32 %v1190_v53, %v1152_v25  ;;  %v1182_v53 = vsel %vm1176_vm13, %v1167_v39, 0.0  ;;  %v1180_v39 = vsel %vm1176_vm13, %v1163_v33, 0.0  ;;  %v1156_v33 = vsel %vm1149_vm12, %v5866_v14, 0.0 }
 0x46e   : > { %v1183_v14 = vsel %vm1176_vm13, %v5870_v38, 0.0 }
 0x470   : > { %v1200_v5 = vpop.permute.xlu1 %1199  ;;  %v1205_v57 = vpop.permute.xlu0 %1204 }
 0x471   : > { %v1230_v44 = vmul.f32 %v1205_v57, %v1155_v31  ;;  %v1228_v57 = vmul.f32 %v1195_v52, %v1153_v28 }
 0x474   : > { %v1210_v10 = vpop.permute.xlu1 %1209  ;;  %v1215_v9 = vpop.permute.xlu0 %1214 }
 0x478   : > { %v5874_v23 = vpop.permute.xlu1 %1219  ;;  %v1225_v42 = vpop.permute.xlu0 %1224 }
 0x479   : > { %v1234_v32 = vmul.f32 %v1225_v42, %v1159_v29 }
 0x47d   : > { %v1237_v43 = vpop.permute.xlu1 %1236  ;;  %v1241_v30 = vpop.permute.xlu0 %1240 }
 0x47e   : > { %v1267_v55 = vmul.f32 %v1237_v43, %v5608_v27  ;;  %v1268_v43 = vmul.f32 %v1241_v30, %v5606_v26  ;;  %v1184_v30 = vsel %vm1176_vm13, %v1171_v50, 0.0 }
 0x480   : > { %v1275_v7 = vadd.f32 %v1267_v55, %v1227_v45  ;;  %v1154_v45 = vsel %vm1149_vm12, %v1138_v11, 0.0 }
 0x481   : > { %v1245_v2 = vpop.permute.xlu1 %1244  ;;  %v1253_v12 = vpop.permute.xlu0 %1252 }
 0x482   : > { %v1271_v28 = vmul.f32 %v1253_v12, %v5624_v49  ;;  %v1158_v12 = vsel %vm1149_vm12, %v5868_v56, 0.0 }
 0x485   : > { %v1249_v34 = vpop.permute.xlu1 %1248  ;;  %v1261_v51 = vpop.permute.xlu0 %1260 }
 0x486   : > { %v1270_v46 = vmul.f32 %v1249_v34, %v5614_v36 }
 0x488   : > { %v1278_v25 = vadd.f32 %v1270_v46, %v1230_v44  ;;  %v1229_v44 = vmul.f32 %v1200_v5, %v1154_v45  ;;  %v1233_v45 = vmul.f32 %v5874_v23, %v1158_v12 }
 0x489   : > { %v1257_v0 = vpop.permute.xlu1 %1256 }
 0x48a   : > { %v1285_v3 = vpop.permute.xlu0 %1284  ;;  %v1272_v55 = vmul.f32 %v1257_v0, %v5622_v47  ;;  %v1276_v0 = vadd.f32 %v1268_v43, %v1228_v57 }
 0x48b   : > { %v1315_v54 = vmul.f32 %v1285_v3, %v1179_v24  ;;  %v1232_v24 = vmul.f32 %v1215_v9, %v1157_v13  ;;  %v1269_v3 = vmul.f32 %v1245_v2, %v5616_v37  ;;  %v1181_v9 = vsel %vm1176_vm13, %v1165_v40, 0.0 }
 0x48c   : > { %v1186_v2 = vsel %vm1176_vm13, %v1175_v41, 0.0 }
 0x48d   : > { %v1323_v58 = vadd.f32 %v1315_v54, %v1275_v7   ;;  %v1265_v1 = vpop.permute.xlu1 %1264  ;;  %v1280_v63 = vadd.f32 %v1272_v55, %v1232_v24 }
 0x48e   : > { %v1297_v61 = vpop.permute.xlu0 %1296  ;;  %v1274_v11 = vmul.f32 %v1265_v1, %v5630_v59  ;;  %v1277_v1 = vadd.f32 %v1269_v3, %v1229_v44 }
 0x48f   : > { %v1318_v34 = vmul.f32 %v1297_v61, %v1182_v53 }
 0x490   : > { %v1282_v53 = vadd.f32 %v1274_v11, %v1234_v32 }
 0x491   : > { %v1326_v31 = vadd.f32 %v1318_v34, %v1278_v25   ;;  %v1231_v25 = vmul.f32 %v1210_v10, %v1156_v33  ;;  %v1273_v34 = vmul.f32 %v1261_v51, %v5632_v60  ;;  %v1185_v10 = vsel %vm1176_vm13, %v5872_v62, 0.0 }
 0x492   : > { %v1289_v7 = vpop.permute.xlu1 %1288  ;;  %v1305_v46 = vpop.permute.xlu0 %1304 }
 0x493   : > { %v1316_v52 = vmul.f32 %v1289_v7, %v1180_v39  ;;  %v1320_v54 = vmul.f32 %v1305_v46, %v1184_v30  ;;  %v1279_v40 = vadd.f32 %v1271_v28, %v1231_v25  ;;  %v1281_v57 = vadd.f32 %v1273_v34, %v1233_v45 }
 0x495   : > { %v1324_v50 = vadd.f32 %v1316_v52, %v1276_v0   ;;  %v1328_v63 = vadd.f32 %v1320_v54, %v1280_v63  }
 0x496   : > { %v1293_v43 = vpop.permute.xlu1 %1292  ;;  %v1313_v61 = vpop.permute.xlu0 %1312 }
 0x497   : > { %v1317_v5 = vmul.f32 %v1293_v43, %v1181_v9  ;;  %v1322_v42 = vmul.f32 %v1313_v61, %v1186_v2  ;;  %v7080_v33 = vmov %v1324_v50 }
 0x499   : > { %v1325_v32 = vadd.f32 %v1317_v5, %v1277_v1   ;;  %v1330_v29 = vadd.f32 %v1322_v42, %v1282_v53  }
 0x49a   : > { %v1301_v55 = vpop.permute.xlu1 %1300 }
 0x49b   : > { %v1319_v41 = vmul.f32 %v1301_v55, %v1183_v14 }
 0x49d   : > { %v1327_v56 = vadd.f32 %v1319_v41, %v1279_v40  }
 0x49e   : > { %v1309_v13 = vpop.permute.xlu1 %1308 }
 0x49f   : > { %v1321_v39 = vmul.f32 %v1309_v13, %v1185_v10 }
 0x4a1   : > { %v1329_v30 = vadd.f32 %v1321_v39, %v1281_v57   ;;  %v7081_v39 = vmov %v1323_v58 }
 0x4a2 PF: > { %v7082_v11 = vmov %v4840_v29  ;;  %v7083_v12 = vmov %v4844_v30  ;;  %v7084_v13 = vmov %v4848_v63  ;;  %v7085_v14 = vmov %v4852_v56  ;;  %v4868_v39 = vphi %v4836_v39, %v7081_v39   ;;  %v4864_v33 = vphi %v4832_v33, %v7080_v33   ;;  %v4860_v32 = vphi %v4828_v32, %v1325_v32   ;;  %v4856_v31 = vphi %v4824_v31, %v1326_v31   ;;  %v4852_v56 = vphi %v4820_v56, %v1327_v56   ;;  %v4848_v63 = vphi %v4816_v63, %v1328_v63   ;;  %v4844_v30 = vphi %v4812_v30, %v1329_v30   ;;  %v4840_v29 = vphi %v4808_v29, %v1330_v29  }
 0x4a3   : > { %v7086_v23 = vmov %v4856_v31  ;;  %v7087_v24 = vmov %v4860_v32  ;;  %v7088_v25 = vmov %v4864_v33  ;;  %v7089_v28 = vmov %v4868_v39 }
 0x4a4 PF: > { %1349 = sbr.rel (%p916_p1) target bundleno = 1626 (0x65a), region = 104  ;;  %s3153_s23 = sadd.s32 (!%p916_p1), 4294967294, %s7161_s2  ;;  %v5994_v56 = vmov (!%p916_p1), 0   ;;  %v5996_v38 = vmov (!%p916_p1), 0   ;;  %v5998_v62 = vmov (!%p916_p1), 0   ;;  %v6000_v51 = vmov (!%p916_p1), 0   ;;  %v4900_v28 = vphi %v5667_v28, %v7089_v28   ;;  %v4896_v25 = vphi %v5665_v25, %v7088_v25   ;;  %v4892_v24 = vphi %v5663_v24, %v7087_v24   ;;  %v4888_v23 = vphi %v5661_v23, %v7086_v23   ;;  %v4884_v14 = vphi %v5659_v14, %v7085_v14   ;;  %v4880_v13 = vphi %v5657_v13, %v7084_v13   ;;  %v4876_v12 = vphi %v5655_v12, %v7083_v12   ;;  %v4872_v11 = vphi %v5653_v11, %v7082_v11  }
 0x4a5   : > { %p5990_p8 = scmp.lt.s32.totalorder (!%p916_p1), %s3153_s23, 1  ;;  %p3154_p10 = scmp.ge.s32.totalorder (!%p916_p1), %s3153_s23, 1  ;;  %v6002_v31 = vmov (!%p916_p1), 0   ;;  %v6004_v58 = vmov (!%p916_p1), 0   ;;  %v6006_v29 = vmov (!%p916_p1), 0   ;;  %v6008_v23 = vmov (!%p916_p1), 0  }
 0x4ab   : > { %1354 = sbr.rel (%p3154_p10) target bundleno = 1409 (0x581), region = 108  ;;  %s5269_s18 = smov (!%p3154_p10), 4   ;;  %v5270_v24 = vmov (!%p3154_p10), 0   ;;  %v5272_v30 = vmov (!%p3154_p10), 1   ;;  %v5273_v0 = vmov (!%p3154_p10), 2   ;;  %vm1371_vm14 = vcmp.ge.s32.totalorder (!%p3154_p10), %v5531_v35, 4 }
 0x4ac   : > { %1359 = vrot.lane.b32.xlu1 (!%p3154_p10), %v5616_v37, %s5269_s18  ;;  %1355 = vrot.lane.b32.xlu0 (!%p3154_p10), %v5608_v27, %s5269_s18  ;;  %s5271_s19 = smov (!%p3154_p10), 124   ;;  %vm1398_vm15 = vcmp.lt.s32.totalorder (!%p3154_p10), %v5531_v35, 30 }
 0x4ad   : > { %4239 = vset.pattern.permute.xlu1 (!%p3154_p10), %v5270_v24  ;;  %4238 = vset.pattern.permute.xlu0 (!%p3154_p10), %v5270_v24 }
 0x4b0   : > { %1361 = vrot.lane.b32.xlu1 (!%p3154_p10), %v5614_v36, %s5269_s18  ;;  %1357 = vrot.lane.b32.xlu0 (!%p3154_p10), %v5606_v26, %s5269_s18 }
 0x4b4   : > { %1365 = vrot.lane.b32.xlu1 %v5622_v47, %s5269_s18  ;;  %1363 = vrot.lane.b32.xlu0 %v5624_v49, %s5269_s18 }
 0x4b8   : > { %1369 = vrot.lane.b32.xlu1 %v5630_v59, %s5269_s18  ;;  %1367 = vrot.lane.b32.xlu0 %v5632_v60, %s5269_s18 }
 0x4bc   : > { %1384 = vrot.lane.b32.xlu1 %v5606_v26, %s5271_s19  ;;  %1382 = vrot.lane.b32.xlu0 %v5608_v27, %s5271_s19 }
 0x4c0   : > { %1388 = vrot.lane.b32.xlu1 %v5614_v36, %s5271_s19  ;;  %1386 = vrot.lane.b32.xlu0 %v5616_v37, %s5271_s19 }
 0x4c4   : > { %1392 = vrot.lane.b32.xlu1 %v5622_v47, %s5271_s19  ;;  %1390 = vrot.lane.b32.xlu0 %v5624_v49, %s5271_s19 }
 0x4c8   : > { %1396 = vrot.lane.b32.xlu1 %v5630_v59, %s5271_s19  ;;  %1394 = vrot.lane.b32.xlu0 %v5632_v60, %s5271_s19 }
 0x4cc   : > { %1416 = vperm.xlu1 %4239, %v5505_v16   ;;  %1411 = vperm.xlu0 %4238, %v5503_v15  }
 0x4d0   : > { %1421 = vperm.xlu1 %4239, %v5507_v17   ;;  %1426 = vperm.xlu0 %4238, %v5509_v18  }
 0x4d4   : > { %1431 = vperm.xlu1 %4239, %v5511_v19   ;;  %1436 = vperm.xlu0 %4238, %v5513_v20  }
 0x4d8   : > { %1441 = vperm.xlu1 %4239, %v5515_v21   ;;  %1446 = vperm.xlu0 %4238, %v5517_v22  }
 0x4dc   : > { %4240 = vset.pattern.permute.xlu1 %v5272_v30  ;;  %4241 = vset.pattern.permute.xlu0 %v5272_v30 }
 0x4dd   : > { %1458 = vperm.xlu1 %4240, %v5503_v15   ;;  %1462 = vperm.xlu0 %4241, %v5505_v16  }
 0x4e1   : > { %1466 = vperm.xlu1 %4240, %v5507_v17   ;;  %1474 = vperm.xlu0 %4241, %v5511_v19  }
 0x4e5   : > { %1470 = vperm.xlu1 %4240, %v5509_v18   ;;  %1482 = vperm.xlu0 %4241, %v5515_v21  }
 0x4e9   : > { %1478 = vperm.xlu1 %4240, %v5513_v20   ;;  %4242 = vset.pattern.permute.xlu0 %v5273_v0 }
 0x4ea   : > { %1506 = vperm.xlu0 %4242, %v5503_v15  }
 0x4ed   : > { %1486 = vperm.xlu1 %4240, %v5517_v22  }
 0x4ee   : > { %1518 = vperm.xlu0 %4242, %v5509_v18  }
 0x4f1   : > { %4243 = vset.pattern.permute.xlu1 %v5273_v0 }
 0x4f2   : > { %1510 = vperm.xlu1 %4243, %v5505_v16   ;;  %1526 = vperm.xlu0 %4242, %v5513_v20  }
 0x4f6   : > { %1514 = vperm.xlu1 %4243, %v5507_v17   ;;  %1534 = vperm.xlu0 %4242, %v5517_v22  }
 0x4fa   : > { %1522 = vperm.xlu1 %4243, %v5511_v19  }
 0x4fe   : > { %1530 = vperm.xlu1 %4243, %v5515_v21  }
 0x51e   : > { %v1360_v3 = vpop.permute.xlu1 %1359  ;;  %v1356_v11 = vpop.permute.xlu0 %1355 }
 0x51f   : > { %v1374_v39 = vsel %vm1371_vm14, %v1356_v11, 0.0 }
 0x522   : > { %v1362_v7 = vpop.permute.xlu1 %1361  ;;  %v1358_v46 = vpop.permute.xlu0 %1357 }
 0x523   : > { %v1377_v23 = vsel %vm1371_vm14, %v1362_v7, 0.0  ;;  %v1375_v0 = vsel %vm1371_vm14, %v1358_v46, 0.0 }
 0x526   : > { %v1366_v63 = vpop.permute.xlu1 %1365  ;;  %v6050_v52 = vpop.permute.xlu0 %1363 }
 0x527   : > { %v1379_v7 = vsel %vm1371_vm14, %v1366_v63, 0.0 }
 0x52a   : > { %v1370_v54 = vpop.permute.xlu1 %1369  ;;  %v6052_v44 = vpop.permute.xlu0 %1367 }
 0x52b   : > { %v1381_v46 = vsel %vm1371_vm14, %v1370_v54, 0.0 }
 0x52e   : > { %v1385_v32 = vpop.permute.xlu1 %1384  ;;  %v1383_v33 = vpop.permute.xlu0 %1382 }
 0x52f   : > { %v1401_v62 = vsel %vm1398_vm15, %v1383_v33, 0.0 }
 0x532   : > { %v1389_v9 = vpop.permute.xlu1 %1388  ;;  %v1387_v50 = vpop.permute.xlu0 %1386 }
 0x533   : > { %v1404_v11 = vsel %vm1398_vm15, %v1389_v9, 0.0  ;;  %v1402_v9 = vsel %vm1398_vm15, %v1385_v32, 0.0  ;;  %v1378_v32 = vsel %vm1371_vm14, %v6050_v52, 0.0 }
 0x536   : > { %v1393_v2 = vpop.permute.xlu1 %1392  ;;  %v6054_v1 = vpop.permute.xlu0 %1390 }
 0x537   : > { %v1405_v52 = vsel %vm1398_vm15, %v6054_v1, 0.0 }
 0x53a   : > { %v1397_v28 = vpop.permute.xlu1 %1396  ;;  %v6056_v53 = vpop.permute.xlu0 %1394 }
 0x54b   : > { %v1417_v43 = vpop.permute.xlu1 %1416  ;;  %v1412_v61 = vpop.permute.xlu0 %1411 }
 0x54c   : > { %v1449_v56 = vmul.f32 %v1412_v61, %v1374_v39  ;;  %v1376_v39 = vsel %vm1371_vm14, %v1360_v3, 0.0 }
 0x54f   : > { %v1422_v5 = vpop.permute.xlu1 %1421  ;;  %v1427_v42 = vpop.permute.xlu0 %1426 }
 0x550   : > { %v1452_v24 = vmul.f32 %v1427_v42, %v1377_v23  ;;  %v1450_v42 = vmul.f32 %v1417_v43, %v1375_v0 }
 0x553   : > { %v1432_v25 = vpop.permute.xlu1 %1431  ;;  %v1437_v14 = vpop.permute.xlu0 %1436 }
 0x557   : > { %v6058_v40 = vpop.permute.xlu1 %1441  ;;  %v1447_v55 = vpop.permute.xlu0 %1446 }
 0x558   : > { %v1456_v54 = vmul.f32 %v1447_v55, %v1381_v46 }
 0x55c   : > { %v1459_v34 = vpop.permute.xlu1 %1458  ;;  %v1463_v41 = vpop.permute.xlu0 %1462 }
 0x55d   : > { %v1489_v57 = vmul.f32 %v1459_v34, %v5608_v27  ;;  %v1490_v61 = vmul.f32 %v1463_v41, %v5606_v26  ;;  %v1406_v41 = vsel %vm1398_vm15, %v1393_v2, 0.0 }
 0x55f   : > { %v1497_v31 = vadd.f32 %v1489_v57, %v1449_v56  ;;  %v1454_v56 = vmul.f32 %v1437_v14, %v1379_v7  ;;  %v1403_v14 = vsel %vm1398_vm15, %v1387_v50, 0.0 }
 0x560   : > { %v1467_v12 = vpop.permute.xlu1 %1466  ;;  %v1475_v45 = vpop.permute.xlu0 %1474 }
 0x564   : > { %v1471_v10 = vpop.permute.xlu1 %1470  ;;  %v1483_v13 = vpop.permute.xlu0 %1482 }
 0x565   : > { %v1492_v58 = vmul.f32 %v1471_v10, %v5614_v36 }
 0x567   : > { %v1500_v34 = vadd.f32 %v1492_v58, %v1452_v24  ;;  %v1451_v24 = vmul.f32 %v1422_v5, %v1376_v39  ;;  %v1495_v39 = vmul.f32 %v1483_v13, %v5632_v60 }
 0x568   : > { %v1479_v38 = vpop.permute.xlu1 %1478 }
 0x569   : > { %v1507_v51 = vpop.permute.xlu0 %1506  ;;  %v1494_v57 = vmul.f32 %v1479_v38, %v5622_v47  ;;  %v1498_v38 = vadd.f32 %v1490_v61, %v1450_v42 }
 0x56a   : > { %v1537_v29 = vmul.f32 %v1507_v51, %v1401_v62  ;;  %v1491_v62 = vmul.f32 %v1467_v12, %v5616_v37  ;;  %v1408_v12 = vsel %vm1398_vm15, %v1397_v28, 0.0 }
 0x56b   : > { %v1502_v63 = vadd.f32 %v1494_v57, %v1454_v56  ;;  %v1453_v57 = vmul.f32 %v1432_v25, %v1378_v32  ;;  %v1407_v25 = vsel %vm1398_vm15, %v6056_v53, 0.0 }
 0x56c   : > { %v1545_v23 = vadd.f32 %v1537_v29, %v1497_v31   ;;  %v1487_v30 = vpop.permute.xlu1 %1486 }
 0x56d   : > { %v1519_v33 = vpop.permute.xlu0 %1518  ;;  %v1496_v3 = vmul.f32 %v1487_v30, %v5630_v59  ;;  %v1499_v30 = vadd.f32 %v1491_v62, %v1451_v24 }
 0x56e   : > { %v1540_v10 = vmul.f32 %v1519_v33, %v1404_v11  ;;  %v1493_v11 = vmul.f32 %v1475_v45, %v5624_v49  ;;  %v1380_v45 = vsel %vm1371_vm14, %v6052_v44, 0.0 }
 0x56f   : > { %v1504_v61 = vadd.f32 %v1496_v3, %v1456_v54  ;;  %v1455_v7 = vmul.f32 %v6058_v40, %v1380_v45 }
 0x570   : > { %v1548_v31 = vadd.f32 %v1540_v10, %v1500_v34   ;;  %v1501_v50 = vadd.f32 %v1493_v11, %v1453_v57 }
 0x571   : > { %v1511_v51 = vpop.permute.xlu1 %1510  ;;  %v1527_v58 = vpop.permute.xlu0 %1526  ;;  %v1503_v46 = vadd.f32 %v1495_v39, %v1455_v7 }
 0x572   : > { %v1538_v43 = vmul.f32 %v1511_v51, %v1402_v9  ;;  %v1542_v29 = vmul.f32 %v1527_v58, %v1406_v41 }
 0x574   : > { %v1546_v2 = vadd.f32 %v1538_v43, %v1498_v38   ;;  %v1550_v0 = vadd.f32 %v1542_v29, %v1502_v63  }
 0x575   : > { %v1515_v33 = vpop.permute.xlu1 %1514  ;;  %v1535_v34 = vpop.permute.xlu0 %1534 }
 0x576   : > { %v1539_v5 = vmul.f32 %v1515_v33, %v1403_v14  ;;  %v1544_v55 = vmul.f32 %v1535_v34, %v1408_v12  ;;  %v7091_v62 = vmov %v1550_v0  ;;  %v7092_v29 = vmov %v1546_v2 }
 0x578   : > { %v1547_v58 = vadd.f32 %v1539_v5, %v1499_v30   ;;  %v1552_v56 = vadd.f32 %v1544_v55, %v1504_v61  }
 0x579   : > { %v1523_v10 = vpop.permute.xlu1 %1522 }
 0x57a   : > { %v1541_v28 = vmul.f32 %v1523_v10, %v1405_v52 }
 0x57c   : > { %v1549_v51 = vadd.f32 %v1541_v28, %v1501_v50  }
 0x57d   : > { %v1531_v42 = vpop.permute.xlu1 %1530 }
 0x57e   : > { %v1543_v9 = vmul.f32 %v1531_v42, %v1407_v25 }
 0x580   : > { %v1551_v38 = vadd.f32 %v1543_v9, %v1503_v46  }
 0x581 PF: > { %1563 = sbr.rel (%p5990_p8) target bundleno = 1623 (0x657), region = 112  ;;  %s5274_s17 = smov (!%p5990_p8), 8   ;;  %v5275_v44 = vmov (!%p5990_p8), 0   ;;  %v5277_v1 = vmov (!%p5990_p8), 1   ;;  %v5278_v53 = vmov (!%p5990_p8), 2   ;;  %vm1580_vm0 = vcmp.ge.s32.totalorder (!%p5990_p8), %v5531_v35, 8  ;;  %v4932_v23 = vphi %v6008_v23, %v1545_v23   ;;  %v4928_v29 = vphi %v6006_v29, %v7092_v29   ;;  %v4924_v58 = vphi %v6004_v58, %v1547_v58   ;;  %v4920_v31 = vphi %v6002_v31, %v1548_v31   ;;  %v4916_v51 = vphi %v6000_v51, %v1549_v51   ;;  %v4912_v62 = vphi %v5998_v62, %v7091_v62   ;;  %v4908_v38 = vphi %v5996_v38, %v1551_v38   ;;  %v4904_v56 = vphi %v5994_v56, %v1552_v56  }
 0x582   : > { %1568 = vrot.lane.b32.xlu1 (!%p5990_p8), %v5616_v37, %s5274_s17  ;;  %1564 = vrot.lane.b32.xlu0 (!%p5990_p8), %v5608_v27, %s5274_s17  ;;  %s5276_s26 = smov (!%p5990_p8), 120   ;;  %vm1607_vm1 = vcmp.lt.s32.totalorder (!%p5990_p8), %v5531_v35, 26 }
 0x583   : > { %4245 = vset.pattern.permute.xlu1 (!%p5990_p8), %v5275_v44  ;;  %4244 = vset.pattern.permute.xlu0 (!%p5990_p8), %v5275_v44 }
 0x586   : > { %1570 = vrot.lane.b32.xlu1 (!%p5990_p8), %v5614_v36, %s5274_s17  ;;  %1566 = vrot.lane.b32.xlu0 (!%p5990_p8), %v5606_v26, %s5274_s17 }
 0x58a   : > { %1574 = vrot.lane.b32.xlu1 %v5622_v47, %s5274_s17  ;;  %1572 = vrot.lane.b32.xlu0 %v5624_v49, %s5274_s17 }
 0x58e   : > { %1578 = vrot.lane.b32.xlu1 %v5630_v59, %s5274_s17  ;;  %1576 = vrot.lane.b32.xlu0 %v5632_v60, %s5274_s17 }
 0x592   : > { %1593 = vrot.lane.b32.xlu1 %v5606_v26, %s5276_s26  ;;  %1591 = vrot.lane.b32.xlu0 %v5608_v27, %s5276_s26 }
 0x596   : > { %1597 = vrot.lane.b32.xlu1 %v5614_v36, %s5276_s26  ;;  %1595 = vrot.lane.b32.xlu0 %v5616_v37, %s5276_s26 }
 0x59a   : > { %1601 = vrot.lane.b32.xlu1 %v5622_v47, %s5276_s26  ;;  %1599 = vrot.lane.b32.xlu0 %v5624_v49, %s5276_s26 }
 0x59e   : > { %1605 = vrot.lane.b32.xlu1 %v5630_v59, %s5276_s26  ;;  %1603 = vrot.lane.b32.xlu0 %v5632_v60, %s5276_s26 }
 0x5a2   : > { %1625 = vperm.xlu1 %4245, %v5505_v16   ;;  %1620 = vperm.xlu0 %4244, %v5503_v15  }
 0x5a6   : > { %1630 = vperm.xlu1 %4245, %v5507_v17   ;;  %1635 = vperm.xlu0 %4244, %v5509_v18  }
 0x5aa   : > { %1640 = vperm.xlu1 %4245, %v5511_v19   ;;  %1645 = vperm.xlu0 %4244, %v5513_v20  }
 0x5ae   : > { %1650 = vperm.xlu1 %4245, %v5515_v21   ;;  %1655 = vperm.xlu0 %4244, %v5517_v22  }
 0x5b2   : > { %4246 = vset.pattern.permute.xlu1 %v5277_v1  ;;  %4247 = vset.pattern.permute.xlu0 %v5277_v1 }
 0x5b3   : > { %1667 = vperm.xlu1 %4246, %v5503_v15   ;;  %1671 = vperm.xlu0 %4247, %v5505_v16  }
 0x5b7   : > { %1675 = vperm.xlu1 %4246, %v5507_v17   ;;  %1683 = vperm.xlu0 %4247, %v5511_v19  }
 0x5bb   : > { %1679 = vperm.xlu1 %4246, %v5509_v18   ;;  %1691 = vperm.xlu0 %4247, %v5515_v21  }
 0x5bf   : > { %1687 = vperm.xlu1 %4246, %v5513_v20   ;;  %4248 = vset.pattern.permute.xlu0 %v5278_v53 }
 0x5c0   : > { %1715 = vperm.xlu0 %4248, %v5503_v15  }
 0x5c3   : > { %1695 = vperm.xlu1 %4246, %v5517_v22  }
 0x5c4   : > { %1727 = vperm.xlu0 %4248, %v5509_v18  }
 0x5c7   : > { %4249 = vset.pattern.permute.xlu1 %v5278_v53 }
 0x5c8   : > { %1719 = vperm.xlu1 %4249, %v5505_v16   ;;  %1735 = vperm.xlu0 %4248, %v5513_v20  }
 0x5cc   : > { %1723 = vperm.xlu1 %4249, %v5507_v17   ;;  %1743 = vperm.xlu0 %4248, %v5517_v22  }
 0x5d0   : > { %1731 = vperm.xlu1 %4249, %v5511_v19  }
 0x5d4   : > { %1739 = vperm.xlu1 %4249, %v5515_v21  }
 0x5f4   : > { %v1569_v40 = vpop.permute.xlu1 %1568  ;;  %v1565_v13 = vpop.permute.xlu0 %1564 }
 0x5f5   : > { %v1583_v10 = vsel %vm1580_vm0, %v1565_v13, 0.0 }
 0x5f8   : > { %v1571_v31 = vpop.permute.xlu1 %1570  ;;  %v1567_v23 = vpop.permute.xlu0 %1566 }
 0x5f9   : > { %v1586_v9 = vsel %vm1580_vm0, %v1571_v31, 0.0  ;;  %v1584_v13 = vsel %vm1580_vm0, %v1567_v23, 0.0 }
 0x5fc   : > { %v1575_v56 = vpop.permute.xlu1 %1574  ;;  %v6189_v41 = vpop.permute.xlu0 %1572 }
 0x5fd   : > { %v1588_v31 = vsel %vm1580_vm0, %v1575_v56, 0.0 }
 0x600   : > { %v1579_v38 = vpop.permute.xlu1 %1578  ;;  %v6191_v62 = vpop.permute.xlu0 %1576 }
 0x601   : > { %v1590_v23 = vsel %vm1580_vm0, %v1579_v38, 0.0 }
 0x604   : > { %v1594_v3 = vpop.permute.xlu1 %1593  ;;  %v1592_v51 = vpop.permute.xlu0 %1591 }
 0x605   : > { %v1610_v45 = vsel %vm1607_vm1, %v1592_v51, 0.0 }
 0x608   : > { %v1598_v58 = vpop.permute.xlu1 %1597  ;;  %v1596_v63 = vpop.permute.xlu0 %1595 }
 0x60c   : > { %v1602_v43 = vpop.permute.xlu1 %1601  ;;  %v6193_v29 = vpop.permute.xlu0 %1599 }
 0x610   : > { %v1606_v24 = vpop.permute.xlu1 %1605  ;;  %v6195_v54 = vpop.permute.xlu0 %1603 }
 0x621   : > { %v1626_v32 = vpop.permute.xlu1 %1625  ;;  %v1621_v14 = vpop.permute.xlu0 %1620 }
 0x622   : > { %v1658_v39 = vmul.f32 %v1621_v14, %v1583_v10  ;;  %v1613_v14 = vsel %vm1607_vm1, %v1598_v58, 0.0  ;;  %v1611_v58 = vsel %vm1607_vm1, %v1594_v3, 0.0  ;;  %v1587_v3 = vsel %vm1580_vm0, %v6189_v41, 0.0 }
 0x623   : > { %v1614_v41 = vsel %vm1607_vm1, %v6193_v29, 0.0 }
 0x625   : > { %v1631_v2 = vpop.permute.xlu1 %1630  ;;  %v1636_v0 = vpop.permute.xlu0 %1635 }
 0x626   : > { %v1661_v44 = vmul.f32 %v1636_v0, %v1586_v9  ;;  %v1659_v0 = vmul.f32 %v1626_v32, %v1584_v13 }
 0x629   : > { %v1641_v12 = vpop.permute.xlu1 %1640  ;;  %v1646_v30 = vpop.permute.xlu0 %1645 }
 0x62d   : > { %v6197_v11 = vpop.permute.xlu1 %1650  ;;  %v1656_v61 = vpop.permute.xlu0 %1655 }
 0x62e   : > { %v1665_v38 = vmul.f32 %v1656_v61, %v1590_v23 }
 0x632   : > { %v1668_v33 = vpop.permute.xlu1 %1667  ;;  %v1672_v34 = vpop.permute.xlu0 %1671 }
 0x633   : > { %v1698_v50 = vmul.f32 %v1668_v33, %v5608_v27  ;;  %v1699_v33 = vmul.f32 %v1672_v34, %v5606_v26  ;;  %v1615_v34 = vsel %vm1607_vm1, %v1602_v43, 0.0 }
 0x635   : > { %v1706_v25 = vadd.f32 %v1698_v50, %v1658_v39  ;;  %v1585_v39 = vsel %vm1580_vm0, %v1569_v40, 0.0 }
 0x636   : > { %v1676_v5 = vpop.permute.xlu1 %1675  ;;  %v1684_v55 = vpop.permute.xlu0 %1683  ;;  %v1660_v9 = vmul.f32 %v1631_v2, %v1585_v39 }
 0x637   : > { %v1702_v13 = vmul.f32 %v1684_v55, %v5624_v49  ;;  %v1589_v55 = vsel %vm1580_vm0, %v6191_v62, 0.0 }
 0x638   : > { %v1664_v39 = vmul.f32 %v6197_v11, %v1589_v55 }
 0x63a   : > { %v1680_v57 = vpop.permute.xlu1 %1679  ;;  %v1692_v52 = vpop.permute.xlu0 %1691 }
 0x63b   : > { %v1701_v42 = vmul.f32 %v1680_v57, %v5614_v36 }
 0x63d   : > { %v1709_v10 = vadd.f32 %v1701_v42, %v1661_v44 }
 0x63e   : > { %v1688_v28 = vpop.permute.xlu1 %1687 }
 0x63f   : > { %v1716_v7 = vpop.permute.xlu0 %1715  ;;  %v1703_v50 = vmul.f32 %v1688_v28, %v5622_v47  ;;  %v1707_v28 = vadd.f32 %v1699_v33, %v1659_v0 }
 0x640   : > { %v1746_v46 = vmul.f32 %v1716_v7, %v1610_v45  ;;  %v1663_v45 = vmul.f32 %v1646_v30, %v1588_v31  ;;  %v1700_v7 = vmul.f32 %v1676_v5, %v5616_v37  ;;  %v1612_v30 = vsel %vm1607_vm1, %v1596_v63, 0.0 }
 0x641   : > { %v1617_v5 = vsel %vm1607_vm1, %v1606_v24, 0.0 }
 0x642   : > { %v1754_v1 = vadd.f32 %v1746_v46, %v1706_v25   ;;  %v1696_v53 = vpop.permute.xlu1 %1695  ;;  %v1711_v56 = vadd.f32 %v1703_v50, %v1663_v45 }
 0x643   : > { %v1728_v51 = vpop.permute.xlu0 %1727  ;;  %v1705_v40 = vmul.f32 %v1696_v53, %v5630_v59  ;;  %v1708_v53 = vadd.f32 %v1700_v7, %v1660_v9 }
 0x644   : > { %v1749_v57 = vmul.f32 %v1728_v51, %v1613_v14 }
 0x645   : > { %v1713_v14 = vadd.f32 %v1705_v40, %v1665_v38 }
 0x646   : > { %v1757_v31 = vadd.f32 %v1749_v57, %v1709_v10   ;;  %v1662_v10 = vmul.f32 %v1641_v12, %v1587_v3  ;;  %v1704_v57 = vmul.f32 %v1692_v52, %v5632_v60  ;;  %v1616_v12 = vsel %vm1607_vm1, %v6195_v54, 0.0 }
 0x647   : > { %v1720_v25 = vpop.permute.xlu1 %1719  ;;  %v1736_v42 = vpop.permute.xlu0 %1735 }
 0x648   : > { %v1747_v32 = vmul.f32 %v1720_v25, %v1611_v58  ;;  %v1751_v46 = vmul.f32 %v1736_v42, %v1615_v34  ;;  %v1710_v63 = vadd.f32 %v1702_v13, %v1662_v10  ;;  %v1712_v23 = vadd.f32 %v1704_v57, %v1664_v39 }
 0x64a   : > { %v1755_v43 = vadd.f32 %v1747_v32, %v1707_v28   ;;  %v1759_v44 = vadd.f32 %v1751_v46, %v1711_v56  }
 0x64b   : > { %v1724_v33 = vpop.permute.xlu1 %1723  ;;  %v1744_v51 = vpop.permute.xlu0 %1743 }
 0x64c   : > { %v1748_v2 = vmul.f32 %v1724_v33, %v1612_v30  ;;  %v1753_v61 = vmul.f32 %v1744_v51, %v1617_v5  ;;  %v7093_v62 = vmov %v1759_v44  ;;  %v7094_v29 = vmov %v1755_v43 }
 0x64e   : > { %v1756_v58 = vadd.f32 %v1748_v2, %v1708_v53   ;;  %v1761_v56 = vadd.f32 %v1753_v61, %v1713_v14  }
 0x64f   : > { %v1732_v50 = vpop.permute.xlu1 %1731 }
 0x650   : > { %v1750_v24 = vmul.f32 %v1732_v50, %v1614_v41 }
 0x652   : > { %v1758_v51 = vadd.f32 %v1750_v24, %v1710_v63  }
 0x653   : > { %v1740_v0 = vpop.permute.xlu1 %1739 }
 0x654   : > { %v1752_v45 = vmul.f32 %v1740_v0, %v1616_v12 }
 0x656   : > { %v1760_v38 = vadd.f32 %v1752_v45, %v1712_v23   ;;  %v7095_v23 = vmov %v1754_v1 }
 0x657 PF: > { %v4965_v54 = vmov %v4964_v23   ;;  %v7096_v11 = vmov %v4936_v56  ;;  %v7097_v12 = vmov %v4940_v38  ;;  %v7098_v13 = vmov %v4944_v62  ;;  %v4964_v23 = vphi %v4932_v23, %v7095_v23   ;;  %v4960_v29 = vphi %v4928_v29, %v7094_v29   ;;  %v4956_v58 = vphi %v4924_v58, %v1756_v58   ;;  %v4952_v31 = vphi %v4920_v31, %v1757_v31   ;;  %v4948_v51 = vphi %v4916_v51, %v1758_v51   ;;  %v4944_v62 = vphi %v4912_v62, %v7093_v62   ;;  %v4940_v38 = vphi %v4908_v38, %v1760_v38   ;;  %v4936_v56 = vphi %v4904_v56, %v1761_v56  }
 0x658   : > { %v7099_v14 = vmov %v4948_v51  ;;  %v7100_v23 = vmov %v4952_v31  ;;  %v7101_v24 = vmov %v4956_v58  ;;  %v7102_v25 = vmov %v4960_v29 }
 0x659   : > { %v7103_v28 = vmov %v4965_v54 }
 0x65a PF: > { %v7104_v0 = vmov %v4968_v11  ;;  %v7105_v1 = vmov %v4972_v12  ;;  %v7106_v38 = vmov %v4976_v13  ;;  %v7107_v43 = vmov %v4980_v14  ;;  %v4996_v28 = vphi %v4900_v28, %v7103_v28   ;;  %v4992_v25 = vphi %v4896_v25, %v7102_v25   ;;  %v4988_v24 = vphi %v4892_v24, %v7101_v24   ;;  %v4984_v23 = vphi %v4888_v23, %v7100_v23   ;;  %v4980_v14 = vphi %v4884_v14, %v7099_v14   ;;  %v4976_v13 = vphi %v4880_v13, %v7098_v13   ;;  %v4972_v12 = vphi %v4876_v12, %v7097_v12   ;;  %v4968_v11 = vphi %v4872_v11, %v7096_v11  }
 0x65b   : > { %v7108_v2 = vmov %v4984_v23  ;;  %v7109_v3 = vmov %v4988_v24  ;;  %v7110_v7 = vmov %v4992_v25  ;;  %v7111_v10 = vmov %v4996_v28 }
 0x65c PF: > { %1788 = sbr.rel (%p912_p13) target bundleno = 2465 (0x9a1), region = 116  ;;  %s6337_s20 = sadd.s32 (!%p912_p13), 4294967292, %s7161_s2  ;;  %v6341_v62 = vmov (!%p912_p13), 0   ;;  %v6343_v29 = vmov (!%p912_p13), 0   ;;  %v6345_v11 = vmov (!%p912_p13), 0   ;;  %v6347_v52 = vmov (!%p912_p13), 0   ;;  %v5028_v10 = vphi %v5649_v10, %v7111_v10   ;;  %v5024_v7 = vphi %v5647_v7, %v7110_v7   ;;  %v5020_v3 = vphi %v5645_v3, %v7109_v3   ;;  %v5016_v2 = vphi %v5643_v2, %v7108_v2   ;;  %v5012_v43 = vphi %v5641_v43, %v7107_v43   ;;  %v5008_v38 = vphi %v5639_v38, %v7106_v38   ;;  %v5004_v1 = vphi %v5637_v1, %v7105_v1   ;;  %v5000_v0 = vphi %v5635_v0, %v7104_v0  }
 0x65d   : > { %p1790_p11 = scmp.lt.s32.totalorder (!%p912_p13), %s6337_s20, 2  ;;  %p3156_p12 = scmp.ge.s32.totalorder (!%p912_p13), %s6337_s20, 2  ;;  %v6349_v31 = vmov (!%p912_p13), 0   ;;  %v6351_v58 = vmov (!%p912_p13), 0   ;;  %v6353_v34 = vmov (!%p912_p13), 0   ;;  %v6355_v1 = vmov (!%p912_p13), 0  }
 0x663   : > { %1793 = sbr.rel (%p3156_p12) target bundleno = 2072 (0x818), region = 120  ;;  %p1794_p3 = scmp.lt.s32.totalorder (!%p3156_p12), %s6337_s20, 1  ;;  %v6359_v28 = vmov (!%p3156_p12), 0   ;;  %v6361_v7 = vmov (!%p3156_p12), 0   ;;  %v6363_v40 = vmov (!%p3156_p12), 0   ;;  %v6365_v25 = vmov (!%p3156_p12), 0  }
 0x664   : > { %p3157_p5 = scmp.ge.s32.totalorder (!%p3156_p12), %s6337_s20, 1  ;;  %v6367_v42 = vmov (!%p3156_p12), 0   ;;  %v6369_v56 = vmov (!%p3156_p12), 0   ;;  %v6371_v32 = vmov (!%p3156_p12), 0   ;;  %v6373_v46 = vmov (!%p3156_p12), 0  }
 0x66a   : > { %1797 = sbr.rel (%p3157_p5) target bundleno = 1856 (0x740), region = 124  ;;  %s5279_s24 = smov (!%p3157_p5), 16   ;;  %v5280_v9 = vmov (!%p3157_p5), 0   ;;  %v5282_v38 = vmov (!%p3157_p5), 1   ;;  %v5283_v3 = vmov (!%p3157_p5), 2   ;;  %vm1814_vm2 = vcmp.ge.s32.totalorder (!%p3157_p5), %v5531_v35, 16 }
 0x66b   : > { %1802 = vrot.lane.b32.xlu1 (!%p3157_p5), %v5616_v37, %s5279_s24  ;;  %1798 = vrot.lane.b32.xlu0 (!%p3157_p5), %v5608_v27, %s5279_s24  ;;  %s5281_s0 = smov (!%p3157_p5), 112   ;;  %vm1841_vm3 = vcmp.lt.s32.totalorder (!%p3157_p5), %v5531_v35, 18 }
 0x66c   : > { %4251 = vset.pattern.permute.xlu1 (!%p3157_p5), %v5280_v9  ;;  %4250 = vset.pattern.permute.xlu0 (!%p3157_p5), %v5280_v9 }
 0x66f   : > { %1804 = vrot.lane.b32.xlu1 (!%p3157_p5), %v5614_v36, %s5279_s24  ;;  %1800 = vrot.lane.b32.xlu0 (!%p3157_p5), %v5606_v26, %s5279_s24 }
 0x673   : > { %1808 = vrot.lane.b32.xlu1 %v5622_v47, %s5279_s24  ;;  %1806 = vrot.lane.b32.xlu0 %v5624_v49, %s5279_s24 }
 0x677   : > { %1812 = vrot.lane.b32.xlu1 %v5630_v59, %s5279_s24  ;;  %1810 = vrot.lane.b32.xlu0 %v5632_v60, %s5279_s24 }
 0x67b   : > { %1827 = vrot.lane.b32.xlu1 %v5606_v26, %s5281_s0  ;;  %1825 = vrot.lane.b32.xlu0 %v5608_v27, %s5281_s0 }
 0x67f   : > { %1831 = vrot.lane.b32.xlu1 %v5614_v36, %s5281_s0  ;;  %1829 = vrot.lane.b32.xlu0 %v5616_v37, %s5281_s0 }
 0x683   : > { %1835 = vrot.lane.b32.xlu1 %v5622_v47, %s5281_s0  ;;  %1833 = vrot.lane.b32.xlu0 %v5624_v49, %s5281_s0 }
 0x687   : > { %1839 = vrot.lane.b32.xlu1 %v5630_v59, %s5281_s0  ;;  %1837 = vrot.lane.b32.xlu0 %v5632_v60, %s5281_s0 }
 0x68b   : > { %1859 = vperm.xlu1 %4251, %v5505_v16   ;;  %1854 = vperm.xlu0 %4250, %v5503_v15  }
 0x68f   : > { %1864 = vperm.xlu1 %4251, %v5507_v17   ;;  %1869 = vperm.xlu0 %4250, %v5509_v18  }
 0x693   : > { %1874 = vperm.xlu1 %4251, %v5511_v19   ;;  %1879 = vperm.xlu0 %4250, %v5513_v20  }
 0x697   : > { %1884 = vperm.xlu1 %4251, %v5515_v21   ;;  %1889 = vperm.xlu0 %4250, %v5517_v22  }
 0x69b   : > { %4252 = vset.pattern.permute.xlu1 %v5282_v38  ;;  %4253 = vset.pattern.permute.xlu0 %v5282_v38 }
 0x69c   : > { %1901 = vperm.xlu1 %4252, %v5503_v15   ;;  %1905 = vperm.xlu0 %4253, %v5505_v16  }
 0x6a0   : > { %1909 = vperm.xlu1 %4252, %v5507_v17   ;;  %1917 = vperm.xlu0 %4253, %v5511_v19  }
 0x6a4   : > { %1913 = vperm.xlu1 %4252, %v5509_v18   ;;  %1925 = vperm.xlu0 %4253, %v5515_v21  }
 0x6a8   : > { %1921 = vperm.xlu1 %4252, %v5513_v20   ;;  %4254 = vset.pattern.permute.xlu0 %v5283_v3 }
 0x6a9   : > { %1949 = vperm.xlu0 %4254, %v5503_v15  }
 0x6ac   : > { %1929 = vperm.xlu1 %4252, %v5517_v22  }
 0x6ad   : > { %1961 = vperm.xlu0 %4254, %v5509_v18  }
 0x6b0   : > { %4255 = vset.pattern.permute.xlu1 %v5283_v3 }
 0x6b1   : > { %1953 = vperm.xlu1 %4255, %v5505_v16   ;;  %1969 = vperm.xlu0 %4254, %v5513_v20  }
 0x6b5   : > { %1957 = vperm.xlu1 %4255, %v5507_v17   ;;  %1977 = vperm.xlu0 %4254, %v5517_v22  }
 0x6b9   : > { %1965 = vperm.xlu1 %4255, %v5511_v19  }
 0x6bd   : > { %1973 = vperm.xlu1 %4255, %v5515_v21  }
 0x6dd   : > { %v1803_v30 = vpop.permute.xlu1 %1802  ;;  %v1799_v43 = vpop.permute.xlu0 %1798 }
 0x6de   : > { %v1817_v1 = vsel %vm1814_vm2, %v1799_v43, 0.0 }
 0x6e1   : > { %v1805_v44 = vpop.permute.xlu1 %1804  ;;  %v1801_v5 = vpop.permute.xlu0 %1800 }
 0x6e2   : > { %v1820_v46 = vsel %vm1814_vm2, %v1805_v44, 0.0  ;;  %v1818_v3 = vsel %vm1814_vm2, %v1801_v5, 0.0 }
 0x6e5   : > { %v1809_v53 = vpop.permute.xlu1 %1808  ;;  %v6415_v13 = vpop.permute.xlu0 %1806 }
 0x6e6   : > { %v1822_v44 = vsel %vm1814_vm2, %v1809_v53, 0.0 }
 0x6e9   : > { %v1813_v14 = vpop.permute.xlu1 %1812  ;;  %v6417_v33 = vpop.permute.xlu0 %1810 }
 0x6ea   : > { %v1824_v5 = vsel %vm1814_vm2, %v1813_v14, 0.0 }
 0x6ed   : > { %v1828_v51 = vpop.permute.xlu1 %1827  ;;  %v1826_v2 = vpop.permute.xlu0 %1825 }
 0x6ee   : > { %v1844_v40 = vsel %vm1841_vm3, %v1826_v2, 0.0 }
 0x6f1   : > { %v1832_v61 = vpop.permute.xlu1 %1831  ;;  %v1830_v10 = vpop.permute.xlu0 %1829 }
 0x6f2   : > { %v1847_v43 = vsel %vm1841_vm3, %v1832_v61, 0.0  ;;  %v1845_v61 = vsel %vm1841_vm3, %v1828_v51, 0.0  ;;  %v1821_v51 = vsel %vm1814_vm2, %v6415_v13, 0.0 }
 0x6f5   : > { %v1836_v41 = vpop.permute.xlu1 %1835  ;;  %v6419_v63 = vpop.permute.xlu0 %1833 }
 0x6f6   : > { %v1848_v13 = vsel %vm1841_vm3, %v6419_v63, 0.0 }
 0x6f9   : > { %v1840_v50 = vpop.permute.xlu1 %1839  ;;  %v6421_v57 = vpop.permute.xlu0 %1837 }
 0x70a   : > { %v1860_v24 = vpop.permute.xlu1 %1859  ;;  %v1855_v55 = vpop.permute.xlu0 %1854 }
 0x70b   : > { %v1892_v28 = vmul.f32 %v1855_v55, %v1817_v1  ;;  %v1819_v1 = vsel %vm1814_vm2, %v1803_v30, 0.0 }
 0x70e   : > { %v1865_v39 = vpop.permute.xlu1 %1864  ;;  %v1870_v12 = vpop.permute.xlu0 %1869 }
 0x70f   : > { %v1895_v9 = vmul.f32 %v1870_v12, %v1820_v46  ;;  %v1893_v12 = vmul.f32 %v1860_v24, %v1818_v3 }
 0x712   : > { %v1875_v0 = vpop.permute.xlu1 %1874  ;;  %v1880_v23 = vpop.permute.xlu0 %1879 }
 0x716   : > { %v6423_v45 = vpop.permute.xlu1 %1884  ;;  %v1890_v54 = vpop.permute.xlu0 %1889 }
 0x717   : > { %v1899_v14 = vmul.f32 %v1890_v54, %v1824_v5 }
 0x71b   : > { %v1902_v62 = vpop.permute.xlu1 %1901  ;;  %v1906_v29 = vpop.permute.xlu0 %1905 }
 0x71c   : > { %v1932_v34 = vmul.f32 %v1902_v62, %v5608_v27  ;;  %v1933_v55 = vmul.f32 %v1906_v29, %v5606_v26  ;;  %v1849_v29 = vsel %vm1841_vm3, %v1836_v41, 0.0 }
 0x71e   : > { %v1940_v42 = vadd.f32 %v1932_v34, %v1892_v28  ;;  %v1897_v28 = vmul.f32 %v1880_v23, %v1822_v44  ;;  %v1846_v23 = vsel %vm1841_vm3, %v1830_v10, 0.0 }
 0x71f   : > { %v1910_v11 = vpop.permute.xlu1 %1909  ;;  %v1918_v52 = vpop.permute.xlu0 %1917 }
 0x723   : > { %v1914_v31 = vpop.permute.xlu1 %1913  ;;  %v1926_v58 = vpop.permute.xlu0 %1925 }
 0x724   : > { %v1935_v56 = vmul.f32 %v1914_v31, %v5614_v36 }
 0x726   : > { %v1943_v62 = vadd.f32 %v1935_v56, %v1895_v9  ;;  %v1894_v9 = vmul.f32 %v1865_v39, %v1819_v1  ;;  %v1938_v1 = vmul.f32 %v1926_v58, %v5632_v60 }
 0x727   : > { %v1922_v7 = vpop.permute.xlu1 %1921 }
 0x728   : > { %v1950_v25 = vpop.permute.xlu0 %1949  ;;  %v1937_v34 = vmul.f32 %v1922_v7, %v5622_v47  ;;  %v1941_v7 = vadd.f32 %v1933_v55, %v1893_v12 }
 0x729   : > { %v1980_v32 = vmul.f32 %v1950_v25, %v1844_v40  ;;  %v1934_v40 = vmul.f32 %v1910_v11, %v5616_v37  ;;  %v1851_v11 = vsel %vm1841_vm3, %v1840_v50, 0.0 }
 0x72a   : > { %v1945_v53 = vadd.f32 %v1937_v34, %v1897_v28  ;;  %v1896_v34 = vmul.f32 %v1875_v0, %v1821_v51  ;;  %v1850_v0 = vsel %vm1841_vm3, %v6421_v57, 0.0 }
 0x72b   : > { %v1988_v46 = vadd.f32 %v1980_v32, %v1940_v42   ;;  %v1930_v38 = vpop.permute.xlu1 %1929 }
 0x72c   : > { %v1962_v2 = vpop.permute.xlu0 %1961  ;;  %v1939_v30 = vmul.f32 %v1930_v38, %v5630_v59  ;;  %v1942_v38 = vadd.f32 %v1934_v40, %v1894_v9 }
 0x72d   : > { %v1983_v31 = vmul.f32 %v1962_v2, %v1847_v43  ;;  %v1936_v43 = vmul.f32 %v1918_v52, %v5624_v49  ;;  %v1823_v52 = vsel %vm1814_vm2, %v6417_v33, 0.0 }
 0x72e   : > { %v1947_v55 = vadd.f32 %v1939_v30, %v1899_v14  ;;  %v1898_v44 = vmul.f32 %v6423_v45, %v1823_v52 }
 0x72f   : > { %v1991_v42 = vadd.f32 %v1983_v31, %v1943_v62   ;;  %v1944_v10 = vadd.f32 %v1936_v43, %v1896_v34 }
 0x730   : > { %v1954_v25 = vpop.permute.xlu1 %1953  ;;  %v1970_v56 = vpop.permute.xlu0 %1969  ;;  %v1946_v5 = vadd.f32 %v1938_v1, %v1898_v44 }
 0x731   : > { %v1981_v24 = vmul.f32 %v1954_v25, %v1845_v61  ;;  %v1985_v32 = vmul.f32 %v1970_v56, %v1849_v29 }
 0x733   : > { %v1989_v41 = vadd.f32 %v1981_v24, %v1941_v7   ;;  %v1993_v3 = vadd.f32 %v1985_v32, %v1945_v53  }
 0x734   : > { %v1958_v2 = vpop.permute.xlu1 %1957  ;;  %v1978_v62 = vpop.permute.xlu0 %1977 }
 0x735   : > { %v1982_v39 = vmul.f32 %v1958_v2, %v1846_v23  ;;  %v1987_v54 = vmul.f32 %v1978_v62, %v1851_v11  ;;  %v7112_v40 = vmov %v1993_v3  ;;  %v7113_v32 = vmov %v1989_v41 }
 0x737   : > { %v1990_v56 = vadd.f32 %v1982_v39, %v1942_v38   ;;  %v1995_v28 = vadd.f32 %v1987_v54, %v1947_v55  }
 0x738   : > { %v1966_v31 = vpop.permute.xlu1 %1965 }
 0x739   : > { %v1984_v50 = vmul.f32 %v1966_v31, %v1848_v13 }
 0x73b   : > { %v1992_v25 = vadd.f32 %v1984_v50, %v1944_v10  }
 0x73c   : > { %v1974_v12 = vpop.permute.xlu1 %1973 }
 0x73d   : > { %v1986_v61 = vmul.f32 %v1974_v12, %v1850_v0 }
 0x73f   : > { %v1994_v7 = vadd.f32 %v1986_v61, %v1946_v5  }
 0x740 PF: > { %2006 = sbr.rel (%p1794_p3) target bundleno = 2070 (0x816), region = 128  ;;  %s5284_s3 = smov (!%p1794_p3), 32   ;;  %v5285_v33 = vmov (!%p1794_p3), 0   ;;  %v5287_v63 = vmov (!%p1794_p3), 1   ;;  %v5288_v57 = vmov (!%p1794_p3), 2   ;;  %vm2023_vm4 = vcmp.ge.s32.totalorder (!%p1794_p3), %v5531_v35, 32  ;;  %v5060_v46 = vphi %v6373_v46, %v1988_v46   ;;  %v5056_v32 = vphi %v6371_v32, %v7113_v32   ;;  %v5052_v56 = vphi %v6369_v56, %v1990_v56   ;;  %v5048_v42 = vphi %v6367_v42, %v1991_v42   ;;  %v5044_v25 = vphi %v6365_v25, %v1992_v25   ;;  %v5040_v40 = vphi %v6363_v40, %v7112_v40   ;;  %v5036_v7 = vphi %v6361_v7, %v1994_v7   ;;  %v5032_v28 = vphi %v6359_v28, %v1995_v28  }
 0x741   : > { %2011 = vrot.lane.b32.xlu1 (!%p1794_p3), %v5616_v37, %s5284_s3  ;;  %2007 = vrot.lane.b32.xlu0 (!%p1794_p3), %v5608_v27, %s5284_s3  ;;  %s5286_s4 = smov (!%p1794_p3), 96   ;;  %vm2050_vm5 = vcmp.lt.s32.totalorder (!%p1794_p3), %v5531_v35, 2 }
 0x742   : > { %4257 = vset.pattern.permute.xlu1 (!%p1794_p3), %v5285_v33  ;;  %4256 = vset.pattern.permute.xlu0 (!%p1794_p3), %v5285_v33 }
 0x745   : > { %2013 = vrot.lane.b32.xlu1 (!%p1794_p3), %v5614_v36, %s5284_s3  ;;  %2009 = vrot.lane.b32.xlu0 (!%p1794_p3), %v5606_v26, %s5284_s3 }
 0x749   : > { %2017 = vrot.lane.b32.xlu1 %v5622_v47, %s5284_s3  ;;  %2015 = vrot.lane.b32.xlu0 %v5624_v49, %s5284_s3 }
 0x74d   : > { %2021 = vrot.lane.b32.xlu1 %v5630_v59, %s5284_s3  ;;  %2019 = vrot.lane.b32.xlu0 %v5632_v60, %s5284_s3 }
 0x751   : > { %2036 = vrot.lane.b32.xlu1 %v5606_v26, %s5286_s4  ;;  %2034 = vrot.lane.b32.xlu0 %v5608_v27, %s5286_s4 }
 0x755   : > { %2040 = vrot.lane.b32.xlu1 %v5614_v36, %s5286_s4  ;;  %2038 = vrot.lane.b32.xlu0 %v5616_v37, %s5286_s4 }
 0x759   : > { %2044 = vrot.lane.b32.xlu1 %v5622_v47, %s5286_s4  ;;  %2042 = vrot.lane.b32.xlu0 %v5624_v49, %s5286_s4 }
 0x75d   : > { %2048 = vrot.lane.b32.xlu1 %v5630_v59, %s5286_s4  ;;  %2046 = vrot.lane.b32.xlu0 %v5632_v60, %s5286_s4 }
 0x761   : > { %2068 = vperm.xlu1 %4257, %v5505_v16   ;;  %2063 = vperm.xlu0 %4256, %v5503_v15  }
 0x765   : > { %2073 = vperm.xlu1 %4257, %v5507_v17   ;;  %2078 = vperm.xlu0 %4256, %v5509_v18  }
 0x769   : > { %2083 = vperm.xlu1 %4257, %v5511_v19   ;;  %2088 = vperm.xlu0 %4256, %v5513_v20  }
 0x76d   : > { %2093 = vperm.xlu1 %4257, %v5515_v21   ;;  %2098 = vperm.xlu0 %4256, %v5517_v22  }
 0x771   : > { %4258 = vset.pattern.permute.xlu1 %v5287_v63  ;;  %4259 = vset.pattern.permute.xlu0 %v5287_v63 }
 0x772   : > { %2110 = vperm.xlu1 %4258, %v5503_v15   ;;  %2114 = vperm.xlu0 %4259, %v5505_v16  }
 0x776   : > { %2118 = vperm.xlu1 %4258, %v5507_v17   ;;  %2126 = vperm.xlu0 %4259, %v5511_v19  }
 0x77a   : > { %2122 = vperm.xlu1 %4258, %v5509_v18   ;;  %2134 = vperm.xlu0 %4259, %v5515_v21  }
 0x77e   : > { %2130 = vperm.xlu1 %4258, %v5513_v20   ;;  %4260 = vset.pattern.permute.xlu0 %v5288_v57 }
 0x77f   : > { %2158 = vperm.xlu0 %4260, %v5503_v15  }
 0x782   : > { %2138 = vperm.xlu1 %4258, %v5517_v22  }
 0x783   : > { %2170 = vperm.xlu0 %4260, %v5509_v18  }
 0x786   : > { %4261 = vset.pattern.permute.xlu1 %v5288_v57 }
 0x787   : > { %2162 = vperm.xlu1 %4261, %v5505_v16   ;;  %2178 = vperm.xlu0 %4260, %v5513_v20  }
 0x78b   : > { %2166 = vperm.xlu1 %4261, %v5507_v17   ;;  %2186 = vperm.xlu0 %4260, %v5517_v22  }
 0x78f   : > { %2174 = vperm.xlu1 %4261, %v5511_v19  }
 0x793   : > { %2182 = vperm.xlu1 %4261, %v5515_v21  }
 0x7b3   : > { %v2012_v45 = vpop.permute.xlu1 %2011  ;;  %v2008_v58 = vpop.permute.xlu0 %2007 }
 0x7b4   : > { %v2026_v31 = vsel %vm2023_vm4, %v2008_v58, 0.0 }
 0x7b7   : > { %v2014_v42 = vpop.permute.xlu1 %2013  ;;  %v2010_v46 = vpop.permute.xlu0 %2009 }
 0x7b8   : > { %v2029_v61 = vsel %vm2023_vm4, %v2014_v42, 0.0  ;;  %v2027_v58 = vsel %vm2023_vm4, %v2010_v46, 0.0 }
 0x7bb   : > { %v2018_v28 = vpop.permute.xlu1 %2017  ;;  %v6554_v29 = vpop.permute.xlu0 %2015 }
 0x7bc   : > { %v2031_v42 = vsel %vm2023_vm4, %v2018_v28, 0.0 }
 0x7bf   : > { %v2022_v7 = vpop.permute.xlu1 %2021  ;;  %v6556_v40 = vpop.permute.xlu0 %2019 }
 0x7c0   : > { %v2033_v46 = vsel %vm2023_vm4, %v2022_v7, 0.0 }
 0x7c3   : > { %v2037_v30 = vpop.permute.xlu1 %2036  ;;  %v2035_v25 = vpop.permute.xlu0 %2034 }
 0x7c4   : > { %v2053_v52 = vsel %vm2050_vm5, %v2035_v25, 0.0 }
 0x7c7   : > { %v2041_v56 = vpop.permute.xlu1 %2040  ;;  %v2039_v53 = vpop.permute.xlu0 %2038 }
 0x7cb   : > { %v2045_v24 = vpop.permute.xlu1 %2044  ;;  %v6558_v32 = vpop.permute.xlu0 %2042 }
 0x7cf   : > { %v2049_v9 = vpop.permute.xlu1 %2048  ;;  %v6560_v14 = vpop.permute.xlu0 %2046 }
 0x7e0   : > { %v2069_v51 = vpop.permute.xlu1 %2068  ;;  %v2064_v23 = vpop.permute.xlu0 %2063 }
 0x7e1   : > { %v2101_v1 = vmul.f32 %v2064_v23, %v2026_v31  ;;  %v2056_v23 = vsel %vm2050_vm5, %v2041_v56, 0.0  ;;  %v2054_v56 = vsel %vm2050_vm5, %v2037_v30, 0.0  ;;  %v2030_v30 = vsel %vm2023_vm4, %v6554_v29, 0.0 }
 0x7e2   : > { %v2057_v29 = vsel %vm2050_vm5, %v6558_v32, 0.0 }
 0x7e4   : > { %v2074_v41 = vpop.permute.xlu1 %2073  ;;  %v2079_v3 = vpop.permute.xlu0 %2078 }
 0x7e5   : > { %v2104_v33 = vmul.f32 %v2079_v3, %v2029_v61  ;;  %v2102_v3 = vmul.f32 %v2069_v51, %v2027_v58 }
 0x7e8   : > { %v2084_v11 = vpop.permute.xlu1 %2083  ;;  %v2089_v38 = vpop.permute.xlu0 %2088 }
 0x7ec   : > { %v6562_v43 = vpop.permute.xlu1 %2093  ;;  %v2099_v55 = vpop.permute.xlu0 %2098 }
 0x7ed   : > { %v2108_v7 = vmul.f32 %v2099_v55, %v2033_v46 }
 0x7f1   : > { %v2111_v2 = vpop.permute.xlu1 %2110  ;;  %v2115_v62 = vpop.permute.xlu0 %2114 }
 0x7f2   : > { %v2141_v10 = vmul.f32 %v2111_v2, %v5608_v27  ;;  %v2142_v2 = vmul.f32 %v2115_v62, %v5606_v26  ;;  %v2058_v62 = vsel %vm2050_vm5, %v2045_v24, 0.0 }
 0x7f4   : > { %v2149_v0 = vadd.f32 %v2141_v10, %v2101_v1  ;;  %v2028_v1 = vsel %vm2023_vm4, %v2012_v45, 0.0 }
 0x7f5   : > { %v2119_v39 = vpop.permute.xlu1 %2118  ;;  %v2127_v54 = vpop.permute.xlu0 %2126  ;;  %v2103_v61 = vmul.f32 %v2074_v41, %v2028_v1 }
 0x7f6   : > { %v2145_v58 = vmul.f32 %v2127_v54, %v5624_v49  ;;  %v2032_v54 = vsel %vm2023_vm4, %v6556_v40, 0.0 }
 0x7f7   : > { %v2107_v1 = vmul.f32 %v6562_v43, %v2032_v54 }
 0x7f9   : > { %v2123_v34 = vpop.permute.xlu1 %2122  ;;  %v2135_v13 = vpop.permute.xlu0 %2134 }
 0x7fa   : > { %v2144_v12 = vmul.f32 %v2123_v34, %v5614_v36 }
 0x7fc   : > { %v2152_v31 = vadd.f32 %v2144_v12, %v2104_v33 }
 0x7fd   : > { %v2131_v50 = vpop.permute.xlu1 %2130 }
 0x7fe   : > { %v2159_v44 = vpop.permute.xlu0 %2158  ;;  %v2146_v10 = vmul.f32 %v2131_v50, %v5622_v47  ;;  %v2150_v50 = vadd.f32 %v2142_v2, %v2102_v3 }
 0x7ff   : > { %v2189_v5 = vmul.f32 %v2159_v44, %v2053_v52  ;;  %v2106_v52 = vmul.f32 %v2089_v38, %v2031_v42  ;;  %v2143_v44 = vmul.f32 %v2119_v39, %v5616_v37  ;;  %v2055_v38 = vsel %vm2050_vm5, %v2039_v53, 0.0 }
 0x800   : > { %v2060_v39 = vsel %vm2050_vm5, %v2049_v9, 0.0 }
 0x801   : > { %v2197_v63 = vadd.f32 %v2189_v5, %v2149_v0   ;;  %v2139_v57 = vpop.permute.xlu1 %2138  ;;  %v2154_v28 = vadd.f32 %v2146_v10, %v2106_v52 }
 0x802   : > { %v2171_v25 = vpop.permute.xlu0 %2170  ;;  %v2148_v45 = vmul.f32 %v2139_v57, %v5630_v59  ;;  %v2151_v57 = vadd.f32 %v2143_v44, %v2103_v61 }
 0x803   : > { %v2192_v34 = vmul.f32 %v2171_v25, %v2056_v23 }
 0x804   : > { %v2156_v23 = vadd.f32 %v2148_v45, %v2108_v7 }
 0x805   : > { %v2200_v42 = vadd.f32 %v2192_v34, %v2152_v31   ;;  %v2105_v31 = vmul.f32 %v2084_v11, %v2030_v30  ;;  %v2147_v34 = vmul.f32 %v2135_v13, %v5632_v60  ;;  %v2059_v11 = vsel %vm2050_vm5, %v6560_v14, 0.0 }
 0x806   : > { %v2163_v0 = vpop.permute.xlu1 %2162  ;;  %v2179_v12 = vpop.permute.xlu0 %2178 }
 0x807   : > { %v2190_v51 = vmul.f32 %v2163_v0, %v2054_v56  ;;  %v2194_v5 = vmul.f32 %v2179_v12, %v2058_v62  ;;  %v2153_v53 = vadd.f32 %v2145_v58, %v2105_v31  ;;  %v2155_v46 = vadd.f32 %v2147_v34, %v2107_v1 }
 0x809   : > { %v2198_v24 = vadd.f32 %v2190_v51, %v2150_v50   ;;  %v2202_v33 = vadd.f32 %v2194_v5, %v2154_v28  }
 0x80a   : > { %v2167_v2 = vpop.permute.xlu1 %2166  ;;  %v2187_v25 = vpop.permute.xlu0 %2186 }
 0x80b   : > { %v2191_v41 = vmul.f32 %v2167_v2, %v2055_v38  ;;  %v2196_v55 = vmul.f32 %v2187_v25, %v2060_v39  ;;  %v7114_v40 = vmov %v2202_v33  ;;  %v7115_v32 = vmov %v2198_v24 }
 0x80d   : > { %v2199_v56 = vadd.f32 %v2191_v41, %v2151_v57   ;;  %v2204_v28 = vadd.f32 %v2196_v55, %v2156_v23  }
 0x80e   : > { %v2175_v10 = vpop.permute.xlu1 %2174 }
 0x80f   : > { %v2193_v9 = vmul.f32 %v2175_v10, %v2057_v29 }
 0x811   : > { %v2201_v25 = vadd.f32 %v2193_v9, %v2153_v53  }
 0x812   : > { %v2183_v3 = vpop.permute.xlu1 %2182 }
 0x813   : > { %v2195_v52 = vmul.f32 %v2183_v3, %v2059_v11 }
 0x815   : > { %v2203_v7 = vadd.f32 %v2195_v52, %v2155_v46   ;;  %v7116_v46 = vmov %v2197_v63 }
 0x816 PF: > { %v7117_v62 = vmov %v5064_v28  ;;  %v7118_v29 = vmov %v5068_v7  ;;  %v7119_v11 = vmov %v5072_v40  ;;  %v7120_v52 = vmov %v5076_v25  ;;  %v5092_v46 = vphi %v5060_v46, %v7116_v46   ;;  %v5088_v32 = vphi %v5056_v32, %v7115_v32   ;;  %v5084_v56 = vphi %v5052_v56, %v2199_v56   ;;  %v5080_v42 = vphi %v5048_v42, %v2200_v42   ;;  %v5076_v25 = vphi %v5044_v25, %v2201_v25   ;;  %v5072_v40 = vphi %v5040_v40, %v7114_v40   ;;  %v5068_v7 = vphi %v5036_v7, %v2203_v7   ;;  %v5064_v28 = vphi %v5032_v28, %v2204_v28  }
 0x817   : > { %v7121_v31 = vmov %v5080_v42  ;;  %v7122_v58 = vmov %v5084_v56  ;;  %v7123_v34 = vmov %v5088_v32  ;;  %v7124_v1 = vmov %v5092_v46 }
 0x818 PF: > { %2223 = sbr.rel (%p1790_p11) target bundleno = 2462 (0x99e), region = 132  ;;  %s3158_s1 = sadd.s32 (!%p1790_p11), 4294967290, %s7161_s2  ;;  %v6682_v40 = vmov (!%p1790_p11), 0   ;;  %v6684_v32 = vmov (!%p1790_p11), 0   ;;  %v6686_v14 = vmov (!%p1790_p11), 0   ;;  %v6688_v43 = vmov (!%p1790_p11), 0   ;;  %v5124_v1 = vphi %v6355_v1, %v7124_v1   ;;  %v5120_v34 = vphi %v6353_v34, %v7123_v34   ;;  %v5116_v58 = vphi %v6351_v58, %v7122_v58   ;;  %v5112_v31 = vphi %v6349_v31, %v7121_v31   ;;  %v5108_v52 = vphi %v6347_v52, %v7120_v52   ;;  %v5104_v11 = vphi %v6345_v11, %v7119_v11   ;;  %v5100_v29 = vphi %v6343_v29, %v7118_v29   ;;  %v5096_v62 = vphi %v6341_v62, %v7117_v62  }
 0x819   : > { %p6678_p7 = scmp.lt.s32.totalorder (!%p1790_p11), %s3158_s1, 1  ;;  %p3159_p9 = scmp.ge.s32.totalorder (!%p1790_p11), %s3158_s1, 1  ;;  %v6690_v13 = vmov (!%p1790_p11), 0   ;;  %v6692_v63 = vmov (!%p1790_p11), 0   ;;  %v6694_v42 = vmov (!%p1790_p11), 0   ;;  %v6696_v56 = vmov (!%p1790_p11), 0  }
 0x81f   : > { %2228 = sbr.rel (%p3159_p9) target bundleno = 2277 (0x8e5), region = 136  ;;  %s5289_s2 = smov (!%p3159_p9), 64   ;;  %v5290_v62 = vmov (!%p3159_p9), 0   ;;  %v5291_v50 = vmov (!%p3159_p9), 1   ;;  %v5292_v44 = vmov (!%p3159_p9), 2   ;;  %vm2245_vm6 = vcmp.ge.s32.totalorder (!%p3159_p9), %v5531_v35, 64 }
 0x820   : > { %2233 = vrot.lane.b32.xlu1 (!%p3159_p9), %v5616_v37, %s5289_s2  ;;  %2229 = vrot.lane.b32.xlu0 (!%p3159_p9), %v5608_v27, %s5289_s2 }
 0x821   : > { %4263 = vset.pattern.permute.xlu1 (!%p3159_p9), %v5290_v62  ;;  %4262 = vset.pattern.permute.xlu0 (!%p3159_p9), %v5290_v62 }
 0x824   : > { %2235 = vrot.lane.b32.xlu1 (!%p3159_p9), %v5614_v36, %s5289_s2  ;;  %2231 = vrot.lane.b32.xlu0 (!%p3159_p9), %v5606_v26, %s5289_s2 }
 0x828   : > { %2239 = vrot.lane.b32.xlu1 %v5622_v47, %s5289_s2  ;;  %2237 = vrot.lane.b32.xlu0 %v5624_v49, %s5289_s2 }
 0x82c   : > { %2243 = vrot.lane.b32.xlu1 %v5630_v59, %s5289_s2  ;;  %2241 = vrot.lane.b32.xlu0 %v5632_v60, %s5289_s2 }
 0x830   : > { %2274 = vperm.xlu1 %4263, %v5505_v16   ;;  %2269 = vperm.xlu0 %4262, %v5503_v15  }
 0x834   : > { %2279 = vperm.xlu1 %4263, %v5507_v17   ;;  %2284 = vperm.xlu0 %4262, %v5509_v18  }
 0x838   : > { %2289 = vperm.xlu1 %4263, %v5511_v19   ;;  %2294 = vperm.xlu0 %4262, %v5513_v20  }
 0x83c   : > { %2299 = vperm.xlu1 %4263, %v5515_v21   ;;  %2304 = vperm.xlu0 %4262, %v5517_v22  }
 0x840   : > { %4264 = vset.pattern.permute.xlu1 %v5291_v50  ;;  %4265 = vset.pattern.permute.xlu0 %v5291_v50 }
 0x841   : > { %2316 = vperm.xlu1 %4264, %v5503_v15   ;;  %2320 = vperm.xlu0 %4265, %v5505_v16  }
 0x845   : > { %2324 = vperm.xlu1 %4264, %v5507_v17   ;;  %2332 = vperm.xlu0 %4265, %v5511_v19  }
 0x849   : > { %2328 = vperm.xlu1 %4264, %v5509_v18   ;;  %2340 = vperm.xlu0 %4265, %v5515_v21  }
 0x84d   : > { %2336 = vperm.xlu1 %4264, %v5513_v20   ;;  %4266 = vset.pattern.permute.xlu0 %v5292_v44 }
 0x84e   : > { %2364 = vperm.xlu0 %4266, %v5503_v15  }
 0x851   : > { %2344 = vperm.xlu1 %4264, %v5517_v22  }
 0x852   : > { %2376 = vperm.xlu0 %4266, %v5509_v18  }
 0x855   : > { %4267 = vset.pattern.permute.xlu1 %v5292_v44 }
 0x856   : > { %2368 = vperm.xlu1 %4267, %v5505_v16   ;;  %2384 = vperm.xlu0 %4266, %v5513_v20  }
 0x85a   : > { %2372 = vperm.xlu1 %4267, %v5507_v17   ;;  %2392 = vperm.xlu0 %4266, %v5517_v22  }
 0x85e   : > { %2380 = vperm.xlu1 %4267, %v5511_v19  }
 0x862   : > { %2388 = vperm.xlu1 %4267, %v5515_v21  }
 0x892   : > { %v2234_v45 = vpop.permute.xlu1 %2233  ;;  %v2230_v0 = vpop.permute.xlu0 %2229 }
 0x893   : > { %v2248_v10 = vsel %vm2245_vm6, %v2230_v0, 0.0  ;;  %v2250_v44 = vsel %vm2245_vm6, %v2234_v45, 0.0 }
 0x896   : > { %v2236_v12 = vpop.permute.xlu1 %2235  ;;  %v2232_v28 = vpop.permute.xlu0 %2231 }
 0x897   : > { %v2251_v46 = vsel %vm2245_vm6, %v2236_v12, 0.0  ;;  %v2249_v32 = vsel %vm2245_vm6, %v2232_v28, 0.0 }
 0x89a   : > { %v2240_v51 = vpop.permute.xlu1 %2239  ;;  %v2238_v5 = vpop.permute.xlu0 %2237 }
 0x89b   : > { %v2253_v62 = vsel %vm2245_vm6, %v2240_v51, 0.0  ;;  %v2252_v45 = vsel %vm2245_vm6, %v2238_v5, 0.0 }
 0x89e   : > { %v2244_v61 = vpop.permute.xlu1 %2243  ;;  %v6730_v7 = vpop.permute.xlu0 %2241 }
 0x89f   : > { %v2255_v12 = vsel %vm2245_vm6, %v2244_v61, 0.0  ;;  %v2254_v5 = vsel %vm2245_vm6, %v6730_v7, 0.0 }
 0x8af   : > { %v2275_v30 = vpop.permute.xlu1 %2274  ;;  %v2270_v38 = vpop.permute.xlu0 %2269 }
 0x8b0   : > { %v2307_v34 = vmul.f32 %v2270_v38, %v2248_v10  ;;  %v2308_v50 = vmul.f32 %v2275_v30, %v2249_v32 }
 0x8b3   : > { %v2280_v24 = vpop.permute.xlu1 %2279  ;;  %v2285_v33 = vpop.permute.xlu0 %2284 }
 0x8b4   : > { %v2310_v52 = vmul.f32 %v2285_v33, %v2251_v46  ;;  %v2309_v51 = vmul.f32 %v2280_v24, %v2250_v44 }
 0x8b7   : > { %v2290_v39 = vpop.permute.xlu1 %2289  ;;  %v2295_v57 = vpop.permute.xlu0 %2294 }
 0x8b8   : > { %v2312_v0 = vmul.f32 %v2295_v57, %v2253_v62 }
 0x8bb   : > { %v2300_v58 = vpop.permute.xlu1 %2299  ;;  %v2305_v23 = vpop.permute.xlu0 %2304 }
 0x8bc   : > { %v2314_v30 = vmul.f32 %v2305_v23, %v2255_v12 }
 0x8c0   : > { %v2317_v2 = vpop.permute.xlu1 %2316  ;;  %v2321_v25 = vpop.permute.xlu0 %2320 }
 0x8c1   : > { %v2347_v53 = vmul.f32 %v2317_v2, %v5608_v27  ;;  %v2348_v14 = vmul.f32 %v2321_v25, %v5606_v26 }
 0x8c3   : > { %v2355_v1 = vadd.f32 %v2347_v53, %v2307_v34  ;;  %v2356_v28 = vadd.f32 %v2348_v14, %v2308_v50 }
 0x8c4   : > { %v2325_v41 = vpop.permute.xlu1 %2324  ;;  %v2333_v55 = vpop.permute.xlu0 %2332 }
 0x8c5   : > { %v2349_v38 = vmul.f32 %v2325_v41, %v5616_v37  ;;  %v2351_v61 = vmul.f32 %v2333_v55, %v5624_v49 }
 0x8c7   : > { %v2357_v57 = vadd.f32 %v2349_v38, %v2309_v51 }
 0x8c8   : > { %v2329_v31 = vpop.permute.xlu1 %2328  ;;  %v2341_v29 = vpop.permute.xlu0 %2340 }
 0x8c9   : > { %v2350_v11 = vmul.f32 %v2329_v31, %v5614_v36  ;;  %v2353_v24 = vmul.f32 %v2341_v29, %v5632_v60 }
 0x8cb   : > { %v2358_v13 = vadd.f32 %v2350_v11, %v2310_v52  ;;  %v2311_v11 = vmul.f32 %v2290_v39, %v2252_v45  ;;  %v2313_v52 = vmul.f32 %v2300_v58, %v2254_v5 }
 0x8cc   : > { %v2337_v9 = vpop.permute.xlu1 %2336 }
 0x8cd   : > { %v2365_v54 = vpop.permute.xlu0 %2364  ;;  %v2352_v63 = vmul.f32 %v2337_v9, %v5622_v47  ;;  %v2361_v32 = vadd.f32 %v2353_v24, %v2313_v52 }
 0x8ce   : > { %v2395_v3 = vmul.f32 0.0, %v2365_v54 }
 0x8cf   : > { %v2360_v31 = vadd.f32 %v2352_v63, %v2312_v0 }
 0x8d0   : > { %v2403_v56 = vadd.f32 %v2395_v3, %v2355_v1   ;;  %v2345_v40 = vpop.permute.xlu1 %2344  ;;  %v2359_v3 = vadd.f32 %v2351_v61, %v2311_v11 }
 0x8d1   : > { %v2377_v43 = vpop.permute.xlu0 %2376  ;;  %v2354_v33 = vmul.f32 %v2345_v40, %v5630_v59 }
 0x8d2   : > { %v2398_v42 = vmul.f32 0.0, %v2377_v43 }
 0x8d3   : > { %v2362_v34 = vadd.f32 %v2354_v33, %v2314_v30 }
 0x8d4   : > { %v2406_v13 = vadd.f32 %v2398_v42, %v2358_v13  }
 0x8d5   : > { %v2369_v2 = vpop.permute.xlu1 %2368  ;;  %v2385_v25 = vpop.permute.xlu0 %2384 }
 0x8d6   : > { %v2396_v53 = vmul.f32 0.0, %v2369_v2  ;;  %v2400_v10 = vmul.f32 0.0, %v2385_v25 }
 0x8d8   : > { %v2404_v42 = vadd.f32 %v2396_v53, %v2356_v28   ;;  %v2408_v14 = vadd.f32 %v2400_v10, %v2360_v31  }
 0x8d9   : > { %v2373_v9 = vpop.permute.xlu1 %2372  ;;  %v2393_v41 = vpop.permute.xlu0 %2392 }
 0x8da   : > { %v2397_v54 = vmul.f32 0.0, %v2373_v9  ;;  %v2402_v1 = vmul.f32 0.0, %v2393_v41 }
 0x8dc   : > { %v2405_v63 = vadd.f32 %v2397_v54, %v2357_v57   ;;  %v2410_v40 = vadd.f32 %v2402_v1, %v2362_v34  }
 0x8dd   : > { %v2381_v46 = vpop.permute.xlu1 %2380 }
 0x8de   : > { %v2399_v23 = vmul.f32 0.0, %v2381_v46 }
 0x8e0   : > { %v2407_v43 = vadd.f32 %v2399_v23, %v2359_v3  }
 0x8e1   : > { %v2389_v55 = vpop.permute.xlu1 %2388 }
 0x8e2   : > { %v2401_v62 = vmul.f32 0.0, %v2389_v55 }
 0x8e4   : > { %v2409_v32 = vadd.f32 %v2401_v62, %v2361_v32  }
 0x8e5 PF: > { %2421 = sbr.rel (%p6678_p7) target bundleno = 2460 (0x99c), region = 140  ;;  %v5293_v35 = vmov (!%p6678_p7), 0   ;;  %v5294_v7 = vmov (!%p6678_p7), 1   ;;  %v5295_v56 = vmov (!%p6678_p7), 2   ;;  %v5156_v56 = vphi %v6696_v56, %v2403_v56   ;;  %v5152_v42 = vphi %v6694_v42, %v2404_v42   ;;  %v5148_v63 = vphi %v6692_v63, %v2405_v63   ;;  %v5144_v13 = vphi %v6690_v13, %v2406_v13   ;;  %v5140_v43 = vphi %v6688_v43, %v2407_v43   ;;  %v5136_v14 = vphi %v6686_v14, %v2408_v14   ;;  %v5132_v32 = vphi %v6684_v32, %v2409_v32   ;;  %v5128_v40 = vphi %v6682_v40, %v2410_v40  }
 0x8e6   : > { %4269 = vset.pattern.permute.xlu1 (!%p6678_p7), %v5293_v35  ;;  %4268 = vset.pattern.permute.xlu0 (!%p6678_p7), %v5293_v35 }
 0x8e7   : > { %2456 = vperm.xlu1 (!%p6678_p7), %4269, %v5507_v17   ;;  %2446 = vperm.xlu0 (!%p6678_p7), %4268, %v5503_v15  }
 0x8eb   : > { %2461 = vperm.xlu1 (!%p6678_p7), %4269, %v5509_v18   ;;  %2451 = vperm.xlu0 (!%p6678_p7), %4268, %v5505_v16  }
 0x8ef   : > { %2471 = vperm.xlu1 %4269, %v5513_v20   ;;  %2466 = vperm.xlu0 %4268, %v5511_v19  }
 0x8f3   : > { %2481 = vperm.xlu1 %4269, %v5517_v22   ;;  %2476 = vperm.xlu0 %4268, %v5515_v21  }
 0x8f7   : > { %4271 = vset.pattern.permute.xlu1 %v5294_v7  ;;  %4270 = vset.pattern.permute.xlu0 %v5294_v7 }
 0x8f8   : > { %2497 = vperm.xlu1 %4271, %v5505_v16   ;;  %2493 = vperm.xlu0 %4270, %v5503_v15  }
 0x8fc   : > { %2501 = vperm.xlu1 %4271, %v5507_v17   ;;  %2505 = vperm.xlu0 %4270, %v5509_v18  }
 0x900   : > { %2509 = vperm.xlu1 %4271, %v5511_v19   ;;  %2513 = vperm.xlu0 %4270, %v5513_v20  }
 0x904   : > { %2517 = vperm.xlu1 %4271, %v5515_v21   ;;  %2521 = vperm.xlu0 %4270, %v5517_v22  }
 0x908   : > { %4272 = vset.pattern.permute.xlu1 %v5295_v56  ;;  %4273 = vset.pattern.permute.xlu0 %v5295_v56 }
 0x909   : > { %2541 = vperm.xlu1 %4272, %v5503_v15   ;;  %2545 = vperm.xlu0 %4273, %v5505_v16  }
 0x90d   : > { %2549 = vperm.xlu1 %4272, %v5507_v17   ;;  %2557 = vperm.xlu0 %4273, %v5511_v19  }
 0x911   : > { %2553 = vperm.xlu1 %4272, %v5509_v18   ;;  %2565 = vperm.xlu0 %4273, %v5515_v21  }
 0x915   : > { %2561 = vperm.xlu1 %4272, %v5513_v20  }
 0x919   : > { %2569 = vperm.xlu1 %4272, %v5517_v22  }
 0x966   : > { %v2457_v39 = vpop.permute.xlu1 %2456  ;;  %v2447_v58 = vpop.permute.xlu0 %2446 }
 0x967   : > { %v2484_v44 = vmul.f32 0.0, %v2447_v58  ;;  %v2486_v10 = vmul.f32 0.0, %v2457_v39 }
 0x96a   : > { %v2462_v29 = vpop.permute.xlu1 %2461  ;;  %v2452_v40 = vpop.permute.xlu0 %2451 }
 0x96b   : > { %v2485_v0 = vmul.f32 0.0, %v2452_v40  ;;  %v2487_v34 = vmul.f32 0.0, %v2462_v29 }
 0x96e   : > { %v2472_v14 = vpop.permute.xlu1 %2471  ;;  %v2467_v15 = vpop.permute.xlu0 %2466 }
 0x96f   : > { %v2488_v51 = vmul.f32 0.0, %v2467_v15 }
 0x972   : > { %v2482_v43 = vpop.permute.xlu1 %2481  ;;  %v2477_v16 = vpop.permute.xlu0 %2476 }
 0x973   : > { %v2490_v9 = vmul.f32 0.0, %v2477_v16  ;;  %v2491_v62 = vmul.f32 0.0, %v2482_v43 }
 0x977   : > { %v2498_v13 = vpop.permute.xlu1 %2497  ;;  %v2494_v17 = vpop.permute.xlu0 %2493 }
 0x978   : > { %v2525_v20 = vmul.f32 %v2498_v13, %v5606_v26  ;;  %v2524_v22 = vmul.f32 %v2494_v17, %v5608_v27 }
 0x97a   : > { %v2533_v2 = vadd.f32 %v2525_v20, %v2485_v0  ;;  %v2532_v25 = vadd.f32 %v2524_v22, %v2484_v44 }
 0x97b   : > { %v2502_v63 = vpop.permute.xlu1 %2501  ;;  %v2506_v19 = vpop.permute.xlu0 %2505 }
 0x97c   : > { %v2526_v12 = vmul.f32 %v2502_v63, %v5616_v37  ;;  %v2527_v26 = vmul.f32 %v2506_v19, %v5614_v36  ;;  %v2489_v36 = vmul.f32 0.0, %v2472_v14 }
 0x97e   : > { %v2534_v30 = vadd.f32 %v2526_v12, %v2486_v10  ;;  %v2535_v54 = vadd.f32 %v2527_v26, %v2487_v34 }
 0x97f   : > { %v2510_v42 = vpop.permute.xlu1 %2509  ;;  %v2514_v18 = vpop.permute.xlu0 %2513 }
 0x980   : > { %v2528_v28 = vmul.f32 %v2510_v42, %v5624_v49  ;;  %v2529_v1 = vmul.f32 %v2514_v18, %v5622_v47 }
 0x982   : > { %v2536_v27 = vadd.f32 %v2528_v28, %v2488_v51 }
 0x983   : > { %v2518_v50 = vpop.permute.xlu1 %2517  ;;  %v2522_v21 = vpop.permute.xlu0 %2521 }
 0x984   : > { %v2530_v45 = vmul.f32 %v2518_v50, %v5632_v60  ;;  %v2537_v60 = vadd.f32 %v2529_v1, %v2489_v36  ;;  %v2531_v52 = vmul.f32 %v2522_v21, %v5630_v59 }
 0x986   : > { %v2538_v11 = vadd.f32 %v2530_v45, %v2490_v9  ;;  %v2539_v7 = vadd.f32 %v2531_v52, %v2491_v62 }
 0x988   : > { %v2542_v38 = vpop.permute.xlu1 %2541  ;;  %v2546_v33 = vpop.permute.xlu0 %2545 }
 0x989   : > { %v2572_v31 = vmul.f32 0.0, %v2542_v38  ;;  %v2573_v53 = vmul.f32 0.0, %v2546_v33 }
 0x98b   : > { %v2580_v56 = vadd.f32 %v2572_v31, %v2532_v25   ;;  %v2581_v42 = vadd.f32 %v2573_v53, %v2533_v2  }
 0x98c   : > { %v2550_v57 = vpop.permute.xlu1 %2549  ;;  %v2558_v37 = vpop.permute.xlu0 %2557 }
 0x98d   : > { %v2574_v61 = vmul.f32 0.0, %v2550_v57  ;;  %v2576_v49 = vmul.f32 0.0, %v2558_v37 }
 0x98f   : > { %v2582_v63 = vadd.f32 %v2574_v61, %v2534_v30   ;;  %v2584_v41 = vadd.f32 %v2576_v49, %v2536_v27  }
 0x990   : > { %v2554_v3 = vpop.permute.xlu1 %2553  ;;  %v2566_v46 = vpop.permute.xlu0 %2565 }
 0x991   : > { %v2575_v24 = vmul.f32 0.0, %v2554_v3  ;;  %v2578_v23 = vmul.f32 0.0, %v2566_v46  ;;  %v7126_v43 = vmov %v2584_v41 }
 0x993   : > { %v2583_v13 = vadd.f32 %v2575_v24, %v2535_v54   ;;  %v2586_v32 = vadd.f32 %v2578_v23, %v2538_v11  }
 0x994   : > { %v2562_v5 = vpop.permute.xlu1 %2561 }
 0x995   : > { %v2577_v55 = vmul.f32 0.0, %v2562_v5 }
 0x997   : > { %v2585_v14 = vadd.f32 %v2577_v55, %v2537_v60  }
 0x998   : > { %v2570_v35 = vpop.permute.xlu1 %2569 }
 0x999   : > { %v2579_v39 = vmul.f32 0.0, %v2570_v35 }
 0x99b   : > { %v2587_v40 = vadd.f32 %v2579_v39, %v2539_v7  }
 0x99c PF: > { %v7127_v62 = vmov %v5160_v40  ;;  %v7128_v29 = vmov %v5164_v32  ;;  %v7129_v11 = vmov %v5168_v14  ;;  %v7130_v52 = vmov %v5172_v43  ;;  %v5188_v56 = vphi %v5156_v56, %v2580_v56   ;;  %v5184_v42 = vphi %v5152_v42, %v2581_v42   ;;  %v5180_v63 = vphi %v5148_v63, %v2582_v63   ;;  %v5176_v13 = vphi %v5144_v13, %v2583_v13   ;;  %v5172_v43 = vphi %v5140_v43, %v7126_v43   ;;  %v5168_v14 = vphi %v5136_v14, %v2585_v14   ;;  %v5164_v32 = vphi %v5132_v32, %v2586_v32   ;;  %v5160_v40 = vphi %v5128_v40, %v2587_v40  }
 0x99d   : > { %v7131_v31 = vmov %v5176_v13  ;;  %v7132_v58 = vmov %v5180_v63  ;;  %v7133_v34 = vmov %v5184_v42  ;;  %v7134_v1 = vmov %v5188_v56 }
 0x99e PF: > { %v5221_v47 = vmov %v5220_v1   ;;  %v7135_v0 = vmov %v5192_v62  ;;  %v7136_v1 = vmov %v5196_v29  ;;  %v7137_v38 = vmov %v5200_v11  ;;  %v5220_v1 = vphi %v5124_v1, %v7134_v1   ;;  %v5216_v34 = vphi %v5120_v34, %v7133_v34   ;;  %v5212_v58 = vphi %v5116_v58, %v7132_v58   ;;  %v5208_v31 = vphi %v5112_v31, %v7131_v31   ;;  %v5204_v52 = vphi %v5108_v52, %v7130_v52   ;;  %v5200_v11 = vphi %v5104_v11, %v7129_v11   ;;  %v5196_v29 = vphi %v5100_v29, %v7128_v29   ;;  %v5192_v62 = vphi %v5096_v62, %v7127_v62  }
 0x99f   : > { %v7138_v43 = vmov %v5204_v52  ;;  %v7139_v2 = vmov %v5208_v31  ;;  %v7140_v3 = vmov %v5212_v58  ;;  %v7141_v7 = vmov %v5216_v34 }
 0x9a0   : > { %v7142_v10 = vmov %v5221_v47 }
 0x9a1 PF: > { %v7143_v59 = vmov 0   ;;  %s2612_s19 = scalar_lea.vmem %s7048_s8, %s5483_s21  ;;  %s2677_s17 = sld [smem:[#allocation4 + %s4788_s25]]  ;;  %vm2944_vm15 = vcmask 523264   ;;  %v5252_v10 = vphi %v5028_v10, %v7142_v10   ;;  %v5248_v7 = vphi %v5024_v7, %v7141_v7   ;;  %v5244_v3 = vphi %v5020_v3, %v7140_v3   ;;  %v5240_v2 = vphi %v5016_v2, %v7139_v2   ;;  %v5236_v43 = vphi %v5012_v43, %v7138_v43   ;;  %v5232_v38 = vphi %v5008_v38, %v7137_v38   ;;  %v5228_v1 = vphi %v5004_v1, %v7136_v1   ;;  %v5224_v0 = vphi %v5000_v0, %v7135_v0  }
 0x9a2   : > { %4275 = vset.pattern.permute.xlu1 %v7143_v59  ;;  %4274 = vset.pattern.permute.xlu0 %v7143_v59  ;;  %v2615_v32 = vld [vmem:[%s2612_s19 + $0x10] sm:$0xff]  ;;  %v2613_v56 = vld [vmem:[%s2612_s19] sm:$0xff]  ;;  %v2616_v58 = vld [vmem:[%s2612_s19 + $0x18] sm:$0xff]  ;;  %s6961_s24 = scalar_lea.vmem %s7050_s10, %s5483_s21  ;;  %s2766_s26 = scalar_lea.vmem %s7049_s9, %s5483_s21 }
 0x9a3   : > { %2633 = vperm.xlu1 %4275, %v2615_v32   ;;  %2623 = vperm.xlu0 %4274, %v2613_v56   ;;  %v2614_v29 = vld [vmem:[%s2612_s19 + $0x8] sm:$0xff]  ;;  %v2617_v14 = vld [vmem:[%s2612_s19 + $0x20] sm:$0xff]  ;;  %v2620_v15 = vld [vmem:[%s2612_s19 + $0x38] sm:$0xff]  ;;  %s7144_s21 = sshll.u32 %s4788_s25, 5 }
 0x9a4   : > { %v2618_v40 = vld [vmem:[%s2612_s19 + $0x28] sm:$0xff]  ;;  %v2619_v16 = vld [vmem:[%s2612_s19 + $0x30] sm:$0xff] }
 0x9a7   : > { %2638 = vperm.xlu1 %4275, %v2616_v58   ;;  %2628 = vperm.xlu0 %4274, %v2614_v29   ;;  %v2678_v13 = vstv %s2677_s17 }
 0x9ab   : > { %2648 = vperm.xlu1 %4275, %v2618_v40   ;;  %2643 = vperm.xlu0 %4274, %v2617_v14  }
 0x9af   : > { %2658 = vperm.xlu1 %4275, %v2620_v15   ;;  %2653 = vperm.xlu0 %4274, %v2619_v16  }
 0xa22   : > { %v2634_v17 = vpop.permute.xlu1 %2633  ;;  %v2624_v63 = vpop.permute.xlu0 %2623 }
 0xa23   : > { %v2663_v19 = vadd.f32 %v5244_v3, %v2634_v17  ;;  %v2661_v42 = vadd.f32 %v5252_v10, %v2624_v63 }
 0xa25   : > { %vm2671_vm7 = vcmp.ge.f32.partialorder %v2663_v19, 0.0  ;;  %v2681_v18 = vmul.f32 %v2678_v13, %v2663_v19  ;;  %vm2669_vm8 = vcmp.ge.f32.partialorder %v2661_v42, 0.0  ;;  %v2679_v50 = vmul.f32 %v2678_v13, %v2661_v42 }
 0xa26   : > { %v2639_v21 = vpop.permute.xlu1 %2638  ;;  %v2629_v20 = vpop.permute.xlu0 %2628 }
 0xa27   : > { %v2687_v22 = vsel %vm2669_vm8, %v2661_v42, %v2679_v50  ;;  %v2664_v44 = vadd.f32 %v5240_v2, %v2639_v21  ;;  %v2662_v12 = vadd.f32 %v5248_v7, %v2629_v20  ;;  %v2689_v28 = vsel %vm2671_vm7, %v2663_v19, %v2681_v18  ;;  %v2834_v19 = vld [vmem:[%s6961_s24 + $0x8] sm:$0xff]  ;;  %v2833_v42 = vld [vmem:[%s6961_s24] sm:$0xff]  ;;  %v2836_v18 = vld [vmem:[%s6961_s24 + $0x18] sm:$0xff] }
 0xa28   : > { %v6916_v31 = vmul.f32 %v5534_v48, %v2687_v22  ;;  %v6919_v45 = vmul.f32 %v5534_v48, %v2689_v28  ;;  %v2835_v50 = vld [vmem:[%s6961_s24 + $0x10] sm:$0xff]  ;;  %v2838_v21 = vld [vmem:[%s6961_s24 + $0x28] sm:$0xff]  ;;  %v2837_v20 = vld [vmem:[%s6961_s24 + $0x20] sm:$0xff] }
 0xa29   : > { %vm2672_vm9 = vcmp.ge.f32.partialorder %v2664_v44, 0.0  ;;  %v2682_v33 = vmul.f32 %v2678_v13, %v2664_v44  ;;  %vm2670_vm10 = vcmp.ge.f32.partialorder %v2662_v12, 0.0  ;;  %v2680_v25 = vmul.f32 %v2678_v13, %v2662_v12 }
 0xa2a   : > { %v2649_v53 = vpop.permute.xlu1 %2648  ;;  %v2644_v51 = vpop.permute.xlu0 %2643  ;;  %v2722_v61 = vmul.f32 %v6916_v31, %v2687_v22  ;;  %v2724_v46 = vmul.f32 %v6919_v45, %v2689_v28 }
 0xa2b   : > { %v2690_v10 = vsel %vm2672_vm9, %v2664_v44, %v2682_v33  ;;  %v2688_v30 = vsel %vm2670_vm10, %v2662_v12, %v2680_v25  ;;  %v2666_v26 = vadd.f32 %v5232_v38, %v2649_v53  ;;  %v2665_v27 = vadd.f32 %v5236_v43, %v2644_v51 }
 0xa2c   : > { %v6922_v2 = vmul.f32 %v5534_v48, %v2688_v30  ;;  %v6926_v49 = vmul.f32 %v5534_v48, %v2690_v10 }
 0xa2d   : > { %vm2674_vm11 = vcmp.ge.f32.partialorder %v2666_v26, 0.0  ;;  %v2684_v57 = vmul.f32 %v2678_v13, %v2666_v26  ;;  %vm2673_vm12 = vcmp.ge.f32.partialorder %v2665_v27, 0.0  ;;  %v2683_v37 = vmul.f32 %v2678_v13, %v2665_v27 }
 0xa2e   : > { %v2703_v34 = vadd.f32 %v6922_v2, %v6916_v31  ;;  %v2723_v43 = vmul.f32 %v6922_v2, %v2688_v30  ;;  %v2659_v38 = vpop.permute.xlu1 %2658  ;;  %v2654_v9 = vpop.permute.xlu0 %2653  ;;  %v2725_v52 = vmul.f32 %v6926_v49, %v2690_v10 }
 0xa2f   : > { %v2692_v41 = vsel %vm2674_vm11, %v2666_v26, %v2684_v57  ;;  %v2691_v54 = vsel %vm2673_vm12, %v2665_v27, %v2683_v37  ;;  %v2668_v11 = vadd.f32 %v5224_v0, %v2659_v38  ;;  %v2667_v3 = vadd.f32 %v5228_v1, %v2654_v9  ;;  %v2767_v38 = vld [vmem:[%s2766_s26] sm:$0xff] }
 0xa30   : > { %v2730_v24 = vadd.f32 %v2723_v43, %v2722_v61  ;;  %v6935_v23 = vmul.f32 %v5534_v48, %v2691_v54  ;;  %v2704_v36 = vadd.f32 %v2703_v34, %v6919_v45  ;;  %v6940_v62 = vmul.f32 %v5534_v48, %v2692_v41  ;;  %v2768_v43 = vld [vmem:[%s2766_s26 + $0x8] sm:$0xff] }
 0xa31   : > { %vm2676_vm13 = vcmp.ge.f32.partialorder %v2668_v11, 0.0  ;;  %v2686_v60 = vmul.f32 %v2678_v13, %v2668_v11  ;;  %vm2675_vm14 = vcmp.ge.f32.partialorder %v2667_v3, 0.0  ;;  %v2685_v5 = vmul.f32 %v2678_v13, %v2667_v3 }
 0xa32   : > { %v2731_v55 = vadd.f32 %v2730_v24, %v2724_v46  ;;  %v2705_v0 = vadd.f32 %v2704_v36, %v6926_v49  ;;  %v2726_v7 = vmul.f32 %v6935_v23, %v2691_v54  ;;  %v2727_v32 = vmul.f32 %v6940_v62, %v2692_v41  ;;  %v2772_v36 = vld [vmem:[%s2766_s26 + $0x28] sm:$0xff] }
 0xa33   : > { %v2694_v1 = vsel %vm2676_vm13, %v2668_v11, %v2686_v60  ;;  %v2693_v35 = vsel %vm2675_vm14, %v2667_v3, %v2685_v5  ;;  %v2770_v11 = vld [vmem:[%s2766_s26 + $0x18] sm:$0xff]  ;;  %v2769_v3 = vld [vmem:[%s2766_s26 + $0x10] sm:$0xff]  ;;  %v2771_v60 = vld [vmem:[%s2766_s26 + $0x20] sm:$0xff] }
 0xa34   : > { %v6945_v39 = vmul.f32 %v5534_v48, %v2693_v35  ;;  %v2706_v47 = vadd.f32 %v2705_v0, %v6935_v23  ;;  %v2732_v59 = vadd.f32 %v2731_v55, %v2725_v52  ;;  %v6950_v56 = vmul.f32 %v5534_v48, %v2694_v1  ;;  %v2774_v55 = vld [vmem:[%s2766_s26 + $0x38] sm:$0xff]  ;;  %v2773_v0 = vld [vmem:[%s2766_s26 + $0x30] sm:$0xff] }
 0xa36   : > { %v2707_v58 = vadd.f32 %v2706_v47, %v6940_v62  ;;  %v2733_v29 = vadd.f32 %v2732_v59, %v2726_v7  ;;  %v2728_v14 = vmul.f32 %v6945_v39, %v2693_v35  ;;  %v2729_v13 = vmul.f32 %v6950_v56, %v2694_v1  ;;  %v2840_v7 = vld [vmem:[%s6961_s24 + $0x38] sm:$0xff]  ;;  %v2839_v47 = vld [vmem:[%s6961_s24 + $0x30] sm:$0xff] }
 0xa38   : > { %v2708_v40 = vadd.f32 %v2707_v58, %v6945_v39  ;;  %v2734_v15 = vadd.f32 %v2733_v29, %v2727_v32 }
 0xa3a   : > { %v2709_v16 = vadd.f32 %v2708_v40, %v6950_v56  ;;  %v2735_v17 = vadd.f32 %v2734_v15, %v2728_v14 }
 0xa3c   : > { %2710 = vadd.xlane.f32.xlu0 %v2709_v16  ;;  %v2736_v63 = vadd.f32 %v2735_v17, %v2729_v13 }
 0xa3e   : > { %2737 = vadd.xlane.f32.xlu1 %v2736_v63 }
 0xa4f   : > { %2848 = vperm.xlu1 %4275, %v2834_v19  }
 0xa52   : > { %2843 = vperm.xlu0 %4274, %v2833_v42  }
 0xa53   : > { %2858 = vperm.xlu1 %4275, %v2836_v18  }
 0xa56   : > { %2853 = vperm.xlu0 %4274, %v2835_v50  }
 0xa57   : > { %2868 = vperm.xlu1 %4275, %v2838_v21  }
 0xa5a   : > { %2863 = vperm.xlu0 %4274, %v2837_v20  }
 0xac9   : > { %v2711_v22 = vpop.xlane.xlu0 %2710 }
 0xaca   : > { %v2712_v44 = vrot.slane %v2711_v22, 4 }
 0xacb   : > { %v2738_v12 = vpop.xlane.xlu1 %2737 }
 0xacc   : > { %v2713_v28 = vadd.f32 %v2712_v44, %v2711_v22  ;;  %v2739_v33 = vrot.slane %v2738_v12, 4 }
 0xace   : > { %v2714_v25 = vrot.slane %v2713_v28, 2  ;;  %v2740_v53 = vadd.f32 %v2739_v33, %v2738_v12 }
 0xacf   : > { %v2849_v14 = vpop.permute.xlu1 %2848 }
 0xad0   : > { %v2741_v51 = vrot.slane %v2740_v53, 2  ;;  %v2715_v10 = vadd.f32 %v2714_v25, %v2713_v28  ;;  %v2882_v22 = vmul.f32 %v5534_v48, %v2849_v14 }
 0xad1   : > { %v2844_v15 = vpop.permute.xlu0 %2843 }
 0xad2   : > { %v2716_v30 = vrot.slane %v2715_v10, 1  ;;  %v2742_v26 = vadd.f32 %v2741_v51, %v2740_v53  ;;  %v2881_v44 = vmul.f32 %v5534_v48, %v2844_v15 }
 0xad3   : > { %v2859_v16 = vpop.permute.xlu1 %2858 }
 0xad4   : > { %v2717_v27 = vadd.f32 %v2716_v30, %v2715_v10  ;;  %v2743_v57 = vrot.slane %v2742_v26, 1  ;;  %v2884_v10 = vmul.f32 %v5534_v48, %v2859_v16 }
 0xad5   : > { %v2854_v13 = vpop.permute.xlu0 %2853 }
 0xad6   : > { %3215 = vpush %v2717_v27  ;;  %v2744_v37 = vadd.f32 %v2743_v57, %v2742_v26 }
 0xad7   : > { %v2869_v19 = vpop.permute.xlu1 %2868 }
 0xad8   : > { %3217 = vpush %v2744_v37 }
 0xad9   : > { %v2864_v42 = vpop.permute.xlu0 %2863 }
 0xb07   : > { %s3216_s0 = spop %3215 }
 0xb08   : > { %s6969_s3 = smul.f32 0.00045955883, %s3216_s0 }
 0xb09   : > { %s3218_s4 = spop %3217 }
 0xb0a   : > { %s2749_s1 = smul.f32 %s6969_s3, %s6969_s3  ;;  %v2752_v17 = vstv %s6969_s3 }
 0xb0b   : > { %s2748_s23 = smul.f32 0.00045955883, %s3218_s4  ;;  %s2909_s4 = scalar_lea.vmem %s7052_s12, %s7144_s21  ;;  %v2753_v63 = vmul.f32 %v5534_v48, %v2752_v17 }
 0xb0c   : > { %v2911_v59 = vld [vmem:[%s2909_s4 + $0x8] sm:$0xff]  ;;  %v2910_v32 = vld [vmem:[%s2909_s4] sm:$0xff]  ;;  %v2913_v58 = vld [vmem:[%s2909_s4 + $0x18] sm:$0xff] }
 0xb0d   : > { %s2750_s2 = ssub.f32 %s2748_s23, %s2749_s1  ;;  %v2912_v29 = vld [vmem:[%s2909_s4 + $0x10] sm:$0xff]  ;;  %s3172_s1 = sshll.u32 %s4788_s25, 4  ;;  %v2755_v18 = vsub.f32 %v6922_v2, %v2753_v63  ;;  %v2754_v50 = vsub.f32 %v6916_v31, %v2753_v63  ;;  %v2757_v53 = vsub.f32 %v6926_v49, %v2753_v63  ;;  %v2756_v51 = vsub.f32 %v6919_v45, %v2753_v63 }
 0xb0e   : > { %v2883_v31 = vmul.f32 %v5534_v48, %v2854_v13  ;;  %v2886_v49 = vmul.f32 %v5534_v48, %v2869_v19 }
 0xb0f   : > { %s2751_s30 = smax.f32 %s5258_s16, %s2750_s2 }
 0xb10   : > { %s2762_s18 = sadd.f32 1e-08, %s2751_s30  ;;  %s6989_s30 = scalar_lea.vmem %s7051_s11, %s3172_s1 }
 0xb11   : > { %v4276_v40 = vld [vmem:[%s6989_s30] sm:$0xff]  }
 0xb12   : > { %v2763_v61 = vstv %s2762_s18  ;;  %3205 = vmatprep.mubr.msk.bf16.mxu1 %vm2944_vm15, %v4276_v40 }
 0xb13   : > { %4278 = vrsqrt.f32 %v2763_v61 }
 0xb1d   : > { %v4279_v34 = vpop.eup %4278 }
 0xb1e   : > { %3219 = vpush %v4279_v34  ;;  %v2759_v34 = vsub.f32 %v6940_v62, %v2753_v63 }
 0xb4f   : > { %s3220_s20 = spop %3219 }
 0xb50   : > { %v2775_v9 = vstv %s3220_s20 }
 0xb51   : > { %v2777_v41 = vmul.f32 %v2775_v9, %v2768_v43  ;;  %v2776_v54 = vmul.f32 %v2775_v9, %v2767_v38  ;;  %v2779_v46 = vmul.f32 %v2775_v9, %v2770_v11  ;;  %v2778_v24 = vmul.f32 %v2775_v9, %v2769_v3 }
 0xb52   : > { %v2781_v5 = vmul.f32 %v2775_v9, %v2772_v36  ;;  %v2780_v52 = vmul.f32 %v2775_v9, %v2771_v60  ;;  %v2783_v1 = vmul.f32 %v2775_v9, %v2774_v55  ;;  %v2782_v35 = vmul.f32 %v2775_v9, %v2773_v0 }
 0xb53   : > { %2791 = vperm.xlu1 %4275, %v2777_v41   ;;  %2786 = vperm.xlu0 %4274, %v2776_v54   ;;  %v2758_v43 = vsub.f32 %v6935_v23, %v2753_v63  ;;  %v2885_v9 = vmul.f32 %v5534_v48, %v2864_v42  ;;  %v2761_v23 = vsub.f32 %v6950_v56, %v2753_v63 }
 0xb54   : > { %v2760_v60 = vsub.f32 %v6945_v39, %v2753_v63 }
 0xb57   : > { %2801 = vperm.xlu1 %4275, %v2779_v46   ;;  %2796 = vperm.xlu0 %4274, %v2778_v24  }
 0xb5b   : > { %2811 = vperm.xlu1 %4275, %v2781_v5   ;;  %2806 = vperm.xlu0 %4274, %v2780_v52  }
 0xb5f   : > { %2821 = vperm.xlu1 %4275, %v2783_v1   ;;  %2816 = vperm.xlu0 %4274, %v2782_v35  }
 0xb63   : > { %2878 = vperm.xlu1 %4275, %v2840_v7   ;;  %2873 = vperm.xlu0 %4274, %v2839_v47  }
 0xb67   : > { %2921 = vperm.xlu1 %4275, %v2911_v59   ;;  %2916 = vperm.xlu0 %4274, %v2910_v32   ;;  %v4277_v32 = vld [vmem:[%s6989_s30 + $0x8] sm:$0xff]  }
 0xb6b   : > { %2931 = vperm.xlu1 %4275, %v2913_v58   ;;  %2926 = vperm.xlu0 %4274, %v2912_v29  }
 0xbd2   : > { %v2792_v21 = vpop.permute.xlu1 %2791  ;;  %v2787_v20 = vpop.permute.xlu0 %2786 }
 0xbd3   : > { %v2825_v12 = vmul.f32 %v2792_v21, %v2755_v18  ;;  %v2824_v28 = vmul.f32 %v2787_v20, %v2754_v50 }
 0xbd5   : > { %v2890_v33 = vadd.f32 %v2882_v22, %v2825_v12  ;;  %v2889_v25 = vadd.f32 %v2881_v44, %v2824_v28  ;;  %v7145_v12 = vld [vmem:[#allocation8_spill] sm:$0xff] }
 0xbd6   : > { %v2802_v30 = vpop.permute.xlu1 %2801  ;;  %v2797_v2 = vpop.permute.xlu0 %2796 }
 0xbd7   : > { %v2827_v26 = vmul.f32 %v2802_v30, %v2757_v53  ;;  %v2826_v27 = vmul.f32 %v2797_v2, %v2756_v51  ;;  %v2897_v57 = vpack.c.bf16 %v2890_v33, %v2889_v25 }
 0xbd9   : > { %v2892_v37 = vadd.f32 %v2884_v10, %v2827_v26  ;;  %v2891_v61 = vadd.f32 %v2883_v31, %v2826_v27  ;;  %3197 = vmatprep.subr.bf16.mxu1 %v2897_v57 }
 0xbda   : > { %v2812_v38 = vpop.permute.xlu1 %2811  ;;  %3198 = vmatpush3.bf16.msra.mxu1 %v2897_v57  ;;  %v2807_v45 = vpop.permute.xlu0 %2806 }
 0xbdb   : > { %v2829_v41 = vmul.f32 %v2812_v38, %v2759_v34  ;;  %v2828_v54 = vmul.f32 %v2807_v45, %v2758_v43  ;;  %v2898_v11 = vpack.c.bf16 %v2892_v37, %v2891_v61 }
 0xbdd   : > { %v2894_v3 = vadd.f32 %v2886_v49, %v2829_v41  ;;  %v2893_v46 = vadd.f32 %v2885_v9, %v2828_v54  ;;  %3199 = vmatprep.subr.bf16.mxu1 %v2898_v11 }
 0xbde   : > { %v2822_v24 = vpop.permute.xlu1 %2821  ;;  %3200 = vmatpush3.bf16.msra.mxu1 %v2898_v11  ;;  %v2817_v36 = vpop.permute.xlu0 %2816 }
 0xbdf   : > { %v2899_v62 = vpack.c.bf16 %v2894_v3, %v2893_v46  ;;  %v2831_v55 = vmul.f32 %v2822_v24, %v2761_v23  ;;  %v2830_v0 = vmul.f32 %v2817_v36, %v2760_v60 }
 0xbe1   : > { %3201 = vmatprep.subr.bf16.mxu1 %v2899_v62 }
 0xbe2   : > { %v2879_v5 = vpop.permute.xlu1 %2878  ;;  %3202 = vmatpush3.bf16.msra.mxu1 %v2899_v62  ;;  %v2874_v52 = vpop.permute.xlu0 %2873 }
 0xbe3   : > { %v2888_v1 = vmul.f32 %v5534_v48, %v2879_v5  ;;  %v2887_v35 = vmul.f32 %v5534_v48, %v2874_v52 }
 0xbe5   : > { %v2896_v7 = vadd.f32 %v2888_v1, %v2831_v55  ;;  %v2895_v47 = vadd.f32 %v2887_v35, %v2830_v0 }
 0xbe6   : > { %v2917_v56 = vpop.permute.xlu0 %2916  ;;  %v2922_v39 = vpop.permute.xlu1 %2921 }
 0xbe7   : > { %v2900_v59 = vpack.c.bf16 %v2896_v7, %v2895_v47 }
 0xbe9   : > { %3203 = vmatprep.subr.bf16.mxu1 %v2900_v59 }
 0xbea   : > { %3204 = vmatpush3.bf16.msra.mxu1 %v2900_v59  ;;  %v2927_v58 = vpop.permute.xlu0 %2926  ;;  %v2932_v15 = vpop.permute.xlu1 %2931 }
 0xbed   : > { %3206 = vmatmul.mubr.msk.bf16.vlgmr.msra.gmra.mrb[0].mxu1 %vm2944_vm15, %v4277_v32 }
 0xcc0   : > { %v3207_v29 = vpop.f32.mrb[0].mxu1 }
 0xcc1   : > { %v2994_v40 = vadd.f32 %v3207_v29, %v2927_v58  ;;  %v2985_v14 = vpop.f32.mrb[1].mxu1 }
 0xcc2   : > { %v2986_v16 = vadd.f32 %v2985_v14, %v2917_v56  ;;  %v3208_v13 = vpop.f32.mrb[2].mxu1 }
 0xcc3   : > { %v3002_v17 = vmul.f32 %v5534_v48, %v2994_v40  ;;  %v2997_v63 = vadd.f32 %v3208_v13, %v2932_v15  ;;  %v2988_v19 = vpop.f32.mrb[3].mxu1 }
 0xcc4   : > { %v3000_v42 = vmul.f32 %v5534_v48, %v2986_v16  ;;  %v2989_v18 = vadd.f32 %v2988_v19, %v2922_v39 }
 0xcc5   : > { %v3006_v50 = vadd.f32 %v3002_v17, %v5466_v6  ;;  %v3003_v21 = vmul.f32 %v5534_v48, %v2997_v63 }
 0xcc6   : > { %v3004_v20 = vadd.f32 %v3000_v42, %v5460_v4  ;;  %v3001_v22 = vmul.f32 %v5534_v48, %v2989_v18 }
 0xcc7   : > { %3010 = vst [vmem:[%s5450_s22 + $0x10] sm:$0xff] %v3006_v50  ;;  %v3007_v44 = vadd.f32 %v3003_v21, %v5472_v8 }
 0xcc8   : > { %3008 = vst [vmem:[%s5450_s22] sm:$0xff] %v3004_v20  ;;  %v3005_v28 = vadd.f32 %v3001_v22, %v7145_v12 }
 0xcc9   : > { %3011 = vst [vmem:[%s5450_s22 + $0x18] sm:$0xff] %v3007_v44 }
 0xcca   : > { %3009 = vst [vmem:[%s5450_s22 + $0x8] sm:$0xff] %v3005_v28 }
 0xccb PF: > { %s25_s29 = sadd.s32 1, %s4804_s29   ;;  %s7146_s25 = smov %s4796_s27 }
 0xccc   : > { %p22_p13 = scmp.ge.s32.totalorder %s25_s29, 18   ;;  %s7147_s26 = smov %s4800_s28 }
 0xccd   : > { %s7148_s27 = smov %s7151_s14  ;;  %s7149_s28 = smov %s7155_s15 }
 0xcce   :  { %24 = sbr.rel (!%p22_p13) target bundleno = 10 (0xa), region = 181 }
 0xcd5   :  { %3033 = vsyncpa [#allocation3], 1 }
 0xcd6   :  { %3035 = vsyncpa [#allocation3 + $0x1], 1 }
 0xcd7   :  { %3036 = vsyncpa [#allocation5], 1 }

// kernel: _lambda_.6
= control target key start
LH: loop header
LB: loop body
LE: loop exit
PB: predicated region body
PF: predicated region fallthrough
CT: control target
= control target key end

     0   :  { %v250_v1 = vmov 0   ;;  %vm100_vm0 = vcmask 261120   ;;  %s338_s1 = inlined_call_operand.vmem [shape: bf16[32,256], index: 1, kind: input, shape index: {}]   ;;  %s339_s0 = inlined_call_operand.vmem [shape: bf16[64,32], index: 0, kind: input, shape index: {}]   ;;  %s340_s2 = inlined_call_operand.vmem [shape: f32[64,256], index: 2, kind: output, shape index: {}]  }
   0x1   :  { %v240_v0 = vld [vmem:[%s338_s1 + $0x4] ss:$8 sps:$4 sm:$0xff]   ;;  %145 = vmatprep.mubr.bf16.mxu0 %v250_v1  ;;  %165 = vmatprep.mubr.bf16.mxu1 %v250_v1  ;;  %v242_v2 = vld [vmem:[%s338_s1] ss:$8 sps:$4 sm:$0xff]   ;;  %v243_v3 = vld [vmem:[%s338_s1 + $0x14] ss:$8 sps:$4 sm:$0xff]  }
   0x2   :  { %113 = vmatprep.subr.bf16.mxu0 %v240_v0  ;;  %234 = vmatprep.subr.bf16.mxu1 %v240_v0  ;;  %v245_v4 = vld [vmem:[%s338_s1 + $0x10] ss:$8 sps:$4 sm:$0xff]   ;;  %v246_v5 = vld [vmem:[%s339_s0] sm:$0xff]   ;;  %v248_v7 = vld [vmem:[%s339_s0 + $0x8] sm:$0xff]  }
   0x3   :  { %114 = vmatpush1.bf16.msra.mxu0 %v242_v2  ;;  %236 = vmatpush1.bf16.msra.mxu1 %v242_v2  ;;  %v247_v6 = vld [vmem:[%s339_s0 + $0x10] sm:$0xff]   ;;  %v249_v8 = vld [vmem:[%s339_s0 + $0x18] sm:$0xff]  }
   0x4   :  { %115 = vmatprep.subr.bf16.mxu0 %v243_v3  ;;  %235 = vmatprep.subr.bf16.mxu1 %v243_v3 }
   0x7   :  { %116 = vmatpush1.bf16.msra.mxu0 %v245_v4  ;;  %237 = vmatpush1.bf16.msra.mxu1 %v245_v4 }
   0xa   :  { %230 = vmatmul.mubr.msk.bf16.vlgmr.msra.gmra.mrb[0].mxu0 %vm100_vm0, %v246_v5  ;;  %232 = vmatmul.mubr.msk.bf16.vlgmr.msra.gmra.mrb[0].mxu1 %vm100_vm0, %v247_v6 }
   0xb   :  { %155 = vmatprep.mubr.bf16.mxu0 %v250_v1  ;;  %175 = vmatprep.mubr.bf16.mxu1 %v250_v1 }
  0x12   :  { %231 = vmatmul.mubr.msk.bf16.gmra.mrb[4].mxu0 %vm100_vm0, %v248_v7  ;;  %233 = vmatmul.mubr.msk.bf16.gmra.mrb[4].mxu1 %vm100_vm0, %v249_v8 }
  0xdd   :  { %v147_v9 = vpop.f32.mrb[0].mxu0  ;;  %v167_v10 = vpop.f32.mrb[0].mxu1 }
  0xde   :  { %v149_v11 = vpop.f32.mrb[1].mxu0  ;;  %v169_v12 = vpop.f32.mrb[1].mxu1  ;;  %202 = vst [vmem:[%s340_s2] sm:$0xff] %v147_v9  ;;  %210 = vst [vmem:[%s340_s2 + $0x40] sm:$0xff] %v167_v10 }
  0xdf   :  { %v151_v13 = vpop.f32.mrb[2].mxu0  ;;  %v171_v14 = vpop.f32.mrb[2].mxu1  ;;  %203 = vst [vmem:[%s340_s2 + $0x8] sm:$0xff] %v149_v11  ;;  %211 = vst [vmem:[%s340_s2 + $0x48] sm:$0xff] %v169_v12 }
  0xe0   :  { %v153_v15 = vpop.f32.mrb[3].mxu0  ;;  %v173_v16 = vpop.f32.mrb[3].mxu1  ;;  %204 = vst [vmem:[%s340_s2 + $0x10] sm:$0xff] %v151_v13  ;;  %212 = vst [vmem:[%s340_s2 + $0x50] sm:$0xff] %v171_v14 }
  0xe1   :  { %205 = vst [vmem:[%s340_s2 + $0x18] sm:$0xff] %v153_v15  ;;  %213 = vst [vmem:[%s340_s2 + $0x58] sm:$0xff] %v173_v16 }
  0xe5   :  { %v157_v17 = vpop.f32.mrb[4].mxu0  ;;  %v177_v18 = vpop.f32.mrb[4].mxu1 }
  0xe6   :  { %v159_v19 = vpop.f32.mrb[5].mxu0  ;;  %v179_v20 = vpop.f32.mrb[5].mxu1  ;;  %206 = vst [vmem:[%s340_s2 + $0x20] sm:$0xff] %v157_v17  ;;  %214 = vst [vmem:[%s340_s2 + $0x60] sm:$0xff] %v177_v18 }
  0xe7   :  { %v161_v21 = vpop.f32.mrb[6].mxu0  ;;  %v181_v22 = vpop.f32.mrb[6].mxu1  ;;  %207 = vst [vmem:[%s340_s2 + $0x28] sm:$0xff] %v159_v19  ;;  %215 = vst [vmem:[%s340_s2 + $0x68] sm:$0xff] %v179_v20 }
  0xe8   :  { %v163_v23 = vpop.f32.mrb[7].mxu0  ;;  %v183_v24 = vpop.f32.mrb[7].mxu1  ;;  %208 = vst [vmem:[%s340_s2 + $0x30] sm:$0xff] %v161_v21  ;;  %216 = vst [vmem:[%s340_s2 + $0x70] sm:$0xff] %v181_v22 }
  0xe9   :  { %209 = vst [vmem:[%s340_s2 + $0x38] sm:$0xff] %v163_v23  ;;  %217 = vst [vmem:[%s340_s2 + $0x78] sm:$0xff] %v183_v24 }

// kernel: _lambda_.9
= control target key start
LH: loop header
LB: loop body
LE: loop exit
PB: predicated region body
PF: predicated region fallthrough
CT: control target
= control target key end

     0   :  { %s901_s24 = smov 0   ;;  %s1071_s0 = inlined_call_operand.vmem [shape: f32[2,64,128], index: 0, kind: input, shape index: {}]   ;;  %s1072_s1 = inlined_call_operand.vmem [shape: f32[2,32,128], index: 1, kind: input, shape index: {}]   ;;  %s1073_s2 = inlined_call_operand.vmem [shape: f32[64,1], index: 2, kind: input, shape index: {}]   ;;  %s1074_s3 = inlined_call_operand.vmem [shape: f32[64,1], index: 3, kind: input, shape index: {}]   ;;  %s1075_s4 = inlined_call_operand.vmem [shape: bf16[32,64], index: 4, kind: input, shape index: {}]   ;;  %s1076_s5 = inlined_call_operand.vmem [shape: bf16[32,32], index: 5, kind: input, shape index: {}]   ;;  %s1077_s6 = inlined_call_operand.vmem [shape: f32[32,1], index: 6, kind: input, shape index: {}]   ;;  %s1078_s7 = inlined_call_operand.vmem [shape: f32[2,32,128], index: 7, kind: output, shape index: {}]  }
   0x1 LB: > { %s766_s25 = sadd.s32 4294967295, %s856_s24   ;;  %p770_p0 = scmp.ge.s32.totalorder %s856_s24, 1  ;;  %s856_s24 = sphi %s901_s24, %s17_s24  }
   0x2   : > { %p247_p1 = scmp.lt.s32.totalorder %s856_s24, 3 }
   0x4   : > { %p248_p2 = pnand %p770_p0, %p247_p1 }
   0x5   : > { %p284_p3 = scmp.lt.s32.totalorder (!%p248_p2), %s766_s25, 1  ;;  %v308_v0 = vlaneseq (!%p248_p2)  ;;  %v858_v2 = vmov (!%p248_p2), 0.0   ;;  %v450_v42 = vld [vmem:[%s1074_s3 + $0x8] sm:$0xff] (!%p248_p2)  ;;  %v859_v43 = vmov (!%p248_p2), 0   ;;  %v451_v44 = vld [vmem:[%s1074_s3 + $0x10] sm:$0xff] (!%p248_p2)  ;;  %v452_v45 = vld [vmem:[%s1074_s3 + $0x18] sm:$0xff] (!%p248_p2) }
   0x6   : > { %251 = sbr.rel (%p248_p2) target bundleno = 705 (0x2c1), region = 48  ;;  %843 = vset.pattern.permute.xlu1 (!%p248_p2), %v859_v43  ;;  %842 = vset.pattern.permute.xlu0 (!%p248_p2), %v859_v43  ;;  %v453_v46 = vld [vmem:[%s1074_s3 + $0x20] sm:$0xff] (!%p248_p2)  ;;  %v454_v47 = vld [vmem:[%s1074_s3 + $0x28] sm:$0xff] (!%p248_p2)  ;;  %v455_v63 = vld [vmem:[%s1074_s3 + $0x30] sm:$0xff] (!%p248_p2)  ;;  %s860_s10 = smov (!%p248_p2), 0.0   ;;  %vm541_vm1 = vcmask (!%p248_p2), 261120  }
   0x7   : > { %v309_v1 = vand.u32 (!%p248_p2), 127, %v308_v0  ;;  %464 = vperm.xlu1 (!%p248_p2), %843, %v450_v42   ;;  %v449_v56 = vld [vmem:[%s1074_s3] sm:$0xff] (!%p248_p2)  ;;  %vm607_vm2 = vcmask (!%p248_p2), 523264  }
   0x8   : > { %v663_v0 = vld [vmem:[%s1077_s6] sm:$0xff] (!%p248_p2) }
   0x9   : > { %vm310_vm0 = vcmp.lt.s32.totalorder (!%p248_p2), %v309_v1, 34  ;;  %v665_v1 = vld [vmem:[%s1077_s6 + $0x10] sm:$0xff] (!%p248_p2) }
   0xa   : > { %v915_v3 = vsel (!%p248_p2), %vm310_vm0, 1.0, %v858_v2 }
   0xb   : > { %469 = vperm.xlu1 (!%p248_p2), %843, %v451_v44  }
   0xd   : > { %s1080_s25 = smov (!%p284_p3, %s766_s25), 1 }
   0xe   : > { %s788_s26 = sshll.u32 %s1080_s25, 6 }
   0xf   : > { %s288_s29 = scalar_lea.vmem %s1071_s0, %s788_s26  ;;  %474 = vperm.xlu1 %843, %v452_v45  }
  0x10   : > { %v300_v4 = vld [vmem:[%s288_s29] sm:$0xff]  ;;  %v301_v5 = vld [vmem:[%s288_s29 + $0x8] sm:$0xff]  ;;  %v302_v6 = vld [vmem:[%s288_s29 + $0x10] sm:$0xff] }
  0x11   : > { %v303_v7 = vld [vmem:[%s288_s29 + $0x18] sm:$0xff]  ;;  %v918_v8 = vmul.f32 %v915_v3, %v300_v4  ;;  %v921_v9 = vmul.f32 %v915_v3, %v301_v5  ;;  %v924_v10 = vmul.f32 %v915_v3, %v302_v6  ;;  %v304_v11 = vld [vmem:[%s288_s29 + $0x20] sm:$0xff]  ;;  %v305_v15 = vld [vmem:[%s288_s29 + $0x28] sm:$0xff] }
  0x12   : > { %v927_v12 = vmul.f32 %v915_v3, %v303_v7  ;;  %v935_v18 = vmul.f32 %v915_v3, %v304_v11  ;;  %v306_v20 = vld [vmem:[%s288_s29 + $0x30] sm:$0xff]  ;;  %v940_v23 = vmul.f32 %v915_v3, %v305_v15  ;;  %v307_v25 = vld [vmem:[%s288_s29 + $0x38] sm:$0xff] }
  0x13   : > { %v321_v13 = vadd.f32 %v921_v9, %v918_v8  ;;  %v340_v14 = vmul.f32 %v918_v8, %v300_v4  ;;  %v341_v16 = vmul.f32 %v921_v9, %v301_v5  ;;  %v342_v17 = vmul.f32 %v924_v10, %v302_v6  ;;  %479 = vperm.xlu1 %843, %v453_v46   ;;  %v384_v5 = vld [vmem:[%s1073_s2] sm:$0xff] }
  0x14   : > { %v343_v21 = vmul.f32 %v927_v12, %v303_v7  ;;  %v344_v26 = vmul.f32 %v935_v18, %v304_v11  ;;  %v945_v28 = vmul.f32 %v915_v3, %v306_v20  ;;  %v345_v30 = vmul.f32 %v940_v23, %v305_v15  ;;  %v385_v11 = vld [vmem:[%s1073_s2 + $0x8] sm:$0xff] }
  0x15   : > { %v322_v19 = vadd.f32 %v321_v13, %v924_v10  ;;  %v348_v22 = vadd.f32 %v341_v16, %v340_v14  ;;  %v950_v32 = vmul.f32 %v915_v3, %v307_v25  ;;  %v386_v14 = vld [vmem:[%s1073_s2 + $0x10] sm:$0xff]  ;;  %v387_v16 = vld [vmem:[%s1073_s2 + $0x18] sm:$0xff] }
  0x16   : > { %v346_v34 = vmul.f32 %v945_v28, %v306_v20 }
  0x17   : > { %v323_v24 = vadd.f32 %v322_v19, %v927_v12  ;;  %v349_v27 = vadd.f32 %v348_v22, %v342_v17  ;;  %v347_v37 = vmul.f32 %v950_v32, %v307_v25  ;;  %484 = vperm.xlu1 %843, %v454_v47   ;;  %v388_v19 = vld [vmem:[%s1073_s2 + $0x20] sm:$0xff] }
  0x19   : > { %v324_v29 = vadd.f32 %v323_v24, %v935_v18  ;;  %v350_v31 = vadd.f32 %v349_v27, %v343_v21  ;;  %v389_v21 = vld [vmem:[%s1073_s2 + $0x28] sm:$0xff]  ;;  %v390_v24 = vld [vmem:[%s1073_s2 + $0x30] sm:$0xff] }
  0x1b   : > { %v325_v33 = vadd.f32 %v324_v29, %v940_v23  ;;  %v351_v35 = vadd.f32 %v350_v31, %v344_v26  ;;  %v391_v26 = vld [vmem:[%s1073_s2 + $0x38] sm:$0xff] }
  0x1c   : > { %v456_v29 = vld [vmem:[%s1074_s3 + $0x38] sm:$0xff] }
  0x1d   : > { %v326_v36 = vadd.f32 %v325_v33, %v945_v28  ;;  %v352_v38 = vadd.f32 %v351_v35, %v345_v30 }
  0x1f   : > { %v327_v39 = vadd.f32 %v326_v36, %v950_v32  ;;  %v353_v40 = vadd.f32 %v352_v38, %v346_v34  ;;  %v664_v34 = vld [vmem:[%s1077_s6 + $0x8] sm:$0xff]  ;;  %v844_v38 = vld [vmem:[%s1076_s5] sm:$0xff]  }
  0x20   : > { %805 = vmatprep.mubr.msk.bf16.mxu1 %vm541_vm1, %v844_v38 }
  0x21   : > { %328 = vadd.xlane.f32.xlu0 %v327_v39  ;;  %v354_v41 = vadd.f32 %v353_v40, %v347_v37  ;;  %v666_v39 = vld [vmem:[%s1077_s6 + $0x18] sm:$0xff]  ;;  %v845_v40 = vld [vmem:[%s1076_s5 + $0x8] sm:$0xff]  }
  0x25   : > { %355 = vadd.xlane.f32.xlu0 %v354_v41  ;;  %v846_v41 = vld [vmem:[%s1075_s4] sm:$0xff]  }
  0x26   : > { %817 = vmatprep.mubr.msk.bf16.mxu0 %vm607_vm2, %v846_v41 }
  0x3b   : > { %459 = vperm.xlu0 %842, %v449_v56  }
  0x3f   : > { %489 = vperm.xlu0 %842, %v455_v63  }
  0x43   : > { %669 = vperm.xlu0 %842, %v663_v0  }
  0x47   : > { %679 = vperm.xlu0 %842, %v665_v1  }
  0x86   : > { %v465_v42 = vpop.permute.xlu1 %464 }
  0x87   : > { %v498_v56 = vmul.f32 %v915_v3, %v465_v42 }
  0x8a   : > { %v470_v43 = vpop.permute.xlu1 %469 }
  0x8b   : > { %v499_v1 = vmul.f32 %v915_v3, %v470_v43 }
  0x8e   : > { %v475_v44 = vpop.permute.xlu1 %474 }
  0x92   : > { %v480_v45 = vpop.permute.xlu1 %479 }
  0x96   : > { %v485_v47 = vpop.permute.xlu1 %484 }
  0xae   : > { %v329_v48 = vpop.xlane.xlu0 %328 }
  0xaf   : > { %v330_v49 = vrot.slane %v329_v48, 4 }
  0xb1   : > { %v331_v50 = vadd.f32 %v330_v49, %v329_v48 }
  0xb2   : > { %v356_v51 = vpop.xlane.xlu0 %355 }
  0xb3   : > { %v332_v52 = vrot.slane %v331_v50, 2  ;;  %v357_v53 = vrot.slane %v356_v51, 4 }
  0xb5   : > { %v358_v54 = vadd.f32 %v357_v53, %v356_v51  ;;  %v333_v55 = vadd.f32 %v332_v52, %v331_v50 }
  0xb7   : > { %v359_v57 = vrot.slane %v358_v54, 2  ;;  %v334_v58 = vrot.slane %v333_v55, 1 }
  0xb9   : > { %v335_v59 = vadd.f32 %v334_v58, %v333_v55  ;;  %v360_v60 = vadd.f32 %v359_v57, %v358_v54 }
  0xba   : > { %v460_v50 = vpop.permute.xlu0 %459 }
  0xbb   : > { %825 = vpush %v335_v59  ;;  %v361_v61 = vrot.slane %v360_v60, 1  ;;  %v497_v53 = vmul.f32 %v915_v3, %v460_v50 }
  0xbd   : > { %v362_v62 = vadd.f32 %v361_v61, %v360_v60 }
  0xbf   : > { %827 = vpush %v362_v62 }
  0xec   : > { %s826_s27 = spop %825 }
  0xed   : > { %s984_s28 = smul.f32 0.00045955883, %s826_s27 }
  0xef   : > { %s367_s29 = smul.f32 %s984_s28, %s984_s28  ;;  %v370_v46 = vstv %s984_s28 }
  0xf0   : > { %s828_s30 = spop %827  ;;  %v371_v48 = vmul.f32 %v915_v3, %v370_v46 }
  0xf1   : > { %s366_s8 = smul.f32 0.00045955883, %s828_s30 }
  0xf2   : > { %v372_v51 = vsub.f32 %v918_v8, %v371_v48  ;;  %v373_v54 = vsub.f32 %v921_v9, %v371_v48  ;;  %v374_v61 = vsub.f32 %v924_v10, %v371_v48  ;;  %v375_v0 = vsub.f32 %v927_v12, %v371_v48 }
  0xf3   : > { %s368_s9 = ssub.f32 %s366_s8, %s367_s29  ;;  %v500_v9 = vmul.f32 %v915_v3, %v475_v44  ;;  %v377_v10 = vsub.f32 %v940_v23, %v371_v48  ;;  %v501_v12 = vmul.f32 %v915_v3, %v480_v45  ;;  %v490_v23 = vpop.permute.xlu0 %489 }
  0xf5   : > { %s369_s11 = smax.f32 %s860_s10, %s368_s9  ;;  %s789_s10 = sshll.u32 %s1080_s25, 5 }
  0xf6   : > { %s380_s12 = sadd.f32 1e-08, %s369_s11  ;;  %s293_s13 = scalar_lea.vmem %s1072_s1, %s789_s10 }
  0xf7   : > { %v525_v30 = vld [vmem:[%s293_s13] sm:$0xff]  ;;  %v526_v31 = vld [vmem:[%s293_s13 + $0x8] sm:$0xff]  ;;  %v527_v35 = vld [vmem:[%s293_s13 + $0x10] sm:$0xff]  ;;  %v670_v38 = vpop.permute.xlu0 %669  ;;  %s298_s9 = scalar_lea.vmem %s1078_s7, %s789_s10 }
  0xf8   : > { %v381_v2 = vstv %s380_s12  ;;  %v529_v33 = vpack.c.bf16 %v526_v31, %v525_v30  ;;  %v528_v36 = vld [vmem:[%s293_s13 + $0x18] sm:$0xff] }
  0xf9   : > { %848 = vrsqrt.f32 %v381_v2  ;;  %v530_v37 = vpack.c.bf16 %v528_v36, %v527_v35  ;;  %v847_v35 = vld [vmem:[%s1075_s4 + $0x8] sm:$0xff]  }
  0xfa   : > { %801 = vmatprep.subr.bf16.mxu1 %v529_v33 }
  0xfb   : > { %802 = vmatpush3.bf16.msra.mxu1 %v529_v33  ;;  %v680_v43 = vpop.permute.xlu0 %679 }
  0xfc   : > { %803 = vmatprep.subr.bf16.mxu1 %v530_v37 }
  0xff   : > { %804 = vmatpush3.bf16.msra.mxu1 %v530_v37 }
 0x102   : > { %806 = vmatmul.mubr.msk.bf16.vlgmr.msra.gmra.mrb[0].mxu1 %vm541_vm1, %v845_v40 }
 0x103   : > { %v849_v4 = vpop.eup %848 }
 0x104   : > { %829 = vpush %v849_v4 }
 0x135   : > { %s830_s15 = spop %829 }
 0x136   : > { %v392_v6 = vstv %s830_s15 }
 0x137   : > { %v393_v7 = vmul.f32 %v392_v6, %v384_v5  ;;  %v394_v13 = vmul.f32 %v392_v6, %v385_v11  ;;  %v395_v15 = vmul.f32 %v392_v6, %v386_v14  ;;  %v396_v17 = vmul.f32 %v392_v6, %v387_v16 }
 0x138   : > { %v397_v20 = vmul.f32 %v392_v6, %v388_v19  ;;  %v398_v22 = vmul.f32 %v392_v6, %v389_v21  ;;  %v399_v25 = vmul.f32 %v392_v6, %v390_v24  ;;  %v400_v27 = vmul.f32 %v392_v6, %v391_v26 }
 0x139   : > { %403 = vperm.xlu1 %843, %v393_v7   ;;  %v376_v7 = vsub.f32 %v935_v18, %v371_v48  ;;  %v378_v18 = vsub.f32 %v945_v28, %v371_v48 }
 0x13d   : > { %408 = vperm.xlu1 %843, %v394_v13  }
 0x141   : > { %413 = vperm.xlu1 %843, %v395_v15   ;;  %v502_v15 = vmul.f32 %v915_v3, %v485_v47 }
 0x145   : > { %418 = vperm.xlu1 %843, %v396_v17  }
 0x149   : > { %423 = vperm.xlu1 %843, %v397_v20  }
 0x14d   : > { %428 = vperm.xlu1 %843, %v398_v22  }
 0x151   : > { %433 = vperm.xlu1 %843, %v399_v25   ;;  %v379_v25 = vsub.f32 %v950_v32, %v371_v48 }
 0x155   : > { %438 = vperm.xlu1 %843, %v400_v27   ;;  %v503_v27 = vmul.f32 %v915_v3, %v490_v23 }
 0x159   : > { %494 = vperm.xlu1 %843, %v456_v29  }
 0x15d   : > { %674 = vperm.xlu1 %843, %v664_v34  }
 0x161   : > { %684 = vperm.xlu1 %843, %v666_v39  }
 0x1b8   : > { %v404_v49 = vpop.permute.xlu1 %403 }
 0x1b9   : > { %v441_v52 = vmul.f32 %v404_v49, %v372_v51 }
 0x1bb   : > { %v505_v58 = vadd.f32 %v497_v53, %v441_v52 }
 0x1bc   : > { %v409_v55 = vpop.permute.xlu1 %408 }
 0x1bd   : > { %v442_v57 = vmul.f32 %v409_v55, %v373_v54 }
 0x1bf   : > { %v506_v59 = vadd.f32 %v498_v56, %v442_v57 }
 0x1c0   : > { %v414_v60 = vpop.permute.xlu1 %413 }
 0x1c1   : > { %v517_v62 = vpack.c.bf16 %v506_v59, %v505_v58  ;;  %v443_v63 = vmul.f32 %v414_v60, %v374_v61 }
 0x1c3   : > { %809 = vmatprep.subr.bf16.mxu0 %v517_v62  ;;  %v507_v4 = vadd.f32 %v499_v1, %v443_v63 }
 0x1c4   : > { %v419_v8 = vpop.permute.xlu1 %418  ;;  %810 = vmatpush3.bf16.msra.mxu0 %v517_v62 }
 0x1c5   : > { %v444_v2 = vmul.f32 %v419_v8, %v375_v0 }
 0x1c7   : > { %v508_v5 = vadd.f32 %v500_v9, %v444_v2 }
 0x1c8   : > { %v424_v6 = vpop.permute.xlu1 %423 }
 0x1c9   : > { %v518_v11 = vpack.c.bf16 %v508_v5, %v507_v4  ;;  %v445_v13 = vmul.f32 %v424_v6, %v376_v7 }
 0x1cb   : > { %811 = vmatprep.subr.bf16.mxu0 %v518_v11  ;;  %v509_v17 = vadd.f32 %v501_v12, %v445_v13 }
 0x1cc   : > { %v429_v14 = vpop.permute.xlu1 %428  ;;  %812 = vmatpush3.bf16.msra.mxu0 %v518_v11 }
 0x1cd   : > { %v446_v16 = vmul.f32 %v429_v14, %v377_v10 }
 0x1cf   : > { %v510_v19 = vadd.f32 %v502_v15, %v446_v16 }
 0x1d0   : > { %v434_v20 = vpop.permute.xlu1 %433 }
 0x1d1   : > { %v519_v21 = vpack.c.bf16 %v510_v19, %v509_v17  ;;  %v447_v24 = vmul.f32 %v434_v20, %v378_v18 }
 0x1d3   : > { %813 = vmatprep.subr.bf16.mxu0 %v519_v21  ;;  %v511_v31 = vadd.f32 %v503_v27, %v447_v24 }
 0x1d4   : > { %v439_v22 = vpop.permute.xlu1 %438  ;;  %814 = vmatpush3.bf16.msra.mxu0 %v519_v21 }
 0x1d5   : > { %v448_v29 = vmul.f32 %v439_v22, %v379_v25  ;;  %v807_v28 = vpop.f32.mrb[0].mxu1 }
 0x1d6   : > { %v582_v32 = vpop.f32.mrb[1].mxu1 }
 0x1d7   : > { %v808_v36 = vpop.f32.mrb[2].mxu1 }
 0x1d8   : > { %v495_v26 = vpop.permute.xlu1 %494  ;;  %v585_v37 = vpop.f32.mrb[3].mxu1 }
 0x1d9   : > { %v504_v30 = vmul.f32 %v915_v3, %v495_v26 }
 0x1db   : > { %v512_v33 = vadd.f32 %v504_v30, %v448_v29 }
 0x1dc   : > { %v675_v39 = vpop.permute.xlu1 %674 }
 0x1dd   : > { %v520_v34 = vpack.c.bf16 %v512_v33, %v511_v31 }
 0x1df   : > { %815 = vmatprep.subr.bf16.mxu0 %v520_v34 }
 0x1e0   : > { %816 = vmatpush3.bf16.msra.mxu0 %v520_v34  ;;  %v685_v49 = vpop.permute.xlu1 %684 }
 0x1e3   : > { %818 = vmatmul.mubr.msk.bf16.vlgmr.msra.gmra.mrb[0].mxu0 %vm607_vm2, %v847_v35 }
 0x2b6   : > { %v819_v40 = vpop.f32.mrb[0].mxu0 }
 0x2b7   : > { %v657_v41 = vadd.f32 %v819_v40, %v807_v28  ;;  %v648_v42 = vpop.f32.mrb[1].mxu0 }
 0x2b8   : > { %v649_v44 = vadd.f32 %v648_v42, %v582_v32  ;;  %v820_v45 = vpop.f32.mrb[2].mxu0 }
 0x2b9   : > { %v689_v46 = vadd.f32 %v680_v43, %v657_v41  ;;  %v660_v47 = vadd.f32 %v820_v45, %v808_v36  ;;  %v651_v48 = vpop.f32.mrb[3].mxu0 }
 0x2ba   : > { %v687_v50 = vadd.f32 %v670_v38, %v649_v44  ;;  %v652_v51 = vadd.f32 %v651_v48, %v585_v37 }
 0x2bb   : > { %v693_v52 = vmul.f32 %v915_v3, %v689_v46  ;;  %v690_v53 = vadd.f32 %v685_v49, %v660_v47 }
 0x2bc   : > { %v691_v54 = vmul.f32 %v915_v3, %v687_v50  ;;  %v688_v55 = vadd.f32 %v675_v39, %v652_v51 }
 0x2bd   : > { %697 = vst [vmem:[%s298_s9 + $0x10] sm:$0xff] %v693_v52  ;;  %v694_v56 = vmul.f32 %v915_v3, %v690_v53 }
 0x2be   : > { %695 = vst [vmem:[%s298_s9] sm:$0xff] %v691_v54  ;;  %v692_v57 = vmul.f32 %v915_v3, %v688_v55 }
 0x2bf   : > { %698 = vst [vmem:[%s298_s9 + $0x18] sm:$0xff] %v694_v56 }
 0x2c0   : > { %696 = vst [vmem:[%s298_s9 + $0x8] sm:$0xff] %v692_v57 }
 0x2c1 PF: > { %s17_s24 = sadd.s32 1, %s856_s24  }
 0x2c2   : > { %p14_p4 = scmp.ge.s32.totalorder %s17_s24, 4  }
 0x2c4   :  { %16 = sbr.rel (!%p14_p4) target bundleno = 1 (0x1), region = 81 }

// kernel: _lambda_.11
= control target key start
LH: loop header
LB: loop body
LE: loop exit
PB: predicated region body
PF: predicated region fallthrough
CT: control target
= control target key end

     0   :  { %s825_s23 = smov 0   ;;  %s911_s0 = inlined_call_operand.vmem [shape: f32[2,32,128], index: 0, kind: input, shape index: {}]   ;;  %s912_s1 = inlined_call_operand.vmem [shape: f32[2,64,128], index: 1, kind: input, shape index: {}]   ;;  %s913_s2 = inlined_call_operand.<no memory space> [shape: f32[1], index: 2, kind: input, shape index: {}]   ;;  %s914_s3 = inlined_call_operand.vmem [shape: bf16[64,32], index: 3, kind: input, shape index: {}]   ;;  %s915_s4 = inlined_call_operand.vmem [shape: f32[64,1], index: 4, kind: input, shape index: {}]   ;;  %s916_s5 = inlined_call_operand.vmem [shape: bf16[32,64], index: 5, kind: input, shape index: {}]   ;;  %s917_s6 = inlined_call_operand.vmem [shape: f32[2,32,128], index: 6, kind: output, shape index: {}]  }
   0x1   :  { %11 = sst [smem:[#allocation2]] %s913_s2 }
   0x2 LB: > { %s657_s24 = sadd.s32 4294967295, %s784_s23   ;;  %p661_p0 = scmp.ge.s32.totalorder %s784_s23, 1  ;;  %s784_s23 = sphi %s825_s23, %s17_s23  }
   0x3   : > { %p223_p1 = scmp.lt.s32.totalorder %s784_s23, 3 }
   0x5   : > { %p224_p2 = pnand %p661_p0, %p223_p1 }
   0x6   : > { %p258_p3 = scmp.lt.s32.totalorder (!%p224_p2), %s657_s24, 1  ;;  %s282_s25 = sld [smem:[#allocation2]] (!%p224_p2)  ;;  %v740_v0 = vld [vmem:[%s914_s3] sm:$0xff] (!%p224_p2)   ;;  %vm370_vm0 = vcmask (!%p224_p2), 261120   ;;  %v304_v2 = vld [vmem:[%s915_s4 + $0x10] sm:$0xff] (!%p224_p2)  ;;  %v786_v3 = vmov (!%p224_p2), 0  }
   0x7   : > { %227 = sbr.rel (%p224_p2) target bundleno = 510 (0x1fe), region = 44  ;;  %709 = vmatprep.mubr.msk.bf16.mxu0 (!%p224_p2), %vm370_vm0, %v740_v0  ;;  %v302_v1 = vld [vmem:[%s915_s4] sm:$0xff] (!%p224_p2)  ;;  %738 = vset.pattern.permute.xlu0 (!%p224_p2), %v786_v3  ;;  %v303_v11 = vld [vmem:[%s915_s4 + $0x8] sm:$0xff] (!%p224_p2)  ;;  %v305_v12 = vld [vmem:[%s915_s4 + $0x18] sm:$0xff] (!%p224_p2)  ;;  %vm530_vm5 = vcmask (!%p224_p2), 523264  }
   0x8   : > { %739 = vset.pattern.permute.xlu1 (!%p224_p2), %v786_v3  ;;  %312 = vperm.xlu0 (!%p224_p2), %738, %v302_v1   ;;  %v306_v21 = vld [vmem:[%s915_s4 + $0x20] sm:$0xff] (!%p224_p2)  ;;  %v307_v22 = vld [vmem:[%s915_s4 + $0x28] sm:$0xff] (!%p224_p2)  ;;  %v308_v23 = vld [vmem:[%s915_s4 + $0x30] sm:$0xff] (!%p224_p2) }
   0x9   : > { %322 = vperm.xlu1 (!%p224_p2), %739, %v304_v2   ;;  %v741_v24 = vld [vmem:[%s914_s3 + $0x8] sm:$0xff] (!%p224_p2)   ;;  %v309_v25 = vld [vmem:[%s915_s4 + $0x38] sm:$0xff] (!%p224_p2)  ;;  %v742_v26 = vld [vmem:[%s914_s3 + $0x10] sm:$0xff] (!%p224_p2)  }
   0xa   : > { %v743_v27 = vld [vmem:[%s914_s3 + $0x18] sm:$0xff] (!%p224_p2)   ;;  %v744_v28 = vld [vmem:[%s916_s5] sm:$0xff] (!%p224_p2)  }
   0xb   : > { %725 = vmatprep.mubr.msk.bf16.mxu1 (!%p224_p2), %vm530_vm5, %v744_v28 }
   0xc   : > { %v283_v6 = vstv (!%p224_p2), %s282_s25  ;;  %317 = vperm.xlu0 (!%p224_p2), %738, %v303_v11  }
   0xd   : > { %327 = vperm.xlu1 (!%p224_p2), %739, %v305_v12  }
   0xe   : > { %s919_s24 = smov (!%p258_p3, %s657_s24), 1 }
   0xf   : > { %s690_s2 = sshll.u32 %s919_s24, 5  ;;  %s691_s9 = sshll.u32 %s919_s24, 6 }
  0x10   : > { %s262_s10 = scalar_lea.vmem %s911_s0, %s690_s2  ;;  %332 = vperm.xlu0 %738, %v306_v21   ;;  %s889_s12 = scalar_lea.vmem %s912_s1, %s691_s9 }
  0x11   : > { %v274_v4 = vld [vmem:[%s262_s10] sm:$0xff]  ;;  %v275_v5 = vld [vmem:[%s262_s10 + $0x8] sm:$0xff]  ;;  %v276_v7 = vld [vmem:[%s262_s10 + $0x10] sm:$0xff]  ;;  %337 = vperm.xlu1 %739, %v307_v22   ;;  %s272_s17 = scalar_lea.vmem %s917_s6, %s690_s2 }
  0x12   : > { %vm278_vm1 = vcmp.ge.f32.partialorder %v274_v4, 0.0  ;;  %vm279_vm2 = vcmp.ge.f32.partialorder %v275_v5, 0.0  ;;  %v284_v8 = vmul.f32 %v283_v6, %v274_v4  ;;  %v285_v9 = vmul.f32 %v283_v6, %v275_v5  ;;  %v277_v10 = vld [vmem:[%s262_s10 + $0x18] sm:$0xff]  ;;  %v498_v12 = vld [vmem:[%s889_s12 + $0x10] sm:$0xff]  ;;  %v500_v28 = vld [vmem:[%s889_s12 + $0x20] sm:$0xff] }
  0x13   : > { %vm280_vm3 = vcmp.ge.f32.partialorder %v276_v7, 0.0  ;;  %vm281_vm4 = vcmp.ge.f32.partialorder %v277_v10, 0.0  ;;  %v286_v13 = vmul.f32 %v283_v6, %v276_v7  ;;  %v287_v14 = vmul.f32 %v283_v6, %v277_v10 }
  0x14   : > { %v288_v15 = vsel %vm278_vm1, %v274_v4, %v284_v8  ;;  %v289_v16 = vsel %vm279_vm2, %v275_v5, %v285_v9  ;;  %342 = vperm.xlu0 %738, %v308_v23  }
  0x15   : > { %v300_v17 = vpack.c.bf16 %v289_v16, %v288_v15  ;;  %v290_v18 = vsel %vm280_vm3, %v276_v7, %v286_v13  ;;  %v291_v19 = vsel %vm281_vm4, %v277_v10, %v287_v14  ;;  %347 = vperm.xlu1 %739, %v309_v25   ;;  %v496_v14 = vld [vmem:[%s889_s12] sm:$0xff]  ;;  %v499_v16 = vld [vmem:[%s889_s12 + $0x18] sm:$0xff] }
  0x16   : > { %v301_v20 = vpack.c.bf16 %v291_v19, %v290_v18  ;;  %v497_v18 = vld [vmem:[%s889_s12 + $0x8] sm:$0xff] }
  0x17   : > { %705 = vmatprep.subr.bf16.mxu0 %v300_v17 }
  0x18   : > { %706 = vmatpush3.bf16.msra.mxu0 %v300_v17 }
  0x19   : > { %707 = vmatprep.subr.bf16.mxu0 %v301_v20 }
  0x1c   : > { %708 = vmatpush3.bf16.msra.mxu0 %v301_v20 }
  0x1f   : > { %710 = vmatmul.mubr.msk.bf16.vlgmr.msra.gmra.mrb[0].mxu0 %vm370_vm0, %v741_v24 }
  0x20   : > { %713 = vmatprep.mubr.msk.bf16.mxu0 %vm370_vm0, %v742_v26 }
  0x27   : > { %714 = vmatmul.mubr.msk.bf16.gmra.mrb[4].mxu0 %vm370_vm0, %v743_v27  ;;  %v502_v27 = vld [vmem:[%s889_s12 + $0x30] sm:$0xff] }
  0x87   : > { %v313_v29 = vpop.permute.xlu0 %312 }
  0x88   : > { %v323_v30 = vpop.permute.xlu1 %322 }
  0x8b   : > { %v318_v31 = vpop.permute.xlu0 %317 }
  0x8c   : > { %v328_v32 = vpop.permute.xlu1 %327 }
  0x8f   : > { %v333_v36 = vpop.permute.xlu0 %332 }
  0x90   : > { %v338_v42 = vpop.permute.xlu1 %337 }
  0x93   : > { %v343_v47 = vpop.permute.xlu0 %342 }
  0x94   : > { %v348_v51 = vpop.permute.xlu1 %347 }
  0xf2   : > { %v711_v33 = vpop.f32.mrb[0].mxu0 }
  0xf3   : > { %v426_v34 = vadd.f32 %v711_v33, %v323_v30  ;;  %v417_v35 = vpop.f32.mrb[1].mxu0  ;;  %v503_v30 = vld [vmem:[%s889_s12 + $0x38] sm:$0xff] }
  0xf4   : > { %v418_v37 = vadd.f32 %v417_v35, %v313_v29  ;;  %v712_v38 = vpop.f32.mrb[2].mxu0 }
  0xf5   : > { %v678_v39 = vmul.f32 -1.442695, %v426_v34  ;;  %v429_v40 = vadd.f32 %v712_v38, %v328_v32  ;;  %v420_v41 = vpop.f32.mrb[3].mxu0  ;;  %v501_v32 = vld [vmem:[%s889_s12 + $0x28] sm:$0xff] }
  0xf6   : > { %v676_v43 = vmul.f32 -1.442695, %v418_v37  ;;  %v421_v44 = vadd.f32 %v420_v41, %v318_v31  ;;  %v745_v41 = vld [vmem:[%s916_s5 + $0x8] sm:$0xff]  }
  0xf7   : > { %746 = vpow2.f32 %v678_v39  ;;  %v679_v45 = vmul.f32 -1.442695, %v429_v40 }
  0xf8   : > { %748 = vpow2.f32 %v676_v43  ;;  %v677_v46 = vmul.f32 -1.442695, %v421_v44 }
  0xf9   : > { %750 = vpow2.f32 %v679_v45 }
  0xfa   : > { %752 = vpow2.f32 %v677_v46  ;;  %v715_v48 = vpop.f32.mrb[4].mxu0 }
  0xfb   : > { %v442_v49 = vadd.f32 %v715_v48, %v343_v47  ;;  %v433_v50 = vpop.f32.mrb[5].mxu0 }
  0xfc   : > { %v434_v52 = vadd.f32 %v433_v50, %v333_v36  ;;  %v716_v53 = vpop.f32.mrb[6].mxu0 }
  0xfd   : > { %v682_v54 = vmul.f32 -1.442695, %v442_v49  ;;  %v445_v55 = vadd.f32 %v716_v53, %v348_v51  ;;  %v436_v56 = vpop.f32.mrb[7].mxu0 }
  0xfe   : > { %v680_v57 = vmul.f32 -1.442695, %v434_v52  ;;  %v437_v58 = vadd.f32 %v436_v56, %v338_v42 }
  0xff   : > { %754 = vpow2.f32 %v682_v54  ;;  %v683_v59 = vmul.f32 -1.442695, %v445_v55 }
 0x100   : > { %756 = vpow2.f32 %v680_v57  ;;  %v681_v60 = vmul.f32 -1.442695, %v437_v58 }
 0x101   : > { %v747_v61 = vpop.eup %746  ;;  %758 = vpow2.f32 %v683_v59 }
 0x102   : > { %v749_v62 = vpop.eup %748  ;;  %v474_v63 = vadd.f32 1.0, %v747_v61  ;;  %760 = vpow2.f32 %v681_v60 }
 0x103   : > { %v751_v0 = vpop.eup %750  ;;  %v472_v1 = vadd.f32 1.0, %v749_v62 }
 0x104   : > { %v753_v2 = vpop.eup %752  ;;  %762 = vrcp.f32 %v474_v63  ;;  %v475_v3 = vadd.f32 1.0, %v751_v0 }
 0x105   : > { %764 = vrcp.f32 %v472_v1  ;;  %v473_v4 = vadd.f32 1.0, %v753_v2 }
 0x106   : > { %766 = vrcp.f32 %v475_v3 }
 0x107   : > { %768 = vrcp.f32 %v473_v4 }
 0x109   : > { %v755_v5 = vpop.eup %754 }
 0x10a   : > { %v757_v6 = vpop.eup %756  ;;  %v478_v7 = vadd.f32 1.0, %v755_v5 }
 0x10b   : > { %v759_v8 = vpop.eup %758  ;;  %v476_v9 = vadd.f32 1.0, %v757_v6 }
 0x10c   : > { %v761_v10 = vpop.eup %760  ;;  %770 = vrcp.f32 %v478_v7  ;;  %v479_v11 = vadd.f32 1.0, %v759_v8 }
 0x10d   : > { %772 = vrcp.f32 %v476_v9  ;;  %v477_v13 = vadd.f32 1.0, %v761_v10 }
 0x10e   : > { %v763_v15 = vpop.eup %762  ;;  %774 = vrcp.f32 %v479_v11 }
 0x10f   : > { %v765_v17 = vpop.eup %764  ;;  %776 = vrcp.f32 %v477_v13  ;;  %v506_v19 = vmul.f32 %v763_v15, %v498_v12 }
 0x110   : > { %v767_v20 = vpop.eup %766  ;;  %v504_v21 = vmul.f32 %v765_v17, %v496_v14 }
 0x111   : > { %v769_v22 = vpop.eup %768  ;;  %v507_v23 = vmul.f32 %v767_v20, %v499_v16 }
 0x112   : > { %v505_v24 = vmul.f32 %v769_v22, %v497_v18 }
 0x113   : > { %v517_v25 = vpack.c.bf16 %v507_v23, %v506_v19 }
 0x114   : > { %v516_v26 = vpack.c.bf16 %v505_v24, %v504_v21 }
 0x116   : > { %v771_v29 = vpop.eup %770  ;;  %717 = vmatprep.subr.bf16.mxu1 %v516_v26 }
 0x117   : > { %v773_v31 = vpop.eup %772  ;;  %718 = vmatpush3.bf16.msra.mxu1 %v516_v26  ;;  %v510_v33 = vmul.f32 %v771_v29, %v502_v27 }
 0x118   : > { %v775_v34 = vpop.eup %774  ;;  %719 = vmatprep.subr.bf16.mxu1 %v517_v25  ;;  %v508_v35 = vmul.f32 %v773_v31, %v500_v28 }
 0x119   : > { %v777_v36 = vpop.eup %776  ;;  %v511_v37 = vmul.f32 %v775_v34, %v503_v30 }
 0x11a   : > { %v509_v38 = vmul.f32 %v777_v36, %v501_v32 }
 0x11b   : > { %720 = vmatpush3.bf16.msra.mxu1 %v517_v25  ;;  %v519_v39 = vpack.c.bf16 %v511_v37, %v510_v33 }
 0x11c   : > { %v518_v40 = vpack.c.bf16 %v509_v38, %v508_v35 }
 0x11e   : > { %721 = vmatprep.subr.bf16.mxu1 %v518_v40 }
 0x11f   : > { %722 = vmatpush3.bf16.msra.mxu1 %v518_v40 }
 0x120   : > { %723 = vmatprep.subr.bf16.mxu1 %v519_v39 }
 0x123   : > { %724 = vmatpush3.bf16.msra.mxu1 %v519_v39 }
 0x126   : > { %726 = vmatmul.mubr.msk.bf16.vlgmr.msra.gmra.mrb[0].mxu1 %vm530_vm5, %v745_v41 }
 0x1f9   : > { %v727_v42 = vpop.f32.mrb[0].mxu1 }
 0x1fa   : > { %588 = vst [vmem:[%s272_s17 + $0x10] sm:$0xff] %v727_v42  ;;  %v571_v43 = vpop.f32.mrb[1].mxu1 }
 0x1fb   : > { %586 = vst [vmem:[%s272_s17] sm:$0xff] %v571_v43  ;;  %v728_v44 = vpop.f32.mrb[2].mxu1 }
 0x1fc   : > { %589 = vst [vmem:[%s272_s17 + $0x18] sm:$0xff] %v728_v44  ;;  %v574_v45 = vpop.f32.mrb[3].mxu1 }
 0x1fd   : > { %587 = vst [vmem:[%s272_s17 + $0x8] sm:$0xff] %v574_v45 }
 0x1fe PF: > { %s17_s23 = sadd.s32 1, %s784_s23  }
 0x1ff   : > { %p14_p4 = scmp.ge.s32.totalorder %s17_s23, 4  }
 0x201   :  { %16 = sbr.rel (!%p14_p4) target bundleno = 2 (0x2), region = 77 }

// kernel: _lambda_.10
= control target key start
LH: loop header
LB: loop body
LE: loop exit
PB: predicated region body
PF: predicated region fallthrough
CT: control target
= control target key end

     0   :  { %s8512_s0 = inlined_call_operand.vmem [shape: f32[2,32,128], index: 0, kind: input, shape index: {}]   ;;  %s8513_s1 = inlined_call_operand.vmem [shape: f32[8], index: 1, kind: input, shape index: {}, may-alias: {1,2}]   ;;  %s8514_s2 = inlined_call_operand.vmem [shape: f32[8], index: 2, kind: input, shape index: {}, may-alias: {1,2}]   ;;  %s8515_s3 = inlined_call_operand.vmem [shape: bf16[8,128,32], index: 3, kind: input, shape index: {}]   ;;  %s8516_s4 = inlined_call_operand.vmem [shape: f32[8,128,1], index: 4, kind: input, shape index: {}]   ;;  %s8517_s5 = inlined_call_operand.vmem [shape: f32[8,128,1], index: 5, kind: input, shape index: {}, may-alias: {5,9}]   ;;  %s8518_s6 = inlined_call_operand.vmem [shape: f32[8,128,1], index: 6, kind: input, shape index: {}, may-alias: {6,10}]   ;;  %s8519_s7 = inlined_call_operand.vmem [shape: f32[8,128,3], index: 7, kind: input, shape index: {}]   ;;  %s8520_s8 = inlined_call_operand.vmem [shape: f32[8,128,1], index: 8, kind: input, shape index: {}]   ;;  %s8521_s9 = inlined_call_operand.vmem [shape: f32[8,128,1], index: 9, kind: input, shape index: {}, may-alias: {5,9}]   ;;  %s8522_s10 = inlined_call_operand.vmem [shape: f32[8,128,1], index: 10, kind: input, shape index: {}, may-alias: {6,10}]   ;;  %s8523_s11 = inlined_call_operand.vmem [shape: bf16[8,64,128], index: 11, kind: input, shape index: {}]   ;;  %s8524_s12 = inlined_call_operand.vmem [shape: f32[8,64,1], index: 12, kind: input, shape index: {}]   ;;  %s8525_s13 = inlined_call_operand.hbm [shape: f32[2,32,128], index: 13, kind: output, shape index: {0}]   ;;  %s8526_s14 = inlined_call_operand.vmem [shape: f32[2,32,128], index: 14, kind: output, shape index: {1}]  }
   0x1   :  { %8640 = sst [smem:[#allocation87_spill]] %s8512_s0 }
   0x2   :  { %8641 = sst [smem:[#allocation88_spill]] %s8513_s1 }
   0x3   :  { %8642 = sst [smem:[#allocation89_spill]] %s8514_s2 }
   0x4   :  { %8643 = sst [smem:[#allocation90_spill]] %s8515_s3 }
   0x5   :  { %20 = vsyncpa [#allocation4], 0 }
   0x6   :  { %21 = vsyncpa [#allocation6], 0 }
   0x7   :  { %22 = vsyncpa [#allocation3], 0 }
   0x8   :  { %24 = vsyncpa [#allocation3 + $0x1], 0  ;;  %s5906_s29 = smov 0   ;;  %s5908_s30 = smov 0  }
   0x9   :  { %s5910_s15 = smov 0   ;;  %s5912_s16 = smov 0  }
   0xa   :  { %s5914_s17 = smov 0   ;;  %s5916_s18 = smov 0  }
   0xb   :  { %s5918_s19 = smov 0   ;;  %s5920_s20 = smov 0  }
   0xc LB: > { %8644 = sst [smem:[#allocation11_spill]] %s5388_s29  ;;  %s3833_s21 = sadd.s32 4294967295, %s5416_s20   ;;  %s5416_s20 = sphi %s5920_s20, %s30_s20   ;;  %s5412_s19 = sphi %s5918_s19, %s8923_s19   ;;  %s5408_s18 = sphi %s5916_s18, %s8922_s18   ;;  %s5404_s17 = sphi %s5914_s17, %s8921_s17   ;;  %s5400_s16 = sphi %s5912_s16, %s8920_s16   ;;  %s5396_s15 = sphi %s5910_s15, %s8919_s15   ;;  %s5392_s30 = sphi %s5908_s30, %s8925_s30   ;;  %s5388_s29 = sphi %s5906_s29, %s8924_s29  }
   0xd   : > { %8645 = sst [smem:[#allocation12_spill]] %s5396_s15  ;;  %s3834_s22 = sadd.s32 4294967294, %s5416_s20  }
   0xe   : > { %8646 = sst [smem:[#allocation13_spill]] %s5408_s18  ;;  %s39_s23 = sadd.s32 1, %s5408_s18 }
   0xf   : > { %8647 = sst [smem:[#allocation14_spill]] %s5412_s19  ;;  %s42_s24 = sadd.s32 1, %s5412_s19 }
  0x10   : > { %8648 = sst [smem:[#allocation15_spill]] %s5416_s20  ;;  %p40_p0 = scmp.ge.s32.totalorder %s39_s23, 8 }
  0x11   : > { %s327_s25 = sadd.s32 1, %s5396_s15  ;;  %p337_p1 = scmp.ne.s32.totalorder %s5396_s15, %s5392_s30 }
  0x12   : > { %p338_p2 = scmp.eq.s32.totalorder %s3833_s21, 15  ;;  %s8927_s23 = smov (%p40_p0, %s39_s23), 0 }
  0x13   : > { %8649 = sst [smem:[#allocation16_spill]] %s8927_s23  ;;  %s8929_s24 = smov (!%p40_p0, %s42_s24), %s5412_s19 }
  0x14   : > { %p5956_p3 = por %p338_p2, %p337_p1  ;;  %p343_p4 = scmp.ne.s32.totalorder %s5392_s30, %s5388_s29 }
  0x15   : > { %p44_p5 = scmp.ge.s32.totalorder %s8929_s24, 2  ;;  %p344_p6 = scmp.eq.s32.totalorder %s3834_s22, 15 }
  0x16   : > { %s8650_s26 = scalar_select %p5956_p3, 1, 0 }
  0x17   : > { %p3835_p7 = scmp.ge.s32.totalorder %s5416_s20, 1  ;;  %p377_p8 = scmp.lt.s32.totalorder %s5416_s20, 17 }
  0x18   : > { %8651 = sst [smem:[#allocation17_spill]] %s8650_s26  ;;  %s8931_s24 = smov (%p44_p5, %s8929_s24), 0 }
  0x19   : > { %8652 = sst [smem:[#allocation18_spill]] %s8931_s24  ;;  %p5966_p9 = por %p344_p6, %p343_p4 }
  0x1a   : > { %p5970_p10 = pnand %p3835_p7, %p377_p8  ;;  %s324_s23 = ssub.s32 %s5412_s19, %s8931_s24 }
  0x1b   : > { %s8653_s27 = scalar_select %p5966_p9, 1, 0 }
  0x1c   : > { %s8655_s28 = scalar_select %p5970_p10, 1, 0 }
  0x1d   : > { %8654 = sst [smem:[#allocation19_spill]] %s8653_s27  ;;  %p325_p11 = scmp.eq.s32.totalorder %s324_s23, 0 }
  0x1e   : > { %p3980_p12 = pneg %p5970_p10  ;;  %p5978_p13 = scmp.eq.s32.totalorder %s3833_s21, 0 }
  0x1f   : > { %s8657_s1 = sld [smem:[#allocation88_spill]]  ;;  %s8660_s2 = sld [smem:[#allocation89_spill]] }
  0x20   : > { %s8656_s22 = scalar_select %p5978_p13, 1, 0 }
  0x21   : > { %s5986_s26 = scalar_select %p325_p11, %s5396_s15, %s327_s25  }
  0x22   : > { %p5990_p0 = pnand %p5978_p13, %p3980_p12 }
  0x23   : > { %8658 = sst [smem:[#allocation20_spill]] %s5986_s26 }
  0x24   : > { %p4902_p2 = pneg %p5990_p0 }
  0x25   : > { %s390_s20 = sshll.u32 %s8657_s1, 4  ;;  %s401_s21 = sshll.u32 %s8660_s2, 4  ;;  %s391_s20 = int_to_ptr.vmem [resolvable:$true] %s390_s20  ;;  %s402_s21 = int_to_ptr.vmem [resolvable:$true] %s401_s21 }
  0x26   : > { %s4900_s19 = scalar_lea.vmem %s391_s20, 16  ;;  %p4908_p6 = scmp.lt.s32.totalorder %s391_s20, %s391_s20 }
  0x27   : > { %p4901_p1 = scmp.ne.s32.totalorder %s391_s20, %s4900_s19  ;;  %p4909_p7 = scmp.lt.s32.totalorder %s4900_s19, %s4900_s19 }
  0x29   : > { %p4903_p4 = pnand %p4902_p2, %p4901_p1  ;;  %p4910_p8 = por %p4909_p7, %p4908_p6 }
  0x2b   : > { %p4904_p5 = pneg %p4903_p4 }
  0x2d   : > { %p4911_p11 = pnand %p4910_p8, %p4904_p5 }
  0x2f   : > { %4914 = shalt.err (!%p4911_p11)
}
  0x30   : > { %s5802_s29 = smov [#allocation2]   ;;  %s4915_s18 = scalar_lea.vmem %s402_s21, 16 }
  0x31   : > { %3983 = dma.vmem_to_smem (!%p5990_p0), %s391_s20, 16, %s5802_s29, [#allocation4]  }
  0x32   : > { %p4916_p12 = scmp.ne.s32.totalorder %s402_s21, %s4915_s18  ;;  %p4923_p13 = scmp.lt.s32.totalorder %s402_s21, %s402_s21 }
  0x33   : > { %p4924_p10 = scmp.lt.s32.totalorder %s4915_s18, %s4915_s18 }
  0x34   : > { %p4918_p9 = pnand %p4916_p12, %p4902_p2 }
  0x35   : > { %p4925_p1 = por %p4924_p10, %p4923_p13 }
  0x36   : > { %p4919_p3 = pneg %p4918_p9 }
  0x38   : > { %p4926_p4 = pnand %p4925_p1, %p4919_p3 }
  0x3a   : > { %4929 = shalt.err (!%p4926_p4)
}
  0x3b   : > { %s5803_s24 = smov [#allocation5]   ;;  %p8661_p5 = scmp.ne.s32.totalorder %s8655_s28, 0 }
  0x3c   : > { %3986 = dma.vmem_to_smem (!%p5990_p0), %s402_s21, 16, %s5803_s24, [#allocation6]  }
  0x3d   : > { %452 = sbr.rel (%p8661_p5) target bundleno = 2892 (0xb4c), region = 72 }
  0x44   : > { %p8662_p6 = scmp.ne.s32.totalorder %s8656_s22, 0 }
  0x46   : > { %5375 = dma.done.wait (%p8662_p6), [#allocation4], 16  }
  0x47   : > { %5377 = vsyncadd (%p8662_p6), [#allocation4], 4294967280 }
  0x48   : > { %5379 = dma.done.wait (%p8662_p6), [#allocation6], 16  }
  0x49   : > { %5381 = vsyncadd (%p8662_p6), [#allocation6], 4294967280 }
  0x4a   : > { %462 = sfence }
  0x4b   : > { %s8541_s19 = sand.u32 1, %s5392_s30   ;;  %p508_p3 = scmp.lt.s32.totalorder %s5404_s17, 1 }
  0x4c   : > { %s3842_s20 = sshll.u32 %s8541_s19, 5  ;;  %s520_s25 = ssub.s32 0, %s5400_s16 }
  0x4d   : > { %s509_s27 = scalar_select %p508_p3, %s5404_s17, 1 }
  0x4e   : > { %p519_p9 = scmp.lt.s32.totalorder %s5400_s16, 0  ;;  %s3847_s28 = smin.u32 %s5400_s16, %s520_s25 }
  0x4f   : > { %s3887_s23 = sshll.u32 %s509_s27, 5  ;;  %s522_s21 = sand.u32 3, %s3847_s28  }
  0x50   : > { %s8663_s0 = sld [smem:[#allocation87_spill]]  ;;  %s6027_s2 = scalar_lea.vmem %s8526_s14, %s3887_s23 }
  0x51   : > { %s523_s26 = ssub.s32 0, %s522_s21  ;;  %s6031_s19 = scalar_lea.vmem [#allocation7], %s3842_s20 }
  0x52   : > { %s8933_s26 = smov (!%p519_p9, %s523_s26), %s522_s21  ;;  %p3850_p13 = scmp.ne.s32.totalorder %s5400_s16, 0 }
  0x53   : > { %p3849_p10 = scmp.lt.s32.totalorder %s8933_s26, 0  ;;  %s529_s15 = sadd.s32 4, %s8933_s26  ;;  %v5804_v4 = vmov (!%p3850_p13), 0.0  }
  0x54   : > { %534 = sbr.rel (%p3850_p13) target bundleno = 91 (0x5b), region = 84  ;;  %543 = vst [vmem:[%s6027_s2] sm:$0xff] (!%p3850_p13), %v5804_v4  ;;  %544 = vst [vmem:[%s6027_s2 + $0x8] sm:$0xff] (!%p3850_p13), %v5804_v4 }
  0x55   : > { %s8935_s15 = smov (!%p3849_p10, %s529_s15), %s8933_s26  ;;  %545 = vst [vmem:[%s6027_s2 + $0x10] sm:$0xff] (!%p3850_p13), %v5804_v4  ;;  %546 = vst [vmem:[%s6027_s2 + $0x18] sm:$0xff] (!%p3850_p13), %v5804_v4 }
  0x56   : > { %s512_s18 = scalar_lea.vmem %s8663_s0, %s3887_s23 }
  0x57   : > { %v535_v0 = vld [vmem:[%s512_s18] sm:$0xff] (!%p3850_p13)  ;;  %v536_v1 = vld [vmem:[%s512_s18 + $0x8] sm:$0xff] (!%p3850_p13)  ;;  %v537_v2 = vld [vmem:[%s512_s18 + $0x10] sm:$0xff] (!%p3850_p13) }
  0x58   : > { %539 = vst [vmem:[%s6031_s19] sm:$0xff] (!%p3850_p13), %v535_v0  ;;  %540 = vst [vmem:[%s6031_s19 + $0x8] sm:$0xff] (!%p3850_p13), %v536_v1  ;;  %v538_v3 = vld [vmem:[%s512_s18 + $0x18] sm:$0xff] (!%p3850_p13) }
  0x59   : > { %541 = vst [vmem:[%s6031_s19 + $0x10] sm:$0xff] (!%p3850_p13), %v537_v2  ;;  %542 = vst [vmem:[%s6031_s19 + $0x18] sm:$0xff] (!%p3850_p13), %v538_v3 }
  0x5b PF: > { %s8542_s1 = sshll.u32 %s5400_s16, 6  ;;  %s8668_s3 = sld [smem:[#allocation90_spill]]  ;;  %vm715_vm0 = vcmask 261120   ;;  %v8543_v10 = vmov 0   ;;  %v547_v56 = vlaneseq }
  0x5c   : > { %4856 = vset.pattern.permute.xlu0 %v8543_v10  ;;  %4857 = vset.pattern.permute.xlu1 %v8543_v10  ;;  %s6071_s27 = sshll.u32 %s5400_s16, 7  ;;  %s853_s24 = sld [smem:[#allocation2 + %s5400_s16]] }
  0x5d   : > { %s6078_s21 = scalar_lea.vmem %s8516_s4, %s6071_s27  ;;  %s1257_s18 = scalar_lea.vmem %s8519_s7, %s6071_s27  ;;  %v6146_v59 = vand.u32 127, %v547_v56 }
  0x5e   : > { %v579_v15 = vld [vmem:[%s6078_s21] sm:$0xff]  ;;  %v6088_v17 = vld [vmem:[%s1257_s18 + $0x8] sm:$0xff]  ;;  %v6091_v18 = vld [vmem:[%s1257_s18 + $0x10] sm:$0xff]  ;;  %p1274_p0 = scmp.lt.s32.totalorder %s8935_s15, 2  ;;  %p3871_p2 = scmp.ge.s32.totalorder %s8935_s15, 2 }
  0x5f   : > { %v6043_v5 = vld [vmem:[%s6031_s19] sm:$0xff]  ;;  %v6046_v6 = vld [vmem:[%s6031_s19 + $0x8] sm:$0xff]  ;;  %8670 = vst [vmem:[#allocation26_spill] sm:$0xff] %v6088_v17  ;;  %8671 = vst [vmem:[#allocation27_spill] sm:$0xff] %v6091_v18  ;;  %597 = vperm.xlu0 %4856, %v579_v15   ;;  %vm549_vm1 = vcmp.lt.s32.totalorder %v6146_v59, 34  ;;  %p1278_p7 = scmp.lt.s32.totalorder (!%p3871_p2), %s8935_s15, 1 }
  0x60   : > { %8664 = vst [vmem:[#allocation21_spill] sm:$0xff] %v6043_v5  ;;  %8665 = vst [vmem:[#allocation22_spill] sm:$0xff] %v6046_v6  ;;  %v6049_v7 = vld [vmem:[%s6031_s19 + $0x10] sm:$0xff]  ;;  %v575_v8 = vpack.c.bf16 %v6046_v6, %v6043_v5  ;;  %v6055_v9 = vld [vmem:[%s6031_s19 + $0x18] sm:$0xff]  ;;  %p3872_p8 = scmp.ge.s32.totalorder (!%p3871_p2), %s8935_s15, 1 }
  0x61   : > { %8666 = vst [vmem:[#allocation23_spill] sm:$0xff] %v6049_v7  ;;  %8667 = vst [vmem:[#allocation24_spill] sm:$0xff] %v6055_v9  ;;  %s6062_s25 = scalar_lea.vmem %s8668_s3, %s8542_s1  ;;  %v576_v11 = vpack.c.bf16 %v6055_v9, %v6049_v7  ;;  %v6086_v16 = vld [vmem:[%s1257_s18] sm:$0xff]  ;;  %v6093_v19 = vld [vmem:[%s1257_s18 + $0x18] sm:$0xff]  ;;  %s6281_s3 = scalar_lea.vmem %s8517_s5, %s6071_s27 }
  0x62   : > { %v4858_v12 = vld [vmem:[%s6062_s25] sm:$0xff]   ;;  %3914 = vmatprep.subr.bf16.mxu0 %v575_v8  ;;  %v4859_v13 = vld [vmem:[%s6062_s25 + $0x8] sm:$0xff]   ;;  %v4860_v14 = vld [vmem:[%s6062_s25 + $0x10] sm:$0xff]   ;;  %8669 = vst [vmem:[#allocation25_spill] sm:$0xff] %v6086_v16  ;;  %v6148_v61 = vstv %s853_s24  ;;  %s5807_s24 = smov 0.0  }
  0x63   : > { %3915 = vmatpush3.bf16.msra.mxu0 %v575_v8  ;;  %3918 = vmatprep.mubr.msk.bf16.mxu0 %vm715_vm0, %v4858_v12  ;;  %8672 = vst [vmem:[#allocation28_spill] sm:$0xff] %v6093_v19  ;;  %v6095_v20 = vld [vmem:[%s1257_s18 + $0x20] sm:$0xff]  ;;  %v6098_v21 = vld [vmem:[%s1257_s18 + $0x28] sm:$0xff]  ;;  %v6100_v22 = vld [vmem:[%s1257_s18 + $0x30] sm:$0xff]  ;;  %v5806_v12 = vmov 0.0  }
  0x64   : > { %3916 = vmatprep.subr.bf16.mxu0 %v576_v11  ;;  %8673 = vst [vmem:[#allocation29_spill] sm:$0xff] %v6095_v20  ;;  %8674 = vst [vmem:[#allocation30_spill] sm:$0xff] %v6098_v21  ;;  %v6102_v23 = vld [vmem:[%s1257_s18 + $0x38] sm:$0xff]  ;;  %v6105_v25 = vld [vmem:[%s1257_s18 + $0x40] sm:$0xff] }
  0x65   : > { %8675 = vst [vmem:[#allocation31_spill] sm:$0xff] %v6100_v22  ;;  %8676 = vst [vmem:[#allocation32_spill] sm:$0xff] %v6102_v23  ;;  %v4861_v24 = vld [vmem:[%s6062_s25 + $0x18] sm:$0xff]   ;;  %v6107_v26 = vld [vmem:[%s1257_s18 + $0x48] sm:$0xff] }
  0x66   : > { %8677 = vst [vmem:[#allocation33_spill] sm:$0xff] %v6105_v25  ;;  %8678 = vst [vmem:[#allocation34_spill] sm:$0xff] %v6107_v26  ;;  %v6109_v27 = vld [vmem:[%s1257_s18 + $0x50] sm:$0xff]  ;;  %v6111_v28 = vld [vmem:[%s1257_s18 + $0x58] sm:$0xff] }
  0x67   : > { %3917 = vmatpush3.bf16.msra.mxu0 %v576_v11  ;;  %8679 = vst [vmem:[#allocation35_spill] sm:$0xff] %v6109_v27  ;;  %8680 = vst [vmem:[#allocation36_spill] sm:$0xff] %v6111_v28  ;;  %v6113_v29 = vld [vmem:[%s1257_s18 + $0x60] sm:$0xff]  ;;  %v6115_v30 = vld [vmem:[%s1257_s18 + $0x68] sm:$0xff] }
  0x68   : > { %8681 = vst [vmem:[#allocation37_spill] sm:$0xff] %v6113_v29  ;;  %8682 = vst [vmem:[#allocation38_spill] sm:$0xff] %v6115_v30  ;;  %v6117_v31 = vld [vmem:[%s1257_s18 + $0x70] sm:$0xff]  ;;  %v6119_v32 = vld [vmem:[%s1257_s18 + $0x78] sm:$0xff] }
  0x69   : > { %8683 = vst [vmem:[#allocation39_spill] sm:$0xff] %v6117_v31  ;;  %8684 = vst [vmem:[#allocation40_spill] sm:$0xff] %v6119_v32  ;;  %v581_v33 = vld [vmem:[%s6078_s21 + $0x10] sm:$0xff]  ;;  %v4862_v34 = vld [vmem:[%s6062_s25 + $0x20] sm:$0xff]  }
  0x6a   : > { %3919 = vmatmul.mubr.msk.bf16.vlgmr.msra.gmra.mrb[0].mxu0 %vm715_vm0, %v4859_v13  ;;  %607 = vperm.xlu1 %4857, %v581_v33   ;;  %v580_v35 = vld [vmem:[%s6078_s21 + $0x8] sm:$0xff]  ;;  %v582_v36 = vld [vmem:[%s6078_s21 + $0x18] sm:$0xff]  ;;  %v583_v37 = vld [vmem:[%s6078_s21 + $0x20] sm:$0xff]  ;;  %v6152_v13 = vsel %vm549_vm1, 1.0, %v5806_v12 }
  0x6b   : > { %3922 = vmatprep.mubr.msk.bf16.mxu0 %vm715_vm0, %v4860_v14  ;;  %602 = vperm.xlu0 %4856, %v580_v35   ;;  %v584_v38 = vld [vmem:[%s6078_s21 + $0x28] sm:$0xff]  ;;  %v585_v39 = vld [vmem:[%s6078_s21 + $0x30] sm:$0xff]  ;;  %v586_v42 = vld [vmem:[%s6078_s21 + $0x38] sm:$0xff]  ;;  %8685 = vst [vmem:[#allocation41_spill] sm:$0xff] %v6152_v13 }
  0x6c   : > { %v4863_v40 = vld [vmem:[%s6062_s25 + $0x28] sm:$0xff]   ;;  %v4864_v41 = vld [vmem:[%s6062_s25 + $0x30] sm:$0xff]   ;;  %v587_v43 = vld [vmem:[%s6078_s21 + $0x40] sm:$0xff] }
  0x6d   : > { %v588_v44 = vld [vmem:[%s6078_s21 + $0x48] sm:$0xff]  ;;  %v589_v45 = vld [vmem:[%s6078_s21 + $0x50] sm:$0xff]  ;;  %v4865_v46 = vld [vmem:[%s6062_s25 + $0x38] sm:$0xff]   ;;  %s6256_s25 = scalar_lea.vmem %s8518_s6, %s6071_s27 }
  0x6e   : > { %612 = vperm.xlu1 %4857, %v582_v36   ;;  %v590_v47 = vld [vmem:[%s6078_s21 + $0x58] sm:$0xff]  ;;  %v591_v48 = vld [vmem:[%s6078_s21 + $0x60] sm:$0xff]  ;;  %v592_v49 = vld [vmem:[%s6078_s21 + $0x68] sm:$0xff] }
  0x6f   : > { %617 = vperm.xlu0 %4856, %v583_v37   ;;  %v593_v50 = vld [vmem:[%s6078_s21 + $0x70] sm:$0xff]  ;;  %v594_v51 = vld [vmem:[%s6078_s21 + $0x78] sm:$0xff] }
  0x72   : > { %3923 = vmatmul.mubr.msk.bf16.gmra.mrb[4].mxu0 %vm715_vm0, %v4861_v24  ;;  %622 = vperm.xlu1 %4857, %v584_v38  }
  0x73   : > { %3926 = vmatprep.mubr.msk.bf16.mxu0 %vm715_vm0, %v4862_v34  ;;  %627 = vperm.xlu0 %4856, %v585_v39  }
  0x76   : > { %632 = vperm.xlu1 %4857, %v586_v42  }
  0x77   : > { %637 = vperm.xlu0 %4856, %v587_v43  }
  0x7a   : > { %3927 = vmatmul.mubr.msk.bf16.gmra.mrb[8].mxu0 %vm715_vm0, %v4863_v40  ;;  %642 = vperm.xlu1 %4857, %v588_v44  }
  0x7b   : > { %3930 = vmatprep.mubr.msk.bf16.mxu0 %vm715_vm0, %v4864_v41  ;;  %647 = vperm.xlu0 %4856, %v589_v45  }
  0x7e   : > { %652 = vperm.xlu1 %4857, %v590_v47  }
  0x7f   : > { %657 = vperm.xlu0 %4856, %v591_v48  }
  0x82   : > { %3931 = vmatmul.mubr.msk.bf16.gmra.mrb[12].mxu0 %vm715_vm0, %v4865_v46  ;;  %662 = vperm.xlu1 %4857, %v592_v49  }
  0x83   : > { %667 = vperm.xlu0 %4856, %v593_v50  }
  0x86   : > { %672 = vperm.xlu1 %4857, %v594_v51  }
  0xde   : > { %v598_v52 = vpop.permute.xlu0 %597 }
  0xe9   : > { %v608_v53 = vpop.permute.xlu1 %607 }
  0xea   : > { %v603_v54 = vpop.permute.xlu0 %602 }
  0xed   : > { %v613_v55 = vpop.permute.xlu1 %612 }
  0xee   : > { %v618_v57 = vpop.permute.xlu0 %617 }
  0xf1   : > { %v623_v58 = vpop.permute.xlu1 %622 }
  0xf2   : > { %v628_v62 = vpop.permute.xlu0 %627 }
  0xf5   : > { %v633_v1 = vpop.permute.xlu1 %632 }
  0xf6   : > { %v638_v36 = vpop.permute.xlu0 %637 }
  0xf9   : > { %v6160_v39 = vpop.permute.xlu1 %642 }
 0x13d   : > { %v3920_v60 = vpop.f32.mrb[0].mxu0 }
 0x13e   : > { %v783_v63 = vadd.f32 %v3920_v60, %v608_v53  ;;  %v774_v0 = vpop.f32.mrb[1].mxu0  ;;  %v648_v60 = vpop.permute.xlu0 %647 }
 0x13f   : > { %v775_v2 = vadd.f32 %v774_v0, %v598_v52  ;;  %v3921_v3 = vpop.f32.mrb[2].mxu0 }
 0x140   : > { %vm839_vm2 = vcmp.ge.f32.partialorder %v783_v63, 0.0  ;;  %v857_v4 = vmul.f32 %v6148_v61, %v783_v63  ;;  %v786_v8 = vadd.f32 %v3921_v3, %v613_v55  ;;  %v777_v11 = vpop.f32.mrb[3].mxu0 }
 0x141   : > { %vm837_vm3 = vcmp.ge.f32.partialorder %v775_v2, 0.0  ;;  %v855_v14 = vmul.f32 %v6148_v61, %v775_v2  ;;  %v778_v15 = vadd.f32 %v777_v11, %v603_v54 }
 0x142   : > { %vm840_vm4 = vcmp.ge.f32.partialorder %v786_v8, 0.0  ;;  %v858_v24 = vmul.f32 %v6148_v61, %v786_v8  ;;  %v873_v33 = vsel %vm839_vm2, %v783_v63, %v857_v4 }
 0x143   : > { %v871_v34 = vsel %vm837_vm3, %v775_v2, %v855_v14  ;;  %vm838_vm5 = vcmp.ge.f32.partialorder %v778_v15, 0.0  ;;  %v856_v35 = vmul.f32 %v6148_v61, %v778_v15  ;;  %v6163_v42 = vmul.f32 %v6152_v13, %v873_v33  ;;  %v653_v2 = vpop.permute.xlu1 %652 }
 0x144   : > { %v6158_v37 = vmul.f32 %v6152_v13, %v871_v34  ;;  %v874_v38 = vsel %vm840_vm4, %v786_v8, %v858_v24 }
 0x145   : > { %v872_v40 = vsel %vm838_vm5, %v778_v15, %v856_v35  ;;  %v3924_v41 = vpop.f32.mrb[4].mxu0  ;;  %v6166_v43 = vmul.f32 %v6152_v13, %v874_v38 }
 0x146   : > { %v6169_v44 = vmul.f32 %v6152_v13, %v872_v40  ;;  %v799_v45 = vadd.f32 %v3924_v41, %v628_v62  ;;  %v790_v46 = vpop.f32.mrb[5].mxu0  ;;  %v930_v47 = vmul.f32 %v6158_v37, %v871_v34  ;;  %v932_v62 = vmul.f32 %v6163_v42, %v873_v33 }
 0x147   : > { %v791_v48 = vadd.f32 %v790_v46, %v618_v57  ;;  %v3925_v49 = vpop.f32.mrb[6].mxu0  ;;  %v933_v57 = vmul.f32 %v6166_v43, %v874_v38 }
 0x148   : > { %v903_v50 = vadd.f32 %v6169_v44, %v6158_v37  ;;  %v931_v51 = vmul.f32 %v6169_v44, %v872_v40  ;;  %vm843_vm6 = vcmp.ge.f32.partialorder %v799_v45, 0.0  ;;  %v861_v52 = vmul.f32 %v6148_v61, %v799_v45  ;;  %v793_v53 = vpop.f32.mrb[7].mxu0 }
 0x149   : > { %vm841_vm7 = vcmp.ge.f32.partialorder %v791_v48, 0.0  ;;  %v859_v54 = vmul.f32 %v6148_v61, %v791_v48  ;;  %v802_v55 = vadd.f32 %v3925_v49, %v633_v1  ;;  %v794_v56 = vadd.f32 %v793_v53, %v623_v58  ;;  %v663_v53 = vpop.permute.xlu1 %662 }
 0x14a   : > { %v904_v63 = vadd.f32 %v903_v50, %v6163_v42  ;;  %v946_v0 = vadd.f32 %v931_v51, %v930_v47  ;;  %v877_v3 = vsel %vm843_vm6, %v799_v45, %v861_v52  ;;  %v658_v47 = vpop.permute.xlu0 %657 }
 0x14b   : > { %v875_v4 = vsel %vm841_vm7, %v791_v48, %v859_v54  ;;  %vm844_vm8 = vcmp.ge.f32.partialorder %v802_v55, 0.0  ;;  %v862_v8 = vmul.f32 %v6148_v61, %v802_v55  ;;  %vm842_vm9 = vcmp.ge.f32.partialorder %v794_v56, 0.0 }
 0x14c   : > { %v947_v11 = vadd.f32 %v946_v0, %v932_v62  ;;  %v6182_v12 = vmul.f32 %v6152_v13, %v875_v4  ;;  %v905_v58 = vadd.f32 %v904_v63, %v6166_v43  ;;  %v860_v14 = vmul.f32 %v6148_v61, %v794_v56 }
 0x14d   : > { %v878_v1 = vsel %vm844_vm8, %v802_v55, %v862_v8  ;;  %v3928_v15 = vpop.f32.mrb[8].mxu0  ;;  %v6189_v38 = vmul.f32 %v6152_v13, %v877_v3 }
 0x14e   : > { %v906_v24 = vadd.f32 %v905_v58, %v6182_v12  ;;  %v934_v33 = vmul.f32 %v6182_v12, %v875_v4  ;;  %v948_v34 = vadd.f32 %v947_v11, %v933_v57  ;;  %v806_v35 = vpop.f32.mrb[9].mxu0  ;;  %v876_v40 = vsel %vm842_vm9, %v794_v56, %v860_v14 }
 0x14f   : > { %v815_v41 = vadd.f32 %v3928_v15, %v648_v60  ;;  %v807_v45 = vadd.f32 %v806_v35, %v638_v36  ;;  %v3929_v46 = vpop.f32.mrb[10].mxu0  ;;  %v6192_v49 = vmul.f32 %v6152_v13, %v878_v1  ;;  %v6195_v50 = vmul.f32 %v6152_v13, %v876_v40  ;;  %v668_v15 = vpop.permute.xlu0 %667 }
 0x150   : > { %v949_v48 = vadd.f32 %v948_v34, %v934_v33  ;;  %v818_v51 = vadd.f32 %v3929_v46, %v653_v2  ;;  %v809_v52 = vpop.f32.mrb[11].mxu0  ;;  %v936_v62 = vmul.f32 %v6189_v38, %v877_v3  ;;  %v673_v35 = vpop.permute.xlu1 %672 }
 0x151   : > { %vm847_vm10 = vcmp.ge.f32.partialorder %v815_v41, 0.0  ;;  %v865_v54 = vmul.f32 %v6148_v61, %v815_v41  ;;  %vm845_vm11 = vcmp.ge.f32.partialorder %v807_v45, 0.0  ;;  %v863_v55 = vmul.f32 %v6148_v61, %v807_v45 }
 0x152   : > { %v907_v36 = vadd.f32 %v906_v24, %v6195_v50  ;;  %v935_v56 = vmul.f32 %v6195_v50, %v876_v40  ;;  %v866_v60 = vmul.f32 %v6148_v61, %v818_v51  ;;  %vm848_vm12 = vcmp.ge.f32.partialorder %v818_v51, 0.0 }
 0x153   : > { %v879_v57 = vsel %vm845_vm11, %v807_v45, %v863_v55  ;;  %v810_v63 = vadd.f32 %v809_v52, %v6160_v39  ;;  %v881_v4 = vsel %vm847_vm10, %v815_v41, %v865_v54  ;;  %v937_v11 = vmul.f32 %v6192_v49, %v878_v1 }
 0x154   : > { %v908_v0 = vadd.f32 %v907_v36, %v6189_v38  ;;  %v950_v2 = vadd.f32 %v949_v48, %v935_v56  ;;  %v6206_v8 = vmul.f32 %v6152_v13, %v879_v57  ;;  %v882_v39 = vsel %vm848_vm12, %v818_v51, %v866_v60 }
 0x155   : > { %vm846_vm13 = vcmp.ge.f32.partialorder %v810_v63, 0.0  ;;  %v864_v58 = vmul.f32 %v6148_v61, %v810_v63  ;;  %v3932_v14 = vpop.f32.mrb[12].mxu0  ;;  %v6213_v40 = vmul.f32 %v6152_v13, %v881_v4  ;;  %v6220_v56 = vmul.f32 %v6152_v13, %v882_v39 }
 0x156   : > { %v951_v24 = vadd.f32 %v950_v2, %v936_v62  ;;  %v909_v3 = vadd.f32 %v908_v0, %v6192_v49  ;;  %v938_v33 = vmul.f32 %v6206_v8, %v879_v57  ;;  %v822_v34 = vpop.f32.mrb[13].mxu0  ;;  %v831_v45 = vadd.f32 %v3932_v14, %v668_v15 }
 0x157   : > { %v880_v41 = vsel %vm846_vm13, %v810_v63, %v864_v58  ;;  %v823_v46 = vadd.f32 %v822_v34, %v658_v47  ;;  %v3933_v1 = vpop.f32.mrb[14].mxu0  ;;  %v940_v63 = vmul.f32 %v6213_v40, %v881_v4 }
 0x158   : > { %v910_v48 = vadd.f32 %v909_v3, %v6206_v8  ;;  %v952_v52 = vadd.f32 %v951_v24, %v937_v11  ;;  %v6217_v54 = vmul.f32 %v6152_v13, %v880_v41  ;;  %v834_v55 = vadd.f32 %v3933_v1, %v673_v35  ;;  %v825_v36 = vpop.f32.mrb[15].mxu0 }
 0x159   : > { %vm851_vm14 = vcmp.ge.f32.partialorder %v831_v45, 0.0  ;;  %v869_v51 = vmul.f32 %v6148_v61, %v831_v45  ;;  %vm849_vm15 = vcmp.ge.f32.partialorder %v823_v46, 0.0  ;;  %v867_v57 = vmul.f32 %v6148_v61, %v823_v46 }
 0x15a   : > { %v953_v60 = vadd.f32 %v952_v52, %v938_v33  ;;  %v911_v62 = vadd.f32 %v910_v48, %v6217_v54  ;;  %v939_v47 = vmul.f32 %v6217_v54, %v880_v41  ;;  %v870_v0 = vmul.f32 %v6148_v61, %v834_v55 }
 0x15b   : > { %v826_v2 = vadd.f32 %v825_v36, %v663_v53  ;;  %v883_v58 = vsel %vm849_vm15, %v823_v46, %v867_v57  ;;  %vm852_vm0 = vcmp.ge.f32.partialorder %v834_v55, 0.0  ;;  %v885_v15 = vsel %vm851_vm14, %v831_v45, %v869_v51 }
 0x15c   : > { %v954_v11 = vadd.f32 %v953_v60, %v939_v47  ;;  %v912_v14 = vadd.f32 %v911_v62, %v6213_v40  ;;  %v6230_v24 = vmul.f32 %v6152_v13, %v883_v58  ;;  %v941_v33 = vmul.f32 %v6220_v56, %v882_v39 }
 0x15d   : > { %vm850_vm1 = vcmp.ge.f32.partialorder %v826_v2, 0.0  ;;  %v868_v3 = vmul.f32 %v6148_v61, %v826_v2  ;;  %v886_v53 = vsel %vm852_vm0, %v834_v55, %v870_v0  ;;  %v6237_v46 = vmul.f32 %v6152_v13, %v885_v15  ;;  %v1130_v0 = vld [vmem:[%s6256_s25 + $0x8] sm:$0xff] }
 0x15e   : > { %v955_v34 = vadd.f32 %v954_v11, %v940_v63  ;;  %v913_v4 = vadd.f32 %v912_v14, %v6220_v56  ;;  %v942_v35 = vmul.f32 %v6230_v24, %v883_v58  ;;  %v6245_v39 = vmul.f32 %v6152_v13, %v886_v53  ;;  %v1132_v11 = vld [vmem:[%s6256_s25 + $0x18] sm:$0xff]  ;;  %v1131_v58 = vld [vmem:[%s6256_s25 + $0x10] sm:$0xff]  ;;  %v1134_v14 = vld [vmem:[%s6256_s25 + $0x28] sm:$0xff] }
 0x15f   : > { %v884_v41 = vsel %vm850_vm1, %v826_v2, %v868_v3  ;;  %v944_v51 = vmul.f32 %v6237_v46, %v885_v15  ;;  %v1129_v2 = vld [vmem:[%s6256_s25] sm:$0xff]  ;;  %v1136_v3 = vld [vmem:[%s6256_s25 + $0x38] sm:$0xff] }
 0x160   : > { %v6240_v45 = vmul.f32 %v6152_v13, %v884_v41  ;;  %v914_v1 = vadd.f32 %v913_v4, %v6230_v24  ;;  %v956_v48 = vadd.f32 %v955_v34, %v941_v33  ;;  %v945_v47 = vmul.f32 %v6245_v39, %v886_v53  ;;  %v1133_v15 = vld [vmem:[%s6256_s25 + $0x20] sm:$0xff]  ;;  %v1135_v33 = vld [vmem:[%s6256_s25 + $0x30] sm:$0xff]  ;;  %v1138_v34 = vld [vmem:[%s6256_s25 + $0x48] sm:$0xff] }
 0x161   : > { %v1137_v4 = vld [vmem:[%s6256_s25 + $0x40] sm:$0xff]  ;;  %v1139_v53 = vld [vmem:[%s6256_s25 + $0x50] sm:$0xff] }
 0x162   : > { %v943_v61 = vmul.f32 %v6240_v45, %v884_v41  ;;  %v915_v52 = vadd.f32 %v914_v1, %v6240_v45  ;;  %v957_v36 = vadd.f32 %v956_v48, %v942_v35  ;;  %v1140_v35 = vld [vmem:[%s6256_s25 + $0x58] sm:$0xff]  ;;  %v1142_v41 = vld [vmem:[%s6256_s25 + $0x68] sm:$0xff]  ;;  %v1141_v1 = vld [vmem:[%s6256_s25 + $0x60] sm:$0xff] }
 0x164   : > { %v916_v55 = vadd.f32 %v915_v52, %v6237_v46  ;;  %v958_v60 = vadd.f32 %v957_v36, %v943_v61 }
 0x166   : > { %v917_v62 = vadd.f32 %v916_v55, %v6245_v39  ;;  %v959_v57 = vadd.f32 %v958_v60, %v944_v51 }
 0x168   : > { %918 = vadd.xlane.f32.xlu0 %v917_v62  ;;  %v960_v63 = vadd.f32 %v959_v57, %v945_v47 }
 0x16a   : > { %961 = vadd.xlane.f32.xlu1 %v960_v63 }
 0x17b   : > { %1152 = vperm.xlu1 %4857, %v1130_v0  }
 0x17e   : > { %1147 = vperm.xlu0 %4856, %v1129_v2  }
 0x17f   : > { %1162 = vperm.xlu1 %4857, %v1132_v11  }
 0x182   : > { %1157 = vperm.xlu0 %4856, %v1131_v58  }
 0x183   : > { %1172 = vperm.xlu1 %4857, %v1134_v14  }
 0x186   : > { %1167 = vperm.xlu0 %4856, %v1133_v15   ;;  %v1000_v15 = vld [vmem:[%s6281_s3 + $0x8] sm:$0xff] }
 0x187   : > { %1182 = vperm.xlu1 %4857, %v1136_v3   ;;  %v999_v3 = vld [vmem:[%s6281_s3] sm:$0xff] }
 0x18a   : > { %1177 = vperm.xlu0 %4856, %v1135_v33  }
 0x18b   : > { %1192 = vperm.xlu1 %4857, %v1138_v34  }
 0x18e   : > { %1187 = vperm.xlu0 %4856, %v1137_v4  }
 0x18f   : > { %1202 = vperm.xlu1 %4857, %v1140_v35   ;;  %v1002_v35 = vld [vmem:[%s6281_s3 + $0x18] sm:$0xff] }
 0x192   : > { %1197 = vperm.xlu0 %4856, %v1139_v53   ;;  %v1001_v53 = vld [vmem:[%s6281_s3 + $0x10] sm:$0xff] }
 0x193   : > { %1212 = vperm.xlu1 %4857, %v1142_v41  }
 0x196   : > { %1207 = vperm.xlu0 %4856, %v1141_v1  }
 0x1f5   : > { %v919_v48 = vpop.xlane.xlu0 %918 }
 0x1f6   : > { %v920_v61 = vrot.slane %v919_v48, 4 }
 0x1f7   : > { %v962_v52 = vpop.xlane.xlu1 %961 }
 0x1f8   : > { %v921_v36 = vadd.f32 %v920_v61, %v919_v48  ;;  %v963_v55 = vrot.slane %v962_v52, 4  ;;  %v1004_v48 = vld [vmem:[%s6281_s3 + $0x28] sm:$0xff]  ;;  %v1003_v61 = vld [vmem:[%s6281_s3 + $0x20] sm:$0xff] }
 0x1fa   : > { %v922_v51 = vrot.slane %v921_v36, 2  ;;  %v964_v60 = vadd.f32 %v963_v55, %v962_v52  ;;  %v1006_v55 = vld [vmem:[%s6281_s3 + $0x38] sm:$0xff] }
 0x1fc   : > { %v965_v62 = vrot.slane %v964_v60, 2  ;;  %v923_v47 = vadd.f32 %v922_v51, %v921_v36  ;;  %v1005_v51 = vld [vmem:[%s6281_s3 + $0x30] sm:$0xff] }
 0x1fe   : > { %v924_v57 = vrot.slane %v923_v47, 1  ;;  %v966_v63 = vadd.f32 %v965_v62, %v964_v60 }
 0x200   : > { %v925_v0 = vadd.f32 %v924_v57, %v923_v47  ;;  %v967_v2 = vrot.slane %v966_v63, 1  ;;  %v1008_v47 = vld [vmem:[%s6281_s3 + $0x48] sm:$0xff]  ;;  %v1007_v57 = vld [vmem:[%s6281_s3 + $0x40] sm:$0xff] }
 0x202   : > { %3958 = vpush %v925_v0  ;;  %v968_v11 = vadd.f32 %v967_v2, %v966_v63  ;;  %v1010_v2 = vld [vmem:[%s6281_s3 + $0x58] sm:$0xff] }
 0x204   : > { %3960 = vpush %v968_v11  ;;  %v1009_v11 = vld [vmem:[%s6281_s3 + $0x50] sm:$0xff] }
 0x233   : > { %s3959_s28 = spop %3958 }
 0x234   : > { %s6272_s23 = smul.f32 0.00022977941, %s3959_s28 }
 0x235   : > { %s3961_s21 = spop %3960 }
 0x236   : > { %s973_s22 = smul.f32 %s6272_s23, %s6272_s23 }
 0x237   : > { %s972_s29 = smul.f32 0.00022977941, %s3961_s21 }
 0x239   : > { %s974_s18 = ssub.f32 %s972_s29, %s973_s22 }
 0x23b   : > { %s975_s26 = smax.f32 %s5807_s24, %s974_s18 }
 0x23c   : > { %s994_s20 = sadd.f32 1e-08, %s975_s26 }
 0x23e   : > { %v995_v58 = vstv %s994_s20 }
 0x23f   : > { %4866 = vrsqrt.f32 %v995_v58 }
 0x249   : > { %v4867_v14 = vpop.eup %4866 }
 0x24a   : > { %3962 = vpush %v4867_v14 }
 0x27b   : > { %s3963_s28 = spop %3962 }
 0x27c   : > { %v1015_v33 = vstv %s3963_s28 }
 0x27d   : > { %v1017_v34 = vmul.f32 %v1015_v33, %v1000_v15  ;;  %v1016_v4 = vmul.f32 %v1015_v33, %v999_v3  ;;  %v1019_v41 = vmul.f32 %v1015_v33, %v1002_v35  ;;  %v1018_v1 = vmul.f32 %v1015_v33, %v1001_v53  ;;  %v1012_v15 = vld [vmem:[%s6281_s3 + $0x68] sm:$0xff]  ;;  %v1011_v3 = vld [vmem:[%s6281_s3 + $0x60] sm:$0xff]  ;;  %v1014_v35 = vld [vmem:[%s6281_s3 + $0x78] sm:$0xff] }
 0x27e   : > { %v1021_v52 = vmul.f32 %v1015_v33, %v1004_v48  ;;  %v1020_v36 = vmul.f32 %v1015_v33, %v1003_v61  ;;  %v1023_v60 = vmul.f32 %v1015_v33, %v1006_v55  ;;  %v1022_v62 = vmul.f32 %v1015_v33, %v1005_v51  ;;  %v1013_v53 = vld [vmem:[%s6281_s3 + $0x70] sm:$0xff]  ;;  %v1144_v48 = vld [vmem:[%s6256_s25 + $0x78] sm:$0xff] }
 0x27f   : > { %1039 = vperm.xlu1 %4857, %v1017_v34   ;;  %1034 = vperm.xlu0 %4856, %v1016_v4   ;;  %v1025_v63 = vmul.f32 %v1015_v33, %v1008_v47  ;;  %v1024_v0 = vmul.f32 %v1015_v33, %v1007_v57  ;;  %v1027_v58 = vmul.f32 %v1015_v33, %v1010_v2  ;;  %v1143_v61 = vld [vmem:[%s6256_s25 + $0x70] sm:$0xff] }
 0x280   : > { %v1026_v14 = vmul.f32 %v1015_v33, %v1009_v11  ;;  %v1029_v34 = vmul.f32 %v1015_v33, %v1012_v15  ;;  %v1028_v4 = vmul.f32 %v1015_v33, %v1011_v3  ;;  %v976_v11 = vstv %s6272_s23 }
 0x283   : > { %1049 = vperm.xlu1 %4857, %v1019_v41   ;;  %1044 = vperm.xlu0 %4856, %v1018_v1   ;;  %v1031_v41 = vmul.f32 %v1015_v33, %v1014_v35  ;;  %v1030_v1 = vmul.f32 %v1015_v33, %v1013_v53 }
 0x287   : > { %1059 = vperm.xlu1 %4857, %v1021_v52   ;;  %1054 = vperm.xlu0 %4856, %v1020_v36   ;;  %v1153_v52 = vpop.permute.xlu1 %1152  ;;  %v1148_v36 = vpop.permute.xlu0 %1147 }
 0x288   : > { %v1226_v53 = vmul.f32 %v6152_v13, %v1153_v52 }
 0x28b   : > { %1069 = vperm.xlu1 %4857, %v1023_v60   ;;  %1064 = vperm.xlu0 %4856, %v1022_v62   ;;  %v1163_v55 = vpop.permute.xlu1 %1162  ;;  %v1158_v51 = vpop.permute.xlu0 %1157 }
 0x28c   : > { %v1228_v9 = vmul.f32 %v6152_v13, %v1163_v55  ;;  %v1227_v52 = vmul.f32 %v6152_v13, %v1158_v51 }
 0x28f   : > { %1079 = vperm.xlu1 %4857, %v1025_v63   ;;  %1074 = vperm.xlu0 %4856, %v1024_v0   ;;  %v1173_v60 = vpop.permute.xlu1 %1172  ;;  %v1168_v62 = vpop.permute.xlu0 %1167 }
 0x290   : > { %v1229_v55 = vmul.f32 %v6152_v13, %v1168_v62 }
 0x293   : > { %1089 = vperm.xlu1 %4857, %v1027_v58   ;;  %1084 = vperm.xlu0 %4856, %v1026_v14   ;;  %v1183_v47 = vpop.permute.xlu1 %1182  ;;  %v1178_v57 = vpop.permute.xlu0 %1177  ;;  %v6304_v58 = vmul.f32 %v6152_v13, %v976_v11 }
 0x295   : > { %v979_v3 = vsub.f32 %v6169_v44, %v6304_v58  ;;  %v981_v10 = vsub.f32 %v6166_v43, %v6304_v58  ;;  %v980_v44 = vsub.f32 %v6163_v42, %v6304_v58  ;;  %v982_v43 = vsub.f32 %v6182_v12, %v6304_v58 }
 0x297   : > { %1099 = vperm.xlu1 %4857, %v1029_v34   ;;  %1094 = vperm.xlu0 %4856, %v1028_v4   ;;  %v1193_v63 = vpop.permute.xlu1 %1192  ;;  %v1188_v0 = vpop.permute.xlu0 %1187  ;;  %v978_v34 = vsub.f32 %v6158_v37, %v6304_v58 }
 0x29b   : > { %1109 = vperm.xlu1 %4857, %v1031_v41   ;;  %1104 = vperm.xlu0 %4856, %v1030_v1   ;;  %v1203_v2 = vpop.permute.xlu1 %1202  ;;  %v1198_v33 = vpop.permute.xlu0 %1197  ;;  %v1225_v41 = vmul.f32 %v6152_v13, %v1148_v36 }
 0x29f   : > { %1222 = vperm.xlu1 %4857, %v1144_v48   ;;  %1217 = vperm.xlu0 %4856, %v1143_v61   ;;  %v6306_v14 = vpop.permute.xlu1 %1212  ;;  %v6308_v15 = vpop.permute.xlu0 %1207 }
 0x2fe   : > { %v1040_v4 = vpop.permute.xlu1 %1039  ;;  %v1035_v35 = vpop.permute.xlu0 %1034 }
 0x2ff   : > { %v1113_v1 = vmul.f32 %v1040_v4, %v979_v3  ;;  %v1112_v48 = vmul.f32 %v1035_v35, %v978_v34  ;;  %v983_v4 = vsub.f32 %v6195_v50, %v6304_v58 }
 0x301   : > { %v6316_v61 = vadd.f32 %v1226_v53, %v1113_v1  ;;  %v6318_v11 = vadd.f32 %v1225_v41, %v1112_v48  ;;  %v1230_v53 = vmul.f32 %v6152_v13, %v1173_v60  ;;  %v1232_v1 = vmul.f32 %v6152_v13, %v1183_v47 }
 0x302   : > { %v1050_v6 = vpop.permute.xlu1 %1049  ;;  %v1045_v37 = vpop.permute.xlu0 %1044  ;;  %v1231_v60 = vmul.f32 %v6152_v13, %v1178_v57  ;;  %v1233_v47 = vmul.f32 %v6152_v13, %v1188_v0 }
 0x303   : > { %8686 = vst [vmem:[#allocation42_spill] sm:$0xff] %v6318_v11  ;;  %v1115_v5 = vmul.f32 %v1050_v6, %v981_v10  ;;  %v1114_v36 = vmul.f32 %v1045_v37, %v980_v44  ;;  %v984_v10 = vsub.f32 %v6189_v38, %v6304_v58 }
 0x305   : > { %v6326_v3 = vadd.f32 %v1228_v9, %v1115_v5  ;;  %v6328_v34 = vadd.f32 %v1227_v52, %v1114_v36  ;;  %v985_v9 = vsub.f32 %v6192_v49, %v6304_v58  ;;  %v987_v52 = vsub.f32 %v6217_v54, %v6304_v58 }
 0x306   : > { %v1060_v35 = vpop.permute.xlu1 %1059  ;;  %v1055_v42 = vpop.permute.xlu0 %1054  ;;  %v986_v49 = vsub.f32 %v6206_v8, %v6304_v58  ;;  %v988_v54 = vsub.f32 %v6213_v40, %v6304_v58 }
 0x307   : > { %v1117_v41 = vmul.f32 %v1060_v35, %v983_v4  ;;  %v1116_v51 = vmul.f32 %v1055_v42, %v982_v43  ;;  %v1234_v4 = vmul.f32 %v6152_v13, %v1193_v63  ;;  %v1235_v63 = vmul.f32 %v6152_v13, %v1198_v33 }
 0x309   : > { %v6336_v6 = vadd.f32 %v1230_v53, %v1117_v41  ;;  %v6338_v5 = vadd.f32 %v1229_v55, %v1116_v51  ;;  %v989_v53 = vsub.f32 %v6220_v56, %v6304_v58  ;;  %v1236_v41 = vmul.f32 %v6152_v13, %v1203_v2 }
 0x30a   : > { %v1070_v50 = vpop.permute.xlu1 %1069  ;;  %v1065_v12 = vpop.permute.xlu0 %1064  ;;  %v990_v56 = vsub.f32 %v6230_v24, %v6304_v58  ;;  %v1237_v2 = vmul.f32 %v6152_v13, %v6308_v15  ;;  %v992_v24 = vsub.f32 %v6237_v46, %v6304_v58  ;;  %v6397_v46 = vmov 0  }
 0x30b   : > { %v1119_v48 = vmul.f32 %v1070_v50, %v985_v9  ;;  %v1118_v62 = vmul.f32 %v1065_v12, %v984_v10  ;;  %v991_v50 = vsub.f32 %v6240_v45, %v6304_v58  ;;  %v993_v45 = vsub.f32 %v6245_v39, %v6304_v58 }
 0x30c   : > { %v6395_v39 = vmov 0   ;;  %v6399_v58 = vmov 0   ;;  %v6459_v46 = vmov (!%p3871_p2), 0  }
 0x30d   : > { %v6346_v44 = vadd.f32 %v1232_v1, %v1119_v48  ;;  %v6348_v37 = vadd.f32 %v1231_v60, %v1118_v62  ;;  %v1238_v1 = vmul.f32 %v6152_v13, %v6306_v14  ;;  %v6457_v39 = vmov (!%p3871_p2), 0  }
 0x30e   : > { %v1080_v36 = vpop.permute.xlu1 %1079  ;;  %v1075_v38 = vpop.permute.xlu0 %1074 }
 0x30f   : > { %v1121_v43 = vmul.f32 %v1080_v36, %v987_v52  ;;  %v1120_v57 = vmul.f32 %v1075_v38, %v986_v49 }
 0x311   : > { %v6356_v35 = vadd.f32 %v1234_v4, %v1121_v43  ;;  %v6358_v42 = vadd.f32 %v1233_v47, %v1120_v57 }
 0x312   : > { %v1090_v55 = vpop.permute.xlu1 %1089  ;;  %v1085_v8 = vpop.permute.xlu0 %1084 }
 0x313   : > { %v1123_v51 = vmul.f32 %v1090_v55, %v989_v53  ;;  %v1122_v0 = vmul.f32 %v1085_v8, %v988_v54  ;;  %v6393_v53 = vmov 0   ;;  %v6401_v54 = vmov 0  }
 0x314   : > { %v6403_v55 = vmov 0   ;;  %v6405_v8 = vmov 0   ;;  %v6455_v53 = vmov (!%p3871_p2), 0  }
 0x315   : > { %v6366_v9 = vadd.f32 %v1236_v41, %v1123_v51  ;;  %v6368_v10 = vadd.f32 %v1235_v63, %v1122_v0  ;;  %v6407_v41 = vmov 0   ;;  %v6409_v63 = vmov 0  }
 0x316   : > { %v1100_v12 = vpop.permute.xlu1 %1099  ;;  %v1095_v40 = vpop.permute.xlu0 %1094  ;;  %v6411_v51 = vmov 0   ;;  %v6413_v0 = vmov 0  }
 0x317   : > { %v1125_v33 = vmul.f32 %v1100_v12, %v991_v50  ;;  %v1124_v60 = vmul.f32 %v1095_v40, %v990_v56  ;;  %v6415_v50 = vmov 0   ;;  %v6417_v56 = vmov 0  }
 0x318   : > { %v6419_v12 = vmov 0   ;;  %v6421_v40 = vmov 0  }
 0x319   : > { %v6378_v48 = vadd.f32 %v1238_v1, %v1125_v33  ;;  %v6380_v62 = vadd.f32 %v1237_v2, %v1124_v60  ;;  %v6423_v1 = vmov 0   ;;  %v6429_v2 = vmov (!%p3871_p2), 0  }
 0x31a   : > { %v1110_v52 = vpop.permute.xlu1 %1109  ;;  %v1105_v49 = vpop.permute.xlu0 %1104  ;;  %v6431_v33 = vmov (!%p3871_p2), 0   ;;  %v6433_v60 = vmov (!%p3871_p2), 0  }
 0x31b   : > { %8687 = vst [vmem:[#allocation43_spill] sm:$0xff] %v6380_v62  ;;  %v1127_v14 = vmul.f32 %v1110_v52, %v993_v45  ;;  %v1126_v4 = vmul.f32 %v1105_v49, %v992_v24  ;;  %v6435_v52 = vmov (!%p3871_p2), 0   ;;  %v6437_v49 = vmov (!%p3871_p2), 0  }
 0x31c   : > { %v6439_v45 = vmov (!%p3871_p2), 0   ;;  %v6441_v24 = vmov (!%p3871_p2), 0  }
 0x31d   : > { %1277 = sbr.rel (%p3871_p2) target bundleno = 1411 (0x583), region = 88 }
 0x31e   : > { %v1223_v36 = vpop.permute.xlu1 %1222  ;;  %v1218_v38 = vpop.permute.xlu0 %1217 }
 0x31f   : > { %v1240_v15 = vmul.f32 %v6152_v13, %v1223_v36  ;;  %v1239_v47 = vmul.f32 %v6152_v13, %v1218_v38  ;;  %v6443_v36 = vmov (!%p3871_p2), 0   ;;  %v6445_v38 = vmov (!%p3871_p2), 0  }
 0x321   : > { %v6388_v43 = vadd.f32 %v1240_v15, %v1127_v14  ;;  %v6390_v57 = vadd.f32 %v1239_v47, %v1126_v4  ;;  %v6447_v14 = vmov (!%p3871_p2), 0   ;;  %v6449_v4 = vmov (!%p3871_p2), 0  }
 0x322   : > { %v6451_v15 = vmov (!%p3871_p2), 0   ;;  %v6453_v47 = vmov (!%p3871_p2), 0  }
 0x323   : > { %8688 = vst [vmem:[#allocation44_spill] sm:$0xff] %v6388_v43  ;;  %8689 = vst [vmem:[#allocation45_spill] sm:$0xff] %v6390_v57 }
 0x324   : > { %1281 = sbr.rel (%p3872_p8) target bundleno = 1105 (0x451), region = 92 }
 0x32b   : > { %s5808_s0 = smov 1   ;;  %v5809_v58 = vmov 0   ;;  %s5810_s3 = smov 127   ;;  %v5811_v54 = vmov 1   ;;  %v5812_v50 = vmov 2   ;;  %vm1314_vm2 = vcmp.ge.s32.totalorder %v6146_v59, 1 }
 0x32c   : > { %1286 = vrot.lane.b32.xlu1 %v6328_v34, %s5808_s0  ;;  %1282 = vrot.lane.b32.xlu0 %v6318_v11, %s5808_s0  ;;  %vm1365_vm3 = vcmp.lt.s32.totalorder %v6146_v59, 33 }
 0x32d   : > { %4869 = vset.pattern.permute.xlu1 %v5809_v58  ;;  %4868 = vset.pattern.permute.xlu0 %v5809_v58 }
 0x330   : > { %1288 = vrot.lane.b32.xlu1 %v6326_v3, %s5808_s0  ;;  %1284 = vrot.lane.b32.xlu0 %v6316_v61, %s5808_s0 }
 0x334   : > { %1292 = vrot.lane.b32.xlu1 %v6336_v6, %s5808_s0  ;;  %1290 = vrot.lane.b32.xlu0 %v6338_v5, %s5808_s0 }
 0x338   : > { %1296 = vrot.lane.b32.xlu1 %v6346_v44, %s5808_s0  ;;  %1294 = vrot.lane.b32.xlu0 %v6348_v37, %s5808_s0 }
 0x33c   : > { %1300 = vrot.lane.b32.xlu1 %v6356_v35, %s5808_s0  ;;  %1298 = vrot.lane.b32.xlu0 %v6358_v42, %s5808_s0 }
 0x340   : > { %1304 = vrot.lane.b32.xlu1 %v6366_v9, %s5808_s0  ;;  %1302 = vrot.lane.b32.xlu0 %v6368_v10, %s5808_s0 }
 0x344   : > { %1308 = vrot.lane.b32.xlu1 %v6378_v48, %s5808_s0  ;;  %1306 = vrot.lane.b32.xlu0 %v6380_v62, %s5808_s0 }
 0x348   : > { %1312 = vrot.lane.b32.xlu1 %v6388_v43, %s5808_s0  ;;  %1310 = vrot.lane.b32.xlu0 %v6390_v57, %s5808_s0 }
 0x34c   : > { %1335 = vrot.lane.b32.xlu1 %v6316_v61, %s5810_s3  ;;  %1333 = vrot.lane.b32.xlu0 %v6318_v11, %s5810_s3 }
 0x350   : > { %1339 = vrot.lane.b32.xlu1 %v6326_v3, %s5810_s3  ;;  %1337 = vrot.lane.b32.xlu0 %v6328_v34, %s5810_s3 }
 0x354   : > { %1343 = vrot.lane.b32.xlu1 %v6336_v6, %s5810_s3  ;;  %1341 = vrot.lane.b32.xlu0 %v6338_v5, %s5810_s3 }
 0x358   : > { %1347 = vrot.lane.b32.xlu1 %v6346_v44, %s5810_s3  ;;  %1345 = vrot.lane.b32.xlu0 %v6348_v37, %s5810_s3 }
 0x35c   : > { %1351 = vrot.lane.b32.xlu1 %v6356_v35, %s5810_s3  ;;  %1349 = vrot.lane.b32.xlu0 %v6358_v42, %s5810_s3 }
 0x360   : > { %1355 = vrot.lane.b32.xlu1 %v6366_v9, %s5810_s3  ;;  %1353 = vrot.lane.b32.xlu0 %v6368_v10, %s5810_s3 }
 0x364   : > { %1359 = vrot.lane.b32.xlu1 %v6378_v48, %s5810_s3  ;;  %1357 = vrot.lane.b32.xlu0 %v6380_v62, %s5810_s3 }
 0x368   : > { %1363 = vrot.lane.b32.xlu1 %v6388_v43, %s5810_s3  ;;  %1361 = vrot.lane.b32.xlu0 %v6390_v57, %s5810_s3 }
 0x36c   : > { %1391 = vperm.xlu1 %4869, %v6088_v17   ;;  %1386 = vperm.xlu0 %4868, %v6086_v16  }
 0x370   : > { %1396 = vperm.xlu1 %4869, %v6091_v18   ;;  %1401 = vperm.xlu0 %4868, %v6093_v19  }
 0x374   : > { %1406 = vperm.xlu1 %4869, %v6095_v20   ;;  %1411 = vperm.xlu0 %4868, %v6098_v21  }
 0x378   : > { %1416 = vperm.xlu1 %4869, %v6100_v22   ;;  %1421 = vperm.xlu0 %4868, %v6102_v23  }
 0x37c   : > { %1426 = vperm.xlu1 %4869, %v6105_v25   ;;  %1431 = vperm.xlu0 %4868, %v6107_v26  }
 0x380   : > { %1436 = vperm.xlu1 %4869, %v6109_v27   ;;  %1441 = vperm.xlu0 %4868, %v6111_v28  }
 0x384   : > { %1446 = vperm.xlu1 %4869, %v6113_v29   ;;  %1451 = vperm.xlu0 %4868, %v6115_v30  }
 0x388   : > { %1456 = vperm.xlu1 %4869, %v6117_v31   ;;  %1461 = vperm.xlu0 %4868, %v6119_v32  }
 0x38c   : > { %4870 = vset.pattern.permute.xlu1 %v5811_v54  ;;  %4871 = vset.pattern.permute.xlu0 %v5811_v54 }
 0x38d   : > { %1481 = vperm.xlu1 %4870, %v6086_v16   ;;  %1485 = vperm.xlu0 %4871, %v6088_v17  }
 0x391   : > { %1489 = vperm.xlu1 %4870, %v6091_v18   ;;  %1497 = vperm.xlu0 %4871, %v6095_v20  }
 0x395   : > { %1493 = vperm.xlu1 %4870, %v6093_v19   ;;  %1505 = vperm.xlu0 %4871, %v6100_v22  }
 0x399   : > { %1501 = vperm.xlu1 %4870, %v6098_v21   ;;  %1513 = vperm.xlu0 %4871, %v6105_v25  }
 0x39d   : > { %1509 = vperm.xlu1 %4870, %v6102_v23   ;;  %1521 = vperm.xlu0 %4871, %v6109_v27  }
 0x39e   : > { %v6521_v55 = vpop.permute.xlu1 %1286  ;;  %v1283_v8 = vpop.permute.xlu0 %1282 }
 0x3a1   : > { %1517 = vperm.xlu1 %4870, %v6107_v26   ;;  %1529 = vperm.xlu0 %4871, %v6113_v29  }
 0x3a2   : > { %v1289_v41 = vpop.permute.xlu1 %1288  ;;  %v1285_v63 = vpop.permute.xlu0 %1284 }
 0x3a5   : > { %1525 = vperm.xlu1 %4870, %v6111_v28   ;;  %1537 = vperm.xlu0 %4871, %v6117_v31  }
 0x3a6   : > { %v1293_v51 = vpop.permute.xlu1 %1292  ;;  %v1291_v0 = vpop.permute.xlu0 %1290 }
 0x3a9   : > { %1533 = vperm.xlu1 %4870, %v6115_v30   ;;  %4872 = vset.pattern.permute.xlu0 %v5812_v50 }
 0x3aa   : > { %v6528_v56 = vpop.permute.xlu1 %1296  ;;  %1577 = vperm.xlu0 %4872, %v6086_v16   ;;  %v1295_v12 = vpop.permute.xlu0 %1294 }
 0x3ad   : > { %1541 = vperm.xlu1 %4870, %v6119_v32  }
 0x3ae   : > { %v6532_v40 = vpop.permute.xlu1 %1300  ;;  %1589 = vperm.xlu0 %4872, %v6093_v19   ;;  %v6535_v1 = vpop.permute.xlu0 %1298 }
 0x3b1   : > { %4873 = vset.pattern.permute.xlu1 %v5812_v50 }
 0x3b2   : > { %1581 = vperm.xlu1 %4873, %v6088_v17   ;;  %v6538_v2 = vpop.permute.xlu1 %1304  ;;  %1597 = vperm.xlu0 %4872, %v6098_v21   ;;  %v6541_v33 = vpop.permute.xlu0 %1302 }
 0x3b6   : > { %1585 = vperm.xlu1 %4873, %v6091_v18   ;;  %v6544_v60 = vpop.permute.xlu1 %1308  ;;  %1605 = vperm.xlu0 %4872, %v6102_v23   ;;  %v6547_v52 = vpop.permute.xlu0 %1306  ;;  %v1320_v23 = vsel %vm1314_vm2, %v1289_v41, 0.0 }
 0x3ba   : > { %1593 = vperm.xlu1 %4873, %v6095_v20   ;;  %v6550_v49 = vpop.permute.xlu1 %1312  ;;  %1613 = vperm.xlu0 %4872, %v6107_v26   ;;  %v6553_v45 = vpop.permute.xlu0 %1310 }
 0x3be   : > { %1601 = vperm.xlu1 %4873, %v6100_v22   ;;  %v6556_v24 = vpop.permute.xlu1 %1335  ;;  %1621 = vperm.xlu0 %4872, %v6111_v28   ;;  %v6559_v36 = vpop.permute.xlu0 %1333 }
 0x3c2   : > { %1609 = vperm.xlu1 %4873, %v6105_v25   ;;  %1629 = vperm.xlu0 %4872, %v6115_v30   ;;  %v6563_v38 = vpop.permute.xlu1 %1339  ;;  %v6565_v14 = vpop.permute.xlu0 %1337  ;;  %v1318_v30 = vsel %vm1314_vm2, %v1285_v63, 0.0  ;;  %v1319_v25 = vsel %vm1314_vm2, %v6521_v55, 0.0  ;;  %v1322_v63 = vsel %vm1314_vm2, %v1293_v51, 0.0  ;;  %v1324_v55 = vsel %vm1314_vm2, %v6528_v56, 0.0 }
 0x3c3   : > { %v1326_v51 = vsel %vm1314_vm2, %v6532_v40, 0.0 }
 0x3c6   : > { %1617 = vperm.xlu1 %4873, %v6109_v27   ;;  %1637 = vperm.xlu0 %4872, %v6119_v32   ;;  %v6569_v4 = vpop.permute.xlu1 %1343  ;;  %v6571_v15 = vpop.permute.xlu0 %1341 }
 0x3ca   : > { %1625 = vperm.xlu1 %4873, %v6113_v29   ;;  %v6575_v47 = vpop.permute.xlu1 %1347  ;;  %v6577_v53 = vpop.permute.xlu0 %1345 }
 0x3ce   : > { %1633 = vperm.xlu1 %4873, %v6117_v31   ;;  %v6579_v39 = vpop.permute.xlu1 %1351  ;;  %v6581_v46 = vpop.permute.xlu0 %1349  ;;  %v1317_v31 = vsel %vm1314_vm2, %v1283_v8, 0.0 }
 0x3d2   : > { %v6583_v58 = vpop.permute.xlu1 %1355  ;;  %v6585_v54 = vpop.permute.xlu0 %1353 }
 0x3d3   : > { %8690 = vst [vmem:[#allocation46_spill] sm:$0xff] %v6585_v54 }
 0x3d6   : > { %v6587_v50 = vpop.permute.xlu1 %1359  ;;  %v6589_v7 = vpop.permute.xlu0 %1357 }
 0x3d7   : > { %8691 = vst [vmem:[#allocation47_spill] sm:$0xff] %v6589_v7 }
 0x3da   : > { %v6591_v13 = vpop.permute.xlu1 %1363  ;;  %v6593_v32 = vpop.permute.xlu0 %1361 }
 0x3db   : > { %8692 = vst [vmem:[#allocation48_spill] sm:$0xff] %v6591_v13  ;;  %8693 = vst [vmem:[#allocation49_spill] sm:$0xff] %v6593_v32 }
 0x3eb   : > { %v1392_v29 = vpop.permute.xlu1 %1391  ;;  %v1387_v28 = vpop.permute.xlu0 %1386 }
 0x3ec   : > { %v6600_v27 = vmul.f32 %v1392_v29, %v1318_v30  ;;  %v1464_v26 = vmul.f32 %v1387_v28, %v1317_v31  ;;  %v1321_v29 = vsel %vm1314_vm2, %v1291_v0, 0.0  ;;  %v1325_v0 = vsel %vm1314_vm2, %v6535_v1, 0.0 }
 0x3ed   : > { %v1329_v1 = vsel %vm1314_vm2, %v6547_v52, 0.0 }
 0x3ef   : > { %v1397_v22 = vpop.permute.xlu1 %1396  ;;  %v1402_v21 = vpop.permute.xlu0 %1401 }
 0x3f0   : > { %v6607_v20 = vmul.f32 %v1397_v22, %v1319_v25  ;;  %v1467_v8 = vmul.f32 %v1402_v21, %v1320_v23  ;;  %v1323_v22 = vsel %vm1314_vm2, %v1295_v12, 0.0  ;;  %v1328_v12 = vsel %vm1314_vm2, %v6538_v2, 0.0 }
 0x3f1   : > { %v1331_v2 = vsel %vm1314_vm2, %v6553_v45, 0.0 }
 0x3f3   : > { %v1407_v30 = vpop.permute.xlu1 %1406  ;;  %v1412_v28 = vpop.permute.xlu0 %1411 }
 0x3f4   : > { %v6613_v31 = vmul.f32 %v1407_v30, %v1321_v29  ;;  %v6615_v19 = vmul.f32 %v1412_v28, %v1322_v63  ;;  %v1327_v28 = vsel %vm1314_vm2, %v6541_v33, 0.0 }
 0x3f7   : > { %v1417_v21 = vpop.permute.xlu1 %1416  ;;  %v1422_v23 = vpop.permute.xlu0 %1421 }
 0x3f8   : > { %v6622_v25 = vmul.f32 %v1417_v21, %v1323_v22  ;;  %v6624_v41 = vmul.f32 %v1422_v23, %v1324_v55 }
 0x3fb   : > { %v1427_v63 = vpop.permute.xlu1 %1426  ;;  %v1432_v29 = vpop.permute.xlu0 %1431 }
 0x3fc   : > { %v6632_v56 = vmul.f32 %v1427_v63, %v1325_v0  ;;  %v6634_v30 = vmul.f32 %v1432_v29, %v1326_v51 }
 0x3ff   : > { %v1437_v55 = vpop.permute.xlu1 %1436  ;;  %v1442_v40 = vpop.permute.xlu0 %1441 }
 0x400   : > { %v6642_v22 = vmul.f32 %v1437_v55, %v1327_v28  ;;  %v6644_v21 = vmul.f32 %v1442_v40, %v1328_v12 }
 0x402   : > { %8694 = vst [vmem:[#allocation50_spill] sm:$0xff] %v6642_v22 }
 0x403   : > { %v1447_v23 = vpop.permute.xlu1 %1446  ;;  %v6649_v51 = vpop.permute.xlu0 %1451 }
 0x404   : > { %v6651_v0 = vmul.f32 %v1447_v23, %v1329_v1 }
 0x406   : > { %8695 = vst [vmem:[#allocation51_spill] sm:$0xff] %v6651_v0 }
 0x407   : > { %v1457_v33 = vpop.permute.xlu1 %1456  ;;  %v6656_v63 = vpop.permute.xlu0 %1461 }
 0x408   : > { %8696 = vst [vmem:[#allocation52_spill] sm:$0xff] %v6656_v63  ;;  %v6658_v29 = vmul.f32 %v1457_v33, %v1331_v2 }
 0x40a   : > { %8697 = vst [vmem:[#allocation53_spill] sm:$0xff] %v6658_v29  ;;  %v1368_v29 = vsel %vm1365_vm3, %v6559_v36, 0.0 }
 0x40c   : > { %v1482_v12 = vpop.permute.xlu1 %1481  ;;  %v1486_v28 = vpop.permute.xlu0 %1485 }
 0x40d   : > { %v1544_v2 = vmul.f32 %v1482_v12, %v6318_v11  ;;  %v1371_v12 = vsel %vm1365_vm3, %v6563_v38, 0.0  ;;  %v1545_v11 = vmul.f32 %v1486_v28, %v6316_v61 }
 0x40f   : > { %v1560_v62 = vadd.f32 %v1544_v2, %v1464_v26  ;;  %v1373_v26 = vsel %vm1365_vm3, %v6569_v4, 0.0  ;;  %v1370_v4 = vsel %vm1365_vm3, %v6565_v14, 0.0  ;;  %v1377_v14 = vsel %vm1365_vm3, %v6579_v39, 0.0 }
 0x410   : > { %v1490_v55 = vpop.permute.xlu1 %1489  ;;  %v1498_v40 = vpop.permute.xlu0 %1497 }
 0x411   : > { %v1548_v28 = vmul.f32 %v1498_v40, %v6338_v5 }
 0x414   : > { %v1494_v18 = vpop.permute.xlu1 %1493  ;;  %v1506_v52 = vpop.permute.xlu0 %1505 }
 0x415   : > { %v1547_v22 = vmul.f32 %v1494_v18, %v6326_v3  ;;  %v1369_v18 = vsel %vm1365_vm3, %v6556_v24, 0.0  ;;  %v1375_v24 = vsel %vm1365_vm3, %v6575_v47, 0.0 }
 0x417   : > { %v1563_v63 = vadd.f32 %v1547_v22, %v1467_v8 }
 0x418   : > { %v1502_v16 = vpop.permute.xlu1 %1501  ;;  %v6660_v17 = vpop.permute.xlu0 %1513 }
 0x419   : > { %v1549_v43 = vmul.f32 %v1502_v16, %v6336_v6 }
 0x41b   : > { %v1565_v16 = vadd.f32 %v1549_v43, %v6615_v19 }
 0x41c   : > { %v1510_v1 = vpop.permute.xlu1 %1509  ;;  %v6662_v23 = vpop.permute.xlu0 %1521 }
 0x41d   : > { %v1551_v38 = vmul.f32 %v1510_v1, %v6346_v44 }
 0x41f   : > { %v1567_v19 = vadd.f32 %v1551_v38, %v6624_v41  ;;  %v1564_v41 = vadd.f32 %v1548_v28, %v6613_v31  ;;  %v1374_v31 = vsel %vm1365_vm3, %v6577_v53, 0.0  ;;  %v8701_v28 = vld [vmem:[#allocation44_spill] sm:$0xff] }
 0x420   : > { %v1518_v32 = vpop.permute.xlu1 %1517  ;;  %v6664_v57 = vpop.permute.xlu0 %1529 }
 0x421   : > { %8698 = vst [vmem:[#allocation54_spill] sm:$0xff] %v6664_v57  ;;  %v1553_v43 = vmul.f32 %v1518_v32, %v6356_v35  ;;  %v1550_v32 = vmul.f32 %v1506_v52, %v6348_v37  ;;  %v1552_v52 = vmul.f32 %v6660_v17, %v6358_v42  ;;  %v1376_v17 = vsel %vm1365_vm3, %v6581_v46, 0.0 }
 0x423   : > { %v1569_v40 = vadd.f32 %v1553_v43, %v6634_v30  ;;  %v1566_v30 = vadd.f32 %v1550_v32, %v6622_v25  ;;  %v1381_v25 = vsel %vm1365_vm3, %v6587_v50, 0.0  ;;  %v8702_v50 = vld [vmem:[#allocation52_spill] sm:$0xff]  ;;  %v8706_v32 = vld [vmem:[#allocation43_spill] sm:$0xff] }
 0x424   : > { %v1526_v45 = vpop.permute.xlu1 %1525  ;;  %v6666_v0 = vpop.permute.xlu0 %1537 }
 0x425   : > { %8699 = vst [vmem:[#allocation55_spill] sm:$0xff] %v6666_v0 }
 0x428   : > { %v1534_v33 = vpop.permute.xlu1 %1533 }
 0x429   : > { %v1578_v7 = vpop.permute.xlu0 %1577 }
 0x42a   : > { %v1640_v13 = vmul.f32 %v1578_v7, %v1368_v29 }
 0x42c   : > { %v6674_v54 = vadd.f32 %v1640_v13, %v1560_v62   ;;  %v6676_v57 = vpop.permute.xlu1 %1541  ;;  %v1561_v13 = vadd.f32 %v1545_v11, %v6600_v27  ;;  %v1546_v62 = vmul.f32 %v1490_v55, %v6328_v34 }
 0x42d   : > { %v1590_v0 = vpop.permute.xlu0 %1589 }
 0x42e   : > { %v1643_v36 = vmul.f32 %v1590_v0, %v1371_v12  ;;  %v1562_v11 = vadd.f32 %v1546_v62, %v6607_v20  ;;  %v1372_v12 = vsel %vm1365_vm3, %v6571_v15, 0.0  ;;  %v1330_v15 = vsel %vm1314_vm2, %v6544_v60, 0.0 }
 0x42f   : > { %v1477_v53 = vmul.f32 %v6649_v51, %v1330_v15  ;;  %v8708_v15 = vld [vmem:[#allocation47_spill] sm:$0xff] }
 0x430   : > { %v6686_v7 = vadd.f32 %v1643_v36, %v1563_v63  }
 0x431   : > { %v1582_v8 = vpop.permute.xlu1 %1581  ;;  %v1598_v22 = vpop.permute.xlu0 %1597 }
 0x432   : > { %v1641_v0 = vmul.f32 %v1582_v8, %v1369_v18  ;;  %v1645_v29 = vmul.f32 %v1598_v22, %v1373_v26  ;;  %v1555_v18 = vmul.f32 %v1526_v45, %v6366_v9  ;;  %v1379_v8 = vsel %vm1365_vm3, %v6583_v58, 0.0 }
 0x433   : > { %v1332_v58 = vsel %vm1314_vm2, %v6550_v49, 0.0 }
 0x434   : > { %v6701_v63 = vadd.f32 %v1641_v0, %v1561_v13   ;;  %v6703_v27 = vadd.f32 %v1645_v29, %v1565_v16   ;;  %v1571_v45 = vadd.f32 %v1555_v18, %v6644_v21  ;;  %v1557_v16 = vmul.f32 %v1534_v33, %v6378_v48 }
 0x435   : > { %v1586_v55 = vpop.permute.xlu1 %1585  ;;  %v1606_v1 = vpop.permute.xlu0 %1605  ;;  %v1568_v21 = vadd.f32 %v1552_v52, %v6632_v56  ;;  %v1554_v33 = vmul.f32 %v6662_v23, %v6368_v10  ;;  %v8704_v56 = vld [vmem:[#allocation48_spill] sm:$0xff] }
 0x436   : > { %v1642_v2 = vmul.f32 %v1586_v55, %v1370_v4  ;;  %v1647_v47 = vmul.f32 %v1606_v1, %v1375_v24  ;;  %v1383_v23 = vsel %vm1365_vm3, %v8704_v56, 0.0 }
 0x438   : > { %v6715_v36 = vadd.f32 %v1642_v2, %v1562_v11   ;;  %v6717_v38 = vadd.f32 %v1647_v47, %v1567_v19   ;;  %v1573_v11 = vadd.f32 %v1557_v16, %v1477_v53  ;;  %v1559_v19 = vmul.f32 %v6676_v57, %v8701_v28  ;;  %v8703_v47 = vld [vmem:[#allocation46_spill] sm:$0xff]  ;;  %v8710_v16 = vld [vmem:[#allocation45_spill] sm:$0xff] }
 0x439   : > { %v1594_v26 = vpop.permute.xlu1 %1593  ;;  %v1614_v13 = vpop.permute.xlu0 %1613  ;;  %v1479_v2 = vmul.f32 %v8702_v50, %v1332_v58  ;;  %v1378_v46 = vsel %vm1365_vm3, %v8703_v47, 0.0  ;;  %v8707_v57 = vld [vmem:[#allocation54_spill] sm:$0xff]  ;;  %v8712_v58 = vld [vmem:[#allocation49_spill] sm:$0xff]  ;;  %v8716_v47 = vmov %v6686_v7 }
 0x43a   : > { %v8700_v20 = vmov %v6715_v36  ;;  %v1644_v62 = vmul.f32 %v1594_v26, %v1372_v12  ;;  %v1649_v39 = vmul.f32 %v1614_v13, %v1377_v14  ;;  %v8705_v12 = vld [vmem:[#allocation50_spill] sm:$0xff]  ;;  %v1382_v53 = vsel %vm1365_vm3, %v8712_v58, 0.0 }
 0x43b   : > { %v1575_v18 = vadd.f32 %v1559_v19, %v1479_v2 }
 0x43c   : > { %v1660_v22 = vadd.f32 %v1644_v62, %v1564_v41   ;;  %v1665_v24 = vadd.f32 %v1649_v39, %v1569_v40   ;;  %v1570_v41 = vadd.f32 %v1554_v33, %v8705_v12  ;;  %v1556_v40 = vmul.f32 %v8707_v57, %v8706_v32 }
 0x43d   : > { %v1602_v60 = vpop.permute.xlu1 %1601  ;;  %v1622_v0 = vpop.permute.xlu0 %1621 }
 0x43e   : > { %v1646_v29 = vmul.f32 %v1602_v60, %v1374_v31  ;;  %v1651_v4 = vmul.f32 %v1622_v0, %v1379_v8  ;;  %v1380_v8 = vsel %vm1365_vm3, %v8708_v15, 0.0  ;;  %v8709_v31 = vld [vmem:[#allocation51_spill] sm:$0xff]  ;;  %v8715_v15 = vmov %v1660_v22 }
 0x43f   : > { %v8711_v0 = vld [vmem:[#allocation55_spill] sm:$0xff] }
 0x440   : > { %v1662_v14 = vadd.f32 %v1646_v29, %v1566_v30   ;;  %v1667_v49 = vadd.f32 %v1651_v4, %v1571_v45   ;;  %v1572_v30 = vadd.f32 %v1556_v40, %v8709_v31  ;;  %v1558_v29 = vmul.f32 %v8711_v0, %v8710_v16 }
 0x441   : > { %v1610_v51 = vpop.permute.xlu1 %1609  ;;  %v1630_v43 = vpop.permute.xlu0 %1629 }
 0x442   : > { %v1648_v55 = vmul.f32 %v1610_v51, %v1376_v17  ;;  %v1653_v1 = vmul.f32 %v1630_v43, %v1381_v25  ;;  %v8713_v17 = vld [vmem:[#allocation53_spill] sm:$0xff] }
 0x444   : > { %v1664_v36 = vadd.f32 %v1648_v55, %v1568_v21   ;;  %v1669_v60 = vadd.f32 %v1653_v1, %v1573_v11   ;;  %v1574_v21 = vadd.f32 %v1558_v29, %v8713_v17 }
 0x445   : > { %v1618_v26 = vpop.permute.xlu1 %1617  ;;  %v1638_v13 = vpop.permute.xlu0 %1637 }
 0x446   : > { %v1650_v62 = vmul.f32 %v1618_v26, %v1378_v46  ;;  %v1655_v39 = vmul.f32 %v1638_v13, %v1383_v23  ;;  %v8719_v46 = vmov %v6674_v54 }
 0x448   : > { %v1666_v45 = vadd.f32 %v1650_v62, %v1570_v41   ;;  %v1671_v2 = vadd.f32 %v1655_v39, %v1575_v18   ;;  %v8718_v39 = vmov %v6701_v63 }
 0x449   : > { %v1626_v52 = vpop.permute.xlu1 %1625 }
 0x44a   : > { %v1652_v4 = vmul.f32 %v1626_v52, %v1380_v8 }
 0x44c   : > { %v1668_v52 = vadd.f32 %v1652_v4, %v1572_v30   ;;  %v8714_v4 = vmov %v6703_v27 }
 0x44d   : > { %v1634_v25 = vpop.permute.xlu1 %1633 }
 0x44e   : > { %v1654_v33 = vmul.f32 %v1634_v25, %v1382_v53  ;;  %v8717_v53 = vmov %v8700_v20 }
 0x450   : > { %v1670_v33 = vadd.f32 %v1654_v33, %v1574_v21  }
 0x451 PF: > { %1690 = sbr.rel (%p1278_p7) target bundleno = 1406 (0x57e), region = 96  ;;  %v5480_v46 = vphi %v6459_v46, %v8719_v46   ;;  %v5476_v39 = vphi %v6457_v39, %v8718_v39   ;;  %v5472_v53 = vphi %v6455_v53, %v8717_v53   ;;  %v5468_v47 = vphi %v6453_v47, %v8716_v47   ;;  %v5464_v15 = vphi %v6451_v15, %v8715_v15   ;;  %v5460_v4 = vphi %v6449_v4, %v8714_v4   ;;  %v5456_v14 = vphi %v6447_v14, %v1662_v14   ;;  %v5452_v38 = vphi %v6445_v38, %v6717_v38   ;;  %v5448_v36 = vphi %v6443_v36, %v1664_v36   ;;  %v5444_v24 = vphi %v6441_v24, %v1665_v24   ;;  %v5440_v45 = vphi %v6439_v45, %v1666_v45   ;;  %v5436_v49 = vphi %v6437_v49, %v1667_v49   ;;  %v5432_v52 = vphi %v6435_v52, %v1668_v52   ;;  %v5428_v60 = vphi %v6433_v60, %v1669_v60   ;;  %v5424_v33 = vphi %v6431_v33, %v1670_v33   ;;  %v5420_v2 = vphi %v6429_v2, %v1671_v2  }
 0x458   : > { %s5813_s1 = smov 2   ;;  %v8720_v54 = vld [vmem:[#allocation42_spill] sm:$0xff]  ;;  %v5814_v7 = vmov 0   ;;  %v8721_v49 = vld [vmem:[#allocation43_spill] sm:$0xff]  ;;  %v8722_v38 = vld [vmem:[#allocation44_spill] sm:$0xff]  ;;  %s5815_s25 = smov 126  }
 0x459   : > { %1695 = vrot.lane.b32.xlu1 %v6328_v34, %s5813_s1  ;;  %1691 = vrot.lane.b32.xlu0 %v8720_v54, %s5813_s1  ;;  %v8723_v24 = vld [vmem:[#allocation45_spill] sm:$0xff]  ;;  %v8724_v63 = vld [vmem:[#allocation26_spill] sm:$0xff]  ;;  %v8726_v14 = vld [vmem:[#allocation27_spill] sm:$0xff]  ;;  %v5816_v2 = vmov 1   ;;  %v5817_v32 = vmov 2   ;;  %vm1723_vm4 = vcmp.ge.s32.totalorder %v6146_v59, 2 }
 0x45a   : > { %4875 = vset.pattern.permute.xlu1 %v5814_v7  ;;  %4874 = vset.pattern.permute.xlu0 %v5814_v7  ;;  %v8725_v27 = vld [vmem:[#allocation25_spill] sm:$0xff]  ;;  %v8727_v36 = vld [vmem:[#allocation28_spill] sm:$0xff]  ;;  %v8729_v22 = vld [vmem:[#allocation30_spill] sm:$0xff]  ;;  %vm1774_vm5 = vcmp.lt.s32.totalorder %v6146_v59, 32 }
 0x45b   : > { %v8728_v20 = vld [vmem:[#allocation29_spill] sm:$0xff]  ;;  %v8730_v45 = vld [vmem:[#allocation31_spill] sm:$0xff]  ;;  %v8731_v60 = vld [vmem:[#allocation32_spill] sm:$0xff] }
 0x45c   : > { %v8732_v11 = vld [vmem:[#allocation33_spill] sm:$0xff]  ;;  %v8733_v28 = vld [vmem:[#allocation34_spill] sm:$0xff]  ;;  %v8734_v19 = vld [vmem:[#allocation35_spill] sm:$0xff] }
 0x45d   : > { %1697 = vrot.lane.b32.xlu1 %v6326_v3, %s5813_s1  ;;  %1693 = vrot.lane.b32.xlu0 %v6316_v61, %s5813_s1  ;;  %v8735_v51 = vld [vmem:[#allocation36_spill] sm:$0xff]  ;;  %v8736_v43 = vld [vmem:[#allocation37_spill] sm:$0xff]  ;;  %v8737_v55 = vld [vmem:[#allocation38_spill] sm:$0xff] }
 0x45e   : > { %v8738_v1 = vld [vmem:[#allocation39_spill] sm:$0xff]  ;;  %v8739_v50 = vld [vmem:[#allocation40_spill] sm:$0xff] }
 0x461   : > { %1701 = vrot.lane.b32.xlu1 %v6336_v6, %s5813_s1  ;;  %1699 = vrot.lane.b32.xlu0 %v6338_v5, %s5813_s1 }
 0x465   : > { %1705 = vrot.lane.b32.xlu1 %v6346_v44, %s5813_s1  ;;  %1703 = vrot.lane.b32.xlu0 %v6348_v37, %s5813_s1 }
 0x469   : > { %1709 = vrot.lane.b32.xlu1 %v6356_v35, %s5813_s1  ;;  %1707 = vrot.lane.b32.xlu0 %v6358_v42, %s5813_s1 }
 0x46d   : > { %1713 = vrot.lane.b32.xlu1 %v6366_v9, %s5813_s1  ;;  %1711 = vrot.lane.b32.xlu0 %v6368_v10, %s5813_s1 }
 0x471   : > { %1717 = vrot.lane.b32.xlu1 %v6378_v48, %s5813_s1  ;;  %1715 = vrot.lane.b32.xlu0 %v8721_v49, %s5813_s1 }
 0x475   : > { %1721 = vrot.lane.b32.xlu1 %v8722_v38, %s5813_s1  ;;  %1719 = vrot.lane.b32.xlu0 %v8723_v24, %s5813_s1 }
 0x479   : > { %1744 = vrot.lane.b32.xlu1 %v6316_v61, %s5815_s25  ;;  %1742 = vrot.lane.b32.xlu0 %v8720_v54, %s5815_s25 }
 0x47d   : > { %1748 = vrot.lane.b32.xlu1 %v6326_v3, %s5815_s25  ;;  %1746 = vrot.lane.b32.xlu0 %v6328_v34, %s5815_s25 }
 0x481   : > { %1752 = vrot.lane.b32.xlu1 %v6336_v6, %s5815_s25  ;;  %1750 = vrot.lane.b32.xlu0 %v6338_v5, %s5815_s25 }
 0x485   : > { %1756 = vrot.lane.b32.xlu1 %v6346_v44, %s5815_s25  ;;  %1754 = vrot.lane.b32.xlu0 %v6348_v37, %s5815_s25 }
 0x489   : > { %1760 = vrot.lane.b32.xlu1 %v6356_v35, %s5815_s25  ;;  %1758 = vrot.lane.b32.xlu0 %v6358_v42, %s5815_s25 }
 0x48d   : > { %1764 = vrot.lane.b32.xlu1 %v6366_v9, %s5815_s25  ;;  %1762 = vrot.lane.b32.xlu0 %v6368_v10, %s5815_s25 }
 0x491   : > { %1768 = vrot.lane.b32.xlu1 %v6378_v48, %s5815_s25  ;;  %1766 = vrot.lane.b32.xlu0 %v8721_v49, %s5815_s25 }
 0x495   : > { %1772 = vrot.lane.b32.xlu1 %v8722_v38, %s5815_s25  ;;  %1770 = vrot.lane.b32.xlu0 %v8723_v24, %s5815_s25 }
 0x499   : > { %1800 = vperm.xlu1 %4875, %v8724_v63   ;;  %1795 = vperm.xlu0 %4874, %v8725_v27  }
 0x49d   : > { %1805 = vperm.xlu1 %4875, %v8726_v14   ;;  %1810 = vperm.xlu0 %4874, %v8727_v36  }
 0x4a1   : > { %1815 = vperm.xlu1 %4875, %v8728_v20   ;;  %1820 = vperm.xlu0 %4874, %v8729_v22  }
 0x4a5   : > { %1825 = vperm.xlu1 %4875, %v8730_v45   ;;  %1830 = vperm.xlu0 %4874, %v8731_v60  }
 0x4a9   : > { %1835 = vperm.xlu1 %4875, %v8732_v11   ;;  %1840 = vperm.xlu0 %4874, %v8733_v28  }
 0x4ad   : > { %1845 = vperm.xlu1 %4875, %v8734_v19   ;;  %1850 = vperm.xlu0 %4874, %v8735_v51  }
 0x4b1   : > { %1855 = vperm.xlu1 %4875, %v8736_v43   ;;  %1860 = vperm.xlu0 %4874, %v8737_v55  }
 0x4b5   : > { %1865 = vperm.xlu1 %4875, %v8738_v1   ;;  %1870 = vperm.xlu0 %4874, %v8739_v50  }
 0x4b9   : > { %4876 = vset.pattern.permute.xlu1 %v5816_v2  ;;  %4877 = vset.pattern.permute.xlu0 %v5816_v2 }
 0x4ba   : > { %1890 = vperm.xlu1 %4876, %v8725_v27   ;;  %1894 = vperm.xlu0 %4877, %v8724_v63  }
 0x4be   : > { %1898 = vperm.xlu1 %4876, %v8726_v14   ;;  %1906 = vperm.xlu0 %4877, %v8728_v20  }
 0x4c2   : > { %1902 = vperm.xlu1 %4876, %v8727_v36   ;;  %1914 = vperm.xlu0 %4877, %v8730_v45  }
 0x4c6   : > { %1910 = vperm.xlu1 %4876, %v8729_v22   ;;  %1922 = vperm.xlu0 %4877, %v8732_v11  }
 0x4ca   : > { %1918 = vperm.xlu1 %4876, %v8731_v60   ;;  %1930 = vperm.xlu0 %4877, %v8734_v19  }
 0x4cb   : > { %v6918_v47 = vpop.permute.xlu1 %1695  ;;  %v1692_v46 = vpop.permute.xlu0 %1691 }
 0x4ce   : > { %1926 = vperm.xlu1 %4876, %v8733_v28   ;;  %1938 = vperm.xlu0 %4877, %v8736_v43  }
 0x4cf   : > { %v1698_v56 = vpop.permute.xlu1 %1697  ;;  %v1694_v23 = vpop.permute.xlu0 %1693 }
 0x4d2   : > { %1934 = vperm.xlu1 %4876, %v8735_v51   ;;  %1946 = vperm.xlu0 %4877, %v8738_v1  }
 0x4d3   : > { %v1702_v12 = vpop.permute.xlu1 %1701  ;;  %v1700_v41 = vpop.permute.xlu0 %1699 }
 0x4d4   : > { %v1730_v2 = vsel %vm1723_vm4, %v1700_v41, 0.0 }
 0x4d6   : > { %1942 = vperm.xlu1 %4876, %v8737_v55   ;;  %4878 = vset.pattern.permute.xlu0 %v5817_v32 }
 0x4d7   : > { %v6925_v57 = vpop.permute.xlu1 %1705  ;;  %1986 = vperm.xlu0 %4878, %v8725_v27   ;;  %v1704_v40 = vpop.permute.xlu0 %1703 }
 0x4da   : > { %1950 = vperm.xlu1 %4876, %v8739_v50  }
 0x4db   : > { %v6929_v18 = vpop.permute.xlu1 %1709  ;;  %1998 = vperm.xlu0 %4878, %v8727_v36   ;;  %v6932_v26 = vpop.permute.xlu0 %1707  ;;  %v1726_v36 = vsel %vm1723_vm4, %v1692_v46, 0.0 }
 0x4dc   : > { %v1735_v41 = vsel %vm1723_vm4, %v6929_v18, 0.0 }
 0x4de   : > { %4879 = vset.pattern.permute.xlu1 %v5817_v32 }
 0x4df   : > { %1990 = vperm.xlu1 %4879, %v8724_v63   ;;  %v6935_v13 = vpop.permute.xlu1 %1713  ;;  %2006 = vperm.xlu0 %4878, %v8729_v22   ;;  %v6938_v62 = vpop.permute.xlu0 %1711 }
 0x4e3   : > { %1994 = vperm.xlu1 %4879, %v8726_v14   ;;  %v6941_v39 = vpop.permute.xlu1 %1717  ;;  %2014 = vperm.xlu0 %4878, %v8731_v60   ;;  %v6944_v15 = vpop.permute.xlu0 %1715 }
 0x4e7   : > { %2002 = vperm.xlu1 %4879, %v8728_v20   ;;  %v6947_v8 = vpop.permute.xlu1 %1721  ;;  %2022 = vperm.xlu0 %4878, %v8733_v28   ;;  %v6950_v31 = vpop.permute.xlu0 %1719  ;;  %v1727_v20 = vsel %vm1723_vm4, %v1694_v23, 0.0  ;;  %v1728_v28 = vsel %vm1723_vm4, %v6918_v47, 0.0  ;;  %v1733_v47 = vsel %vm1723_vm4, %v6925_v57, 0.0 }
 0x4eb   : > { %2010 = vperm.xlu1 %4879, %v8730_v45   ;;  %v6953_v30 = vpop.permute.xlu1 %1744  ;;  %2030 = vperm.xlu0 %4878, %v8735_v51   ;;  %v6956_v52 = vpop.permute.xlu0 %1742 }
 0x4ef   : > { %2018 = vperm.xlu1 %4879, %v8732_v11   ;;  %2038 = vperm.xlu0 %4878, %v8737_v55   ;;  %v6960_v16 = vpop.permute.xlu1 %1748  ;;  %v6962_v0 = vpop.permute.xlu0 %1746 }
 0x4f3   : > { %2026 = vperm.xlu1 %4879, %v8734_v19   ;;  %2046 = vperm.xlu0 %4878, %v8739_v50   ;;  %v6966_v29 = vpop.permute.xlu1 %1752  ;;  %v6968_v4 = vpop.permute.xlu0 %1750  ;;  %v1729_v19 = vsel %vm1723_vm4, %v1698_v56, 0.0  ;;  %v1731_v50 = vsel %vm1723_vm4, %v1702_v12, 0.0  ;;  %v1732_v56 = vsel %vm1723_vm4, %v1704_v40, 0.0  ;;  %v1737_v40 = vsel %vm1723_vm4, %v6935_v13, 0.0 }
 0x4f4   : > { %v1740_v13 = vsel %vm1723_vm4, %v6950_v31, 0.0 }
 0x4f7   : > { %2034 = vperm.xlu1 %4879, %v8736_v43   ;;  %v6972_v58 = vpop.permute.xlu1 %1756  ;;  %v6974_v53 = vpop.permute.xlu0 %1754 }
 0x4fb   : > { %2042 = vperm.xlu1 %4879, %v8738_v1   ;;  %v6976_v25 = vpop.permute.xlu1 %1760  ;;  %v6978_v17 = vpop.permute.xlu0 %1758 }
 0x4ff   : > { %v6980_v21 = vpop.permute.xlu1 %1764  ;;  %v6982_v33 = vpop.permute.xlu0 %1762 }
 0x500   : > { %8740 = vst [vmem:[#allocation56_spill] sm:$0xff] %v6982_v33 }
 0x503   : > { %v6984_v7 = vpop.permute.xlu1 %1768  ;;  %v6986_v63 = vpop.permute.xlu0 %1766 }
 0x504   : > { %8741 = vst [vmem:[#allocation57_spill] sm:$0xff] %v6986_v63 }
 0x507   : > { %v6988_v27 = vpop.permute.xlu1 %1772  ;;  %v6990_v14 = vpop.permute.xlu0 %1770 }
 0x508   : > { %8742 = vst [vmem:[#allocation58_spill] sm:$0xff] %v6988_v27  ;;  %8743 = vst [vmem:[#allocation59_spill] sm:$0xff] %v6990_v14 }
 0x518   : > { %v1801_v22 = vpop.permute.xlu1 %1800  ;;  %v1796_v45 = vpop.permute.xlu0 %1795 }
 0x519   : > { %v6997_v60 = vmul.f32 %v1801_v22, %v1727_v20  ;;  %v1873_v11 = vmul.f32 %v1796_v45, %v1726_v36 }
 0x51c   : > { %v1806_v51 = vpop.permute.xlu1 %1805  ;;  %v1811_v43 = vpop.permute.xlu0 %1810 }
 0x51d   : > { %v7004_v55 = vmul.f32 %v1806_v51, %v1728_v28  ;;  %v1876_v1 = vmul.f32 %v1811_v43, %v1729_v19  ;;  %v1734_v28 = vsel %vm1723_vm4, %v6932_v26, 0.0  ;;  %v1738_v26 = vsel %vm1723_vm4, %v6944_v15, 0.0 }
 0x520   : > { %v1816_v46 = vpop.permute.xlu1 %1815  ;;  %v1821_v23 = vpop.permute.xlu0 %1820 }
 0x521   : > { %v7010_v32 = vmul.f32 %v1816_v46, %v1730_v2  ;;  %v7012_v36 = vmul.f32 %v1821_v23, %v1731_v50  ;;  %v1736_v50 = vsel %vm1723_vm4, %v6938_v62, 0.0 }
 0x524   : > { %v1826_v20 = vpop.permute.xlu1 %1825  ;;  %v1831_v22 = vpop.permute.xlu0 %1830 }
 0x525   : > { %v7019_v45 = vmul.f32 %v1826_v20, %v1732_v56  ;;  %v7021_v12 = vmul.f32 %v1831_v22, %v1733_v47 }
 0x528   : > { %v1836_v19 = vpop.permute.xlu1 %1835  ;;  %v1841_v51 = vpop.permute.xlu0 %1840 }
 0x529   : > { %v7029_v57 = vmul.f32 %v1836_v19, %v1734_v28  ;;  %v7031_v43 = vmul.f32 %v1841_v51, %v1735_v41 }
 0x52c   : > { %v1846_v2 = vpop.permute.xlu1 %1845  ;;  %v1851_v18 = vpop.permute.xlu0 %1850 }
 0x52d   : > { %v7039_v46 = vmul.f32 %v1846_v2, %v1736_v50  ;;  %v7041_v23 = vmul.f32 %v1851_v18, %v1737_v40 }
 0x52f   : > { %8744 = vst [vmem:[#allocation60_spill] sm:$0xff] %v7039_v46 }
 0x530   : > { %v1856_v47 = vpop.permute.xlu1 %1855  ;;  %v7046_v56 = vpop.permute.xlu0 %1860 }
 0x531   : > { %v7048_v20 = vmul.f32 %v1856_v47, %v1738_v26 }
 0x533   : > { %8745 = vst [vmem:[#allocation61_spill] sm:$0xff] %v7048_v20 }
 0x534   : > { %v1866_v62 = vpop.permute.xlu1 %1865  ;;  %v7053_v22 = vpop.permute.xlu0 %1870 }
 0x535   : > { %8746 = vst [vmem:[#allocation62_spill] sm:$0xff] %v7053_v22  ;;  %v7055_v41 = vmul.f32 %v1866_v62, %v1740_v13 }
 0x537   : > { %8747 = vst [vmem:[#allocation63_spill] sm:$0xff] %v7055_v41  ;;  %v1777_v41 = vsel %vm1774_vm5, %v6956_v52, 0.0 }
 0x539   : > { %v1891_v28 = vpop.permute.xlu1 %1890  ;;  %v1895_v19 = vpop.permute.xlu0 %1894 }
 0x53a   : > { %v1953_v13 = vmul.f32 %v1891_v28, %v8720_v54  ;;  %v1780_v54 = vsel %vm1774_vm5, %v6960_v16, 0.0  ;;  %v1954_v28 = vmul.f32 %v1895_v19, %v6316_v61 }
 0x53c   : > { %v1969_v49 = vadd.f32 %v1953_v13, %v1873_v11  ;;  %v1778_v11 = vsel %vm1774_vm5, %v6953_v30, 0.0  ;;  %v1779_v30 = vsel %vm1774_vm5, %v6962_v0, 0.0  ;;  %v1786_v0 = vsel %vm1774_vm5, %v6976_v25, 0.0 }
 0x53d   : > { %v1899_v51 = vpop.permute.xlu1 %1898  ;;  %v1907_v40 = vpop.permute.xlu0 %1906 }
 0x53e   : > { %v1955_v16 = vmul.f32 %v1899_v51, %v6328_v34 }
 0x541   : > { %v1903_v50 = vpop.permute.xlu1 %1902  ;;  %v1915_v15 = vpop.permute.xlu0 %1914 }
 0x542   : > { %v1956_v46 = vmul.f32 %v1903_v50, %v6326_v3  ;;  %v1971_v50 = vadd.f32 %v1955_v16, %v7004_v55 }
 0x544   : > { %v1972_v38 = vadd.f32 %v1956_v46, %v1876_v1 }
 0x545   : > { %v1911_v2 = vpop.permute.xlu1 %1910  ;;  %v7057_v18 = vpop.permute.xlu0 %1922 }
 0x549   : > { %v1919_v26 = vpop.permute.xlu1 %1918  ;;  %v7059_v47 = vpop.permute.xlu0 %1930 }
 0x54a   : > { %8748 = vst [vmem:[#allocation64_spill] sm:$0xff] %v7059_v47  ;;  %v1958_v47 = vmul.f32 %v1911_v2, %v6336_v6  ;;  %v1957_v2 = vmul.f32 %v1907_v40, %v6338_v5 }
 0x54d   : > { %v1927_v14 = vpop.permute.xlu1 %1926  ;;  %v7061_v24 = vpop.permute.xlu0 %1938 }
 0x54e   : > { %8749 = vst [vmem:[#allocation65_spill] sm:$0xff] %v7061_v24 }
 0x551   : > { %v1935_v31 = vpop.permute.xlu1 %1934  ;;  %v7063_v20 = vpop.permute.xlu0 %1946 }
 0x552   : > { %8750 = vst [vmem:[#allocation66_spill] sm:$0xff] %v7063_v20 }
 0x555   : > { %v1943_v62 = vpop.permute.xlu1 %1942 }
 0x556   : > { %v1987_v63 = vpop.permute.xlu0 %1986 }
 0x557   : > { %v2049_v27 = vmul.f32 %v1987_v63, %v1777_v41 }
 0x559   : > { %v7071_v33 = vadd.f32 %v2049_v27, %v1969_v49   ;;  %v7073_v24 = vpop.permute.xlu1 %1950  ;;  %v1782_v49 = vsel %vm1774_vm5, %v6966_v29, 0.0  ;;  %v1960_v27 = vmul.f32 %v1919_v26, %v6346_v44  ;;  %v1962_v26 = vmul.f32 %v1927_v14, %v6356_v35 }
 0x55a   : > { %v1999_v20 = vpop.permute.xlu0 %1998  ;;  %v1959_v14 = vmul.f32 %v1915_v15, %v6348_v37 }
 0x55b   : > { %v8751_v22 = vmov %v7071_v33  ;;  %v2052_v52 = vmul.f32 %v1999_v20, %v1780_v54  ;;  %v1970_v33 = vadd.f32 %v1954_v28, %v6997_v60  ;;  %v1974_v20 = vadd.f32 %v1958_v47, %v7012_v36 }
 0x55c   : > { %v1976_v36 = vadd.f32 %v1960_v27, %v7021_v12  ;;  %v1781_v28 = vsel %vm1774_vm5, %v6968_v4, 0.0  ;;  %v1973_v12 = vadd.f32 %v1957_v2, %v7010_v32  ;;  %v1978_v40 = vadd.f32 %v1962_v26, %v7031_v43  ;;  %v8755_v2 = vld [vmem:[#allocation44_spill] sm:$0xff] }
 0x55d   : > { %v7083_v63 = vadd.f32 %v2052_v52, %v1972_v38   ;;  %v1784_v38 = vsel %vm1774_vm5, %v6972_v58, 0.0  ;;  %v1739_v4 = vsel %vm1723_vm4, %v6941_v39, 0.0  ;;  %v1788_v27 = vsel %vm1774_vm5, %v6980_v21, 0.0 }
 0x55e   : > { %v1991_v1 = vpop.permute.xlu1 %1990  ;;  %v2007_v46 = vpop.permute.xlu0 %2006  ;;  %v1783_v32 = vsel %vm1774_vm5, %v6974_v53, 0.0  ;;  %v1741_v21 = vsel %vm1723_vm4, %v6947_v8, 0.0  ;;  %v1886_v53 = vmul.f32 %v7046_v56, %v1739_v4  ;;  %v1968_v8 = vmul.f32 %v7073_v24, %v8755_v2  ;;  %v8761_v24 = vld [vmem:[#allocation65_spill] sm:$0xff] }
 0x55f   : > { %v2050_v41 = vmul.f32 %v1991_v1, %v1778_v11  ;;  %v2054_v19 = vmul.f32 %v2007_v46, %v1782_v49  ;;  %v1964_v11 = vmul.f32 %v1935_v31, %v6366_v9  ;;  %v1975_v31 = vadd.f32 %v1959_v14, %v7019_v45 }
 0x560   : > { %v1961_v1 = vmul.f32 %v7057_v18, %v6358_v42  ;;  %v1790_v45 = vsel %vm1774_vm5, %v6984_v7, 0.0  ;;  %v8756_v7 = vld [vmem:[#allocation62_spill] sm:$0xff] }
 0x561   : > { %v7098_v29 = vadd.f32 %v2050_v41, %v1970_v33   ;;  %v7100_v60 = vadd.f32 %v2054_v19, %v1974_v20   ;;  %v1980_v46 = vadd.f32 %v1964_v11, %v7041_v23  ;;  %v1966_v20 = vmul.f32 %v1943_v62, %v6378_v48  ;;  %v8754_v62 = vld [vmem:[#allocation64_spill] sm:$0xff] }
 0x562   : > { %v1995_v47 = vpop.permute.xlu1 %1994  ;;  %v2015_v13 = vpop.permute.xlu0 %2014  ;;  %v1785_v23 = vsel %vm1774_vm5, %v6978_v17, 0.0  ;;  %v1977_v18 = vadd.f32 %v1961_v1, %v7029_v57  ;;  %v8758_v57 = vld [vmem:[#allocation58_spill] sm:$0xff] }
 0x563   : > { %v8752_v51 = vmov %v7100_v60  ;;  %v2051_v54 = vmul.f32 %v1995_v47, %v1779_v30  ;;  %v2056_v58 = vmul.f32 %v2015_v13, %v1784_v38  ;;  %v1963_v60 = vmul.f32 %v8754_v62, %v6368_v10 }
 0x564   : > { %v1888_v13 = vmul.f32 %v8756_v7, %v1741_v21 }
 0x565   : > { %v7112_v52 = vadd.f32 %v2051_v54, %v1971_v50   ;;  %v7114_v38 = vadd.f32 %v2056_v58, %v1976_v36   ;;  %v1982_v50 = vadd.f32 %v1966_v20, %v1886_v53  ;;  %v8757_v54 = vld [vmem:[#allocation56_spill] sm:$0xff]  ;;  %v8764_v20 = vld [vmem:[#allocation45_spill] sm:$0xff] }
 0x566   : > { %v2003_v49 = vpop.permute.xlu1 %2002  ;;  %v2023_v33 = vpop.permute.xlu0 %2022  ;;  %v1787_v17 = vsel %vm1774_vm5, %v8757_v54, 0.0  ;;  %v1984_v11 = vadd.f32 %v1968_v8, %v1888_v13 }
 0x567   : > { %v8753_v55 = vmov %v7112_v52  ;;  %v2053_v16 = vmul.f32 %v2003_v49, %v1781_v28  ;;  %v2058_v25 = vmul.f32 %v2023_v33, %v1786_v0  ;;  %v1792_v0 = vsel %vm1774_vm5, %v8758_v57, 0.0  ;;  %v8759_v28 = vld [vmem:[#allocation60_spill] sm:$0xff] }
 0x568   : > { %v1979_v52 = vadd.f32 %v1963_v60, %v8759_v28 }
 0x569   : > { %v2069_v15 = vadd.f32 %v2053_v16, %v1973_v12   ;;  %v2074_v43 = vadd.f32 %v2058_v25, %v1978_v40   ;;  %v8760_v12 = vld [vmem:[#allocation43_spill] sm:$0xff] }
 0x56a   : > { %v2011_v39 = vpop.permute.xlu1 %2010  ;;  %v2031_v41 = vpop.permute.xlu0 %2030  ;;  %v1965_v40 = vmul.f32 %v8761_v24, %v8760_v12 }
 0x56b   : > { %v2055_v19 = vmul.f32 %v2011_v39, %v1783_v32  ;;  %v2060_v30 = vmul.f32 %v2031_v41, %v1788_v27  ;;  %v8762_v27 = vld [vmem:[#allocation57_spill] sm:$0xff]  ;;  %v8765_v39 = vld [vmem:[#allocation66_spill] sm:$0xff]  ;;  %v8769_v24 = vmov %v2074_v43 }
 0x56c   : > { %v1789_v32 = vsel %vm1774_vm5, %v8762_v27, 0.0  ;;  %v1967_v41 = vmul.f32 %v8765_v39, %v8764_v20  ;;  %v8773_v39 = vmov %v7098_v29 }
 0x56d   : > { %v2071_v14 = vadd.f32 %v2055_v19, %v1975_v31   ;;  %v2076_v49 = vadd.f32 %v2060_v30, %v1980_v46   ;;  %v8763_v31 = vld [vmem:[#allocation61_spill] sm:$0xff]  ;;  %v8766_v30 = vld [vmem:[#allocation59_spill] sm:$0xff] }
 0x56e   : > { %v2019_v56 = vpop.permute.xlu1 %2018  ;;  %v2039_v36 = vpop.permute.xlu0 %2038  ;;  %v1981_v1 = vadd.f32 %v1965_v40, %v8763_v31  ;;  %v1791_v21 = vsel %vm1774_vm5, %v8766_v30, 0.0 }
 0x56f   : > { %v2057_v26 = vmul.f32 %v2019_v56, %v1785_v23  ;;  %v2062_v47 = vmul.f32 %v2039_v36, %v1790_v45  ;;  %v8767_v23 = vld [vmem:[#allocation63_spill] sm:$0xff] }
 0x571   : > { %v2073_v36 = vadd.f32 %v2057_v26, %v1977_v18   ;;  %v2078_v58 = vadd.f32 %v2062_v47, %v1982_v50   ;;  %v1983_v18 = vadd.f32 %v1967_v41, %v8767_v23  ;;  %v8771_v47 = vmov %v7083_v63 }
 0x572   : > { %v2027_v33 = vpop.permute.xlu1 %2026  ;;  %v2047_v16 = vpop.permute.xlu0 %2046 }
 0x573   : > { %v2059_v25 = vmul.f32 %v2027_v33, %v1787_v17  ;;  %v2064_v4 = vmul.f32 %v2047_v16, %v1792_v0  ;;  %v8768_v60 = vmov %v2078_v58 }
 0x575   : > { %v2075_v45 = vadd.f32 %v2059_v25, %v1979_v52   ;;  %v2080_v2 = vadd.f32 %v2064_v4, %v1984_v11   ;;  %v8770_v4 = vmov %v8752_v51 }
 0x576   : > { %v2035_v46 = vpop.permute.xlu1 %2034 }
 0x577   : > { %v2061_v19 = vmul.f32 %v2035_v46, %v1789_v32  ;;  %v8774_v46 = vmov %v8751_v22 }
 0x579   : > { %v2077_v52 = vadd.f32 %v2061_v19, %v1981_v1  }
 0x57a   : > { %v2043_v53 = vpop.permute.xlu1 %2042 }
 0x57b   : > { %v2063_v62 = vmul.f32 %v2043_v53, %v1791_v21  ;;  %v8772_v53 = vmov %v8753_v55 }
 0x57d   : > { %v2079_v33 = vadd.f32 %v2063_v62, %v1983_v18  }
 0x57e PF: > { %v5537_v22 = vmov %v5536_v53   ;;  %v5541_v29 = vmov %v5540_v39   ;;  %v5545_v43 = vmov %v5544_v46   ;;  %v8775_v53 = vmov %v5484_v2  ;;  %v5544_v46 = vphi %v5480_v46, %v8774_v46   ;;  %v5540_v39 = vphi %v5476_v39, %v8773_v39   ;;  %v5536_v53 = vphi %v5472_v53, %v8772_v53   ;;  %v5532_v47 = vphi %v5468_v47, %v8771_v47   ;;  %v5528_v15 = vphi %v5464_v15, %v2069_v15   ;;  %v5524_v4 = vphi %v5460_v4, %v8770_v4   ;;  %v5520_v14 = vphi %v5456_v14, %v2071_v14   ;;  %v5516_v38 = vphi %v5452_v38, %v7114_v38   ;;  %v5512_v36 = vphi %v5448_v36, %v2073_v36   ;;  %v5508_v24 = vphi %v5444_v24, %v8769_v24   ;;  %v5504_v45 = vphi %v5440_v45, %v2075_v45   ;;  %v5500_v49 = vphi %v5436_v49, %v2076_v49   ;;  %v5496_v52 = vphi %v5432_v52, %v2077_v52   ;;  %v5492_v60 = vphi %v5428_v60, %v8768_v60   ;;  %v5488_v33 = vphi %v5424_v33, %v2079_v33   ;;  %v5484_v2 = vphi %v5420_v2, %v2080_v2  }
 0x57f   : > { %v8776_v39 = vmov %v5488_v33  ;;  %v8777_v46 = vmov %v5492_v60  ;;  %v8778_v58 = vmov %v5496_v52  ;;  %v8779_v54 = vmov %v5500_v49 }
 0x580   : > { %v8780_v55 = vmov %v5504_v45  ;;  %v8781_v8 = vmov %v5508_v24  ;;  %v8782_v41 = vmov %v5512_v36  ;;  %v8783_v63 = vmov %v5516_v38 }
 0x581   : > { %v8784_v51 = vmov %v5520_v14  ;;  %v8785_v0 = vmov %v5524_v4  ;;  %v8786_v50 = vmov %v5528_v15  ;;  %v8787_v56 = vmov %v5532_v47 }
 0x582   : > { %v8788_v12 = vmov %v5537_v22  ;;  %v8789_v40 = vmov %v5541_v29  ;;  %v8790_v1 = vmov %v5545_v43 }
 0x583 PF: > { %2115 = sbr.rel (%p1274_p0) target bundleno = 2025 (0x7e9), region = 100  ;;  %s3873_s23 = sadd.s32 (!%p1274_p0), 4294967294, %s8935_s15  ;;  %v7314_v15 = vmov (!%p1274_p0), 0   ;;  %v7316_v38 = vmov (!%p1274_p0), 0   ;;  %v7318_v14 = vmov (!%p1274_p0), 0   ;;  %v7320_v49 = vmov (!%p1274_p0), 0   ;;  %v5608_v1 = vphi %v6423_v1, %v8790_v1   ;;  %v5604_v40 = vphi %v6421_v40, %v8789_v40   ;;  %v5600_v12 = vphi %v6419_v12, %v8788_v12   ;;  %v5596_v56 = vphi %v6417_v56, %v8787_v56   ;;  %v5592_v50 = vphi %v6415_v50, %v8786_v50   ;;  %v5588_v0 = vphi %v6413_v0, %v8785_v0   ;;  %v5584_v51 = vphi %v6411_v51, %v8784_v51   ;;  %v5580_v63 = vphi %v6409_v63, %v8783_v63   ;;  %v5576_v41 = vphi %v6407_v41, %v8782_v41   ;;  %v5572_v8 = vphi %v6405_v8, %v8781_v8   ;;  %v5568_v55 = vphi %v6403_v55, %v8780_v55   ;;  %v5564_v54 = vphi %v6401_v54, %v8779_v54   ;;  %v5560_v58 = vphi %v6399_v58, %v8778_v58   ;;  %v5556_v46 = vphi %v6397_v46, %v8777_v46   ;;  %v5552_v39 = vphi %v6395_v39, %v8776_v39   ;;  %v5548_v53 = vphi %v6393_v53, %v8775_v53  }
 0x584   : > { %p7306_p11 = scmp.lt.s32.totalorder (!%p1274_p0), %s3873_s23, 1  ;;  %p7310_p12 = scmp.ge.s32.totalorder (!%p1274_p0), %s3873_s23, 1  ;;  %v7322_v45 = vmov (!%p1274_p0), 0   ;;  %v7324_v63 = vmov (!%p1274_p0), 0   ;;  %v7326_v51 = vmov (!%p1274_p0), 0   ;;  %v7328_v55 = vmov (!%p1274_p0), 0  }
 0x585   : > { %v7330_v60 = vmov (!%p1274_p0), 0   ;;  %v7332_v50 = vmov (!%p1274_p0), 0   ;;  %v7334_v2 = vmov (!%p1274_p0), 0   ;;  %v7336_v8 = vmov (!%p1274_p0), 0  }
 0x586   : > { %v7338_v56 = vmov (!%p1274_p0), 0   ;;  %v7340_v36 = vmov (!%p1274_p0), 0   ;;  %v7342_v26 = vmov (!%p1274_p0), 0   ;;  %v7344_v47 = vmov (!%p1274_p0), 0  }
 0x58a   : > { %2120 = sbr.rel (%p7310_p12) target bundleno = 1719 (0x6b7), region = 104 }
 0x591   : > { %s5818_s15 = smov 4   ;;  %v8793_v7 = vld [vmem:[#allocation42_spill] sm:$0xff]  ;;  %v5819_v13 = vmov 0   ;;  %v8794_v54 = vld [vmem:[#allocation43_spill] sm:$0xff]  ;;  %v8795_v17 = vld [vmem:[#allocation44_spill] sm:$0xff]  ;;  %s5820_s29 = smov 124  }
 0x592   : > { %2125 = vrot.lane.b32.xlu1 %v6328_v34, %s5818_s15  ;;  %2121 = vrot.lane.b32.xlu0 %v8793_v7, %s5818_s15  ;;  %v8796_v58 = vld [vmem:[#allocation45_spill] sm:$0xff]  ;;  %v8797_v57 = vld [vmem:[#allocation26_spill] sm:$0xff]  ;;  %v8799_v28 = vld [vmem:[#allocation27_spill] sm:$0xff]  ;;  %v5821_v46 = vmov 1   ;;  %v5822_v53 = vmov 2   ;;  %vm2153_vm6 = vcmp.ge.s32.totalorder %v6146_v59, 4 }
 0x593   : > { %4881 = vset.pattern.permute.xlu1 %v5819_v13  ;;  %4880 = vset.pattern.permute.xlu0 %v5819_v13  ;;  %v8798_v0 = vld [vmem:[#allocation25_spill] sm:$0xff]  ;;  %v8800_v52 = vld [vmem:[#allocation28_spill] sm:$0xff]  ;;  %v8802_v24 = vld [vmem:[#allocation30_spill] sm:$0xff]  ;;  %vm2204_vm7 = vcmp.lt.s32.totalorder %v6146_v59, 30 }
 0x594   : > { %v8801_v12 = vld [vmem:[#allocation29_spill] sm:$0xff]  ;;  %v8803_v40 = vld [vmem:[#allocation31_spill] sm:$0xff]  ;;  %v8804_v11 = vld [vmem:[#allocation32_spill] sm:$0xff] }
 0x595   : > { %v8805_v33 = vld [vmem:[#allocation33_spill] sm:$0xff]  ;;  %v8806_v16 = vld [vmem:[#allocation34_spill] sm:$0xff]  ;;  %v8807_v25 = vld [vmem:[#allocation35_spill] sm:$0xff] }
 0x596   : > { %2127 = vrot.lane.b32.xlu1 %v6326_v3, %s5818_s15  ;;  %2123 = vrot.lane.b32.xlu0 %v6316_v61, %s5818_s15  ;;  %v8808_v4 = vld [vmem:[#allocation36_spill] sm:$0xff]  ;;  %v8809_v27 = vld [vmem:[#allocation37_spill] sm:$0xff]  ;;  %v8810_v32 = vld [vmem:[#allocation38_spill] sm:$0xff] }
 0x597   : > { %v8811_v31 = vld [vmem:[#allocation39_spill] sm:$0xff]  ;;  %v8812_v1 = vld [vmem:[#allocation40_spill] sm:$0xff] }
 0x59a   : > { %2131 = vrot.lane.b32.xlu1 %v6336_v6, %s5818_s15  ;;  %2129 = vrot.lane.b32.xlu0 %v6338_v5, %s5818_s15 }
 0x59e   : > { %2135 = vrot.lane.b32.xlu1 %v6346_v44, %s5818_s15  ;;  %2133 = vrot.lane.b32.xlu0 %v6348_v37, %s5818_s15 }
 0x5a2   : > { %2139 = vrot.lane.b32.xlu1 %v6356_v35, %s5818_s15  ;;  %2137 = vrot.lane.b32.xlu0 %v6358_v42, %s5818_s15 }
 0x5a6   : > { %2143 = vrot.lane.b32.xlu1 %v6366_v9, %s5818_s15  ;;  %2141 = vrot.lane.b32.xlu0 %v6368_v10, %s5818_s15 }
 0x5aa   : > { %2147 = vrot.lane.b32.xlu1 %v6378_v48, %s5818_s15  ;;  %2145 = vrot.lane.b32.xlu0 %v8794_v54, %s5818_s15 }
 0x5ae   : > { %2151 = vrot.lane.b32.xlu1 %v8795_v17, %s5818_s15  ;;  %2149 = vrot.lane.b32.xlu0 %v8796_v58, %s5818_s15 }
 0x5b2   : > { %2174 = vrot.lane.b32.xlu1 %v6316_v61, %s5820_s29  ;;  %2172 = vrot.lane.b32.xlu0 %v8793_v7, %s5820_s29 }
 0x5b6   : > { %2178 = vrot.lane.b32.xlu1 %v6326_v3, %s5820_s29  ;;  %2176 = vrot.lane.b32.xlu0 %v6328_v34, %s5820_s29 }
 0x5ba   : > { %2182 = vrot.lane.b32.xlu1 %v6336_v6, %s5820_s29  ;;  %2180 = vrot.lane.b32.xlu0 %v6338_v5, %s5820_s29 }
 0x5be   : > { %2186 = vrot.lane.b32.xlu1 %v6346_v44, %s5820_s29  ;;  %2184 = vrot.lane.b32.xlu0 %v6348_v37, %s5820_s29 }
 0x5c2   : > { %2190 = vrot.lane.b32.xlu1 %v6356_v35, %s5820_s29  ;;  %2188 = vrot.lane.b32.xlu0 %v6358_v42, %s5820_s29 }
 0x5c6   : > { %2194 = vrot.lane.b32.xlu1 %v6366_v9, %s5820_s29  ;;  %2192 = vrot.lane.b32.xlu0 %v6368_v10, %s5820_s29 }
 0x5ca   : > { %2198 = vrot.lane.b32.xlu1 %v6378_v48, %s5820_s29  ;;  %2196 = vrot.lane.b32.xlu0 %v8794_v54, %s5820_s29 }
 0x5ce   : > { %2202 = vrot.lane.b32.xlu1 %v8795_v17, %s5820_s29  ;;  %2200 = vrot.lane.b32.xlu0 %v8796_v58, %s5820_s29 }
 0x5d2   : > { %2230 = vperm.xlu1 %4881, %v8797_v57   ;;  %2225 = vperm.xlu0 %4880, %v8798_v0  }
 0x5d6   : > { %2235 = vperm.xlu1 %4881, %v8799_v28   ;;  %2240 = vperm.xlu0 %4880, %v8800_v52  }
 0x5da   : > { %2245 = vperm.xlu1 %4881, %v8801_v12   ;;  %2250 = vperm.xlu0 %4880, %v8802_v24  }
 0x5de   : > { %2255 = vperm.xlu1 %4881, %v8803_v40   ;;  %2260 = vperm.xlu0 %4880, %v8804_v11  }
 0x5e2   : > { %2265 = vperm.xlu1 %4881, %v8805_v33   ;;  %2270 = vperm.xlu0 %4880, %v8806_v16  }
 0x5e6   : > { %2275 = vperm.xlu1 %4881, %v8807_v25   ;;  %2280 = vperm.xlu0 %4880, %v8808_v4  }
 0x5ea   : > { %2285 = vperm.xlu1 %4881, %v8809_v27   ;;  %2290 = vperm.xlu0 %4880, %v8810_v32  }
 0x5ee   : > { %2295 = vperm.xlu1 %4881, %v8811_v31   ;;  %2300 = vperm.xlu0 %4880, %v8812_v1  }
 0x5f2   : > { %4882 = vset.pattern.permute.xlu1 %v5821_v46  ;;  %4883 = vset.pattern.permute.xlu0 %v5821_v46 }
 0x5f3   : > { %2320 = vperm.xlu1 %4882, %v8798_v0   ;;  %2324 = vperm.xlu0 %4883, %v8797_v57  }
 0x5f7   : > { %2328 = vperm.xlu1 %4882, %v8799_v28   ;;  %2336 = vperm.xlu0 %4883, %v8801_v12  }
 0x5fb   : > { %2332 = vperm.xlu1 %4882, %v8800_v52   ;;  %2344 = vperm.xlu0 %4883, %v8803_v40  }
 0x5ff   : > { %2340 = vperm.xlu1 %4882, %v8802_v24   ;;  %2352 = vperm.xlu0 %4883, %v8805_v33  }
 0x603   : > { %2348 = vperm.xlu1 %4882, %v8804_v11   ;;  %2360 = vperm.xlu0 %4883, %v8807_v25  }
 0x604   : > { %v7406_v20 = vpop.permute.xlu1 %2125  ;;  %v2122_v39 = vpop.permute.xlu0 %2121 }
 0x607   : > { %2356 = vperm.xlu1 %4882, %v8806_v16   ;;  %2368 = vperm.xlu0 %4883, %v8809_v27  }
 0x608   : > { %v2128_v41 = vpop.permute.xlu1 %2127  ;;  %v2124_v19 = vpop.permute.xlu0 %2123 }
 0x60b   : > { %2364 = vperm.xlu1 %4882, %v8808_v4   ;;  %2376 = vperm.xlu0 %4883, %v8811_v31  }
 0x60c   : > { %v2132_v30 = vpop.permute.xlu1 %2131  ;;  %v2130_v21 = vpop.permute.xlu0 %2129 }
 0x60d   : > { %v2160_v46 = vsel %vm2153_vm6, %v2130_v21, 0.0 }
 0x60f   : > { %2372 = vperm.xlu1 %4882, %v8810_v32   ;;  %4884 = vset.pattern.permute.xlu0 %v5822_v53 }
 0x610   : > { %v7413_v23 = vpop.permute.xlu1 %2135  ;;  %2416 = vperm.xlu0 %4884, %v8798_v0   ;;  %v2134_v18 = vpop.permute.xlu0 %2133 }
 0x613   : > { %2380 = vperm.xlu1 %4882, %v8812_v1  }
 0x614   : > { %v7417_v62 = vpop.permute.xlu1 %2139  ;;  %2428 = vperm.xlu0 %4884, %v8800_v52   ;;  %v7420_v22 = vpop.permute.xlu0 %2137  ;;  %v2156_v52 = vsel %vm2153_vm6, %v2122_v39, 0.0 }
 0x615   : > { %v2165_v21 = vsel %vm2153_vm6, %v7417_v62, 0.0 }
 0x617   : > { %4885 = vset.pattern.permute.xlu1 %v5822_v53 }
 0x618   : > { %2420 = vperm.xlu1 %4885, %v8797_v57   ;;  %v7423_v29 = vpop.permute.xlu1 %2143  ;;  %2436 = vperm.xlu0 %4884, %v8802_v24   ;;  %v7426_v43 = vpop.permute.xlu0 %2141 }
 0x61c   : > { %2424 = vperm.xlu1 %4885, %v8799_v28   ;;  %v7429_v15 = vpop.permute.xlu1 %2147  ;;  %2444 = vperm.xlu0 %4884, %v8804_v11   ;;  %v7432_v38 = vpop.permute.xlu0 %2145 }
 0x620   : > { %2432 = vperm.xlu1 %4885, %v8801_v12   ;;  %v7435_v14 = vpop.permute.xlu1 %2151  ;;  %2452 = vperm.xlu0 %4884, %v8806_v16   ;;  %v7438_v49 = vpop.permute.xlu0 %2149  ;;  %v2157_v12 = vsel %vm2153_vm6, %v2124_v19, 0.0  ;;  %v2158_v16 = vsel %vm2153_vm6, %v7406_v20, 0.0  ;;  %v2163_v20 = vsel %vm2153_vm6, %v7413_v23, 0.0 }
 0x624   : > { %2440 = vperm.xlu1 %4885, %v8803_v40   ;;  %v7441_v45 = vpop.permute.xlu1 %2174  ;;  %2460 = vperm.xlu0 %4884, %v8808_v4   ;;  %v7444_v63 = vpop.permute.xlu0 %2172 }
 0x628   : > { %2448 = vperm.xlu1 %4885, %v8805_v33   ;;  %2468 = vperm.xlu0 %4884, %v8810_v32   ;;  %v7448_v51 = vpop.permute.xlu1 %2178  ;;  %v7450_v55 = vpop.permute.xlu0 %2176 }
 0x62c   : > { %2456 = vperm.xlu1 %4885, %v8807_v25   ;;  %2476 = vperm.xlu0 %4884, %v8812_v1   ;;  %v7454_v60 = vpop.permute.xlu1 %2182  ;;  %v7456_v50 = vpop.permute.xlu0 %2180  ;;  %v2159_v25 = vsel %vm2153_vm6, %v2128_v41, 0.0  ;;  %v2161_v1 = vsel %vm2153_vm6, %v2132_v30, 0.0  ;;  %v2162_v41 = vsel %vm2153_vm6, %v2134_v18, 0.0  ;;  %v2167_v18 = vsel %vm2153_vm6, %v7423_v29, 0.0 }
 0x62d   : > { %v2170_v29 = vsel %vm2153_vm6, %v7438_v49, 0.0 }
 0x630   : > { %2464 = vperm.xlu1 %4885, %v8809_v27   ;;  %v7460_v2 = vpop.permute.xlu1 %2186  ;;  %v7462_v8 = vpop.permute.xlu0 %2184 }
 0x634   : > { %2472 = vperm.xlu1 %4885, %v8811_v31   ;;  %v7464_v56 = vpop.permute.xlu1 %2190  ;;  %v7466_v36 = vpop.permute.xlu0 %2188 }
 0x638   : > { %v7468_v26 = vpop.permute.xlu1 %2194  ;;  %v7470_v47 = vpop.permute.xlu0 %2192 }
 0x639   : > { %8813 = vst [vmem:[#allocation67_spill] sm:$0xff] %v7470_v47 }
 0x63c   : > { %v7472_v13 = vpop.permute.xlu1 %2198  ;;  %v7474_v57 = vpop.permute.xlu0 %2196 }
 0x63d   : > { %8814 = vst [vmem:[#allocation68_spill] sm:$0xff] %v7474_v57 }
 0x640   : > { %v7476_v0 = vpop.permute.xlu1 %2202  ;;  %v7478_v28 = vpop.permute.xlu0 %2200 }
 0x641   : > { %8815 = vst [vmem:[#allocation69_spill] sm:$0xff] %v7476_v0  ;;  %8816 = vst [vmem:[#allocation70_spill] sm:$0xff] %v7478_v28 }
 0x651   : > { %v2231_v24 = vpop.permute.xlu1 %2230  ;;  %v2226_v40 = vpop.permute.xlu0 %2225 }
 0x652   : > { %v7485_v11 = vmul.f32 %v2231_v24, %v2157_v12  ;;  %v2303_v33 = vmul.f32 %v2226_v40, %v2156_v52 }
 0x655   : > { %v2236_v4 = vpop.permute.xlu1 %2235  ;;  %v2241_v27 = vpop.permute.xlu0 %2240 }
 0x656   : > { %v7492_v32 = vmul.f32 %v2236_v4, %v2158_v16  ;;  %v2306_v31 = vmul.f32 %v2241_v27, %v2159_v25  ;;  %v2164_v16 = vsel %vm2153_vm6, %v7420_v22, 0.0  ;;  %v2168_v22 = vsel %vm2153_vm6, %v7432_v38, 0.0 }
 0x659   : > { %v2246_v39 = vpop.permute.xlu1 %2245  ;;  %v2251_v19 = vpop.permute.xlu0 %2250 }
 0x65a   : > { %v7498_v53 = vmul.f32 %v2246_v39, %v2160_v46  ;;  %v7500_v52 = vmul.f32 %v2251_v19, %v2161_v1  ;;  %v2166_v1 = vsel %vm2153_vm6, %v7426_v43, 0.0 }
 0x65d   : > { %v2256_v12 = vpop.permute.xlu1 %2255  ;;  %v2261_v24 = vpop.permute.xlu0 %2260 }
 0x65e   : > { %v7507_v40 = vmul.f32 %v2256_v12, %v2162_v41  ;;  %v7509_v30 = vmul.f32 %v2261_v24, %v2163_v20 }
 0x661   : > { %v2266_v25 = vpop.permute.xlu1 %2265  ;;  %v2271_v4 = vpop.permute.xlu0 %2270 }
 0x662   : > { %v7517_v23 = vmul.f32 %v2266_v25, %v2164_v16  ;;  %v7519_v27 = vmul.f32 %v2271_v4, %v2165_v21 }
 0x665   : > { %v2276_v46 = vpop.permute.xlu1 %2275  ;;  %v2281_v62 = vpop.permute.xlu0 %2280 }
 0x666   : > { %v7527_v39 = vmul.f32 %v2276_v46, %v2166_v1  ;;  %v7529_v19 = vmul.f32 %v2281_v62, %v2167_v18 }
 0x668   : > { %8817 = vst [vmem:[#allocation71_spill] sm:$0xff] %v7527_v39 }
 0x669   : > { %v2286_v20 = vpop.permute.xlu1 %2285  ;;  %v7534_v41 = vpop.permute.xlu0 %2290 }
 0x66a   : > { %v7536_v12 = vmul.f32 %v2286_v20, %v2168_v22 }
 0x66c   : > { %8818 = vst [vmem:[#allocation72_spill] sm:$0xff] %v7536_v12 }
 0x66d   : > { %v2296_v43 = vpop.permute.xlu1 %2295  ;;  %v7541_v24 = vpop.permute.xlu0 %2300 }
 0x66e   : > { %8819 = vst [vmem:[#allocation73_spill] sm:$0xff] %v7541_v24  ;;  %v7543_v21 = vmul.f32 %v2296_v43, %v2170_v29 }
 0x670   : > { %8820 = vst [vmem:[#allocation74_spill] sm:$0xff] %v7543_v21  ;;  %v2207_v21 = vsel %vm2204_vm7, %v7444_v63, 0.0 }
 0x672   : > { %v2321_v16 = vpop.permute.xlu1 %2320  ;;  %v2325_v25 = vpop.permute.xlu0 %2324 }
 0x673   : > { %v2383_v29 = vmul.f32 %v2321_v16, %v8793_v7  ;;  %v2210_v7 = vsel %vm2204_vm7, %v7448_v51, 0.0  ;;  %v2384_v16 = vmul.f32 %v2325_v25, %v6316_v61 }
 0x675   : > { %v2399_v54 = vadd.f32 %v2383_v29, %v2303_v33  ;;  %v2208_v33 = vsel %vm2204_vm7, %v7441_v45, 0.0  ;;  %v2214_v45 = vsel %vm2204_vm7, %v7460_v2, 0.0 }
 0x676   : > { %v2329_v4 = vpop.permute.xlu1 %2328  ;;  %v2337_v18 = vpop.permute.xlu0 %2336 }
 0x677   : > { %v2385_v51 = vmul.f32 %v2329_v4, %v6328_v34  ;;  %v2387_v4 = vmul.f32 %v2337_v18, %v6338_v5 }
 0x67a   : > { %v2333_v1 = vpop.permute.xlu1 %2332  ;;  %v2345_v38 = vpop.permute.xlu0 %2344 }
 0x67b   : > { %v2386_v39 = vmul.f32 %v2333_v1, %v6326_v3 }
 0x67d   : > { %v2402_v24 = vadd.f32 %v2386_v39, %v2306_v31 }
 0x67e   : > { %v2341_v46 = vpop.permute.xlu1 %2340  ;;  %v7545_v62 = vpop.permute.xlu0 %2352 }
 0x67f   : > { %v2388_v17 = vmul.f32 %v2341_v46, %v6336_v6 }
 0x682   : > { %v2349_v22 = vpop.permute.xlu1 %2348  ;;  %v7547_v20 = vpop.permute.xlu0 %2360 }
 0x686   : > { %v2357_v28 = vpop.permute.xlu1 %2356  ;;  %v7549_v58 = vpop.permute.xlu0 %2368 }
 0x687   : > { %8821 = vst [vmem:[#allocation75_spill] sm:$0xff] %v7549_v58 }
 0x68a   : > { %v2365_v49 = vpop.permute.xlu1 %2364  ;;  %v7551_v12 = vpop.permute.xlu0 %2376 }
 0x68b   : > { %8822 = vst [vmem:[#allocation76_spill] sm:$0xff] %v7551_v12 }
 0x68e   : > { %v2373_v43 = vpop.permute.xlu1 %2372 }
 0x68f   : > { %v2417_v57 = vpop.permute.xlu0 %2416 }
 0x690   : > { %v2479_v0 = vmul.f32 %v2417_v57, %v2207_v21  ;;  %v2390_v21 = vmul.f32 %v2349_v22, %v6346_v44 }
 0x692   : > { %v7559_v47 = vadd.f32 %v2479_v0, %v2399_v54   ;;  %v7561_v58 = vpop.permute.xlu1 %2380  ;;  %v2212_v54 = vsel %vm2204_vm7, %v7454_v60, 0.0  ;;  %v2400_v0 = vadd.f32 %v2384_v16, %v7485_v11  ;;  %v2209_v60 = vsel %vm2204_vm7, %v7450_v55, 0.0 }
 0x693   : > { %v2429_v12 = vpop.permute.xlu0 %2428  ;;  %v2401_v11 = vadd.f32 %v2385_v51, %v7492_v32  ;;  %v2216_v55 = vsel %vm2204_vm7, %v7464_v56, 0.0  ;;  %v2211_v16 = vsel %vm2204_vm7, %v7456_v50, 0.0  ;;  %v2169_v50 = vsel %vm2153_vm6, %v7429_v15, 0.0 }
 0x694   : > { %v2482_v63 = vmul.f32 %v2429_v12, %v2210_v7  ;;  %v2404_v12 = vadd.f32 %v2388_v17, %v7500_v52  ;;  %v2406_v17 = vadd.f32 %v2390_v21, %v7509_v30  ;;  %v2392_v52 = vmul.f32 %v2357_v28, %v6356_v35 }
 0x695   : > { %v2403_v30 = vadd.f32 %v2387_v4, %v7498_v53  ;;  %v2389_v28 = vmul.f32 %v2345_v38, %v6348_v37  ;;  %v2218_v21 = vsel %vm2204_vm7, %v7468_v26, 0.0  ;;  %v2213_v53 = vsel %vm2204_vm7, %v7462_v8, 0.0  ;;  %v8824_v4 = vld [vmem:[#allocation44_spill] sm:$0xff] }
 0x696   : > { %v7571_v57 = vadd.f32 %v2482_v63, %v2402_v24   ;;  %v2408_v18 = vadd.f32 %v2392_v52, %v7519_v27  ;;  %v2391_v38 = vmul.f32 %v7545_v62, %v6358_v42  ;;  %v2171_v26 = vsel %vm2153_vm6, %v7435_v14, 0.0 }
 0x697   : > { %v2421_v31 = vpop.permute.xlu1 %2420  ;;  %v2437_v39 = vpop.permute.xlu0 %2436  ;;  %v2405_v27 = vadd.f32 %v2389_v28, %v7507_v40  ;;  %v2220_v40 = vsel %vm2204_vm7, %v7472_v13, 0.0  ;;  %v2398_v14 = vmul.f32 %v7561_v58, %v8824_v4  ;;  %v8825_v13 = vld [vmem:[#allocation73_spill] sm:$0xff]  ;;  %v8830_v58 = vld [vmem:[#allocation75_spill] sm:$0xff] }
 0x698   : > { %v2480_v25 = vmul.f32 %v2421_v31, %v2208_v33  ;;  %v2484_v1 = vmul.f32 %v2437_v39, %v2212_v54  ;;  %v2394_v33 = vmul.f32 %v2365_v49, %v6366_v9  ;;  %v2396_v31 = vmul.f32 %v2373_v43, %v6378_v48 }
 0x699   : > { %v2407_v62 = vadd.f32 %v2391_v38, %v7517_v23  ;;  %v2393_v43 = vmul.f32 %v7547_v20, %v6368_v10  ;;  %v8827_v23 = vld [vmem:[#allocation69_spill] sm:$0xff] }
 0x69a   : > { %v7586_v24 = vadd.f32 %v2480_v25, %v2400_v0   ;;  %v7588_v2 = vadd.f32 %v2484_v1, %v2404_v12   ;;  %v2410_v49 = vadd.f32 %v2394_v33, %v7529_v19  ;;  %v2316_v1 = vmul.f32 %v7534_v41, %v2169_v50 }
 0x69b   : > { %v2425_v46 = vpop.permute.xlu1 %2424  ;;  %v2445_v22 = vpop.permute.xlu0 %2444  ;;  %v2215_v19 = vsel %vm2204_vm7, %v7466_v36, 0.0  ;;  %v2222_v20 = vsel %vm2204_vm7, %v8827_v23, 0.0 }
 0x69c   : > { %v2481_v29 = vmul.f32 %v2425_v46, %v2209_v60  ;;  %v2486_v7 = vmul.f32 %v2445_v22, %v2214_v45  ;;  %v2318_v22 = vmul.f32 %v8825_v13, %v2171_v26  ;;  %v8835_v26 = vld [vmem:[#allocation70_spill] sm:$0xff] }
 0x69e   : > { %v7600_v63 = vadd.f32 %v2481_v29, %v2401_v11   ;;  %v7602_v60 = vadd.f32 %v2486_v7, %v2406_v17   ;;  %v2412_v11 = vadd.f32 %v2396_v31, %v2316_v1  ;;  %v8826_v29 = vld [vmem:[#allocation67_spill] sm:$0xff]  ;;  %v8833_v31 = vld [vmem:[#allocation45_spill] sm:$0xff]  ;;  %v2221_v1 = vsel %vm2204_vm7, %v8835_v26, 0.0 }
 0x69f   : > { %v2433_v54 = vpop.permute.xlu1 %2432  ;;  %v2453_v0 = vpop.permute.xlu0 %2452  ;;  %v2217_v36 = vsel %vm2204_vm7, %v8826_v29, 0.0  ;;  %v8840_v26 = vmov %v7586_v24 }
 0x6a0   : > { %v8823_v32 = vmov %v7600_v63  ;;  %v2483_v51 = vmul.f32 %v2433_v54, %v2211_v16  ;;  %v2488_v56 = vmul.f32 %v2453_v0, %v2216_v55  ;;  %v8828_v16 = vld [vmem:[#allocation71_spill] sm:$0xff] }
 0x6a1   : > { %v2409_v63 = vadd.f32 %v2393_v43, %v8828_v16 }
 0x6a2   : > { %v2499_v8 = vadd.f32 %v2483_v51, %v2403_v30   ;;  %v2504_v51 = vadd.f32 %v2488_v56, %v2408_v18   ;;  %v8829_v30 = vld [vmem:[#allocation43_spill] sm:$0xff]  ;;  %v2414_v18 = vadd.f32 %v2398_v14, %v2318_v22 }
 0x6a3   : > { %v2441_v15 = vpop.permute.xlu1 %2440  ;;  %v2461_v39 = vpop.permute.xlu0 %2460  ;;  %v2395_v28 = vmul.f32 %v8830_v58, %v8829_v30 }
 0x6a4   : > { %v2485_v12 = vmul.f32 %v2441_v15, %v2213_v53  ;;  %v2490_v25 = vmul.f32 %v2461_v39, %v2218_v21  ;;  %v8831_v21 = vld [vmem:[#allocation68_spill] sm:$0xff] }
 0x6a5   : > { %v2219_v53 = vsel %vm2204_vm7, %v8831_v21, 0.0  ;;  %v8834_v39 = vld [vmem:[#allocation76_spill] sm:$0xff] }
 0x6a6   : > { %v2501_v50 = vadd.f32 %v2485_v12, %v2405_v27   ;;  %v2506_v45 = vadd.f32 %v2490_v25, %v2410_v49   ;;  %v8832_v27 = vld [vmem:[#allocation72_spill] sm:$0xff]  ;;  %v2397_v12 = vmul.f32 %v8834_v39, %v8833_v31 }
 0x6a7   : > { %v2449_v41 = vpop.permute.xlu1 %2448  ;;  %v2469_v17 = vpop.permute.xlu0 %2468  ;;  %v2411_v38 = vadd.f32 %v2395_v28, %v8832_v27 }
 0x6a8   : > { %v2487_v52 = vmul.f32 %v2449_v41, %v2215_v19  ;;  %v2492_v46 = vmul.f32 %v2469_v17, %v2220_v40  ;;  %v8836_v19 = vld [vmem:[#allocation74_spill] sm:$0xff] }
 0x6aa   : > { %v2503_v55 = vadd.f32 %v2487_v52, %v2407_v62   ;;  %v2508_v7 = vadd.f32 %v2492_v46, %v2412_v11   ;;  %v2413_v62 = vadd.f32 %v2397_v12, %v8836_v19 }
 0x6ab   : > { %v2457_v33 = vpop.permute.xlu1 %2456  ;;  %v2477_v54 = vpop.permute.xlu0 %2476 }
 0x6ac   : > { %v2489_v0 = vmul.f32 %v2457_v33, %v2217_v36  ;;  %v2494_v56 = vmul.f32 %v2477_v54, %v2222_v20  ;;  %v8837_v14 = vmov %v2508_v7  ;;  %v8839_v36 = vmov %v8823_v32 }
 0x6ae   : > { %v2505_v63 = vadd.f32 %v2489_v0, %v2409_v63   ;;  %v2510_v15 = vadd.f32 %v2494_v56, %v2414_v18   ;;  %v8838_v56 = vmov %v7571_v57 }
 0x6af   : > { %v2465_v49 = vpop.permute.xlu1 %2464 }
 0x6b0   : > { %v2491_v25 = vmul.f32 %v2465_v49, %v2219_v53 }
 0x6b2   : > { %v2507_v49 = vadd.f32 %v2491_v25, %v2411_v38  }
 0x6b3   : > { %v2473_v40 = vpop.permute.xlu1 %2472 }
 0x6b4   : > { %v2493_v43 = vmul.f32 %v2473_v40, %v2221_v1 }
 0x6b6   : > { %v2509_v38 = vadd.f32 %v2493_v43, %v2413_v62  }
 0x6b7 PF: > { %2529 = sbr.rel (%p7306_p11) target bundleno = 2020 (0x7e4), region = 108  ;;  %v5672_v47 = vphi %v7344_v47, %v7559_v47   ;;  %v5668_v26 = vphi %v7342_v26, %v8840_v26   ;;  %v5664_v36 = vphi %v7340_v36, %v8839_v36   ;;  %v5660_v56 = vphi %v7338_v56, %v8838_v56   ;;  %v5656_v8 = vphi %v7336_v8, %v2499_v8   ;;  %v5652_v2 = vphi %v7334_v2, %v7588_v2   ;;  %v5648_v50 = vphi %v7332_v50, %v2501_v50   ;;  %v5644_v60 = vphi %v7330_v60, %v7602_v60   ;;  %v5640_v55 = vphi %v7328_v55, %v2503_v55   ;;  %v5636_v51 = vphi %v7326_v51, %v2504_v51   ;;  %v5632_v63 = vphi %v7324_v63, %v2505_v63   ;;  %v5628_v45 = vphi %v7322_v45, %v2506_v45   ;;  %v5624_v49 = vphi %v7320_v49, %v2507_v49   ;;  %v5620_v14 = vphi %v7318_v14, %v8837_v14   ;;  %v5616_v38 = vphi %v7316_v38, %v2509_v38   ;;  %v5612_v15 = vphi %v7314_v15, %v2510_v15  }
 0x6be   : > { %s5823_s18 = smov 8   ;;  %v8841_v57 = vld [vmem:[#allocation42_spill] sm:$0xff]  ;;  %v5824_v24 = vmov 0   ;;  %v8842_v2 = vld [vmem:[#allocation43_spill] sm:$0xff]  ;;  %v8843_v8 = vld [vmem:[#allocation44_spill] sm:$0xff]  ;;  %s5825_s26 = smov 120  }
 0x6bf   : > { %2534 = vrot.lane.b32.xlu1 %v6328_v34, %s5823_s18  ;;  %2530 = vrot.lane.b32.xlu0 %v8841_v57, %s5823_s18  ;;  %v8844_v47 = vld [vmem:[#allocation45_spill] sm:$0xff]  ;;  %v8845_v45 = vld [vmem:[#allocation26_spill] sm:$0xff]  ;;  %v8847_v55 = vld [vmem:[#allocation27_spill] sm:$0xff]  ;;  %v5826_v29 = vmov 1   ;;  %v5827_v30 = vmov 2   ;;  %vm2562_vm8 = vcmp.ge.s32.totalorder %v6146_v59, 8 }
 0x6c0   : > { %4887 = vset.pattern.permute.xlu1 %v5824_v24  ;;  %4886 = vset.pattern.permute.xlu0 %v5824_v24  ;;  %v8846_v60 = vld [vmem:[#allocation25_spill] sm:$0xff]  ;;  %v8848_v32 = vld [vmem:[#allocation28_spill] sm:$0xff]  ;;  %v8850_v50 = vld [vmem:[#allocation30_spill] sm:$0xff]  ;;  %vm2613_vm9 = vcmp.lt.s32.totalorder %v6146_v59, 26 }
 0x6c1   : > { %v8849_v51 = vld [vmem:[#allocation29_spill] sm:$0xff]  ;;  %v8851_v15 = vld [vmem:[#allocation31_spill] sm:$0xff]  ;;  %v8852_v11 = vld [vmem:[#allocation32_spill] sm:$0xff] }
 0x6c2   : > { %v8853_v4 = vld [vmem:[#allocation33_spill] sm:$0xff]  ;;  %v8854_v14 = vld [vmem:[#allocation34_spill] sm:$0xff]  ;;  %v8855_v41 = vld [vmem:[#allocation35_spill] sm:$0xff] }
 0x6c3   : > { %2536 = vrot.lane.b32.xlu1 %v6326_v3, %s5823_s18  ;;  %2532 = vrot.lane.b32.xlu0 %v6316_v61, %s5823_s18  ;;  %v8856_v17 = vld [vmem:[#allocation36_spill] sm:$0xff]  ;;  %v8857_v52 = vld [vmem:[#allocation37_spill] sm:$0xff]  ;;  %v8858_v46 = vld [vmem:[#allocation38_spill] sm:$0xff] }
 0x6c4   : > { %v8859_v13 = vld [vmem:[#allocation39_spill] sm:$0xff]  ;;  %v8860_v22 = vld [vmem:[#allocation40_spill] sm:$0xff] }
 0x6c7   : > { %2540 = vrot.lane.b32.xlu1 %v6336_v6, %s5823_s18  ;;  %2538 = vrot.lane.b32.xlu0 %v6338_v5, %s5823_s18 }
 0x6cb   : > { %2544 = vrot.lane.b32.xlu1 %v6346_v44, %s5823_s18  ;;  %2542 = vrot.lane.b32.xlu0 %v6348_v37, %s5823_s18 }
 0x6cf   : > { %2548 = vrot.lane.b32.xlu1 %v6356_v35, %s5823_s18  ;;  %2546 = vrot.lane.b32.xlu0 %v6358_v42, %s5823_s18 }
 0x6d3   : > { %2552 = vrot.lane.b32.xlu1 %v6366_v9, %s5823_s18  ;;  %2550 = vrot.lane.b32.xlu0 %v6368_v10, %s5823_s18 }
 0x6d7   : > { %2556 = vrot.lane.b32.xlu1 %v6378_v48, %s5823_s18  ;;  %2554 = vrot.lane.b32.xlu0 %v8842_v2, %s5823_s18 }
 0x6db   : > { %2560 = vrot.lane.b32.xlu1 %v8843_v8, %s5823_s18  ;;  %2558 = vrot.lane.b32.xlu0 %v8844_v47, %s5823_s18 }
 0x6df   : > { %2583 = vrot.lane.b32.xlu1 %v6316_v61, %s5825_s26  ;;  %2581 = vrot.lane.b32.xlu0 %v8841_v57, %s5825_s26 }
 0x6e3   : > { %2587 = vrot.lane.b32.xlu1 %v6326_v3, %s5825_s26  ;;  %2585 = vrot.lane.b32.xlu0 %v6328_v34, %s5825_s26 }
 0x6e7   : > { %2591 = vrot.lane.b32.xlu1 %v6336_v6, %s5825_s26  ;;  %2589 = vrot.lane.b32.xlu0 %v6338_v5, %s5825_s26 }
 0x6eb   : > { %2595 = vrot.lane.b32.xlu1 %v6346_v44, %s5825_s26  ;;  %2593 = vrot.lane.b32.xlu0 %v6348_v37, %s5825_s26 }
 0x6ef   : > { %2599 = vrot.lane.b32.xlu1 %v6356_v35, %s5825_s26  ;;  %2597 = vrot.lane.b32.xlu0 %v6358_v42, %s5825_s26 }
 0x6f3   : > { %2603 = vrot.lane.b32.xlu1 %v6366_v9, %s5825_s26  ;;  %2601 = vrot.lane.b32.xlu0 %v6368_v10, %s5825_s26 }
 0x6f7   : > { %2607 = vrot.lane.b32.xlu1 %v6378_v48, %s5825_s26  ;;  %2605 = vrot.lane.b32.xlu0 %v8842_v2, %s5825_s26 }
 0x6fb   : > { %2611 = vrot.lane.b32.xlu1 %v8843_v8, %s5825_s26  ;;  %2609 = vrot.lane.b32.xlu0 %v8844_v47, %s5825_s26 }
 0x6ff   : > { %2639 = vperm.xlu1 %4887, %v8845_v45   ;;  %2634 = vperm.xlu0 %4886, %v8846_v60  }
 0x703   : > { %2644 = vperm.xlu1 %4887, %v8847_v55   ;;  %2649 = vperm.xlu0 %4886, %v8848_v32  }
 0x707   : > { %2654 = vperm.xlu1 %4887, %v8849_v51   ;;  %2659 = vperm.xlu0 %4886, %v8850_v50  }
 0x70b   : > { %2664 = vperm.xlu1 %4887, %v8851_v15   ;;  %2669 = vperm.xlu0 %4886, %v8852_v11  }
 0x70f   : > { %2674 = vperm.xlu1 %4887, %v8853_v4   ;;  %2679 = vperm.xlu0 %4886, %v8854_v14  }
 0x713   : > { %2684 = vperm.xlu1 %4887, %v8855_v41   ;;  %2689 = vperm.xlu0 %4886, %v8856_v17  }
 0x717   : > { %2694 = vperm.xlu1 %4887, %v8857_v52   ;;  %2699 = vperm.xlu0 %4886, %v8858_v46  }
 0x71b   : > { %2704 = vperm.xlu1 %4887, %v8859_v13   ;;  %2709 = vperm.xlu0 %4886, %v8860_v22  }
 0x71f   : > { %4888 = vset.pattern.permute.xlu1 %v5826_v29  ;;  %4889 = vset.pattern.permute.xlu0 %v5826_v29 }
 0x720   : > { %2729 = vperm.xlu1 %4888, %v8846_v60   ;;  %2733 = vperm.xlu0 %4889, %v8845_v45  }
 0x724   : > { %2737 = vperm.xlu1 %4888, %v8847_v55   ;;  %2745 = vperm.xlu0 %4889, %v8849_v51  }
 0x728   : > { %2741 = vperm.xlu1 %4888, %v8848_v32   ;;  %2753 = vperm.xlu0 %4889, %v8851_v15  }
 0x72c   : > { %2749 = vperm.xlu1 %4888, %v8850_v50   ;;  %2761 = vperm.xlu0 %4889, %v8853_v4  }
 0x730   : > { %2757 = vperm.xlu1 %4888, %v8852_v11   ;;  %2769 = vperm.xlu0 %4889, %v8855_v41  }
 0x731   : > { %v7803_v36 = vpop.permute.xlu1 %2534  ;;  %v2531_v7 = vpop.permute.xlu0 %2530 }
 0x734   : > { %2765 = vperm.xlu1 %4888, %v8854_v14   ;;  %2777 = vperm.xlu0 %4889, %v8857_v52  }
 0x735   : > { %v2537_v23 = vpop.permute.xlu1 %2536  ;;  %v2533_v20 = vpop.permute.xlu0 %2532 }
 0x738   : > { %2773 = vperm.xlu1 %4888, %v8856_v17   ;;  %2785 = vperm.xlu0 %4889, %v8859_v13  }
 0x739   : > { %v2541_v16 = vpop.permute.xlu1 %2540  ;;  %v2539_v63 = vpop.permute.xlu0 %2538 }
 0x73a   : > { %v2569_v29 = vsel %vm2562_vm8, %v2539_v63, 0.0 }
 0x73c   : > { %2781 = vperm.xlu1 %4888, %v8858_v46   ;;  %4890 = vset.pattern.permute.xlu0 %v5827_v30 }
 0x73d   : > { %v7810_v58 = vpop.permute.xlu1 %2544  ;;  %2825 = vperm.xlu0 %4890, %v8846_v60   ;;  %v2543_v28 = vpop.permute.xlu0 %2542 }
 0x740   : > { %2789 = vperm.xlu1 %4888, %v8860_v22  }
 0x741   : > { %v7814_v18 = vpop.permute.xlu1 %2548  ;;  %2837 = vperm.xlu0 %4890, %v8848_v32   ;;  %v7817_v33 = vpop.permute.xlu0 %2546  ;;  %v2565_v32 = vsel %vm2562_vm8, %v2531_v7, 0.0 }
 0x742   : > { %v2574_v63 = vsel %vm2562_vm8, %v7814_v18, 0.0 }
 0x744   : > { %4891 = vset.pattern.permute.xlu1 %v5827_v30 }
 0x745   : > { %2829 = vperm.xlu1 %4891, %v8845_v45   ;;  %v7820_v54 = vpop.permute.xlu1 %2552  ;;  %2845 = vperm.xlu0 %4890, %v8850_v50   ;;  %v7823_v0 = vpop.permute.xlu0 %2550 }
 0x749   : > { %2833 = vperm.xlu1 %4891, %v8847_v55   ;;  %v7826_v56 = vpop.permute.xlu1 %2556  ;;  %2853 = vperm.xlu0 %4890, %v8852_v11   ;;  %v7829_v21 = vpop.permute.xlu0 %2554 }
 0x74d   : > { %2841 = vperm.xlu1 %4891, %v8849_v51   ;;  %v7832_v53 = vpop.permute.xlu1 %2560  ;;  %2861 = vperm.xlu0 %4890, %v8854_v14   ;;  %v7835_v27 = vpop.permute.xlu0 %2558  ;;  %v2566_v51 = vsel %vm2562_vm8, %v2533_v20, 0.0  ;;  %v2567_v14 = vsel %vm2562_vm8, %v7803_v36, 0.0  ;;  %v2572_v36 = vsel %vm2562_vm8, %v7810_v58, 0.0 }
 0x751   : > { %2849 = vperm.xlu1 %4891, %v8851_v15   ;;  %v7838_v38 = vpop.permute.xlu1 %2583  ;;  %2869 = vperm.xlu0 %4890, %v8856_v17   ;;  %v7841_v49 = vpop.permute.xlu0 %2581 }
 0x755   : > { %2857 = vperm.xlu1 %4891, %v8853_v4   ;;  %2877 = vperm.xlu0 %4890, %v8858_v46   ;;  %v7845_v31 = vpop.permute.xlu1 %2587  ;;  %v7847_v39 = vpop.permute.xlu0 %2585 }
 0x759   : > { %2865 = vperm.xlu1 %4891, %v8855_v41   ;;  %2885 = vperm.xlu0 %4890, %v8860_v22   ;;  %v7851_v12 = vpop.permute.xlu1 %2591  ;;  %v7853_v25 = vpop.permute.xlu0 %2589  ;;  %v2568_v41 = vsel %vm2562_vm8, %v2537_v23, 0.0  ;;  %v2570_v22 = vsel %vm2562_vm8, %v2541_v16, 0.0  ;;  %v2571_v23 = vsel %vm2562_vm8, %v2543_v28, 0.0  ;;  %v2576_v28 = vsel %vm2562_vm8, %v7820_v54, 0.0 }
 0x75a   : > { %v2579_v54 = vsel %vm2562_vm8, %v7835_v27, 0.0 }
 0x75d   : > { %2873 = vperm.xlu1 %4891, %v8857_v52   ;;  %v7857_v26 = vpop.permute.xlu1 %2595  ;;  %v7859_v1 = vpop.permute.xlu0 %2593 }
 0x761   : > { %2881 = vperm.xlu1 %4891, %v8859_v13   ;;  %v7861_v40 = vpop.permute.xlu1 %2599  ;;  %v7863_v19 = vpop.permute.xlu0 %2597 }
 0x765   : > { %v7865_v62 = vpop.permute.xlu1 %2603  ;;  %v7867_v43 = vpop.permute.xlu0 %2601 }
 0x766   : > { %8861 = vst [vmem:[#allocation77_spill] sm:$0xff] %v7867_v43 }
 0x769   : > { %v7869_v24 = vpop.permute.xlu1 %2607  ;;  %v7871_v45 = vpop.permute.xlu0 %2605 }
 0x76a   : > { %8862 = vst [vmem:[#allocation78_spill] sm:$0xff] %v7871_v45 }
 0x76d   : > { %v7873_v60 = vpop.permute.xlu1 %2611  ;;  %v7875_v55 = vpop.permute.xlu0 %2609 }
 0x76e   : > { %8863 = vst [vmem:[#allocation79_spill] sm:$0xff] %v7873_v60  ;;  %8864 = vst [vmem:[#allocation80_spill] sm:$0xff] %v7875_v55 }
 0x77e   : > { %v2640_v50 = vpop.permute.xlu1 %2639  ;;  %v2635_v15 = vpop.permute.xlu0 %2634 }
 0x77f   : > { %v7882_v11 = vmul.f32 %v2640_v50, %v2566_v51  ;;  %v2712_v4 = vmul.f32 %v2635_v15, %v2565_v32 }
 0x782   : > { %v2645_v17 = vpop.permute.xlu1 %2644  ;;  %v2650_v52 = vpop.permute.xlu0 %2649 }
 0x783   : > { %v7889_v46 = vmul.f32 %v2645_v17, %v2567_v14  ;;  %v2715_v13 = vmul.f32 %v2650_v52, %v2568_v41  ;;  %v2573_v14 = vsel %vm2562_vm8, %v7817_v33, 0.0  ;;  %v2577_v33 = vsel %vm2562_vm8, %v7829_v21, 0.0 }
 0x786   : > { %v2655_v7 = vpop.permute.xlu1 %2654  ;;  %v2660_v20 = vpop.permute.xlu0 %2659 }
 0x787   : > { %v7895_v30 = vmul.f32 %v2655_v7, %v2569_v29  ;;  %v7897_v32 = vmul.f32 %v2660_v20, %v2570_v22  ;;  %v2575_v22 = vsel %vm2562_vm8, %v7823_v0, 0.0 }
 0x78a   : > { %v2665_v51 = vpop.permute.xlu1 %2664  ;;  %v2670_v50 = vpop.permute.xlu0 %2669 }
 0x78b   : > { %v7904_v15 = vmul.f32 %v2665_v51, %v2571_v23  ;;  %v7906_v16 = vmul.f32 %v2670_v50, %v2572_v36 }
 0x78e   : > { %v2675_v41 = vpop.permute.xlu1 %2674  ;;  %v2680_v17 = vpop.permute.xlu0 %2679 }
 0x78f   : > { %v7914_v58 = vmul.f32 %v2675_v41, %v2573_v14  ;;  %v7916_v52 = vmul.f32 %v2680_v17, %v2574_v63 }
 0x792   : > { %v2685_v29 = vpop.permute.xlu1 %2684  ;;  %v2690_v18 = vpop.permute.xlu0 %2689 }
 0x793   : > { %v7924_v7 = vmul.f32 %v2685_v29, %v2575_v22  ;;  %v7926_v20 = vmul.f32 %v2690_v18, %v2576_v28 }
 0x795   : > { %8865 = vst [vmem:[#allocation81_spill] sm:$0xff] %v7924_v7 }
 0x796   : > { %v2695_v36 = vpop.permute.xlu1 %2694  ;;  %v7931_v23 = vpop.permute.xlu0 %2699 }
 0x797   : > { %v7933_v51 = vmul.f32 %v2695_v36, %v2577_v33 }
 0x799   : > { %8866 = vst [vmem:[#allocation82_spill] sm:$0xff] %v7933_v51 }
 0x79a   : > { %v2705_v0 = vpop.permute.xlu1 %2704  ;;  %v7938_v50 = vpop.permute.xlu0 %2709 }
 0x79b   : > { %8867 = vst [vmem:[#allocation83_spill] sm:$0xff] %v7938_v50  ;;  %v7940_v63 = vmul.f32 %v2705_v0, %v2579_v54 }
 0x79d   : > { %8868 = vst [vmem:[#allocation84_spill] sm:$0xff] %v7940_v63  ;;  %v2616_v63 = vsel %vm2613_vm9, %v7841_v49, 0.0 }
 0x79f   : > { %v2730_v14 = vpop.permute.xlu1 %2729  ;;  %v2734_v41 = vpop.permute.xlu0 %2733 }
 0x7a0   : > { %v2792_v54 = vmul.f32 %v2730_v14, %v8841_v57  ;;  %v2619_v57 = vsel %vm2613_vm9, %v7845_v31, 0.0  ;;  %v2793_v14 = vmul.f32 %v2734_v41, %v6316_v61 }
 0x7a2   : > { %v2808_v2 = vadd.f32 %v2792_v54, %v2712_v4  ;;  %v2627_v54 = vsel %vm2613_vm9, %v7865_v62, 0.0  ;;  %v2580_v62 = vsel %vm2562_vm8, %v7832_v53, 0.0 }
 0x7a3   : > { %v2738_v17 = vpop.permute.xlu1 %2737  ;;  %v2746_v28 = vpop.permute.xlu0 %2745 }
 0x7a4   : > { %v2794_v31 = vmul.f32 %v2738_v17, %v6328_v34 }
 0x7a6   : > { %v2810_v34 = vadd.f32 %v2794_v31, %v7889_v46 }
 0x7a7   : > { %v2742_v22 = vpop.permute.xlu1 %2741  ;;  %v2754_v21 = vpop.permute.xlu0 %2753 }
 0x7a8   : > { %v2795_v7 = vmul.f32 %v2742_v22, %v6326_v3  ;;  %v2617_v3 = vsel %vm2613_vm9, %v7838_v38, 0.0  ;;  %v2623_v38 = vsel %vm2613_vm9, %v7857_v26, 0.0  ;;  %v2620_v22 = vsel %vm2613_vm9, %v7853_v25, 0.0 }
 0x7a9   : > { %v2578_v25 = vsel %vm2562_vm8, %v7826_v56, 0.0 }
 0x7aa   : > { %v2811_v50 = vadd.f32 %v2795_v7, %v2715_v13 }
 0x7ab   : > { %v2750_v29 = vpop.permute.xlu1 %2749  ;;  %v7942_v18 = vpop.permute.xlu0 %2761 }
 0x7ac   : > { %v2797_v8 = vmul.f32 %v2750_v29, %v6336_v6 }
 0x7ae   : > { %v2813_v6 = vadd.f32 %v2797_v8, %v7897_v32 }
 0x7af   : > { %v2758_v33 = vpop.permute.xlu1 %2757  ;;  %v7944_v36 = vpop.permute.xlu0 %2769 }
 0x7b0   : > { %v2799_v61 = vmul.f32 %v2758_v33, %v6346_v44  ;;  %v2796_v44 = vmul.f32 %v2746_v28, %v6338_v5 }
 0x7b2   : > { %v2815_v8 = vadd.f32 %v2799_v61, %v7906_v16  ;;  %v2812_v5 = vadd.f32 %v2796_v44, %v7895_v30  ;;  %v2800_v30 = vmul.f32 %v7942_v18, %v6358_v42  ;;  %v2624_v42 = vsel %vm2613_vm9, %v7863_v19, 0.0 }
 0x7b3   : > { %v2766_v55 = vpop.permute.xlu1 %2765  ;;  %v7946_v47 = vpop.permute.xlu0 %2777 }
 0x7b4   : > { %8869 = vst [vmem:[#allocation85_spill] sm:$0xff] %v7946_v47 }
 0x7b7   : > { %v2774_v27 = vpop.permute.xlu1 %2773  ;;  %v7948_v51 = vpop.permute.xlu0 %2785 }
 0x7b8   : > { %8870 = vst [vmem:[#allocation86_spill] sm:$0xff] %v7948_v51  ;;  %v2803_v46 = vmul.f32 %v2774_v27, %v6366_v9 }
 0x7bb   : > { %v2782_v0 = vpop.permute.xlu1 %2781 }
 0x7bc   : > { %v2826_v45 = vpop.permute.xlu0 %2825 }
 0x7bd   : > { %v2888_v60 = vmul.f32 %v2826_v45, %v2616_v63 }
 0x7bf   : > { %v7956_v43 = vadd.f32 %v2888_v60, %v2808_v2   ;;  %v7958_v47 = vpop.permute.xlu1 %2789  ;;  %v2621_v2 = vsel %vm2613_vm9, %v7851_v12, 0.0  ;;  %v2809_v60 = vadd.f32 %v2793_v14, %v7882_v11  ;;  %v2618_v12 = vsel %vm2613_vm9, %v7847_v39, 0.0 }
 0x7c0   : > { %v2838_v51 = vpop.permute.xlu0 %2837  ;;  %v2801_v11 = vmul.f32 %v2766_v55, %v6356_v35  ;;  %v2625_v39 = vsel %vm2613_vm9, %v7861_v40, 0.0  ;;  %v2798_v35 = vmul.f32 %v2754_v21, %v6348_v37  ;;  %v2622_v37 = vsel %vm2613_vm9, %v7859_v1, 0.0 }
 0x7c1   : > { %v2891_v49 = vmul.f32 %v2838_v51, %v2619_v57  ;;  %v2805_v21 = vmul.f32 %v2782_v0, %v6378_v48  ;;  %v2725_v1 = vmul.f32 %v7931_v23, %v2578_v25  ;;  %v2816_v48 = vadd.f32 %v2800_v30, %v7914_v58  ;;  %v8872_v0 = vld [vmem:[#allocation44_spill] sm:$0xff] }
 0x7c2   : > { %v2817_v55 = vadd.f32 %v2801_v11, %v7916_v52  ;;  %v2814_v9 = vadd.f32 %v2798_v35, %v7904_v15  ;;  %v2819_v52 = vadd.f32 %v2803_v46, %v7926_v20  ;;  %v2629_v15 = vsel %vm2613_vm9, %v7869_v24, 0.0  ;;  %v8873_v24 = vld [vmem:[#allocation83_spill] sm:$0xff]  ;;  %v8881_v35 = vld [vmem:[#allocation45_spill] sm:$0xff]  ;;  %v8882_v46 = vld [vmem:[#allocation86_spill] sm:$0xff] }
 0x7c3   : > { %v7968_v45 = vadd.f32 %v2891_v49, %v2811_v50   ;;  %v2802_v20 = vmul.f32 %v7944_v36, %v6368_v10  ;;  %v2821_v18 = vadd.f32 %v2805_v21, %v2725_v1  ;;  %v2807_v53 = vmul.f32 %v7958_v47, %v8872_v0  ;;  %v8875_v58 = vld [vmem:[#allocation79_spill] sm:$0xff]  ;;  %v8876_v36 = vld [vmem:[#allocation81_spill] sm:$0xff] }
 0x7c4   : > { %v2830_v13 = vpop.permute.xlu1 %2829  ;;  %v2846_v7 = vpop.permute.xlu0 %2845  ;;  %v2727_v61 = vmul.f32 %v8873_v24, %v2580_v62  ;;  %v2631_v10 = vsel %vm2613_vm9, %v8875_v58, 0.0  ;;  %v8878_v47 = vld [vmem:[#allocation85_spill] sm:$0xff] }
 0x7c5   : > { %v8871_v4 = vmov %v7968_v45  ;;  %v2889_v51 = vmul.f32 %v2830_v13, %v2617_v3  ;;  %v2893_v63 = vmul.f32 %v2846_v7, %v2621_v2  ;;  %v8874_v13 = vld [vmem:[#allocation77_spill] sm:$0xff]  ;;  %v2818_v7 = vadd.f32 %v2802_v20, %v8876_v36 }
 0x7c6   : > { %v2626_v19 = vsel %vm2613_vm9, %v8874_v13, 0.0 }
 0x7c7   : > { %v7983_v26 = vadd.f32 %v2889_v51, %v2809_v60   ;;  %v7985_v2 = vadd.f32 %v2893_v63, %v2813_v6   ;;  %v8877_v6 = vld [vmem:[#allocation43_spill] sm:$0xff] }
 0x7c8   : > { %v2834_v32 = vpop.permute.xlu1 %2833  ;;  %v2854_v50 = vpop.permute.xlu0 %2853  ;;  %v2804_v63 = vmul.f32 %v8878_v47, %v8877_v6  ;;  %v8888_v47 = vmov %v7956_v43 }
 0x7c9   : > { %v2890_v41 = vmul.f32 %v2834_v32, %v2618_v12  ;;  %v2895_v17 = vmul.f32 %v2854_v50, %v2623_v38  ;;  %v2823_v38 = vadd.f32 %v2807_v53, %v2727_v61 }
 0x7cb   : > { %v7997_v29 = vadd.f32 %v2890_v41, %v2810_v34   ;;  %v7999_v60 = vadd.f32 %v2895_v17, %v2815_v8   ;;  %v8879_v41 = vld [vmem:[#allocation78_spill] sm:$0xff] }
 0x7cc   : > { %v2842_v16 = vpop.permute.xlu1 %2841  ;;  %v2862_v28 = vpop.permute.xlu0 %2861  ;;  %v2628_v17 = vsel %vm2613_vm9, %v8879_v41, 0.0 }
 0x7cd   : > { %v2892_v33 = vmul.f32 %v2842_v16, %v2620_v22  ;;  %v2897_v40 = vmul.f32 %v2862_v28, %v2625_v39  ;;  %v8880_v39 = vld [vmem:[#allocation82_spill] sm:$0xff]  ;;  %v2806_v16 = vmul.f32 %v8882_v46, %v8881_v35  ;;  %v8887_v36 = vmov %v7997_v29 }
 0x7ce   : > { %v2820_v22 = vadd.f32 %v2804_v63, %v8880_v39 }
 0x7cf   : > { %v2908_v8 = vadd.f32 %v2892_v33, %v2812_v5   ;;  %v2913_v51 = vadd.f32 %v2897_v40, %v2817_v55   ;;  %v8883_v33 = vld [vmem:[#allocation80_spill] sm:$0xff] }
 0x7d0   : > { %v2850_v56 = vpop.permute.xlu1 %2849  ;;  %v2870_v27 = vpop.permute.xlu0 %2869  ;;  %v2630_v40 = vsel %vm2613_vm9, %v8883_v33, 0.0 }
 0x7d1   : > { %v2894_v57 = vmul.f32 %v2850_v56, %v2622_v37  ;;  %v2899_v14 = vmul.f32 %v2870_v27, %v2627_v54  ;;  %v8884_v54 = vld [vmem:[#allocation84_spill] sm:$0xff]  ;;  %v8886_v56 = vmov %v8871_v4 }
 0x7d2   : > { %v2822_v37 = vadd.f32 %v2806_v16, %v8884_v54 }
 0x7d3   : > { %v2910_v50 = vadd.f32 %v2894_v57, %v2814_v9   ;;  %v2915_v45 = vadd.f32 %v2899_v14, %v2819_v52  }
 0x7d4   : > { %v2858_v23 = vpop.permute.xlu1 %2857  ;;  %v2878_v49 = vpop.permute.xlu0 %2877 }
 0x7d5   : > { %v2896_v3 = vmul.f32 %v2858_v23, %v2624_v42  ;;  %v2901_v31 = vmul.f32 %v2878_v49, %v2629_v15 }
 0x7d7   : > { %v2912_v55 = vadd.f32 %v2896_v3, %v2816_v48   ;;  %v2917_v14 = vadd.f32 %v2901_v31, %v2821_v18  }
 0x7d8   : > { %v2866_v12 = vpop.permute.xlu1 %2865  ;;  %v2886_v34 = vpop.permute.xlu0 %2885 }
 0x7d9   : > { %v2898_v44 = vmul.f32 %v2866_v12, %v2626_v19  ;;  %v2903_v11 = vmul.f32 %v2886_v34, %v2631_v10 }
 0x7db   : > { %v2914_v32 = vadd.f32 %v2898_v44, %v2818_v7   ;;  %v2919_v15 = vadd.f32 %v2903_v11, %v2823_v38  }
 0x7dc   : > { %v2874_v5 = vpop.permute.xlu1 %2873 }
 0x7dd   : > { %v2900_v28 = vmul.f32 %v2874_v5, %v2628_v17  ;;  %v8885_v63 = vmov %v2914_v32 }
 0x7df   : > { %v2916_v49 = vadd.f32 %v2900_v28, %v2820_v22  }
 0x7e0   : > { %v2882_v25 = vpop.permute.xlu1 %2881 }
 0x7e1   : > { %v2902_v9 = vmul.f32 %v2882_v25, %v2630_v40 }
 0x7e3   : > { %v2918_v38 = vadd.f32 %v2902_v9, %v2822_v37  }
 0x7e4 PF: > { %v5705_v59 = vmov %v5704_v55   ;;  %v5721_v43 = vmov %v5720_v8   ;;  %v8889_v53 = vmov %v5676_v15  ;;  %v8890_v39 = vmov %v5680_v38  ;;  %v5736_v47 = vphi %v5672_v47, %v8888_v47   ;;  %v5732_v26 = vphi %v5668_v26, %v7983_v26   ;;  %v5728_v36 = vphi %v5664_v36, %v8887_v36   ;;  %v5724_v56 = vphi %v5660_v56, %v8886_v56   ;;  %v5720_v8 = vphi %v5656_v8, %v2908_v8   ;;  %v5716_v2 = vphi %v5652_v2, %v7985_v2   ;;  %v5712_v50 = vphi %v5648_v50, %v2910_v50   ;;  %v5708_v60 = vphi %v5644_v60, %v7999_v60   ;;  %v5704_v55 = vphi %v5640_v55, %v2912_v55   ;;  %v5700_v51 = vphi %v5636_v51, %v2913_v51   ;;  %v5696_v63 = vphi %v5632_v63, %v8885_v63   ;;  %v5692_v45 = vphi %v5628_v45, %v2915_v45   ;;  %v5688_v49 = vphi %v5624_v49, %v2916_v49   ;;  %v5684_v14 = vphi %v5620_v14, %v2917_v14   ;;  %v5680_v38 = vphi %v5616_v38, %v2918_v38   ;;  %v5676_v15 = vphi %v5612_v15, %v2919_v15  }
 0x7e5   : > { %v8891_v46 = vmov %v5684_v14  ;;  %v8892_v58 = vmov %v5688_v49  ;;  %v8893_v54 = vmov %v5692_v45  ;;  %v8894_v55 = vmov %v5696_v63 }
 0x7e6   : > { %v8895_v8 = vmov %v5700_v51  ;;  %v8896_v41 = vmov %v5705_v59  ;;  %v8897_v63 = vmov %v5708_v60  ;;  %v8898_v51 = vmov %v5712_v50 }
 0x7e7   : > { %v8899_v0 = vmov %v5716_v2  ;;  %v8900_v50 = vmov %v5721_v43  ;;  %v8901_v12 = vmov %v5728_v36  ;;  %v8902_v40 = vmov %v5732_v26 }
 0x7e8   : > { %v8903_v1 = vmov %v5736_v47 }
 0x7e9 PF: > { %v8904_v26 = vmov 0   ;;  %s2952_s0 = scalar_lea.vmem %s8520_s8, %s6071_s27  ;;  %s3081_s3 = sld [smem:[#allocation5 + %s5400_s16]]  ;;  %v5800_v1 = vphi %v5608_v1, %v8903_v1   ;;  %v5796_v40 = vphi %v5604_v40, %v8902_v40   ;;  %v5792_v12 = vphi %v5600_v12, %v8901_v12   ;;  %v5788_v56 = vphi %v5596_v56, %v5724_v56   ;;  %v5784_v50 = vphi %v5592_v50, %v8900_v50   ;;  %v5780_v0 = vphi %v5588_v0, %v8899_v0   ;;  %v5776_v51 = vphi %v5584_v51, %v8898_v51   ;;  %v5772_v63 = vphi %v5580_v63, %v8897_v63   ;;  %v5768_v41 = vphi %v5576_v41, %v8896_v41   ;;  %v5764_v8 = vphi %v5572_v8, %v8895_v8   ;;  %v5760_v55 = vphi %v5568_v55, %v8894_v55   ;;  %v5756_v54 = vphi %v5564_v54, %v8893_v54   ;;  %v5752_v58 = vphi %v5560_v58, %v8892_v58   ;;  %v5748_v46 = vphi %v5556_v46, %v8891_v46   ;;  %v5744_v39 = vphi %v5552_v39, %v8890_v39   ;;  %v5740_v53 = vphi %v5548_v53, %v8889_v53  }
 0x7ea   : > { %4893 = vset.pattern.permute.xlu1 %v8904_v26  ;;  %4892 = vset.pattern.permute.xlu0 %v8904_v26  ;;  %v2955_v45 = vld [vmem:[%s2952_s0 + $0x10] sm:$0xff]  ;;  %v2953_v4 = vld [vmem:[%s2952_s0] sm:$0xff]  ;;  %v2956_v2 = vld [vmem:[%s2952_s0 + $0x18] sm:$0xff]  ;;  %s8301_s23 = scalar_lea.vmem %s8522_s10, %s6071_s27  ;;  %s8326_s1 = scalar_lea.vmem %s8521_s9, %s6071_s27 }
 0x7eb   : > { %2981 = vperm.xlu1 %4893, %v2955_v45   ;;  %2971 = vperm.xlu0 %4892, %v2953_v4   ;;  %v2954_v60 = vld [vmem:[%s2952_s0 + $0x8] sm:$0xff]  ;;  %v2957_v30 = vld [vmem:[%s2952_s0 + $0x20] sm:$0xff]  ;;  %v2960_v52 = vld [vmem:[%s2952_s0 + $0x38] sm:$0xff]  ;;  %s8906_s27 = sshll.u32 %s5400_s16, 6 }
 0x7ec   : > { %v2958_v29 = vld [vmem:[%s2952_s0 + $0x28] sm:$0xff]  ;;  %v2959_v21 = vld [vmem:[%s2952_s0 + $0x30] sm:$0xff]  ;;  %v2961_v57 = vld [vmem:[%s2952_s0 + $0x40] sm:$0xff] }
 0x7ed   : > { %v2962_v27 = vld [vmem:[%s2952_s0 + $0x48] sm:$0xff]  ;;  %v2964_v14 = vld [vmem:[%s2952_s0 + $0x58] sm:$0xff]  ;;  %v2963_v62 = vld [vmem:[%s2952_s0 + $0x50] sm:$0xff] }
 0x7ee   : > { %v2966_v15 = vld [vmem:[%s2952_s0 + $0x68] sm:$0xff]  ;;  %v2965_v42 = vld [vmem:[%s2952_s0 + $0x60] sm:$0xff]  ;;  %v2968_v48 = vld [vmem:[%s2952_s0 + $0x78] sm:$0xff] }
 0x7ef   : > { %2986 = vperm.xlu1 %4893, %v2956_v2   ;;  %2976 = vperm.xlu0 %4892, %v2954_v60   ;;  %v2967_v20 = vld [vmem:[%s2952_s0 + $0x70] sm:$0xff]  ;;  %v8187_v18 = vstv %s3081_s3  ;;  %s8912_s3 = sand.u32 1, %s5392_s30  }
 0x7f3   : > { %2996 = vperm.xlu1 %4893, %v2958_v29   ;;  %2991 = vperm.xlu0 %4892, %v2957_v30  }
 0x7f7   : > { %3006 = vperm.xlu1 %4893, %v2960_v52   ;;  %3001 = vperm.xlu0 %4892, %v2959_v21  }
 0x7fb   : > { %3016 = vperm.xlu1 %4893, %v2962_v27   ;;  %3011 = vperm.xlu0 %4892, %v2961_v57  }
 0x7ff   : > { %3026 = vperm.xlu1 %4893, %v2964_v14   ;;  %3021 = vperm.xlu0 %4892, %v2963_v62  }
 0x803   : > { %3036 = vperm.xlu1 %4893, %v2966_v15   ;;  %3031 = vperm.xlu0 %4892, %v2965_v42  }
 0x807   : > { %3046 = vperm.xlu1 %4893, %v2968_v48   ;;  %3041 = vperm.xlu0 %4892, %v2967_v20  }
 0x86a   : > { %v2982_v23 = vpop.permute.xlu1 %2981  ;;  %v2972_v49 = vpop.permute.xlu0 %2971 }
 0x86b   : > { %v3051_v3 = vadd.f32 %v5792_v12, %v2982_v23  ;;  %v3049_v31 = vadd.f32 %v5800_v1, %v2972_v49  ;;  %v8905_v12 = vld [vmem:[#allocation41_spill] sm:$0xff] }
 0x86d   : > { %vm3067_vm10 = vcmp.ge.f32.partialorder %v3051_v3, 0.0  ;;  %v3085_v24 = vmul.f32 %v8187_v18, %v3051_v3  ;;  %vm3065_vm11 = vcmp.ge.f32.partialorder %v3049_v31, 0.0  ;;  %v3083_v61 = vmul.f32 %v8187_v18, %v3049_v31 }
 0x86e   : > { %v2987_v13 = vpop.permute.xlu1 %2986  ;;  %v2977_v19 = vpop.permute.xlu0 %2976 }
 0x86f   : > { %v3099_v10 = vsel %vm3065_vm11, %v3049_v31, %v3083_v61  ;;  %v3052_v36 = vadd.f32 %v5788_v56, %v2987_v13  ;;  %v3050_v7 = vadd.f32 %v5796_v40, %v2977_v19  ;;  %v3101_v6 = vsel %vm3067_vm10, %v3051_v3, %v3085_v24 }
 0x870   : > { %v8194_v1 = vmul.f32 %v8905_v12, %v3099_v10  ;;  %v8199_v56 = vmul.f32 %v8905_v12, %v3101_v6 }
 0x871   : > { %vm3068_vm12 = vcmp.ge.f32.partialorder %v3052_v36, 0.0  ;;  %v3086_v47 = vmul.f32 %v8187_v18, %v3052_v36  ;;  %vm3066_vm13 = vcmp.ge.f32.partialorder %v3050_v7, 0.0  ;;  %v3084_v38 = vmul.f32 %v8187_v18, %v3050_v7 }
 0x872   : > { %v2997_v34 = vpop.permute.xlu1 %2996  ;;  %v2992_v44 = vpop.permute.xlu0 %2991  ;;  %v3158_v28 = vmul.f32 %v8194_v1, %v3099_v10  ;;  %v3160_v26 = vmul.f32 %v8199_v56, %v3101_v6 }
 0x873   : > { %v3102_v11 = vsel %vm3068_vm12, %v3052_v36, %v3086_v47  ;;  %v3100_v32 = vsel %vm3066_vm13, %v3050_v7, %v3084_v38  ;;  %v3054_v17 = vadd.f32 %v5780_v0, %v2997_v34  ;;  %v3053_v22 = vadd.f32 %v5784_v50, %v2992_v44 }
 0x874   : > { %v8202_v5 = vmul.f32 %v8905_v12, %v3100_v32  ;;  %v8208_v33 = vmul.f32 %v8905_v12, %v3102_v11 }
 0x875   : > { %vm3070_vm14 = vcmp.ge.f32.partialorder %v3054_v17, 0.0  ;;  %v3088_v35 = vmul.f32 %v8187_v18, %v3054_v17  ;;  %vm3069_vm15 = vcmp.ge.f32.partialorder %v3053_v22, 0.0  ;;  %v3087_v16 = vmul.f32 %v8187_v18, %v3053_v22 }
 0x876   : > { %v3131_v50 = vadd.f32 %v8202_v5, %v8194_v1  ;;  %v3159_v0 = vmul.f32 %v8202_v5, %v3100_v32  ;;  %v3007_v40 = vpop.permute.xlu1 %3006  ;;  %v3002_v25 = vpop.permute.xlu0 %3001  ;;  %v3161_v30 = vmul.f32 %v8208_v33, %v3102_v11 }
 0x877   : > { %v3104_v37 = vsel %vm3070_vm14, %v3054_v17, %v3088_v35  ;;  %v3103_v9 = vsel %vm3069_vm15, %v3053_v22, %v3087_v16  ;;  %v3056_v59 = vadd.f32 %v5772_v63, %v3007_v40  ;;  %v3055_v43 = vadd.f32 %v5776_v51, %v3002_v25 }
 0x878   : > { %v3132_v45 = vadd.f32 %v3131_v50, %v8199_v56  ;;  %v3174_v4 = vadd.f32 %v3159_v0, %v3158_v28  ;;  %v8218_v2 = vmul.f32 %v8905_v12, %v3103_v9  ;;  %v8224_v63 = vmul.f32 %v8905_v12, %v3104_v37 }
 0x879   : > { %vm3072_vm0 = vcmp.ge.f32.partialorder %v3056_v59, 0.0  ;;  %v3090_v60 = vmul.f32 %v8187_v18, %v3056_v59  ;;  %vm3071_vm1 = vcmp.ge.f32.partialorder %v3055_v43, 0.0  ;;  %v3089_v29 = vmul.f32 %v8187_v18, %v3055_v43 }
 0x87a   : > { %v3175_v52 = vadd.f32 %v3174_v4, %v3160_v26  ;;  %v3133_v51 = vadd.f32 %v3132_v45, %v8208_v33  ;;  %v3017_v21 = vpop.permute.xlu1 %3016  ;;  %v3012_v27 = vpop.permute.xlu0 %3011  ;;  %v3162_v20 = vmul.f32 %v8218_v2, %v3103_v9  ;;  %v3163_v31 = vmul.f32 %v8224_v63, %v3104_v37 }
 0x87b   : > { %v3106_v57 = vsel %vm3072_vm0, %v3056_v59, %v3090_v60  ;;  %v3105_v14 = vsel %vm3071_vm1, %v3055_v43, %v3089_v29  ;;  %v3058_v62 = vadd.f32 %v5764_v8, %v3017_v21  ;;  %v3057_v15 = vadd.f32 %v5768_v41, %v3012_v27 }
 0x87c   : > { %v3176_v42 = vadd.f32 %v3175_v52, %v3161_v30  ;;  %v3134_v48 = vadd.f32 %v3133_v51, %v8218_v2  ;;  %v8232_v23 = vmul.f32 %v8905_v12, %v3105_v14  ;;  %v8238_v8 = vmul.f32 %v8905_v12, %v3106_v57 }
 0x87d   : > { %vm3074_vm2 = vcmp.ge.f32.partialorder %v3058_v62, 0.0  ;;  %v3092_v49 = vmul.f32 %v8187_v18, %v3058_v62  ;;  %vm3073_vm3 = vcmp.ge.f32.partialorder %v3057_v15, 0.0  ;;  %v3091_v3 = vmul.f32 %v8187_v18, %v3057_v15 }
 0x87e   : > { %v3177_v24 = vadd.f32 %v3176_v42, %v3162_v20  ;;  %v3135_v41 = vadd.f32 %v3134_v48, %v8224_v63  ;;  %v3027_v61 = vpop.permute.xlu1 %3026  ;;  %v3022_v13 = vpop.permute.xlu0 %3021  ;;  %v3164_v38 = vmul.f32 %v8232_v23, %v3105_v14  ;;  %v3165_v32 = vmul.f32 %v8238_v8, %v3106_v57 }
 0x87f   : > { %v3108_v19 = vsel %vm3074_vm2, %v3058_v62, %v3092_v49  ;;  %v3107_v10 = vsel %vm3073_vm3, %v3057_v15, %v3091_v3  ;;  %v3060_v36 = vadd.f32 %v5756_v54, %v3027_v61  ;;  %v3059_v7 = vadd.f32 %v5760_v55, %v3022_v13 }
 0x880   : > { %v3178_v6 = vadd.f32 %v3177_v24, %v3163_v31  ;;  %v3136_v47 = vadd.f32 %v3135_v41, %v8232_v23  ;;  %v8246_v34 = vmul.f32 %v8905_v12, %v3107_v10  ;;  %v8252_v54 = vmul.f32 %v8905_v12, %v3108_v19 }
 0x881   : > { %vm3076_vm4 = vcmp.ge.f32.partialorder %v3060_v36, 0.0  ;;  %v3094_v44 = vmul.f32 %v8187_v18, %v3060_v36  ;;  %vm3075_vm5 = vcmp.ge.f32.partialorder %v3059_v7, 0.0  ;;  %v3093_v11 = vmul.f32 %v8187_v18, %v3059_v7 }
 0x882   : > { %v3179_v17 = vadd.f32 %v3178_v6, %v3164_v38  ;;  %v3137_v55 = vadd.f32 %v3136_v47, %v8238_v8  ;;  %v3037_v22 = vpop.permute.xlu1 %3036  ;;  %v3032_v35 = vpop.permute.xlu0 %3031  ;;  %v3166_v37 = vmul.f32 %v8246_v34, %v3107_v10  ;;  %v3167_v26 = vmul.f32 %v8252_v54, %v3108_v19 }
 0x883   : > { %v3110_v16 = vsel %vm3076_vm4, %v3060_v36, %v3094_v44  ;;  %v3109_v28 = vsel %vm3075_vm5, %v3059_v7, %v3093_v11  ;;  %v3062_v50 = vadd.f32 %v5748_v46, %v3037_v22  ;;  %v3061_v0 = vadd.f32 %v5752_v58, %v3032_v35  ;;  %v3358_v11 = vld [vmem:[%s8301_s23 + $0x8] sm:$0xff]  ;;  %v3361_v35 = vld [vmem:[%s8301_s23 + $0x20] sm:$0xff] }
 0x884   : > { %v3180_v40 = vadd.f32 %v3179_v17, %v3165_v32  ;;  %v3138_v25 = vadd.f32 %v3137_v55, %v8246_v34  ;;  %v8260_v9 = vmul.f32 %v8905_v12, %v3109_v28  ;;  %v8266_v46 = vmul.f32 %v8905_v12, %v3110_v16  ;;  %v3357_v32 = vld [vmem:[%s8301_s23] sm:$0xff]  ;;  %v3360_v17 = vld [vmem:[%s8301_s23 + $0x18] sm:$0xff]  ;;  %v3359_v55 = vld [vmem:[%s8301_s23 + $0x10] sm:$0xff] }
 0x885   : > { %vm3078_vm6 = vcmp.ge.f32.partialorder %v3062_v50, 0.0  ;;  %v3096_v59 = vmul.f32 %v8187_v18, %v3062_v50  ;;  %vm3077_vm7 = vcmp.ge.f32.partialorder %v3061_v0, 0.0  ;;  %v3095_v43 = vmul.f32 %v8187_v18, %v3061_v0  ;;  %v3362_v22 = vld [vmem:[%s8301_s23 + $0x28] sm:$0xff] }
 0x886   : > { %v3181_v45 = vadd.f32 %v3180_v40, %v3166_v37  ;;  %v3139_v58 = vadd.f32 %v3138_v25, %v8252_v54  ;;  %v3047_v4 = vpop.permute.xlu1 %3046  ;;  %v3042_v60 = vpop.permute.xlu0 %3041  ;;  %v3168_v57 = vmul.f32 %v8260_v9, %v3109_v28  ;;  %v3169_v42 = vmul.f32 %v8266_v46, %v3110_v16  ;;  %v3364_v16 = vld [vmem:[%s8301_s23 + $0x38] sm:$0xff]  ;;  %v3363_v28 = vld [vmem:[%s8301_s23 + $0x30] sm:$0xff]  ;;  %v3370_v37 = vld [vmem:[%s8301_s23 + $0x68] sm:$0xff] }
 0x887   : > { %v3112_v29 = vsel %vm3078_vm6, %v3062_v50, %v3096_v59  ;;  %v3111_v30 = vsel %vm3077_vm7, %v3061_v0, %v3095_v43  ;;  %v3064_v52 = vadd.f32 %v5740_v53, %v3047_v4  ;;  %v3063_v51 = vadd.f32 %v5744_v39, %v3042_v60  ;;  %v3366_v50 = vld [vmem:[%s8301_s23 + $0x48] sm:$0xff]  ;;  %v3365_v0 = vld [vmem:[%s8301_s23 + $0x40] sm:$0xff]  ;;  %v3368_v40 = vld [vmem:[%s8301_s23 + $0x58] sm:$0xff] }
 0x888   : > { %v3182_v21 = vadd.f32 %v3181_v45, %v3167_v26  ;;  %v3140_v27 = vadd.f32 %v3139_v58, %v8260_v9  ;;  %v8274_v14 = vmul.f32 %v8905_v12, %v3111_v30  ;;  %v8280_v53 = vmul.f32 %v8905_v12, %v3112_v29  ;;  %v3367_v25 = vld [vmem:[%s8301_s23 + $0x50] sm:$0xff]  ;;  %v3369_v59 = vld [vmem:[%s8301_s23 + $0x60] sm:$0xff] }
 0x889   : > { %vm3080_vm8 = vcmp.ge.f32.partialorder %v3064_v52, 0.0  ;;  %v3098_v62 = vmul.f32 %v8187_v18, %v3064_v52  ;;  %vm3079_vm9 = vcmp.ge.f32.partialorder %v3063_v51, 0.0  ;;  %v3097_v15 = vmul.f32 %v8187_v18, %v3063_v51 }
 0x88a   : > { %v3183_v48 = vadd.f32 %v3182_v21, %v3168_v57  ;;  %v3141_v39 = vadd.f32 %v3140_v27, %v8266_v46  ;;  %v3170_v3 = vmul.f32 %v8274_v14, %v3111_v30  ;;  %v3171_v18 = vmul.f32 %v8280_v53, %v3112_v29 }
 0x88b   : > { %v3114_v20 = vsel %vm3080_vm8, %v3064_v52, %v3098_v62  ;;  %v3113_v49 = vsel %vm3079_vm9, %v3063_v51, %v3097_v15 }
 0x88c   : > { %v8285_v31 = vmul.f32 %v8905_v12, %v3113_v49  ;;  %v3142_v24 = vadd.f32 %v3141_v39, %v8274_v14  ;;  %v3184_v41 = vadd.f32 %v3183_v48, %v3169_v42  ;;  %v8290_v61 = vmul.f32 %v8905_v12, %v3114_v20  ;;  %v3228_v48 = vld [vmem:[%s8326_s1 + $0x8] sm:$0xff]  ;;  %v3227_v39 = vld [vmem:[%s8326_s1] sm:$0xff] }
 0x88e   : > { %v3143_v13 = vadd.f32 %v3142_v24, %v8280_v53  ;;  %v3185_v19 = vadd.f32 %v3184_v41, %v3170_v3  ;;  %v3172_v36 = vmul.f32 %v8285_v31, %v3113_v49  ;;  %v3173_v47 = vmul.f32 %v8290_v61, %v3114_v20  ;;  %v3230_v24 = vld [vmem:[%s8326_s1 + $0x18] sm:$0xff]  ;;  %v3229_v41 = vld [vmem:[%s8326_s1 + $0x10] sm:$0xff] }
 0x890   : > { %v3144_v10 = vadd.f32 %v3143_v13, %v8285_v31  ;;  %v3186_v7 = vadd.f32 %v3185_v19, %v3171_v18  ;;  %v3232_v19 = vld [vmem:[%s8326_s1 + $0x28] sm:$0xff] }
 0x892   : > { %v3145_v6 = vadd.f32 %v3144_v10, %v8290_v61  ;;  %v3187_v38 = vadd.f32 %v3186_v7, %v3172_v36  ;;  %v3231_v10 = vld [vmem:[%s8326_s1 + $0x20] sm:$0xff] }
 0x894   : > { %3146 = vadd.xlane.f32.xlu0 %v3145_v6  ;;  %v3188_v44 = vadd.f32 %v3187_v38, %v3173_v47  ;;  %v3234_v6 = vld [vmem:[%s8326_s1 + $0x38] sm:$0xff]  ;;  %v3233_v47 = vld [vmem:[%s8326_s1 + $0x30] sm:$0xff] }
 0x896   : > { %3189 = vadd.xlane.f32.xlu1 %v3188_v44 }
 0x8a7   : > { %3380 = vperm.xlu1 %4893, %v3358_v11   ;;  %v3236_v11 = vld [vmem:[%s8326_s1 + $0x48] sm:$0xff] }
 0x8aa   : > { %3375 = vperm.xlu0 %4892, %v3357_v32   ;;  %v3235_v32 = vld [vmem:[%s8326_s1 + $0x40] sm:$0xff] }
 0x8ab   : > { %3390 = vperm.xlu1 %4893, %v3360_v17  }
 0x8ae   : > { %3385 = vperm.xlu0 %4892, %v3359_v55  }
 0x8af   : > { %3400 = vperm.xlu1 %4893, %v3362_v22   ;;  %v3238_v22 = vld [vmem:[%s8326_s1 + $0x58] sm:$0xff] }
 0x8b2   : > { %3395 = vperm.xlu0 %4892, %v3361_v35   ;;  %v3237_v35 = vld [vmem:[%s8326_s1 + $0x50] sm:$0xff] }
 0x8b3   : > { %3410 = vperm.xlu1 %4893, %v3364_v16  }
 0x8b6   : > { %3405 = vperm.xlu0 %4892, %v3363_v28  }
 0x8b7   : > { %3420 = vperm.xlu1 %4893, %v3366_v50   ;;  %v3240_v50 = vld [vmem:[%s8326_s1 + $0x68] sm:$0xff] }
 0x8ba   : > { %3415 = vperm.xlu0 %4892, %v3365_v0   ;;  %v3239_v0 = vld [vmem:[%s8326_s1 + $0x60] sm:$0xff] }
 0x8bb   : > { %3430 = vperm.xlu1 %4893, %v3368_v40  }
 0x8be   : > { %3425 = vperm.xlu0 %4892, %v3367_v25  }
 0x8bf   : > { %3440 = vperm.xlu1 %4893, %v3370_v37   ;;  %v3242_v37 = vld [vmem:[%s8326_s1 + $0x78] sm:$0xff] }
 0x8c2   : > { %3435 = vperm.xlu0 %4892, %v3369_v59   ;;  %v3241_v59 = vld [vmem:[%s8326_s1 + $0x70] sm:$0xff]  ;;  %s8451_s1 = scalar_lea.sflag [#allocation3], %s8912_s3 }
 0x921   : > { %v3147_v43 = vpop.xlane.xlu0 %3146 }
 0x922   : > { %v3148_v26 = vrot.slane %v3147_v43, 4 }
 0x923   : > { %v3190_v45 = vpop.xlane.xlu1 %3189 }
 0x924   : > { %v3149_v58 = vadd.f32 %v3148_v26, %v3147_v43  ;;  %v3191_v4 = vrot.slane %v3190_v45, 4 }
 0x926   : > { %v3150_v60 = vrot.slane %v3149_v58, 2  ;;  %v3192_v29 = vadd.f32 %v3191_v4, %v3190_v45  ;;  %v3372_v45 = vld [vmem:[%s8301_s23 + $0x78] sm:$0xff] }
 0x928   : > { %v3193_v30 = vrot.slane %v3192_v29, 2  ;;  %v3151_v52 = vadd.f32 %v3150_v60, %v3149_v58  ;;  %v3371_v58 = vld [vmem:[%s8301_s23 + $0x70] sm:$0xff] }
 0x92a   : > { %v3152_v51 = vrot.slane %v3151_v52, 1  ;;  %v3194_v21 = vadd.f32 %v3193_v30, %v3192_v29 }
 0x92c   : > { %v3153_v27 = vadd.f32 %v3152_v51, %v3151_v52  ;;  %v3195_v57 = vrot.slane %v3194_v21, 1 }
 0x92e   : > { %3964 = vpush %v3153_v27  ;;  %v3196_v62 = vadd.f32 %v3195_v57, %v3194_v21 }
 0x930   : > { %3966 = vpush %v3196_v62  ;;  %v3381_v62 = vpop.permute.xlu1 %3380 }
 0x95f   : > { %s3965_s21 = spop %3964 }
 0x960   : > { %s8317_s22 = smul.f32 0.00022977941, %s3965_s21 }
 0x961   : > { %s3967_s15 = spop %3966 }
 0x962   : > { %s3201_s29 = smul.f32 %s8317_s22, %s8317_s22 }
 0x963   : > { %s3200_s18 = smul.f32 0.00022977941, %s3967_s15  ;;  %s3505_s15 = scalar_lea.vmem %s8524_s12, %s8906_s27 }
 0x964   : > { %v3507_v4 = vld [vmem:[%s3505_s15 + $0x8] sm:$0xff]  ;;  %v3506_v60 = vld [vmem:[%s3505_s15] sm:$0xff]  ;;  %v3509_v29 = vld [vmem:[%s3505_s15 + $0x18] sm:$0xff]  ;;  %s5828_s27 = smov [#allocation7]  }
 0x965   : > { %s3202_s26 = ssub.f32 %s3200_s18, %s3201_s29  ;;  %v3508_v30 = vld [vmem:[%s3505_s15 + $0x10] sm:$0xff]  ;;  %s3890_s29 = sshll.u32 %s5400_s16, 5  ;;  %v3511_v52 = vld [vmem:[%s3505_s15 + $0x28] sm:$0xff]  ;;  %v3510_v51 = vld [vmem:[%s3505_s15 + $0x20] sm:$0xff] }
 0x966   : > { %v3513_v27 = vld [vmem:[%s3505_s15 + $0x38] sm:$0xff]  ;;  %v3512_v57 = vld [vmem:[%s3505_s15 + $0x30] sm:$0xff]  ;;  %s3891_s16 = sshll.u32 %s5404_s17, 9  ;;  %s8911_s17 = sld [smem:[#allocation17_spill]] }
 0x967   : > { %s3203_s20 = smax.f32 %s5807_s24, %s3202_s26  ;;  %s8355_s26 = scalar_lea.vmem %s8523_s11, %s3890_s29 }
 0x968   : > { %s3222_s28 = sadd.f32 1e-08, %s3203_s20  ;;  %v4894_v21 = vld [vmem:[%s8355_s26] sm:$0xff]   ;;  %s8438_s0 = scalar_lea.hbm %s8525_s13, %s3891_s16 }
 0x969   : > { %3950 = vmatprep.mubr.bf16.mxu1 %v4894_v21  ;;  %s4934_s24 = sshll.u32 %s5828_s27, 4  ;;  %s4935_s24 = int_to_ptr.vmem [resolvable:$false] %s4934_s24 }
 0x96a   : > { %v3223_v15 = vstv %s3222_s28 }
 0x96b   : > { %4898 = vrsqrt.f32 %v3223_v15  ;;  %v3376_v15 = vpop.permute.xlu0 %3375 }
 0x96c   : > { %p8913_p4 = scmp.ne.s32.totalorder %s8911_s17, 0 }
 0x975   : > { %v4899_v42 = vpop.eup %4898 }
 0x976   : > { %3968 = vpush %v4899_v42  ;;  %v3391_v42 = vpop.permute.xlu1 %3390 }
 0x9a7   : > { %s3969_s25 = spop %3968 }
 0x9a8   : > { %v3243_v20 = vstv %s3969_s25 }
 0x9a9   : > { %v3245_v49 = vmul.f32 %v3243_v20, %v3228_v48  ;;  %v3244_v3 = vmul.f32 %v3243_v20, %v3227_v39  ;;  %v3247_v18 = vmul.f32 %v3243_v20, %v3230_v24  ;;  %v3246_v13 = vmul.f32 %v3243_v20, %v3229_v41  ;;  %v3386_v48 = vpop.permute.xlu0 %3385  ;;  %v3401_v39 = vpop.permute.xlu1 %3400 }
 0x9aa   : > { %v3249_v36 = vmul.f32 %v3243_v20, %v3232_v19  ;;  %v3248_v7 = vmul.f32 %v3243_v20, %v3231_v10  ;;  %v3251_v38 = vmul.f32 %v3243_v20, %v3234_v6  ;;  %v3250_v44 = vmul.f32 %v3243_v20, %v3233_v47 }
 0x9ab   : > { %3267 = vperm.xlu1 %4893, %v3245_v49   ;;  %3262 = vperm.xlu0 %4892, %v3244_v3   ;;  %v3253_v17 = vmul.f32 %v3243_v20, %v3236_v11  ;;  %v3252_v55 = vmul.f32 %v3243_v20, %v3235_v32  ;;  %v3255_v16 = vmul.f32 %v3243_v20, %v3238_v22  ;;  %v3204_v19 = vstv %s8317_s22  ;;  %s3690_s22 = sshll.u32 %s6031_s19, 4  ;;  %s8440_s22 = int_to_ptr.vmem [resolvable:$true] %s3690_s22 }
 0x9ac   : > { %v3254_v28 = vmul.f32 %v3243_v20, %v3237_v35  ;;  %v3257_v40 = vmul.f32 %v3243_v20, %v3240_v50  ;;  %v3256_v25 = vmul.f32 %v3243_v20, %v3239_v0  ;;  %v3259_v43 = vmul.f32 %v3243_v20, %v3242_v37  ;;  %s4930_s25 = scalar_lea.vmem %s8440_s22, 512  ;;  %p4937_p3 = scmp.lt.s32.totalorder %s8440_s22, %s4935_s24 }
 0x9ad   : > { %v3258_v26 = vmul.f32 %v3243_v20, %v3241_v59  ;;  %v3396_v20 = vpop.permute.xlu0 %3395  ;;  %v3411_v49 = vpop.permute.xlu1 %3410  ;;  %v8364_v10 = vmul.f32 %v8905_v12, %v3204_v19  ;;  %v3454_v11 = vmul.f32 %v8905_v12, %v3381_v62  ;;  %v3453_v32 = vmul.f32 %v8905_v12, %v3376_v15  ;;  %p4931_p1 = scmp.ne.s32.totalorder %s8440_s22, %s4930_s25 }
 0x9ae   : > { %v3455_v0 = vmul.f32 %v8905_v12, %v3386_v48 }
 0x9af   : > { %3277 = vperm.xlu1 %4893, %v3247_v18   ;;  %3272 = vperm.xlu0 %4892, %v3246_v13   ;;  %v3207_v6 = vsub.f32 %v8202_v5, %v8364_v10  ;;  %v3206_v47 = vsub.f32 %v8194_v1, %v8364_v10  ;;  %v3456_v5 = vmul.f32 %v8905_v12, %v3391_v42  ;;  %p4932_p5 = pnand %p4931_p1, %p8913_p4 }
 0x9b0   : > { %v3213_v21 = vsub.f32 %v8238_v8, %v8364_v10  ;;  %v3215_v19 = vsub.f32 %v8252_v54, %v8364_v10  ;;  %v3214_v8 = vsub.f32 %v8246_v34, %v8364_v10  ;;  %v3216_v54 = vsub.f32 %v8260_v9, %v8364_v10 }
 0x9b1   : > { %v3406_v3 = vpop.permute.xlu0 %3405  ;;  %v3421_v24 = vpop.permute.xlu1 %3420  ;;  %v3218_v9 = vsub.f32 %v8274_v14, %v8364_v10  ;;  %p4933_p6 = pneg %p4932_p5 }
 0x9b2   : > { %v3459_v62 = vmul.f32 %v8905_v12, %v3406_v3 }
 0x9b3   : > { %3287 = vperm.xlu1 %4893, %v3249_v36   ;;  %3282 = vperm.xlu0 %4892, %v3248_v7  }
 0x9b5   : > { %v3416_v41 = vpop.permute.xlu0 %3415  ;;  %v8358_v18 = vpop.permute.xlu1 %3430 }
 0x9b6   : > { %v3464_v34 = vmul.f32 %v8905_v12, %v8358_v18 }
 0x9b7   : > { %3297 = vperm.xlu1 %4893, %v3251_v38   ;;  %3292 = vperm.xlu0 %4892, %v3250_v44  }
 0x9b9   : > { %v8360_v13 = vpop.permute.xlu0 %3425  ;;  %v8366_v36 = vpop.permute.xlu1 %3440 }
 0x9ba   : > { %v3466_v18 = vmul.f32 %v8905_v12, %v8366_v36  ;;  %v3221_v36 = vsub.f32 %v8290_v61, %v8364_v10  ;;  %v4895_v61 = vld [vmem:[%s8355_s26 + $0x8] sm:$0xff]  }
 0x9bb   : > { %3307 = vperm.xlu1 %4893, %v3253_v17   ;;  %3302 = vperm.xlu0 %4892, %v3252_v55  }
 0x9bd   : > { %v8368_v7 = vpop.permute.xlu0 %3435 }
 0x9bf   : > { %3317 = vperm.xlu1 %4893, %v3255_v16   ;;  %3312 = vperm.xlu0 %4892, %v3254_v28   ;;  %v3209_v16 = vsub.f32 %v8208_v33, %v8364_v10  ;;  %v3208_v28 = vsub.f32 %v8199_v56, %v8364_v10  ;;  %v3210_v33 = vsub.f32 %v8218_v2, %v8364_v10 }
 0x9c0   : > { %v3458_v56 = vmul.f32 %v8905_v12, %v3401_v39  ;;  %v3460_v2 = vmul.f32 %v8905_v12, %v3411_v49 }
 0x9c3   : > { %3327 = vperm.xlu1 %4893, %v3257_v40   ;;  %3322 = vperm.xlu0 %4892, %v3256_v25  }
 0x9c7   : > { %3337 = vperm.xlu1 %4893, %v3259_v43   ;;  %3332 = vperm.xlu0 %4892, %v3258_v26   ;;  %v3211_v26 = vsub.f32 %v8224_v63, %v8364_v10  ;;  %v3212_v63 = vsub.f32 %v8232_v23, %v8364_v10  ;;  %v3462_v23 = vmul.f32 %v8905_v12, %v3421_v24 }
 0x9cb   : > { %3450 = vperm.xlu1 %4893, %v3372_v45   ;;  %3445 = vperm.xlu0 %4892, %v3371_v58  }
 0x9cf   : > { %3521 = vperm.xlu1 %4893, %v3507_v4   ;;  %3516 = vperm.xlu0 %4892, %v3506_v60   ;;  %v3457_v4 = vmul.f32 %v8905_v12, %v3396_v20 }
 0x9d3   : > { %3531 = vperm.xlu1 %4893, %v3509_v29   ;;  %3526 = vperm.xlu0 %4892, %v3508_v30  }
 0x9d7   : > { %3541 = vperm.xlu1 %4893, %v3511_v52   ;;  %3536 = vperm.xlu0 %4892, %v3510_v51  }
 0x9db   : > { %3551 = vperm.xlu1 %4893, %v3513_v27   ;;  %3546 = vperm.xlu0 %4892, %v3512_v57  }
 0xa2a   : > { %v3268_v38 = vpop.permute.xlu1 %3267  ;;  %v3263_v44 = vpop.permute.xlu0 %3262 }
 0xa2b   : > { %v3341_v17 = vmul.f32 %v3268_v38, %v3207_v6  ;;  %v3340_v55 = vmul.f32 %v3263_v44, %v3206_v47  ;;  %v3461_v47 = vmul.f32 %v8905_v12, %v3416_v41  ;;  %v3463_v41 = vmul.f32 %v8905_v12, %v8360_v13 }
 0xa2c   : > { %v3465_v13 = vmul.f32 %v8905_v12, %v8368_v7 }
 0xa2d   : > { %v3470_v22 = vadd.f32 %v3454_v11, %v3341_v17  ;;  %v3469_v35 = vadd.f32 %v3453_v32, %v3340_v55  ;;  %v3217_v17 = vsub.f32 %v8266_v46, %v8364_v10  ;;  %v3219_v46 = vsub.f32 %v8280_v53, %v8364_v10 }
 0xa2e   : > { %v3278_v50 = vpop.permute.xlu1 %3277  ;;  %v3273_v1 = vpop.permute.xlu0 %3272 }
 0xa2f   : > { %v3343_v40 = vmul.f32 %v3278_v50, %v3209_v16  ;;  %v3342_v25 = vmul.f32 %v3273_v1, %v3208_v28  ;;  %v3485_v37 = vpack.c.bf16 %v3470_v22, %v3469_v35 }
 0xa31   : > { %v3472_v59 = vadd.f32 %v3456_v5, %v3343_v40  ;;  %v3471_v43 = vadd.f32 %v3455_v0, %v3342_v25  ;;  %3934 = vmatprep.subr.bf16.mxu1 %v3485_v37 }
 0xa32   : > { %v3288_v45 = vpop.permute.xlu1 %3287  ;;  %3935 = vmatpush3.bf16.msra.mxu1 %v3485_v37  ;;  %v3283_v58 = vpop.permute.xlu0 %3282 }
 0xa33   : > { %v3345_v60 = vmul.f32 %v3288_v45, %v3211_v26  ;;  %v3344_v29 = vmul.f32 %v3283_v58, %v3210_v33  ;;  %v3486_v30 = vpack.c.bf16 %v3472_v59, %v3471_v43  ;;  %v3220_v26 = vsub.f32 %v8285_v31, %v8364_v10  ;;  %v4897_v31 = vld [vmem:[%s8355_s26 + $0x18] sm:$0xff]  }
 0xa35   : > { %v3474_v52 = vadd.f32 %v3458_v56, %v3345_v60  ;;  %v3473_v51 = vadd.f32 %v3457_v4, %v3344_v29  ;;  %3936 = vmatprep.subr.bf16.mxu1 %v3486_v30 }
 0xa36   : > { %v3298_v27 = vpop.permute.xlu1 %3297  ;;  %3937 = vmatpush3.bf16.msra.mxu1 %v3486_v30  ;;  %v3293_v57 = vpop.permute.xlu0 %3292 }
 0xa37   : > { %v3347_v15 = vmul.f32 %v3298_v27, %v3213_v21  ;;  %v3346_v42 = vmul.f32 %v3293_v57, %v3212_v63  ;;  %v3487_v48 = vpack.c.bf16 %v3474_v52, %v3473_v51  ;;  %v4896_v52 = vld [vmem:[%s8355_s26 + $0x10] sm:$0xff]  }
 0xa39   : > { %v3476_v39 = vadd.f32 %v3460_v2, %v3347_v15  ;;  %v3475_v20 = vadd.f32 %v3459_v62, %v3346_v42  ;;  %3938 = vmatprep.subr.bf16.mxu1 %v3487_v48 }
 0xa3a   : > { %v3308_v49 = vpop.permute.xlu1 %3307  ;;  %3939 = vmatpush3.bf16.msra.mxu1 %v3487_v48  ;;  %v3303_v6 = vpop.permute.xlu0 %3302 }
 0xa3b   : > { %v3349_v3 = vmul.f32 %v3308_v49, %v3215_v19  ;;  %v3348_v38 = vmul.f32 %v3303_v6, %v3214_v8  ;;  %v3488_v44 = vpack.c.bf16 %v3476_v39, %v3475_v20  ;;  %v8907_v49 = vld [vmem:[#allocation23_spill] sm:$0xff] }
 0xa3d   : > { %v3478_v11 = vadd.f32 %v3462_v23, %v3349_v3  ;;  %v3477_v32 = vadd.f32 %v3461_v47, %v3348_v38  ;;  %3940 = vmatprep.subr.bf16.mxu1 %v3488_v44  ;;  %v8908_v3 = vld [vmem:[#allocation21_spill] sm:$0xff] }
 0xa3e   : > { %v3318_v24 = vpop.permute.xlu1 %3317  ;;  %3941 = vmatpush3.bf16.msra.mxu1 %v3488_v44  ;;  %v3313_v55 = vpop.permute.xlu0 %3312 }
 0xa3f   : > { %v3351_v22 = vmul.f32 %v3318_v24, %v3217_v17  ;;  %v3350_v35 = vmul.f32 %v3313_v55, %v3216_v54  ;;  %v3489_v16 = vpack.c.bf16 %v3478_v11, %v3477_v32  ;;  %v8909_v11 = vld [vmem:[#allocation24_spill] sm:$0xff]  ;;  %v8910_v54 = vld [vmem:[#allocation22_spill] sm:$0xff] }
 0xa41   : > { %v3480_v28 = vadd.f32 %v3464_v34, %v3351_v22  ;;  %v3479_v5 = vadd.f32 %v3463_v41, %v3350_v35  ;;  %3942 = vmatprep.subr.bf16.mxu1 %v3489_v16  ;;  %v3657_v35 = vld [vmem:[%s6027_s2 + $0x10] sm:$0xff] }
 0xa42   : > { %v3328_v50 = vpop.permute.xlu1 %3327  ;;  %3943 = vmatpush3.bf16.msra.mxu1 %v3489_v16  ;;  %v3323_v1 = vpop.permute.xlu0 %3322 }
 0xa43   : > { %v3353_v0 = vmul.f32 %v3328_v50, %v3219_v46  ;;  %v3352_v40 = vmul.f32 %v3323_v1, %v3218_v9  ;;  %v3490_v25 = vpack.c.bf16 %v3480_v28, %v3479_v5  ;;  %v3655_v28 = vld [vmem:[%s6027_s2] sm:$0xff] }
 0xa45   : > { %v3482_v37 = vadd.f32 %v3466_v18, %v3353_v0  ;;  %v3481_v59 = vadd.f32 %v3465_v13, %v3352_v40  ;;  %3944 = vmatprep.subr.bf16.mxu1 %v3490_v25 }
 0xa46   : > { %v3338_v43 = vpop.permute.xlu1 %3337  ;;  %3945 = vmatpush3.bf16.msra.mxu1 %v3490_v25  ;;  %v3333_v53 = vpop.permute.xlu0 %3332 }
 0xa47   : > { %v3491_v14 = vpack.c.bf16 %v3482_v37, %v3481_v59  ;;  %v3355_v56 = vmul.f32 %v3338_v43, %v3221_v36  ;;  %v3354_v45 = vmul.f32 %v3333_v53, %v3220_v26 }
 0xa49   : > { %3946 = vmatprep.subr.bf16.mxu1 %v3491_v14 }
 0xa4a   : > { %v3451_v7 = vpop.permute.xlu1 %3450  ;;  %3947 = vmatpush3.bf16.msra.mxu1 %v3491_v14  ;;  %v3446_v33 = vpop.permute.xlu0 %3445 }
 0xa4b   : > { %v3468_v58 = vmul.f32 %v8905_v12, %v3451_v7  ;;  %v3467_v4 = vmul.f32 %v8905_v12, %v3446_v33 }
 0xa4d   : > { %v3484_v60 = vadd.f32 %v3468_v58, %v3355_v56  ;;  %v3483_v29 = vadd.f32 %v3467_v4, %v3354_v45 }
 0xa4e   : > { %v3517_v10 = vpop.permute.xlu0 %3516  ;;  %v3522_v51 = vpop.permute.xlu1 %3521 }
 0xa4f   : > { %v3492_v30 = vpack.c.bf16 %v3484_v60, %v3483_v29 }
 0xa51   : > { %3948 = vmatprep.subr.bf16.mxu1 %v3492_v30 }
 0xa52   : > { %3949 = vmatpush3.bf16.msra.mxu1 %v3492_v30  ;;  %v3527_v21 = vpop.permute.xlu0 %3526  ;;  %v3532_v63 = vpop.permute.xlu1 %3531 }
 0xa55   : > { %3951 = vmatmul.mubr.bf16.vlgmr.msra.gmra.mrb[0].mxu1 %v4895_v61 }
 0xa56   : > { %3954 = vmatprep.mubr.bf16.mxu1 %v4896_v52  ;;  %v3537_v62 = vpop.permute.xlu0 %3536  ;;  %v3542_v19 = vpop.permute.xlu1 %3541 }
 0xa5a   : > { %v3547_v17 = vpop.permute.xlu0 %3546  ;;  %v3552_v22 = vpop.permute.xlu1 %3551 }
 0xa5d   : > { %3955 = vmatmul.mubr.bf16.gmra.mrb[4].mxu1 %v4897_v31 }
 0xb28   : > { %v3952_v2 = vpop.f32.mrb[0].mxu1 }
 0xb29   : > { %v3621_v27 = vadd.f32 %v3952_v2, %v3527_v21  ;;  %v3612_v57 = vpop.f32.mrb[1].mxu1 }
 0xb2a   : > { %v3613_v15 = vadd.f32 %v3612_v57, %v3517_v10  ;;  %v3953_v42 = vpop.f32.mrb[2].mxu1 }
 0xb2b   : > { %v3645_v48 = vmul.f32 %v8905_v12, %v3621_v27  ;;  %v3624_v39 = vadd.f32 %v3953_v42, %v3532_v63  ;;  %v3615_v20 = vpop.f32.mrb[3].mxu1 }
 0xb2c   : > { %v3643_v8 = vmul.f32 %v8905_v12, %v3613_v15  ;;  %v3616_v23 = vadd.f32 %v3615_v20, %v3522_v51 }
 0xb2d   : > { %v3649_v6 = vadd.f32 %v3645_v48, %v8907_v49  ;;  %v3646_v47 = vmul.f32 %v8905_v12, %v3624_v39 }
 0xb2e   : > { %v3647_v38 = vadd.f32 %v3643_v8, %v8908_v3  ;;  %v3644_v44 = vmul.f32 %v8905_v12, %v3616_v23 }
 0xb2f   : > { %3653 = vst [vmem:[%s6031_s19 + $0x10] sm:$0xff] %v3649_v6  ;;  %v3650_v32 = vadd.f32 %v3646_v47, %v8909_v11 }
 0xb30   : > { %3651 = vst [vmem:[%s6031_s19] sm:$0xff] %v3647_v38  ;;  %v3648_v34 = vadd.f32 %v3644_v44, %v8910_v54  ;;  %v3956_v24 = vpop.f32.mrb[4].mxu1 }
 0xb31   : > { %3654 = vst [vmem:[%s6031_s19 + $0x18] sm:$0xff] %v3650_v32  ;;  %v3637_v55 = vadd.f32 %v3956_v24, %v3547_v17  ;;  %v3628_v41 = vpop.f32.mrb[5].mxu1 }
 0xb32   : > { %3652 = vst [vmem:[%s6031_s19 + $0x8] sm:$0xff] %v3648_v34  ;;  %v3629_v16 = vadd.f32 %v3628_v41, %v3537_v62  ;;  %v3957_v5 = vpop.f32.mrb[6].mxu1  ;;  %s4936_s19 = scalar_lea.vmem %s4935_s24, 1024 }
 0xb33   : > { %v3661_v46 = vmul.f32 %v8905_v12, %v3637_v55  ;;  %v3640_v9 = vadd.f32 %v3957_v5, %v3552_v22  ;;  %v3631_v18 = vpop.f32.mrb[7].mxu1  ;;  %p4938_p9 = scmp.lt.s32.totalorder %s4936_s19, %s4930_s25 }
 0xb35   : > { %p4939_p10 = por %p4938_p9, %p4937_p3 }
 0xb37   : > { %p4940_p13 = pnand %p4939_p10, %p4933_p6 }
 0xb39   : > { %4943 = shalt.err (!%p4940_p13)
}
 0xb3a   : > { %s4944_s21 = scalar_lea.hbm %s8438_s0, 512  ;;  %s4948_s18 = scalar_lea.hbm %s8525_s13, 1024 }
 0xb3b   : > { %p4945_p0 = scmp.ne.s32.totalorder %s8438_s0, %s4944_s21  ;;  %p4949_p8 = scmp.lt.u32.totalorder %s8438_s0, %s8525_s13 }
 0xb3c   : > { %p4950_p11 = scmp.lt.u32.totalorder %s4948_s18, %s4944_s21  ;;  %p4952_p1 = scmp.lt.u32.totalorder %s4944_s21, %s8438_s0 }
 0xb3d   : > { %p4946_p2 = pnand %p4945_p0, %p8913_p4 }
 0xb3e   : > { %p4951_p12 = por %p4950_p11, %p4949_p8 }
 0xb3f   : > { %p4947_p7 = pneg %p4946_p2 }
 0xb40   : > { %p4953_p5 = por %p4952_p1, %p4951_p12 }
 0xb42   : > { %p4954_p6 = pnand %p4953_p5, %p4947_p7 }
 0xb44   : > { %4957 = shalt.err (!%p4954_p6)
}
 0xb45   : > { %s5829_s16 = smov 128   ;;  %s5830_s20 = smov 8   ;;  %v3659_v50 = vmul.f32 %v8905_v12, %v3629_v16  ;;  %v3658_v1 = vld [vmem:[%s6027_s2 + $0x18] sm:$0xff]  ;;  %v3632_v13 = vadd.f32 %v3631_v18, %v3542_v19  ;;  %v3665_v0 = vadd.f32 %v3661_v46, %v3657_v35  ;;  %v3662_v40 = vmul.f32 %v8905_v12, %v3640_v9  ;;  %v3656_v25 = vld [vmem:[%s6027_s2 + $0x8] sm:$0xff] }
 0xb46   : > { %3978 = dma.vmem_to_hbm [thread:$0]  (%p8913_p4), %s8440_s22, 512, %s8438_s0, %s8451_s1, %s5829_s16, %s5829_s16, %s5830_s20  }
 0xb47   : > { %v3663_v37 = vadd.f32 %v3659_v50, %v3655_v28  ;;  %v3660_v59 = vmul.f32 %v8905_v12, %v3632_v13  ;;  %3669 = vst [vmem:[%s6027_s2 + $0x10] sm:$0xff] %v3665_v0  ;;  %v3666_v43 = vadd.f32 %v3662_v40, %v3658_v1 }
 0xb49   : > { %3667 = vst [vmem:[%s6027_s2] sm:$0xff] %v3663_v37  ;;  %v3664_v53 = vadd.f32 %v3660_v59, %v3656_v25  ;;  %3670 = vst [vmem:[%s6027_s2 + $0x18] sm:$0xff] %v3666_v43 }
 0xb4b   : > { %3668 = vst [vmem:[%s6027_s2 + $0x8] sm:$0xff] %v3664_v53 }
 0xb4c PF: > { %s8914_s28 = sld [smem:[#allocation15_spill]]  ;;  %s8915_s22 = sld [smem:[#allocation11_spill]] }
 0xb4d   : > { %s8916_s0 = sld [smem:[#allocation19_spill]] }
 0xb52   : > { %p3995_p4 = scmp.ge.s32.totalorder %s8914_s28, 2  ;;  %s3708_s17 = sand.u32 1, %s8915_s22  }
 0xb53   : > { %p8917_p3 = scmp.ne.s32.totalorder %s8916_s0, 0  ;;  %s3709_s3 = scalar_lea.sflag [#allocation3], %s3708_s17 }
 0xb55   : > { %p3988_p9 = pnand %p3995_p4, %p8917_p3 }
 0xb57   : > { %5383 = dma.done.wait (!%p3988_p9), %s3709_s3, 512  }
 0xb58   : > { %5385 = vsyncadd (!%p3988_p9), %s3709_s3, 4294966784  ;;  %s30_s20 = sadd.s32 1, %s8914_s28   ;;  %s8918_s1 = sld [smem:[#allocation12_spill]] }
 0xb59   : > { %p27_p10 = scmp.ge.s32.totalorder %s30_s20, 18   ;;  %s8919_s15 = sld [smem:[#allocation20_spill]] }
 0xb5a   : > { %s8920_s16 = sld [smem:[#allocation13_spill]]  ;;  %s8921_s17 = sld [smem:[#allocation14_spill]] }
 0xb5b   : > { %s8922_s18 = sld [smem:[#allocation16_spill]]  ;;  %s8923_s19 = sld [smem:[#allocation18_spill]] }
 0xb5c   : > { %s8924_s29 = smov %s5392_s30  ;;  %29 = sbr.rel (!%p27_p10) target bundleno = 12 (0xc), region = 166 }
 0xb5e   : > { %s8925_s30 = smov %s8918_s1 }
 0xb63   :  { %3722 = vsyncpa [#allocation3], 1 }
 0xb64   :  { %3724 = vsyncpa [#allocation3 + $0x1], 1 }
 0xb65   :  { %3725 = vsyncpa [#allocation4], 1 }
 0xb66   :  { %3727 = vsyncpa [#allocation4 + $0x1], 1 }
 0xb67   :  { %3728 = vsyncpa [#allocation6], 1 }

</bundles_post_ra>
